<compile_context>
chip_gen: v6e
topology: v6e:2x2x1
jax: 0.10.0
libtpu: 0.0.40
codegen_flags: <defaults>
</compile_context>

<pallas_src>
import numpy as np
import jax
import jax.numpy as jnp
from jax.experimental import pallas as pl
from jax.experimental.pallas import tpu as pltpu

BN_EPS = 1e-5


# ----------------------------------------------------------------------------
# Pallas kernel: fused (folded-3x3-conv GEMM) + BN(eval, folded) + ReLU
# ----------------------------------------------------------------------------
def _gemm_bn_relu_kernel(w_ref, x_ref, scale_ref, shift_ref, o_ref):
    """One (Cout-tile, spatial-tile) grid step.

    w_ref:     (CT, K)  bf16 -- conv weight with the 9 taps folded into K=9*Cin
    x_ref:     (K, NT)  bf16 -- im2col patches, flattened spatial on lanes
    scale_ref: (CT, 1)  f32  -- gamma / sqrt(running_var + eps)
    shift_ref: (CT, 1)  f32  -- beta - running_mean * scale
    o_ref:     (CT, NT) bf16 -- lane-dense output tile
    """
    acc = jnp.dot(w_ref[...], x_ref[...], preferred_element_type=jnp.float32)
    y = acc * scale_ref[...] + shift_ref[...]          # f32 epilogue (v5e-safe)
    o_ref[...] = jnp.maximum(y, 0.0).astype(o_ref.dtype)


def _pick_tiles(cout, nall, nt_target=2048, min_steps=4):
    """Choose (Cout tile, spatial tile).

    Cout tile: full Cout if <= 128 (or if it does not split evenly), else 128
    (keeps the f32 accumulator <= 16 vregs even for the Cout=512 head conv).
    Spatial tile: a multiple of 128 dividing nall (lane-dense output stores),
    around nt_target, shrunk until the grid has >= min_steps steps so both
    v7x TensorCores get pipelined work.
    """
    ct = cout if (cout <= 128 or cout % 128 != 0) else 128
    if nall % 128 != 0:
        # TODO(synk): odd spatial sizes fall back to one masked-store tile.
        return ct, nall
    nt = min(nall, max(128, nt_target - nt_target % 128))
    while nall % nt != 0:
        nt -= 128
    while (cout // ct) * (nall // nt) < min_steps and nt % 256 == 0:
        nt //= 2
    return ct, nt


def _im2col_3x3(x):
    """(B, Cin, H, W) -> (9*Cin, B*H*W) bf16 patches for a pad=1 3x3 conv.

    K index is k = (dy*3 + dx)*Cin + cin; the flattened spatial (batch folded
    in) sits on the last (lane) axis.  One XLA fusion; pad=1 is folded in.
    """
    B, Cin, H, W = x.shape
    xp = jnp.pad(x.astype(jnp.bfloat16), ((0, 0), (0, 0), (1, 1), (1, 1)))
    taps = [xp[:, :, dy:dy + H, dx:dx + W]
            for dy in range(3) for dx in range(3)]           # 9 x (B,Cin,H,W)
    col = jnp.stack(taps, axis=0)                            # (9, B, Cin, H, W)
    col = jnp.transpose(col, (0, 2, 1, 3, 4))                # (9, Cin, B, H, W)
    return col.reshape(9 * Cin, B * H * W)


def conv3x3_bn_relu(x, w, scale, shift):
    """x: (B, Cin, H, W) NCHW; w: (Cout, Cin, 3, 3) OIHW (torch layout).
    Returns (B, Cout, H, W) bf16 = relu(bn(conv3x3_pad1(x)))."""
    B, Cin, H, W = x.shape
    Cout = w.shape[0]
    K, Nall = 9 * Cin, B * H * W

    col = _im2col_3x3(x)                                              # (K, Nall)
    wt = jnp.transpose(w, (0, 2, 3, 1)).reshape(Cout, K).astype(jnp.bfloat16)
    scale2 = scale.reshape(Cout, 1).astype(jnp.float32)
    shift2 = shift.reshape(Cout, 1).astype(jnp.float32)

    ct, nt = _pick_tiles(Cout, Nall)
    out = pl.pallas_call(
        _gemm_bn_relu_kernel,
        out_shape=jax.ShapeDtypeStruct((Cout, Nall), jnp.bfloat16),
        grid=(Cout // ct, Nall // nt),
        in_specs=[
            # Weight block index is constant along n -> stays VMEM-resident.
            pl.BlockSpec((ct, K), lambda c, n: (c, 0)),
            pl.BlockSpec((K, nt), lambda c, n: (0, n)),
            pl.BlockSpec((ct, 1), lambda c, n: (c, 0)),
            pl.BlockSpec((ct, 1), lambda c, n: (c, 0)),
        ],
        out_specs=pl.BlockSpec((ct, nt), lambda c, n: (c, n)),
        compiler_params=pltpu.CompilerParams(
            dimension_semantics=("parallel", "parallel"),
            vmem_limit_bytes=32 * 1024 * 1024,
        ),
    )(wt, col, scale2, shift2)

    # (Cout, B*H*W) lane-dense -> NCHW for the inter-stage glue.
    return jnp.transpose(out.reshape(Cout, B, H, W), (1, 0, 2, 3))


# ----------------------------------------------------------------------------
# Plain-JAX glue: nn.UpsamplingBilinear2d(scale_factor=2) == align_corners=True
# TODO(synk): fuse upsample + concat into the conv kernel's im2col stage.
# ----------------------------------------------------------------------------
def upsample_bilinear_x2(x):
    """x: (B, C, H, W) -> (B, C, 2H, 2W), bilinear, align_corners=True (bf16 out)."""
    B, C, H, W = x.shape
    x = x.astype(jnp.float32)

    def coords(n_in):
        n_out = 2 * n_in
        src = jnp.arange(n_out, dtype=jnp.float32) * (n_in - 1) / (n_out - 1)
        i0 = jnp.clip(jnp.floor(src).astype(jnp.int32), 0, max(n_in - 2, 0))
        i1 = jnp.clip(i0 + 1, 0, n_in - 1)
        frac = src - i0.astype(jnp.float32)
        return i0, i1, frac

    h0, h1, fh = coords(H)
    w0, w1, fw = coords(W)
    xh = (x[:, :, h0, :] * (1.0 - fh)[None, None, :, None]
          + x[:, :, h1, :] * fh[None, None, :, None])
    out = (xh[:, :, :, w0] * (1.0 - fw)[None, None, None, :]
           + xh[:, :, :, w1] * fw[None, None, None, :])
    return out.astype(jnp.bfloat16)


# ----------------------------------------------------------------------------
# Parameter construction (deterministic, in-script); weights kept in torch OIHW
# ----------------------------------------------------------------------------
def make_conv_bn_params(key, cin, cout):
    kw, kg, kb, km, kv = jax.random.split(key, 5)
    fan_in = cin * 9
    w = jax.random.normal(kw, (cout, cin, 3, 3), jnp.float32) * np.sqrt(2.0 / fan_in)
    gamma = 1.0 + 0.1 * jax.random.normal(kg, (cout,), jnp.float32)
    beta = 0.1 * jax.random.normal(kb, (cout,), jnp.float32)
    running_mean = 0.1 * jax.random.normal(km, (cout,), jnp.float32)
    running_var = jax.random.uniform(kv, (cout,), jnp.float32, minval=0.5, maxval=1.5)
    scale = gamma / jnp.sqrt(running_var + BN_EPS)
    shift = beta - running_mean * scale
    return {"w": w, "scale": scale, "shift": shift}


class DecoderCupConfig:
    hidden_size = 16
    decoder_channels = (16, 16, 8, 8)
    n_skip = 3
    skip_channels = [8, 8, 4, 0]


def init_decoder_cup(key, config):
    head_channels = 512  # hardcoded in the reference module
    decoder_channels = list(config.decoder_channels)
    in_channels = [head_channels] + decoder_channels[:-1]
    out_channels = decoder_channels
    if config.n_skip != 0:
        skip_channels = list(config.skip_channels)
        for i in range(4 - config.n_skip):
            skip_channels[3 - i] = 0
    else:
        skip_channels = [0, 0, 0, 0]

    keys = jax.random.split(key, 1 + 2 * len(in_channels))
    params = {
        "conv_more": make_conv_bn_params(keys[0], config.hidden_size, head_channels),
        "blocks": [],
    }
    for i, (icn, ocn, scn) in enumerate(zip(in_channels, out_channels, skip_channels)):
        conv1 = make_conv_bn_params(keys[1 + 2 * i], icn + scn, ocn)
        conv2 = make_conv_bn_params(keys[2 + 2 * i], ocn, ocn)
        params["blocks"].append({"conv1": conv1, "conv2": conv2})
    return params


# ----------------------------------------------------------------------------
# DecoderCup forward
# ----------------------------------------------------------------------------
def decoder_cup_forward(params, config, hidden_states, features=None,
                        conv_fn=conv3x3_bn_relu):
    x = hidden_states                                    # (B, hidden, H, W) NCHW
    p = params["conv_more"]
    x = conv_fn(x, p["w"], p["scale"], p["shift"])
    for i, bp in enumerate(params["blocks"]):
        if features is not None:
            skip = features[i] if i < config.n_skip else None
        else:
            skip = None
        x = upsample_bilinear_x2(x)
        if skip is not None:
            x = jnp.concatenate([x, skip.astype(x.dtype)], axis=1)   # torch.cat(dim=1)
        x = conv_fn(x, bp["conv1"]["w"], bp["conv1"]["scale"], bp["conv1"]["shift"])
        x = conv_fn(x, bp["conv2"]["w"], bp["conv2"]["scale"], bp["conv2"]["shift"])
    return x


# ----------------------------------------------------------------------------
# Pure-XLA reference (same bf16-operand / f32-accumulate / bf16-out numerics)
# ----------------------------------------------------------------------------
def ref_conv3x3_bn_relu(x, w, scale, shift):
    y = jax.lax.conv_general_dilated(
        x.astype(jnp.bfloat16), w.astype(jnp.bfloat16),
        window_strides=(1, 1), padding=((1, 1), (1, 1)),
        dimension_numbers=("NCHW", "OIHW", "NCHW"),
        preferred_element_type=jnp.float32)
    y = y * scale[None, :, None, None] + shift[None, :, None, None]
    return jnp.maximum(y, 0.0).astype(jnp.bfloat16)


if __name__ == "__main__":
    config = DecoderCupConfig()
    key = jax.random.PRNGKey(0)
    kp, kx, kf0, kf1, kf2 = jax.random.split(key, 5)
    params = init_decoder_cup(kp, config)

    B, H, W = 2, 8, 8
    hidden_states = jax.random.normal(kx, (B, config.hidden_size, H, W), jnp.float32)
    # Encoder skip features (NCHW); spatial matches x after each upsample step.
    features = [
        jax.random.normal(kf0, (B, 8, 16, 16), jnp.float32),
        jax.random.normal(kf1, (B, 8, 32, 32), jnp.float32),
        jax.random.normal(kf2, (B, 4, 64, 64), jnp.float32),
    ]

    run_kernel = jax.jit(lambda p, hs, f: decoder_cup_forward(
        p, config, hs, f, conv_fn=conv3x3_bn_relu))
    run_ref = jax.jit(lambda p, hs, f: decoder_cup_forward(
        p, config, hs, f, conv_fn=ref_conv3x3_bn_relu))

    out = jax.block_until_ready(run_kernel(params, hidden_states, features))
    assert out.shape == (B, config.decoder_channels[-1], 128, 128), out.shape

    ref = jax.block_until_ready(run_ref(params, hidden_states, features))
    np.testing.assert_allclose(
        np.asarray(out.astype(jnp.float32)),
        np.asarray(ref.astype(jnp.float32)),
        rtol=5e-2, atol=5e-2)

    print("KERNEL_OK")
</pallas_src>

<mosaic_0001>
module attributes {stable_mosaic.version = 11 : i64} {
  func.func @_gemm_bn_relu_kernel(%arg0: i32, %arg1: i32, %arg2: memref<128x144xbf16, #tpu.memory_space<vmem>>, %arg3: memref<144x128xbf16, #tpu.memory_space<vmem>>, %arg4: memref<128x1xf32, #tpu.memory_space<vmem>>, %arg5: memref<128x1xf32, #tpu.memory_space<vmem>>, %arg6: memref<128x128xbf16, #tpu.memory_space<vmem>>) attributes {dimension_semantics = [#tpu.dimension_semantics<parallel>, #tpu.dimension_semantics<parallel>], iteration_bounds = array<i64: 4, 1>, scalar_prefetch = 0 : i64, scratch_operands = 0 : i64, tpu.core_type = #tpu.core_type<tc>, window_params = [{transform_indices = @transform_0, window_bounds = array<i64: 128, 144>}, {transform_indices = @transform_1, window_bounds = array<i64: 144, 128>}, {transform_indices = @transform_2, window_bounds = array<i64: 128, 1>}, {transform_indices = @transform_3, window_bounds = array<i64: 128, 1>}, {transform_indices = @transform_4, window_bounds = array<i64: 128, 128>}]} {
    %c0 = arith.constant 0 : index
    %c0_0 = arith.constant 0 : index
    %0 = vector.load %arg2[%c0, %c0_0] : memref<128x144xbf16, #tpu.memory_space<vmem>>, vector<128x144xbf16>
    %c0_1 = arith.constant 0 : index
    %c0_2 = arith.constant 0 : index
    %1 = vector.load %arg3[%c0_1, %c0_2] : memref<144x128xbf16, #tpu.memory_space<vmem>>, vector<144x128xbf16>
    %cst = arith.constant dense<0.000000e+00> : vector<128x128xf32>
    %2 = tpu.matmul %0, %1, %cst {dimension_numbers = #tpu.dot_dimension_numbers<[1], [0], [0], [1], [0, 0, 1, 1], [], []>} : vector<128x144xbf16>, vector<144x128xbf16>, vector<128x128xf32> -> vector<128x128xf32>
    %c0_3 = arith.constant 0 : index
    %c0_4 = arith.constant 0 : index
    %3 = vector.load %arg4[%c0_3, %c0_4] : memref<128x1xf32, #tpu.memory_space<vmem>>, vector<128x1xf32>
    %4 = vector.broadcast %3 : vector<128x1xf32> to vector<128x128xf32>
    %5 = arith.mulf %2, %4 : vector<128x128xf32>
    %c0_5 = arith.constant 0 : index
    %c0_6 = arith.constant 0 : index
    %6 = vector.load %arg5[%c0_5, %c0_6] : memref<128x1xf32, #tpu.memory_space<vmem>>, vector<128x1xf32>
    %7 = vector.broadcast %6 : vector<128x1xf32> to vector<128x128xf32>
    %8 = arith.addf %5, %7 : vector<128x128xf32>
    %cst_7 = arith.constant 0.000000e+00 : f32
    %9 = vector.broadcast %cst_7 : f32 to vector<128x128xf32>
    %10 = arith.maximumf %8, %9 : vector<128x128xf32>
    %11 = arith.truncf %10 : vector<128x128xf32> to vector<128x128xbf16>
    %c0_8 = arith.constant 0 : index
    %c0_9 = arith.constant 0 : index
    %12 = vector.load %arg6[%c0_8, %c0_9] : memref<128x128xbf16, #tpu.memory_space<vmem>>, vector<128x128xbf16>
    tpu.vector_store %arg6[%c0_8, %c0_9], %11 {strides = array<i32>} : memref<128x128xbf16, #tpu.memory_space<vmem>>, vector<128x128xbf16>,
    return
  }
  func.func @transform_0(%arg0: i32, %arg1: i32) -> (i32, i32) {
    %c0_i32 = arith.constant 0 : i32
    %c0_i32_0 = arith.constant 0 : i32
    return %arg0, %c0_i32 : i32, i32
  }
  func.func @transform_1(%arg0: i32, %arg1: i32) -> (i32, i32) {
    %c0_i32 = arith.constant 0 : i32
    %c0_i32_0 = arith.constant 0 : i32
    return %c0_i32, %arg1 : i32, i32
  }
  func.func @transform_2(%arg0: i32, %arg1: i32) -> (i32, i32) {
    %c0_i32 = arith.constant 0 : i32
    %c0_i32_0 = arith.constant 0 : i32
    return %arg0, %c0_i32 : i32, i32
  }
  func.func @transform_3(%arg0: i32, %arg1: i32) -> (i32, i32) {
    %c0_i32 = arith.constant 0 : i32
    %c0_i32_0 = arith.constant 0 : i32
    return %arg0, %c0_i32 : i32, i32
  }
  func.func @transform_4(%arg0: i32, %arg1: i32) -> (i32, i32) {
    %c0_i32 = arith.constant 0 : i32
    return %arg0, %arg1 : i32, i32
  }
}

module attributes {stable_mosaic.version = 11 : i64} {
  func.func @_gemm_bn_relu_kernel(%arg0: i32, %arg1: i32, %arg2: memref<16x4680xbf16, #tpu.memory_space<vmem>>, %arg3: memref<4680x128xbf16, #tpu.memory_space<vmem>>, %arg4: memref<16x1xf32, #tpu.memory_space<vmem>>, %arg5: memref<16x1xf32, #tpu.memory_space<vmem>>, %arg6: memref<16x128xbf16, #tpu.memory_space<vmem>>) attributes {dimension_semantics = [#tpu.dimension_semantics<parallel>, #tpu.dimension_semantics<parallel>], iteration_bounds = array<i64: 1, 4>, scalar_prefetch = 0 : i64, scratch_operands = 0 : i64, tpu.core_type = #tpu.core_type<tc>, window_params = [{transform_indices = @transform_0, window_bounds = array<i64: 16, 4680>}, {transform_indices = @transform_1, window_bounds = array<i64: 4680, 128>}, {transform_indices = @transform_2, window_bounds = array<i64: 16, 1>}, {transform_indices = @transform_3, window_bounds = array<i64: 16, 1>}, {transform_indices = @transform_4, window_bounds = array<i64: 16, 128>}]} {
    %c0 = arith.constant 0 : index
    %c0_0 = arith.constant 0 : index
    %0 = vector.load %arg2[%c0, %c0_0] : memref<16x4680xbf16, #tpu.memory_space<vmem>>, vector<16x4680xbf16>
    %c0_1 = arith.constant 0 : index
    %c0_2 = arith.constant 0 : index
    %1 = vector.load %arg3[%c0_1, %c0_2] : memref<4680x128xbf16, #tpu.memory_space<vmem>>, vector<4680x128xbf16>
    %cst = arith.constant dense<0.000000e+00> : vector<16x128xf32>
    %2 = tpu.matmul %0, %1, %cst {dimension_numbers = #tpu.dot_dimension_numbers<[1], [0], [0], [1], [0, 0, 1, 1], [], []>} : vector<16x4680xbf16>, vector<4680x128xbf16>, vector<16x128xf32> -> vector<16x128xf32>
    %c0_3 = arith.constant 0 : index
    %c0_4 = arith.constant 0 : index
    %3 = vector.load %arg4[%c0_3, %c0_4] : memref<16x1xf32, #tpu.memory_space<vmem>>, vector<16x1xf32>
    %4 = vector.broadcast %3 : vector<16x1xf32> to vector<16x128xf32>
    %5 = arith.mulf %2, %4 : vector<16x128xf32>
    %c0_5 = arith.constant 0 : index
    %c0_6 = arith.constant 0 : index
    %6 = vector.load %arg5[%c0_5, %c0_6] : memref<16x1xf32, #tpu.memory_space<vmem>>, vector<16x1xf32>
    %7 = vector.broadcast %6 : vector<16x1xf32> to vector<16x128xf32>
    %8 = arith.addf %5, %7 : vector<16x128xf32>
    %cst_7 = arith.constant 0.000000e+00 : f32
    %9 = vector.broadcast %cst_7 : f32 to vector<16x128xf32>
    %10 = arith.maximumf %8, %9 : vector<16x128xf32>
    %11 = arith.truncf %10 : vector<16x128xf32> to vector<16x128xbf16>
    %c0_8 = arith.constant 0 : index
    %c0_9 = arith.constant 0 : index
    %12 = vector.load %arg6[%c0_8, %c0_9] : memref<16x128xbf16, #tpu.memory_space<vmem>>, vector<16x128xbf16>
    tpu.vector_store %arg6[%c0_8, %c0_9], %11 {strides = array<i32>} : memref<16x128xbf16, #tpu.memory_space<vmem>>, vector<16x128xbf16>,
    return
  }
  func.func @transform_0(%arg0: i32, %arg1: i32) -> (i32, i32) {
    %c0_i32 = arith.constant 0 : i32
    %c0_i32_0 = arith.constant 0 : i32
    return %arg0, %c0_i32 : i32, i32
  }
  func.func @transform_1(%arg0: i32, %arg1: i32) -> (i32, i32) {
    %c0_i32 = arith.constant 0 : i32
    %c0_i32_0 = arith.constant 0 : i32
    return %c0_i32, %arg1 : i32, i32
  }
  func.func @transform_2(%arg0: i32, %arg1: i32) -> (i32, i32) {
    %c0_i32 = arith.constant 0 : i32
    %c0_i32_0 = arith.constant 0 : i32
    return %arg0, %c0_i32 : i32, i32
  }
  func.func @transform_3(%arg0: i32, %arg1: i32) -> (i32, i32) {
    %c0_i32 = arith.constant 0 : i32
    %c0_i32_0 = arith.constant 0 : i32
    return %arg0, %c0_i32 : i32, i32
  }
  func.func @transform_4(%arg0: i32, %arg1: i32) -> (i32, i32) {
    %c0_i32 = arith.constant 0 : i32
    return %arg0, %arg1 : i32, i32
  }
}

module attributes {stable_mosaic.version = 11 : i64} {
  func.func @_gemm_bn_relu_kernel(%arg0: i32, %arg1: i32, %arg2: memref<16x144xbf16, #tpu.memory_space<vmem>>, %arg3: memref<144x128xbf16, #tpu.memory_space<vmem>>, %arg4: memref<16x1xf32, #tpu.memory_space<vmem>>, %arg5: memref<16x1xf32, #tpu.memory_space<vmem>>, %arg6: memref<16x128xbf16, #tpu.memory_space<vmem>>) attributes {dimension_semantics = [#tpu.dimension_semantics<parallel>, #tpu.dimension_semantics<parallel>], iteration_bounds = array<i64: 1, 4>, scalar_prefetch = 0 : i64, scratch_operands = 0 : i64, tpu.core_type = #tpu.core_type<tc>, window_params = [{transform_indices = @transform_0, window_bounds = array<i64: 16, 144>}, {transform_indices = @transform_1, window_bounds = array<i64: 144, 128>}, {transform_indices = @transform_2, window_bounds = array<i64: 16, 1>}, {transform_indices = @transform_3, window_bounds = array<i64: 16, 1>}, {transform_indices = @transform_4, window_bounds = array<i64: 16, 128>}]} {
    %c0 = arith.constant 0 : index
    %c0_0 = arith.constant 0 : index
    %0 = vector.load %arg2[%c0, %c0_0] : memref<16x144xbf16, #tpu.memory_space<vmem>>, vector<16x144xbf16>
    %c0_1 = arith.constant 0 : index
    %c0_2 = arith.constant 0 : index
    %1 = vector.load %arg3[%c0_1, %c0_2] : memref<144x128xbf16, #tpu.memory_space<vmem>>, vector<144x128xbf16>
    %cst = arith.constant dense<0.000000e+00> : vector<16x128xf32>
    %2 = tpu.matmul %0, %1, %cst {dimension_numbers = #tpu.dot_dimension_numbers<[1], [0], [0], [1], [0, 0, 1, 1], [], []>} : vector<16x144xbf16>, vector<144x128xbf16>, vector<16x128xf32> -> vector<16x128xf32>
    %c0_3 = arith.constant 0 : index
    %c0_4 = arith.constant 0 : index
    %3 = vector.load %arg4[%c0_3, %c0_4] : memref<16x1xf32, #tpu.memory_space<vmem>>, vector<16x1xf32>
    %4 = vector.broadcast %3 : vector<16x1xf32> to vector<16x128xf32>
    %5 = arith.mulf %2, %4 : vector<16x128xf32>
    %c0_5 = arith.constant 0 : index
    %c0_6 = arith.constant 0 : index
    %6 = vector.load %arg5[%c0_5, %c0_6] : memref<16x1xf32, #tpu.memory_space<vmem>>, vector<16x1xf32>
    %7 = vector.broadcast %6 : vector<16x1xf32> to vector<16x128xf32>
    %8 = arith.addf %5, %7 : vector<16x128xf32>
    %cst_7 = arith.constant 0.000000e+00 : f32
    %9 = vector.broadcast %cst_7 : f32 to vector<16x128xf32>
    %10 = arith.maximumf %8, %9 : vector<16x128xf32>
    %11 = arith.truncf %10 : vector<16x128xf32> to vector<16x128xbf16>
    %c0_8 = arith.constant 0 : index
    %c0_9 = arith.constant 0 : index
    %12 = vector.load %arg6[%c0_8, %c0_9] : memref<16x128xbf16, #tpu.memory_space<vmem>>, vector<16x128xbf16>
    tpu.vector_store %arg6[%c0_8, %c0_9], %11 {strides = array<i32>} : memref<16x128xbf16, #tpu.memory_space<vmem>>, vector<16x128xbf16>,
    return
  }
  func.func @transform_0(%arg0: i32, %arg1: i32) -> (i32, i32) {
    %c0_i32 = arith.constant 0 : i32
    %c0_i32_0 = arith.constant 0 : i32
    return %arg0, %c0_i32 : i32, i32
  }
  func.func @transform_1(%arg0: i32, %arg1: i32) -> (i32, i32) {
    %c0_i32 = arith.constant 0 : i32
    %c0_i32_0 = arith.constant 0 : i32
    return %c0_i32, %arg1 : i32, i32
  }
  func.func @transform_2(%arg0: i32, %arg1: i32) -> (i32, i32) {
    %c0_i32 = arith.constant 0 : i32
    %c0_i32_0 = arith.constant 0 : i32
    return %arg0, %c0_i32 : i32, i32
  }
  func.func @transform_3(%arg0: i32, %arg1: i32) -> (i32, i32) {
    %c0_i32 = arith.constant 0 : i32
    %c0_i32_0 = arith.constant 0 : i32
    return %arg0, %c0_i32 : i32, i32
  }
  func.func @transform_4(%arg0: i32, %arg1: i32) -> (i32, i32) {
    %c0_i32 = arith.constant 0 : i32
    return %arg0, %arg1 : i32, i32
  }
}

module attributes {stable_mosaic.version = 11 : i64} {
  func.func @_gemm_bn_relu_kernel(%arg0: i32, %arg1: i32, %arg2: memref<16x216xbf16, #tpu.memory_space<vmem>>, %arg3: memref<216x512xbf16, #tpu.memory_space<vmem>>, %arg4: memref<16x1xf32, #tpu.memory_space<vmem>>, %arg5: memref<16x1xf32, #tpu.memory_space<vmem>>, %arg6: memref<16x512xbf16, #tpu.memory_space<vmem>>) attributes {dimension_semantics = [#tpu.dimension_semantics<parallel>, #tpu.dimension_semantics<parallel>], iteration_bounds = array<i64: 1, 4>, scalar_prefetch = 0 : i64, scratch_operands = 0 : i64, tpu.core_type = #tpu.core_type<tc>, window_params = [{transform_indices = @transform_0, window_bounds = array<i64: 16, 216>}, {transform_indices = @transform_1, window_bounds = array<i64: 216, 512>}, {transform_indices = @transform_2, window_bounds = array<i64: 16, 1>}, {transform_indices = @transform_3, window_bounds = array<i64: 16, 1>}, {transform_indices = @transform_4, window_bounds = array<i64: 16, 512>}]} {
    %c0 = arith.constant 0 : index
    %c0_0 = arith.constant 0 : index
    %0 = vector.load %arg2[%c0, %c0_0] : memref<16x216xbf16, #tpu.memory_space<vmem>>, vector<16x216xbf16>
    %c0_1 = arith.constant 0 : index
    %c0_2 = arith.constant 0 : index
    %1 = vector.load %arg3[%c0_1, %c0_2] : memref<216x512xbf16, #tpu.memory_space<vmem>>, vector<216x512xbf16>
    %cst = arith.constant dense<0.000000e+00> : vector<16x512xf32>
    %2 = tpu.matmul %0, %1, %cst {dimension_numbers = #tpu.dot_dimension_numbers<[1], [0], [0], [1], [0, 0, 1, 1], [], []>} : vector<16x216xbf16>, vector<216x512xbf16>, vector<16x512xf32> -> vector<16x512xf32>
    %c0_3 = arith.constant 0 : index
    %c0_4 = arith.constant 0 : index
    %3 = vector.load %arg4[%c0_3, %c0_4] : memref<16x1xf32, #tpu.memory_space<vmem>>, vector<16x1xf32>
    %4 = vector.broadcast %3 : vector<16x1xf32> to vector<16x512xf32>
    %5 = arith.mulf %2, %4 : vector<16x512xf32>
    %c0_5 = arith.constant 0 : index
    %c0_6 = arith.constant 0 : index
    %6 = vector.load %arg5[%c0_5, %c0_6] : memref<16x1xf32, #tpu.memory_space<vmem>>, vector<16x1xf32>
    %7 = vector.broadcast %6 : vector<16x1xf32> to vector<16x512xf32>
    %8 = arith.addf %5, %7 : vector<16x512xf32>
    %cst_7 = arith.constant 0.000000e+00 : f32
    %9 = vector.broadcast %cst_7 : f32 to vector<16x512xf32>
    %10 = arith.maximumf %8, %9 : vector<16x512xf32>
    %11 = arith.truncf %10 : vector<16x512xf32> to vector<16x512xbf16>
    %c0_8 = arith.constant 0 : index
    %c0_9 = arith.constant 0 : index
    %12 = vector.load %arg6[%c0_8, %c0_9] : memref<16x512xbf16, #tpu.memory_space<vmem>>, vector<16x512xbf16>
    tpu.vector_store %arg6[%c0_8, %c0_9], %11 {strides = array<i32>} : memref<16x512xbf16, #tpu.memory_space<vmem>>, vector<16x512xbf16>,
    return
  }
  func.func @transform_0(%arg0: i32, %arg1: i32) -> (i32, i32) {
    %c0_i32 = arith.constant 0 : i32
    %c0_i32_0 = arith.constant 0 : i32
    return %arg0, %c0_i32 : i32, i32
  }
  func.func @transform_1(%arg0: i32, %arg1: i32) -> (i32, i32) {
    %c0_i32 = arith.constant 0 : i32
    %c0_i32_0 = arith.constant 0 : i32
    return %c0_i32, %arg1 : i32, i32
  }
  func.func @transform_2(%arg0: i32, %arg1: i32) -> (i32, i32) {
    %c0_i32 = arith.constant 0 : i32
    %c0_i32_0 = arith.constant 0 : i32
    return %arg0, %c0_i32 : i32, i32
  }
  func.func @transform_3(%arg0: i32, %arg1: i32) -> (i32, i32) {
    %c0_i32 = arith.constant 0 : i32
    %c0_i32_0 = arith.constant 0 : i32
    return %arg0, %c0_i32 : i32, i32
  }
  func.func @transform_4(%arg0: i32, %arg1: i32) -> (i32, i32) {
    %c0_i32 = arith.constant 0 : i32
    return %arg0, %arg1 : i32, i32
  }
}

module attributes {stable_mosaic.version = 11 : i64} {
  func.func @_gemm_bn_relu_kernel(%arg0: i32, %arg1: i32, %arg2: memref<16x144xbf16, #tpu.memory_space<vmem>>, %arg3: memref<144x512xbf16, #tpu.memory_space<vmem>>, %arg4: memref<16x1xf32, #tpu.memory_space<vmem>>, %arg5: memref<16x1xf32, #tpu.memory_space<vmem>>, %arg6: memref<16x512xbf16, #tpu.memory_space<vmem>>) attributes {dimension_semantics = [#tpu.dimension_semantics<parallel>, #tpu.dimension_semantics<parallel>], iteration_bounds = array<i64: 1, 4>, scalar_prefetch = 0 : i64, scratch_operands = 0 : i64, tpu.core_type = #tpu.core_type<tc>, window_params = [{transform_indices = @transform_0, window_bounds = array<i64: 16, 144>}, {transform_indices = @transform_1, window_bounds = array<i64: 144, 512>}, {transform_indices = @transform_2, window_bounds = array<i64: 16, 1>}, {transform_indices = @transform_3, window_bounds = array<i64: 16, 1>}, {transform_indices = @transform_4, window_bounds = array<i64: 16, 512>}]} {
    %c0 = arith.constant 0 : index
    %c0_0 = arith.constant 0 : index
    %0 = vector.load %arg2[%c0, %c0_0] : memref<16x144xbf16, #tpu.memory_space<vmem>>, vector<16x144xbf16>
    %c0_1 = arith.constant 0 : index
    %c0_2 = arith.constant 0 : index
    %1 = vector.load %arg3[%c0_1, %c0_2] : memref<144x512xbf16, #tpu.memory_space<vmem>>, vector<144x512xbf16>
    %cst = arith.constant dense<0.000000e+00> : vector<16x512xf32>
    %2 = tpu.matmul %0, %1, %cst {dimension_numbers = #tpu.dot_dimension_numbers<[1], [0], [0], [1], [0, 0, 1, 1], [], []>} : vector<16x144xbf16>, vector<144x512xbf16>, vector<16x512xf32> -> vector<16x512xf32>
    %c0_3 = arith.constant 0 : index
    %c0_4 = arith.constant 0 : index
    %3 = vector.load %arg4[%c0_3, %c0_4] : memref<16x1xf32, #tpu.memory_space<vmem>>, vector<16x1xf32>
    %4 = vector.broadcast %3 : vector<16x1xf32> to vector<16x512xf32>
    %5 = arith.mulf %2, %4 : vector<16x512xf32>
    %c0_5 = arith.constant 0 : index
    %c0_6 = arith.constant 0 : index
    %6 = vector.load %arg5[%c0_5, %c0_6] : memref<16x1xf32, #tpu.memory_space<vmem>>, vector<16x1xf32>
    %7 = vector.broadcast %6 : vector<16x1xf32> to vector<16x512xf32>
    %8 = arith.addf %5, %7 : vector<16x512xf32>
    %cst_7 = arith.constant 0.000000e+00 : f32
    %9 = vector.broadcast %cst_7 : f32 to vector<16x512xf32>
    %10 = arith.maximumf %8, %9 : vector<16x512xf32>
    %11 = arith.truncf %10 : vector<16x512xf32> to vector<16x512xbf16>
    %c0_8 = arith.constant 0 : index
    %c0_9 = arith.constant 0 : index
    %12 = vector.load %arg6[%c0_8, %c0_9] : memref<16x512xbf16, #tpu.memory_space<vmem>>, vector<16x512xbf16>
    tpu.vector_store %arg6[%c0_8, %c0_9], %11 {strides = array<i32>} : memref<16x512xbf16, #tpu.memory_space<vmem>>, vector<16x512xbf16>,
    return
  }
  func.func @transform_0(%arg0: i32, %arg1: i32) -> (i32, i32) {
    %c0_i32 = arith.constant 0 : i32
    %c0_i32_0 = arith.constant 0 : i32
    return %arg0, %c0_i32 : i32, i32
  }
  func.func @transform_1(%arg0: i32, %arg1: i32) -> (i32, i32) {
    %c0_i32 = arith.constant 0 : i32
    %c0_i32_0 = arith.constant 0 : i32
    return %c0_i32, %arg1 : i32, i32
  }
  func.func @transform_2(%arg0: i32, %arg1: i32) -> (i32, i32) {
    %c0_i32 = arith.constant 0 : i32
    %c0_i32_0 = arith.constant 0 : i32
    return %arg0, %c0_i32 : i32, i32
  }
  func.func @transform_3(%arg0: i32, %arg1: i32) -> (i32, i32) {
    %c0_i32 = arith.constant 0 : i32
    %c0_i32_0 = arith.constant 0 : i32
    return %arg0, %c0_i32 : i32, i32
  }
  func.func @transform_4(%arg0: i32, %arg1: i32) -> (i32, i32) {
    %c0_i32 = arith.constant 0 : i32
    return %arg0, %arg1 : i32, i32
  }
}

module attributes {stable_mosaic.version = 11 : i64} {
  func.func @_gemm_bn_relu_kernel(%arg0: i32, %arg1: i32, %arg2: memref<8x180xbf16, #tpu.memory_space<vmem>>, %arg3: memref<180x2048xbf16, #tpu.memory_space<vmem>>, %arg4: memref<8x1xf32, #tpu.memory_space<vmem>>, %arg5: memref<8x1xf32, #tpu.memory_space<vmem>>, %arg6: memref<8x2048xbf16, #tpu.memory_space<vmem>>) attributes {dimension_semantics = [#tpu.dimension_semantics<parallel>, #tpu.dimension_semantics<parallel>], iteration_bounds = array<i64: 1, 4>, scalar_prefetch = 0 : i64, scratch_operands = 0 : i64, tpu.core_type = #tpu.core_type<tc>, window_params = [{transform_indices = @transform_0, window_bounds = array<i64: 8, 180>}, {transform_indices = @transform_1, window_bounds = array<i64: 180, 2048>}, {transform_indices = @transform_2, window_bounds = array<i64: 8, 1>}, {transform_indices = @transform_3, window_bounds = array<i64: 8, 1>}, {transform_indices = @transform_4, window_bounds = array<i64: 8, 2048>}]} {
    %c0 = arith.constant 0 : index
    %c0_0 = arith.constant 0 : index
    %0 = vector.load %arg2[%c0, %c0_0] : memref<8x180xbf16, #tpu.memory_space<vmem>>, vector<8x180xbf16>
    %c0_1 = arith.constant 0 : index
    %c0_2 = arith.constant 0 : index
    %1 = vector.load %arg3[%c0_1, %c0_2] : memref<180x2048xbf16, #tpu.memory_space<vmem>>, vector<180x2048xbf16>
    %cst = arith.constant dense<0.000000e+00> : vector<8x2048xf32>
    %2 = tpu.matmul %0, %1, %cst {dimension_numbers = #tpu.dot_dimension_numbers<[1], [0], [0], [1], [0, 0, 1, 1], [], []>} : vector<8x180xbf16>, vector<180x2048xbf16>, vector<8x2048xf32> -> vector<8x2048xf32>
    %c0_3 = arith.constant 0 : index
    %c0_4 = arith.constant 0 : index
    %3 = vector.load %arg4[%c0_3, %c0_4] : memref<8x1xf32, #tpu.memory_space<vmem>>, vector<8x1xf32>
    %4 = vector.broadcast %3 : vector<8x1xf32> to vector<8x2048xf32>
    %5 = arith.mulf %2, %4 : vector<8x2048xf32>
    %c0_5 = arith.constant 0 : index
    %c0_6 = arith.constant 0 : index
    %6 = vector.load %arg5[%c0_5, %c0_6] : memref<8x1xf32, #tpu.memory_space<vmem>>, vector<8x1xf32>
    %7 = vector.broadcast %6 : vector<8x1xf32> to vector<8x2048xf32>
    %8 = arith.addf %5, %7 : vector<8x2048xf32>
    %cst_7 = arith.constant 0.000000e+00 : f32
    %9 = vector.broadcast %cst_7 : f32 to vector<8x2048xf32>
    %10 = arith.maximumf %8, %9 : vector<8x2048xf32>
    %11 = arith.truncf %10 : vector<8x2048xf32> to vector<8x2048xbf16>
    %c0_8 = arith.constant 0 : index
    %c0_9 = arith.constant 0 : index
    %12 = vector.load %arg6[%c0_8, %c0_9] : memref<8x2048xbf16, #tpu.memory_space<vmem>>, vector<8x2048xbf16>
    tpu.vector_store %arg6[%c0_8, %c0_9], %11 {strides = array<i32>} : memref<8x2048xbf16, #tpu.memory_space<vmem>>, vector<8x2048xbf16>,
    return
  }
  func.func @transform_0(%arg0: i32, %arg1: i32) -> (i32, i32) {
    %c0_i32 = arith.constant 0 : i32
    %c0_i32_0 = arith.constant 0 : i32
    return %arg0, %c0_i32 : i32, i32
  }
  func.func @transform_1(%arg0: i32, %arg1: i32) -> (i32, i32) {
    %c0_i32 = arith.constant 0 : i32
    %c0_i32_0 = arith.constant 0 : i32
    return %c0_i32, %arg1 : i32, i32
  }
  func.func @transform_2(%arg0: i32, %arg1: i32) -> (i32, i32) {
    %c0_i32 = arith.constant 0 : i32
    %c0_i32_0 = arith.constant 0 : i32
    return %arg0, %c0_i32 : i32, i32
  }
  func.func @transform_3(%arg0: i32, %arg1: i32) -> (i32, i32) {
    %c0_i32 = arith.constant 0 : i32
    %c0_i32_0 = arith.constant 0 : i32
    return %arg0, %c0_i32 : i32, i32
  }
  func.func @transform_4(%arg0: i32, %arg1: i32) -> (i32, i32) {
    %c0_i32 = arith.constant 0 : i32
    return %arg0, %arg1 : i32, i32
  }
}

module attributes {stable_mosaic.version = 11 : i64} {
  func.func @_gemm_bn_relu_kernel(%arg0: i32, %arg1: i32, %arg2: memref<8x72xbf16, #tpu.memory_space<vmem>>, %arg3: memref<72x2048xbf16, #tpu.memory_space<vmem>>, %arg4: memref<8x1xf32, #tpu.memory_space<vmem>>, %arg5: memref<8x1xf32, #tpu.memory_space<vmem>>, %arg6: memref<8x2048xbf16, #tpu.memory_space<vmem>>) attributes {dimension_semantics = [#tpu.dimension_semantics<parallel>, #tpu.dimension_semantics<parallel>], iteration_bounds = array<i64: 1, 4>, scalar_prefetch = 0 : i64, scratch_operands = 0 : i64, tpu.core_type = #tpu.core_type<tc>, window_params = [{transform_indices = @transform_0, window_bounds = array<i64: 8, 72>}, {transform_indices = @transform_1, window_bounds = array<i64: 72, 2048>}, {transform_indices = @transform_2, window_bounds = array<i64: 8, 1>}, {transform_indices = @transform_3, window_bounds = array<i64: 8, 1>}, {transform_indices = @transform_4, window_bounds = array<i64: 8, 2048>}]} {
    %c0 = arith.constant 0 : index
    %c0_0 = arith.constant 0 : index
    %0 = vector.load %arg2[%c0, %c0_0] : memref<8x72xbf16, #tpu.memory_space<vmem>>, vector<8x72xbf16>
    %c0_1 = arith.constant 0 : index
    %c0_2 = arith.constant 0 : index
    %1 = vector.load %arg3[%c0_1, %c0_2] : memref<72x2048xbf16, #tpu.memory_space<vmem>>, vector<72x2048xbf16>
    %cst = arith.constant dense<0.000000e+00> : vector<8x2048xf32>
    %2 = tpu.matmul %0, %1, %cst {dimension_numbers = #tpu.dot_dimension_numbers<[1], [0], [0], [1], [0, 0, 1, 1], [], []>} : vector<8x72xbf16>, vector<72x2048xbf16>, vector<8x2048xf32> -> vector<8x2048xf32>
    %c0_3 = arith.constant 0 : index
    %c0_4 = arith.constant 0 : index
    %3 = vector.load %arg4[%c0_3, %c0_4] : memref<8x1xf32, #tpu.memory_space<vmem>>, vector<8x1xf32>
    %4 = vector.broadcast %3 : vector<8x1xf32> to vector<8x2048xf32>
    %5 = arith.mulf %2, %4 : vector<8x2048xf32>
    %c0_5 = arith.constant 0 : index
    %c0_6 = arith.constant 0 : index
    %6 = vector.load %arg5[%c0_5, %c0_6] : memref<8x1xf32, #tpu.memory_space<vmem>>, vector<8x1xf32>
    %7 = vector.broadcast %6 : vector<8x1xf32> to vector<8x2048xf32>
    %8 = arith.addf %5, %7 : vector<8x2048xf32>
    %cst_7 = arith.constant 0.000000e+00 : f32
    %9 = vector.broadcast %cst_7 : f32 to vector<8x2048xf32>
    %10 = arith.maximumf %8, %9 : vector<8x2048xf32>
    %11 = arith.truncf %10 : vector<8x2048xf32> to vector<8x2048xbf16>
    %c0_8 = arith.constant 0 : index
    %c0_9 = arith.constant 0 : index
    %12 = vector.load %arg6[%c0_8, %c0_9] : memref<8x2048xbf16, #tpu.memory_space<vmem>>, vector<8x2048xbf16>
    tpu.vector_store %arg6[%c0_8, %c0_9], %11 {strides = array<i32>} : memref<8x2048xbf16, #tpu.memory_space<vmem>>, vector<8x2048xbf16>,
    return
  }
  func.func @transform_0(%arg0: i32, %arg1: i32) -> (i32, i32) {
    %c0_i32 = arith.constant 0 : i32
    %c0_i32_0 = arith.constant 0 : i32
    return %arg0, %c0_i32 : i32, i32
  }
  func.func @transform_1(%arg0: i32, %arg1: i32) -> (i32, i32) {
    %c0_i32 = arith.constant 0 : i32
    %c0_i32_0 = arith.constant 0 : i32
    return %c0_i32, %arg1 : i32, i32
  }
  func.func @transform_2(%arg0: i32, %arg1: i32) -> (i32, i32) {
    %c0_i32 = arith.constant 0 : i32
    %c0_i32_0 = arith.constant 0 : i32
    return %arg0, %c0_i32 : i32, i32
  }
  func.func @transform_3(%arg0: i32, %arg1: i32) -> (i32, i32) {
    %c0_i32 = arith.constant 0 : i32
    %c0_i32_0 = arith.constant 0 : i32
    return %arg0, %c0_i32 : i32, i32
  }
  func.func @transform_4(%arg0: i32, %arg1: i32) -> (i32, i32) {
    %c0_i32 = arith.constant 0 : i32
    return %arg0, %arg1 : i32, i32
  }
}

module attributes {stable_mosaic.version = 11 : i64} {
  func.func @_gemm_bn_relu_kernel(%arg0: i32, %arg1: i32, %arg2: memref<8x72xbf16, #tpu.memory_space<vmem>>, %arg3: memref<72x2048xbf16, #tpu.memory_space<vmem>>, %arg4: memref<8x1xf32, #tpu.memory_space<vmem>>, %arg5: memref<8x1xf32, #tpu.memory_space<vmem>>, %arg6: memref<8x2048xbf16, #tpu.memory_space<vmem>>) attributes {dimension_semantics = [#tpu.dimension_semantics<parallel>, #tpu.dimension_semantics<parallel>], iteration_bounds = array<i64: 1, 16>, scalar_prefetch = 0 : i64, scratch_operands = 0 : i64, tpu.core_type = #tpu.core_type<tc>, window_params = [{transform_indices = @transform_0, window_bounds = array<i64: 8, 72>}, {transform_indices = @transform_1, window_bounds = array<i64: 72, 2048>}, {transform_indices = @transform_2, window_bounds = array<i64: 8, 1>}, {transform_indices = @transform_3, window_bounds = array<i64: 8, 1>}, {transform_indices = @transform_4, window_bounds = array<i64: 8, 2048>}]} {
    %c0 = arith.constant 0 : index
    %c0_0 = arith.constant 0 : index
    %0 = vector.load %arg2[%c0, %c0_0] : memref<8x72xbf16, #tpu.memory_space<vmem>>, vector<8x72xbf16>
    %c0_1 = arith.constant 0 : index
    %c0_2 = arith.constant 0 : index
    %1 = vector.load %arg3[%c0_1, %c0_2] : memref<72x2048xbf16, #tpu.memory_space<vmem>>, vector<72x2048xbf16>
    %cst = arith.constant dense<0.000000e+00> : vector<8x2048xf32>
    %2 = tpu.matmul %0, %1, %cst {dimension_numbers = #tpu.dot_dimension_numbers<[1], [0], [0], [1], [0, 0, 1, 1], [], []>} : vector<8x72xbf16>, vector<72x2048xbf16>, vector<8x2048xf32> -> vector<8x2048xf32>
    %c0_3 = arith.constant 0 : index
    %c0_4 = arith.constant 0 : index
    %3 = vector.load %arg4[%c0_3, %c0_4] : memref<8x1xf32, #tpu.memory_space<vmem>>, vector<8x1xf32>
    %4 = vector.broadcast %3 : vector<8x1xf32> to vector<8x2048xf32>
    %5 = arith.mulf %2, %4 : vector<8x2048xf32>
    %c0_5 = arith.constant 0 : index
    %c0_6 = arith.constant 0 : index
    %6 = vector.load %arg5[%c0_5, %c0_6] : memref<8x1xf32, #tpu.memory_space<vmem>>, vector<8x1xf32>
    %7 = vector.broadcast %6 : vector<8x1xf32> to vector<8x2048xf32>
    %8 = arith.addf %5, %7 : vector<8x2048xf32>
    %cst_7 = arith.constant 0.000000e+00 : f32
    %9 = vector.broadcast %cst_7 : f32 to vector<8x2048xf32>
    %10 = arith.maximumf %8, %9 : vector<8x2048xf32>
    %11 = arith.truncf %10 : vector<8x2048xf32> to vector<8x2048xbf16>
    %c0_8 = arith.constant 0 : index
    %c0_9 = arith.constant 0 : index
    %12 = vector.load %arg6[%c0_8, %c0_9] : memref<8x2048xbf16, #tpu.memory_space<vmem>>, vector<8x2048xbf16>
    tpu.vector_store %arg6[%c0_8, %c0_9], %11 {strides = array<i32>} : memref<8x2048xbf16, #tpu.memory_space<vmem>>, vector<8x2048xbf16>,
    return
  }
  func.func @transform_0(%arg0: i32, %arg1: i32) -> (i32, i32) {
    %c0_i32 = arith.constant 0 : i32
    %c0_i32_0 = arith.constant 0 : i32
    return %arg0, %c0_i32 : i32, i32
  }
  func.func @transform_1(%arg0: i32, %arg1: i32) -> (i32, i32) {
    %c0_i32 = arith.constant 0 : i32
    %c0_i32_0 = arith.constant 0 : i32
    return %c0_i32, %arg1 : i32, i32
  }
  func.func @transform_2(%arg0: i32, %arg1: i32) -> (i32, i32) {
    %c0_i32 = arith.constant 0 : i32
    %c0_i32_0 = arith.constant 0 : i32
    return %arg0, %c0_i32 : i32, i32
  }
  func.func @transform_3(%arg0: i32, %arg1: i32) -> (i32, i32) {
    %c0_i32 = arith.constant 0 : i32
    %c0_i32_0 = arith.constant 0 : i32
    return %arg0, %c0_i32 : i32, i32
  }
  func.func @transform_4(%arg0: i32, %arg1: i32) -> (i32, i32) {
    %c0_i32 = arith.constant 0 : i32
    return %arg0, %arg1 : i32, i32
  }
}

</mosaic_0001>

<bundles_post_ra>
// kernel: _lambda_.9
= control target key start
LH: loop header
LB: loop body
LE: loop exit
PB: predicated region body
PF: predicated region fallthrough
CT: control target
= control target key end

     0   :  { %s1260_s15 = smov 0   ;;  %s1262_s16 = smov 0   ;;  %s1463_s0 = inlined_call_operand.vmem [shape: bf16[512,144], index: 0, kind: input, shape index: {}]   ;;  %s1464_s1 = inlined_call_operand.vmem [shape: bf16[144,128], index: 1, kind: input, shape index: {}]   ;;  %s1465_s2 = inlined_call_operand.vmem [shape: f32[512,1], index: 2, kind: input, shape index: {}]   ;;  %s1466_s3 = inlined_call_operand.vmem [shape: f32[512,1], index: 3, kind: input, shape index: {}]   ;;  %s1467_s4 = inlined_call_operand.vmem [shape: bf16[512,128], index: 4, kind: output, shape index: {}]  }
   0x1   :  { %s1264_s17 = smov 0  }
   0x2 LB: > { %s26_s18 = sadd.s32 1, %s1228_s16  ;;  %p1007_p0 = scmp.ge.s32.totalorder %s1232_s17, 1  ;;  %s1232_s17 = sphi %s1264_s17, %s14_s17   ;;  %s1228_s16 = sphi %s1262_s16, %s1469_s16   ;;  %s1224_s15 = sphi %s1260_s15, %s1468_s15  }
   0x3   : > { %p28_p1 = scmp.ge.s32.totalorder %s26_s18, 4  ;;  %p209_p2 = scmp.lt.s32.totalorder %s1232_s17, 5 }
   0x5   : > { %s1471_s18 = smov (%p28_p1, %s26_s18), 0  ;;  %p210_p3 = pnand %p1007_p0, %p209_p2 }
   0x6   : > { %s1008_s21 = sshll.u32 (!%p210_p3), %s1224_s15, 4 }
   0x7   : > { %213 = sbr.rel (%p210_p3) target bundleno = 279 (0x117), region = 36  ;;  %p254_p4 = scmp.lt.s32.totalorder (!%p210_p3), %s1008_s21, 63 }
   0xc   : > { %v1177_v0 = vld [vmem:[%s1464_s1 + $0x38] sm:$0xff]   ;;  %v1234_v1 = vmov 0   ;;  %v1178_v2 = vld [vmem:[%s1464_s1 + $0x30] sm:$0xff]   ;;  %s1473_s21 = smov (!%p254_p4, %s1008_s21), 63  ;;  %v1179_v3 = vld [vmem:[%s1464_s1 + $0x28] sm:$0xff]   ;;  %vm446_vm0 = vcmask 130048  }
   0xd   : > { %471 = vmatprep.subr.bf16.mxu0 %v1234_v1  ;;  %1132 = vmatprep.subr.bf16.mxu1 %v1234_v1  ;;  %s1296_s26 = sshll.u32 %s1473_s21, 3  ;;  %v1180_v6 = vld [vmem:[%s1464_s1 + $0x20] sm:$0xff]   ;;  %v1181_v9 = vld [vmem:[%s1464_s1 + $0x18] sm:$0xff]   ;;  %v1182_v13 = vld [vmem:[%s1464_s1 + $0x10] sm:$0xff]  }
   0xe   : > { %472 = vmatpush1.bf16.msra.mxu0 %v1177_v0  ;;  %1141 = vmatpush1.bf16.msra.mxu1 %v1177_v0  ;;  %s1304_s29 = scalar_lea.vmem %s1465_s2, %s1296_s26  ;;  %s1319_s8 = scalar_lea.vmem %s1463_s0, %s1296_s26  ;;  %v1183_v17 = vld [vmem:[%s1464_s1 + $0x8] sm:$0xff]   ;;  %v1184_v20 = vld [vmem:[%s1464_s1] sm:$0xff]  }
   0xf   : > { %473 = vmatprep.subr.bf16.mxu0 %v1234_v1  ;;  %1133 = vmatprep.subr.bf16.mxu1 %v1234_v1  ;;  %v570_v4 = vld [vmem:[%s1304_s29 + $0x10] sm:$0xff]  ;;  %v568_v5 = vld [vmem:[%s1304_s29] sm:$0xff]  ;;  %v571_v7 = vld [vmem:[%s1304_s29 + $0x18] sm:$0xff]  ;;  %s1370_s25 = scalar_lea.vmem %s1466_s3, %s1296_s26  ;;  %s1016_s26 = sshll.u32 %s1473_s21, 2 }
  0x10   : > { %1176 = vset.pattern.permute.xlu1 %v1234_v1  ;;  %1175 = vset.pattern.permute.xlu0 %v1234_v1  ;;  %v569_v8 = vld [vmem:[%s1304_s29 + $0x8] sm:$0xff]  ;;  %v572_v11 = vld [vmem:[%s1304_s29 + $0x20] sm:$0xff]  ;;  %v575_v15 = vld [vmem:[%s1304_s29 + $0x38] sm:$0xff] }
  0x11   : > { %596 = vperm.xlu1 %1176, %v570_v4   ;;  %586 = vperm.xlu0 %1175, %v568_v5   ;;  %v573_v10 = vld [vmem:[%s1304_s29 + $0x28] sm:$0xff]  ;;  %v574_v16 = vld [vmem:[%s1304_s29 + $0x30] sm:$0xff]  ;;  %v576_v19 = vld [vmem:[%s1304_s29 + $0x40] sm:$0xff] }
  0x12   : > { %474 = vmatpush1.bf16.msra.mxu0 %v1178_v2  ;;  %1142 = vmatpush1.bf16.msra.mxu1 %v1178_v2  ;;  %v1188_v12 = vld [vmem:[%s1319_s8 + $0x4] ss:$8 sps:$4 sm:$0xff]   ;;  %v579_v21 = vld [vmem:[%s1304_s29 + $0x58] sm:$0xff]  ;;  %v578_v22 = vld [vmem:[%s1304_s29 + $0x50] sm:$0xff] }
  0x13   : > { %475 = vmatprep.subr.bf16.mxu0 %v1234_v1  ;;  %1134 = vmatprep.subr.bf16.mxu1 %v1234_v1  ;;  %v1191_v14 = vld [vmem:[%s1319_s8 + $0x44] ss:$8 sps:$4 sm:$0xff]   ;;  %v1186_v26 = vld [vmem:[%s1319_s8] ss:$8 sps:$4 sm:$0xff]   ;;  %v583_v28 = vld [vmem:[%s1304_s29 + $0x78] sm:$0xff] }
  0x14   : > { %1042 = vmatprep.mubr.msk.bf16.mxu0 %vm446_vm0, %v1188_v12  ;;  %1046 = vmatprep.mubr.msk.bf16.mxu1 %vm446_vm0, %v1191_v14  ;;  %v577_v18 = vld [vmem:[%s1304_s29 + $0x48] sm:$0xff]  ;;  %v1185_v23 = vld [vmem:[%s1464_s1 + $0x40] sm:$0xff]   ;;  %v582_v29 = vld [vmem:[%s1304_s29 + $0x70] sm:$0xff] }
  0x15   : > { %601 = vperm.xlu1 %1176, %v571_v7   ;;  %591 = vperm.xlu0 %1175, %v569_v8   ;;  %v581_v24 = vld [vmem:[%s1304_s29 + $0x68] sm:$0xff]  ;;  %v580_v25 = vld [vmem:[%s1304_s29 + $0x60] sm:$0xff]  ;;  %v1192_v30 = vld [vmem:[%s1319_s8 + $0x14] ss:$8 sps:$4 sm:$0xff]   ;;  %s1432_s29 = scalar_lea.vmem %s1467_s4, %s1016_s26 }
  0x16   : > { %476 = vmatpush1.bf16.msra.mxu0 %v1179_v3  ;;  %1143 = vmatpush1.bf16.msra.mxu1 %v1179_v3  ;;  %v1189_v27 = vld [vmem:[%s1319_s8 + $0x40] ss:$8 sps:$4 sm:$0xff]   ;;  %v1194_v31 = vld [vmem:[%s1319_s8 + $0x54] ss:$8 sps:$4 sm:$0xff]   ;;  %v1196_v34 = vld [vmem:[%s1319_s8 + $0x10] ss:$8 sps:$4 sm:$0xff]  }
  0x17   : > { %477 = vmatprep.subr.bf16.mxu0 %v1234_v1  ;;  %1135 = vmatprep.subr.bf16.mxu1 %v1234_v1  ;;  %v681_v32 = vld [vmem:[%s1370_s25 + $0x8] sm:$0xff]  ;;  %v680_v33 = vld [vmem:[%s1370_s25] sm:$0xff]  ;;  %v1197_v35 = vld [vmem:[%s1319_s8 + $0x50] ss:$8 sps:$4 sm:$0xff]  }
  0x18   : > { %v683_v36 = vld [vmem:[%s1370_s25 + $0x18] sm:$0xff]  ;;  %v682_v37 = vld [vmem:[%s1370_s25 + $0x10] sm:$0xff]  ;;  %v1198_v38 = vld [vmem:[%s1319_s8 + $0x24] ss:$8 sps:$4 sm:$0xff]  }
  0x19   : > { %611 = vperm.xlu1 %1176, %v573_v10   ;;  %606 = vperm.xlu0 %1175, %v572_v11   ;;  %v1200_v39 = vld [vmem:[%s1319_s8 + $0x64] ss:$8 sps:$4 sm:$0xff]   ;;  %v1202_v42 = vld [vmem:[%s1319_s8 + $0x20] ss:$8 sps:$4 sm:$0xff]   ;;  %v687_v44 = vld [vmem:[%s1370_s25 + $0x38] sm:$0xff] }
  0x1a   : > { %478 = vmatpush1.bf16.msra.mxu0 %v1180_v6  ;;  %1144 = vmatpush1.bf16.msra.mxu1 %v1180_v6  ;;  %v685_v40 = vld [vmem:[%s1370_s25 + $0x28] sm:$0xff]  ;;  %v684_v41 = vld [vmem:[%s1370_s25 + $0x20] sm:$0xff]  ;;  %v686_v45 = vld [vmem:[%s1370_s25 + $0x30] sm:$0xff] }
  0x1b   : > { %479 = vmatprep.subr.bf16.mxu0 %v1234_v1  ;;  %1136 = vmatprep.subr.bf16.mxu1 %v1234_v1  ;;  %v1203_v43 = vld [vmem:[%s1319_s8 + $0x60] ss:$8 sps:$4 sm:$0xff]   ;;  %v1204_v46 = vld [vmem:[%s1319_s8 + $0x34] ss:$8 sps:$4 sm:$0xff]   ;;  %v1208_v50 = vld [vmem:[%s1319_s8 + $0x30] ss:$8 sps:$4 sm:$0xff]  }
  0x1c   : > { %v1206_v47 = vld [vmem:[%s1319_s8 + $0x74] ss:$8 sps:$4 sm:$0xff]   ;;  %v689_v48 = vld [vmem:[%s1370_s25 + $0x48] sm:$0xff]  ;;  %v688_v49 = vld [vmem:[%s1370_s25 + $0x40] sm:$0xff] }
  0x1d   : > { %621 = vperm.xlu1 %1176, %v575_v15   ;;  %616 = vperm.xlu0 %1175, %v574_v16   ;;  %v1209_v51 = vld [vmem:[%s1319_s8 + $0x70] ss:$8 sps:$4 sm:$0xff]   ;;  %v693_v54 = vld [vmem:[%s1370_s25 + $0x68] sm:$0xff]  ;;  %v692_v55 = vld [vmem:[%s1370_s25 + $0x60] sm:$0xff] }
  0x1e   : > { %480 = vmatpush1.bf16.msra.mxu0 %v1181_v9  ;;  %1145 = vmatpush1.bf16.msra.mxu1 %v1181_v9  ;;  %v691_v52 = vld [vmem:[%s1370_s25 + $0x58] sm:$0xff]  ;;  %v690_v53 = vld [vmem:[%s1370_s25 + $0x50] sm:$0xff] }
  0x1f   : > { %481 = vmatprep.subr.bf16.mxu0 %v1234_v1  ;;  %1137 = vmatprep.subr.bf16.mxu1 %v1234_v1  ;;  %v695_v56 = vld [vmem:[%s1370_s25 + $0x78] sm:$0xff]  ;;  %v694_v57 = vld [vmem:[%s1370_s25 + $0x70] sm:$0xff] }
  0x21   : > { %631 = vperm.xlu1 %1176, %v577_v18   ;;  %626 = vperm.xlu0 %1175, %v576_v19  }
  0x22   : > { %482 = vmatpush1.bf16.msra.mxu0 %v1182_v13  ;;  %1146 = vmatpush1.bf16.msra.mxu1 %v1182_v13 }
  0x23   : > { %483 = vmatprep.subr.bf16.mxu0 %v1234_v1  ;;  %1138 = vmatprep.subr.bf16.mxu1 %v1234_v1 }
  0x25   : > { %641 = vperm.xlu1 %1176, %v579_v21   ;;  %636 = vperm.xlu0 %1175, %v578_v22  }
  0x26   : > { %484 = vmatpush1.bf16.msra.mxu0 %v1183_v17  ;;  %1147 = vmatpush1.bf16.msra.mxu1 %v1183_v17 }
  0x27   : > { %485 = vmatprep.subr.bf16.mxu0 %v1234_v1  ;;  %1139 = vmatprep.subr.bf16.mxu1 %v1234_v1 }
  0x29   : > { %651 = vperm.xlu1 %1176, %v581_v24   ;;  %646 = vperm.xlu0 %1175, %v580_v25  }
  0x2a   : > { %486 = vmatpush1.bf16.msra.mxu0 %v1184_v20  ;;  %1148 = vmatpush1.bf16.msra.mxu1 %v1184_v20 }
  0x2b   : > { %501 = vmatprep.subr.bf16.mxu0 %v1234_v1  ;;  %1140 = vmatprep.subr.bf16.mxu1 %v1234_v1 }
  0x2d   : > { %661 = vperm.xlu1 %1176, %v583_v28   ;;  %656 = vperm.xlu0 %1175, %v582_v29  }
  0x2e   : > { %502 = vmatpush2.bf16.msra.mxu0 %v1185_v23  ;;  %1149 = vmatpush2.bf16.msra.mxu1 %v1185_v23 }
  0x31   : > { %504 = vmatmul.mubr.bf16.vlgmr.msra.gmra.mxu0 %v1186_v26  ;;  %536 = vmatmul.mubr.bf16.vlgmr.msra.gmra.mxu1 %v1189_v27 }
  0x32   : > { %1043 = vmatprep.mubr.msk.bf16.mxu0 %vm446_vm0, %v1192_v30  ;;  %1047 = vmatprep.mubr.msk.bf16.mxu1 %vm446_vm0, %v1194_v31 }
  0x33   : > { %703 = vperm.xlu1 %1176, %v681_v32   ;;  %698 = vperm.xlu0 %1175, %v680_v33  }
  0x37   : > { %713 = vperm.xlu1 %1176, %v683_v36   ;;  %708 = vperm.xlu0 %1175, %v682_v37  }
  0x39   : > { %512 = vmatmul.mubr.bf16.gmra.mxu0 %v1196_v34  ;;  %544 = vmatmul.mubr.bf16.gmra.mxu1 %v1197_v35 }
  0x3a   : > { %1044 = vmatprep.mubr.msk.bf16.mxu0 %vm446_vm0, %v1198_v38  ;;  %1048 = vmatprep.mubr.msk.bf16.mxu1 %vm446_vm0, %v1200_v39 }
  0x3b   : > { %723 = vperm.xlu1 %1176, %v685_v40   ;;  %718 = vperm.xlu0 %1175, %v684_v41  }
  0x3f   : > { %733 = vperm.xlu1 %1176, %v687_v44   ;;  %728 = vperm.xlu0 %1175, %v686_v45  }
  0x41   : > { %520 = vmatmul.mubr.bf16.gmra.mxu0 %v1202_v42  ;;  %552 = vmatmul.mubr.bf16.gmra.mxu1 %v1203_v43 }
  0x42   : > { %1045 = vmatprep.mubr.msk.bf16.mxu0 %vm446_vm0, %v1204_v46  ;;  %1049 = vmatprep.mubr.msk.bf16.mxu1 %vm446_vm0, %v1206_v47 }
  0x43   : > { %743 = vperm.xlu1 %1176, %v689_v48   ;;  %738 = vperm.xlu0 %1175, %v688_v49  }
  0x47   : > { %753 = vperm.xlu1 %1176, %v691_v52   ;;  %748 = vperm.xlu0 %1175, %v690_v53  }
  0x49   : > { %528 = vmatmul.mubr.bf16.gmra.mxu0 %v1208_v50  ;;  %560 = vmatmul.mubr.bf16.gmra.mxu1 %v1209_v51 }
  0x4b   : > { %763 = vperm.xlu1 %1176, %v693_v54   ;;  %758 = vperm.xlu0 %1175, %v692_v55  }
  0x4f   : > { %773 = vperm.xlu1 %1176, %v695_v56   ;;  %768 = vperm.xlu0 %1175, %v694_v57  }
  0x8c   : > { %v587_v58 = vpop.permute.xlu0 %586  ;;  %v597_v59 = vpop.permute.xlu1 %596 }
  0x90   : > { %v592_v60 = vpop.permute.xlu0 %591  ;;  %v602_v61 = vpop.permute.xlu1 %601 }
  0x94   : > { %v1404_v62 = vpop.permute.xlu0 %606  ;;  %v1406_v63 = vpop.permute.xlu1 %611 }
  0x98   : > { %v1408_v0 = vpop.permute.xlu0 %616  ;;  %v1410_v1 = vpop.permute.xlu1 %621 }
  0x9c   : > { %v627_v2 = vpop.permute.xlu0 %626  ;;  %v632_v3 = vpop.permute.xlu1 %631 }
  0xa0   : > { %v637_v4 = vpop.permute.xlu0 %636  ;;  %v642_v5 = vpop.permute.xlu1 %641 }
  0xa4   : > { %v1412_v6 = vpop.permute.xlu0 %646  ;;  %v1414_v7 = vpop.permute.xlu1 %651 }
  0xa8   : > { %v1416_v8 = vpop.permute.xlu0 %656  ;;  %v1418_v9 = vpop.permute.xlu1 %661 }
  0xae   : > { %v699_v10 = vpop.permute.xlu0 %698  ;;  %v704_v11 = vpop.permute.xlu1 %703 }
  0xb2   : > { %v709_v12 = vpop.permute.xlu0 %708  ;;  %v714_v13 = vpop.permute.xlu1 %713 }
  0xb6   : > { %v1420_v14 = vpop.permute.xlu0 %718  ;;  %v1422_v15 = vpop.permute.xlu1 %723 }
  0xba   : > { %v1424_v16 = vpop.permute.xlu0 %728  ;;  %v1426_v17 = vpop.permute.xlu1 %733 }
  0xbe   : > { %v739_v24 = vpop.permute.xlu0 %738  ;;  %v744_v29 = vpop.permute.xlu1 %743 }
  0xc2   : > { %v749_v46 = vpop.permute.xlu0 %748  ;;  %v754_v53 = vpop.permute.xlu1 %753 }
  0xf1   : > { %v505_v18 = vpop.f32.mrf.mxu0  ;;  %v537_v19 = vpop.f32.mrf.mxu1 }
  0xf2   : > { %v664_v20 = vmul.f32 %v587_v58, %v505_v18  ;;  %v672_v21 = vmul.f32 %v627_v2, %v537_v19 }
  0xf3   : > { %v507_v22 = vpop.f32.mrf.mxu0  ;;  %v539_v23 = vpop.f32.mrf.mxu1 }
  0xf4   : > { %v776_v25 = vadd.f32 %v699_v10, %v664_v20  ;;  %v784_v26 = vadd.f32 %v739_v24, %v672_v21 }
  0xf5   : > { %v508_v27 = vpop.f32.mrf.mxu0  ;;  %v540_v28 = vpop.f32.mrf.mxu1 }
  0xf6   : > { %v665_v30 = vmul.f32 %v592_v60, %v508_v27  ;;  %v673_v31 = vmul.f32 %v632_v3, %v540_v28  ;;  %v792_v36 = vmax.f32 %v776_v25, 0.0  ;;  %v800_v37 = vmax.f32 %v784_v26, 0.0  ;;  %v764_v25 = vpop.permute.xlu1 %763 }
  0xf7   : > { %v510_v32 = vpop.f32.mrf.mxu0  ;;  %v542_v33 = vpop.f32.mrf.mxu1 }
  0xf8   : > { %v777_v34 = vadd.f32 %v704_v11, %v665_v30  ;;  %v785_v35 = vadd.f32 %v744_v29, %v673_v31 }
  0xf9   : > { %v513_v38 = vpop.f32.mrf.mxu0  ;;  %v545_v39 = vpop.f32.mrf.mxu1 }
  0xfa   : > { %v793_v40 = vmax.f32 %v777_v34, 0.0  ;;  %v801_v41 = vmax.f32 %v785_v35, 0.0  ;;  %v666_v42 = vmul.f32 %v597_v59, %v513_v38  ;;  %v674_v43 = vmul.f32 %v637_v4, %v545_v39 }
  0xfb   : > { %v515_v44 = vpop.f32.mrf.mxu0  ;;  %v547_v45 = vpop.f32.mrf.mxu1 }
  0xfc   : > { %v1088_v47 = vpack.c.bf16 %v793_v40, %v792_v36  ;;  %v1108_v48 = vpack.c.bf16 %v801_v41, %v800_v37  ;;  %v778_v49 = vadd.f32 %v709_v12, %v666_v42  ;;  %v786_v50 = vadd.f32 %v749_v46, %v674_v43  ;;  %v774_v41 = vpop.permute.xlu1 %773 }
  0xfd   : > { %v516_v51 = vpop.f32.mrf.mxu0  ;;  %v548_v52 = vpop.f32.mrf.mxu1 }
  0xfe   : > { %1089 = vst [vmem:[%s1432_s29] sm:$0xff] %v1088_v47   ;;  %1128 = vst [vmem:[%s1432_s29 + $0x20] sm:$0xff] %v1108_v48   ;;  %v667_v54 = vmul.f32 %v602_v61, %v516_v51  ;;  %v675_v55 = vmul.f32 %v642_v5, %v548_v52  ;;  %v794_v60 = vmax.f32 %v778_v49, 0.0  ;;  %v802_v2 = vmax.f32 %v786_v50, 0.0  ;;  %v759_v61 = vpop.permute.xlu0 %758 }
  0xff   : > { %v518_v56 = vpop.f32.mrf.mxu0  ;;  %v550_v57 = vpop.f32.mrf.mxu1 }
 0x100   : > { %v779_v58 = vadd.f32 %v714_v13, %v667_v54  ;;  %v787_v59 = vadd.f32 %v754_v53, %v675_v55 }
 0x101   : > { %v521_v3 = vpop.f32.mrf.mxu0  ;;  %v553_v4 = vpop.f32.mrf.mxu1 }
 0x102   : > { %v795_v10 = vmax.f32 %v779_v58, 0.0  ;;  %v803_v11 = vmax.f32 %v787_v59, 0.0  ;;  %v668_v12 = vmul.f32 %v1404_v62, %v521_v3  ;;  %v676_v18 = vmul.f32 %v1412_v6, %v553_v4 }
 0x103   : > { %v523_v19 = vpop.f32.mrf.mxu0  ;;  %v555_v20 = vpop.f32.mrf.mxu1 }
 0x104   : > { %v1093_v5 = vpack.c.bf16 %v795_v10, %v794_v60  ;;  %v1113_v21 = vpack.c.bf16 %v803_v11, %v802_v2  ;;  %v780_v13 = vadd.f32 %v1420_v14, %v668_v12  ;;  %v788_v22 = vadd.f32 %v759_v61, %v676_v18 }
 0x105   : > { %v524_v23 = vpop.f32.mrf.mxu0  ;;  %v556_v24 = vpop.f32.mrf.mxu1 }
 0x106   : > { %1125 = vst [vmem:[%s1432_s29 + $0x8] sm:$0xff] %v1093_v5   ;;  %1129 = vst [vmem:[%s1432_s29 + $0x28] sm:$0xff] %v1113_v21   ;;  %v669_v26 = vmul.f32 %v1406_v63, %v524_v23  ;;  %v677_v27 = vmul.f32 %v1414_v7, %v556_v24  ;;  %v796_v30 = vmax.f32 %v780_v13, 0.0  ;;  %v804_v31 = vmax.f32 %v788_v22, 0.0  ;;  %v769_v7 = vpop.permute.xlu0 %768 }
 0x107   : > { %v526_v62 = vpop.f32.mrf.mxu0  ;;  %v558_v28 = vpop.f32.mrf.mxu1 }
 0x108   : > { %v781_v6 = vadd.f32 %v1422_v15, %v669_v26  ;;  %v789_v29 = vadd.f32 %v764_v25, %v677_v27 }
 0x109   : > { %v529_v14 = vpop.f32.mrf.mxu0  ;;  %v561_v32 = vpop.f32.mrf.mxu1 }
 0x10a   : > { %v797_v33 = vmax.f32 %v781_v6, 0.0  ;;  %v805_v34 = vmax.f32 %v789_v29, 0.0  ;;  %v670_v35 = vmul.f32 %v1408_v0, %v529_v14  ;;  %v678_v36 = vmul.f32 %v1416_v8, %v561_v32 }
 0x10b   : > { %v531_v63 = vpop.f32.mrf.mxu0  ;;  %v563_v37 = vpop.f32.mrf.mxu1 }
 0x10c   : > { %v1098_v38 = vpack.c.bf16 %v797_v33, %v796_v30  ;;  %v1118_v39 = vpack.c.bf16 %v805_v34, %v804_v31  ;;  %v782_v42 = vadd.f32 %v1424_v16, %v670_v35  ;;  %v790_v43 = vadd.f32 %v769_v7, %v678_v36 }
 0x10d   : > { %v532_v40 = vpop.f32.mrf.mxu0  ;;  %v564_v15 = vpop.f32.mrf.mxu1 }
 0x10e   : > { %1126 = vst [vmem:[%s1432_s29 + $0x10] sm:$0xff] %v1098_v38   ;;  %1130 = vst [vmem:[%s1432_s29 + $0x30] sm:$0xff] %v1118_v39   ;;  %v671_v44 = vmul.f32 %v1410_v1, %v532_v40  ;;  %v679_v0 = vmul.f32 %v1418_v9, %v564_v15  ;;  %v798_v48 = vmax.f32 %v782_v42, 0.0  ;;  %v806_v49 = vmax.f32 %v790_v43, 0.0 }
 0x10f   : > { %v534_v8 = vpop.f32.mrf.mxu0  ;;  %v566_v45 = vpop.f32.mrf.mxu1 }
 0x110   : > { %v783_v46 = vadd.f32 %v1426_v17, %v671_v44  ;;  %v791_v47 = vadd.f32 %v774_v41, %v679_v0 }
 0x112   : > { %v799_v50 = vmax.f32 %v783_v46, 0.0  ;;  %v807_v51 = vmax.f32 %v791_v47, 0.0 }
 0x114   : > { %v1103_v52 = vpack.c.bf16 %v799_v50, %v798_v48  ;;  %v1123_v53 = vpack.c.bf16 %v807_v51, %v806_v49 }
 0x116   : > { %1127 = vst [vmem:[%s1432_s29 + $0x18] sm:$0xff] %v1103_v52   ;;  %1131 = vst [vmem:[%s1432_s29 + $0x38] sm:$0xff] %v1123_v53  }
 0x117 PF: > { %s14_s17 = sadd.s32 1, %s1232_s17   ;;  %s1468_s15 = smov %s1228_s16 }
 0x118   : > { %p11_p5 = scmp.ge.s32.totalorder %s14_s17, 6   ;;  %s1469_s16 = smov %s1471_s18 }
 0x11a   :  { %13 = sbr.rel (!%p11_p5) target bundleno = 2 (0x2), region = 75 }

// kernel: _lambda_.10
= control target key start
LH: loop header
LB: loop body
LE: loop exit
PB: predicated region body
PF: predicated region fallthrough
CT: control target
= control target key end

     0   :  { %s9826_s15 = smov 0   ;;  %s9828_s16 = smov 0   ;;  %s11494_s0 = inlined_call_operand.vmem [shape: bf16[16,4680], index: 0, kind: input, shape index: {}]   ;;  %s11495_s1 = inlined_call_operand.vmem [shape: bf16[4680,512], index: 1, kind: input, shape index: {}]   ;;  %s11496_s2 = inlined_call_operand.vmem [shape: f32[16,1], index: 2, kind: input, shape index: {}]   ;;  %s11497_s3 = inlined_call_operand.vmem [shape: f32[16,1], index: 3, kind: input, shape index: {}]   ;;  %s11498_s4 = inlined_call_operand.vmem [shape: bf16[16,512], index: 4, kind: output, shape index: {}]  }
   0x1   :  { %s9830_s17 = smov 0   ;;  %s9832_s18 = smov 0  }
   0x2   :  { %s9834_s19 = smov 0  }
   0x3 LB: > { %s23_s20 = sadd.s32 1, %s9792_s18  ;;  %s8593_s21 = sadd.s32 4294967295, %s9796_s19   ;;  %s9796_s19 = sphi %s9834_s19, %s14_s19   ;;  %s9792_s18 = sphi %s9832_s18, %s11503_s18   ;;  %s9788_s17 = sphi %s9830_s17, %s11502_s17   ;;  %s9784_s16 = sphi %s9828_s16, %s11501_s16   ;;  %s9780_s15 = sphi %s9826_s15, %s11500_s15  }
   0x4   : > { %p24_p0 = scmp.ge.s32.totalorder %s23_s20, 4  ;;  %p66_p1 = scmp.ne.s32.totalorder %s9784_s16, %s9780_s15 }
   0x5   : > { %p67_p2 = scmp.eq.s32.totalorder %s9796_s19, 0  ;;  %p150_p4 = scmp.eq.s32.totalorder %s8593_s21, 3 }
   0x6   : > { %s11505_s20 = smov (%p24_p0, %s23_s20), 0  ;;  %s59_s23 = sadd.s32 1, %s9784_s16 }
   0x7   : > { %p68_p3 = por %p67_p2, %p66_p1  ;;  %s56_s22 = ssub.s32 %s9792_s18, %s11505_s20 }
   0x8   : > { %p57_p5 = scmp.eq.s32.totalorder %s56_s22, 0  ;;  %p9861_p6 = por %p150_p4, %p66_p1 }
   0x9   : > { %p8599_p7 = scmp.ge.s32.totalorder %s9796_s19, 4 }
   0xa   : > { %s9866_s25 = scalar_select %p57_p5, %s9784_s16, %s59_s23  }
   0xb   : > { %200 = sbr.rel (%p8599_p7) target bundleno = 410 (0x19a), region = 28 }
  0x10   : > { %203 = sbr.rel (!%p68_p3) target bundleno = 410 (0x19a), region = 32  ;;  %s205_s26 = sand.u32 (%p68_p3), 1, %s9784_s16  }
  0x11   : > { %s8600_s27 = sshll.u32 (%p68_p3), %s9792_s18, 2  ;;  %s9363_s28 = smul.u32 (%p68_p3), 2340, %s205_s26 }
  0x12   : > { %s9874_s5 = scalar_lea.vmem (%p68_p3), %s11495_s1, %s8600_s27 }
  0x13   : > { %v226_v0 = vld [vmem:[%s9874_s5] sm:$0xf] (%p68_p3)  ;;  %v228_v1 = vld [vmem:[%s9874_s5 + $0x10] sm:$0xf] (%p68_p3)  ;;  %s9881_s6 = scalar_lea.vmem (%p68_p3), [#allocation2], %s9363_s28 }
  0x14   : > { %v230_v2 = vld [vmem:[%s9874_s5 + $0x20] sm:$0xf] (%p68_p3)  ;;  %v232_v3 = vld [vmem:[%s9874_s5 + $0x30] sm:$0xf] (%p68_p3)  ;;  %227 = vst [vmem:[%s9881_s6] sm:$0xf] (%p68_p3), %v226_v0 }
  0x15   : > { %v234_v4 = vld [vmem:[%s9874_s5 + $0x40] sm:$0xf]  ;;  %229 = vst [vmem:[%s9881_s6 + $0x4] sm:$0xf] %v228_v1  ;;  %231 = vst [vmem:[%s9881_s6 + $0x8] sm:$0xf] %v230_v2 }
  0x16   : > { %233 = vst [vmem:[%s9881_s6 + $0xc] sm:$0xf] %v232_v3  ;;  %235 = vst [vmem:[%s9881_s6 + $0x10] sm:$0xf] %v234_v4  ;;  %v236_v5 = vld [vmem:[%s9874_s5 + $0x50] sm:$0xf] }
  0x17   : > { %v238_v6 = vld [vmem:[%s9874_s5 + $0x60] sm:$0xf]  ;;  %v240_v7 = vld [vmem:[%s9874_s5 + $0x70] sm:$0xf]  ;;  %237 = vst [vmem:[%s9881_s6 + $0x14] sm:$0xf] %v236_v5 }
  0x18   : > { %239 = vst [vmem:[%s9881_s6 + $0x18] sm:$0xf] %v238_v6  ;;  %241 = vst [vmem:[%s9881_s6 + $0x1c] sm:$0xf] %v240_v7  ;;  %v242_v8 = vld [vmem:[%s9874_s5 + $0x80] sm:$0xf] }
  0x19   : > { %v244_v9 = vld [vmem:[%s9874_s5 + $0x90] sm:$0xf]  ;;  %v246_v10 = vld [vmem:[%s9874_s5 + $0xa0] sm:$0xf]  ;;  %243 = vst [vmem:[%s9881_s6 + $0x20] sm:$0xf] %v242_v8 }
  0x1a   : > { %245 = vst [vmem:[%s9881_s6 + $0x24] sm:$0xf] %v244_v9  ;;  %247 = vst [vmem:[%s9881_s6 + $0x28] sm:$0xf] %v246_v10  ;;  %v248_v11 = vld [vmem:[%s9874_s5 + $0xb0] sm:$0xf] }
  0x1b   : > { %v250_v12 = vld [vmem:[%s9874_s5 + $0xc0] sm:$0xf]  ;;  %v252_v13 = vld [vmem:[%s9874_s5 + $0xd0] sm:$0xf]  ;;  %249 = vst [vmem:[%s9881_s6 + $0x2c] sm:$0xf] %v248_v11 }
  0x1c   : > { %251 = vst [vmem:[%s9881_s6 + $0x30] sm:$0xf] %v250_v12  ;;  %253 = vst [vmem:[%s9881_s6 + $0x34] sm:$0xf] %v252_v13  ;;  %v254_v14 = vld [vmem:[%s9874_s5 + $0xe0] sm:$0xf] }
  0x1d   : > { %v256_v15 = vld [vmem:[%s9874_s5 + $0xf0] sm:$0xf]  ;;  %v258_v16 = vld [vmem:[%s9874_s5 + $0x100] sm:$0xf]  ;;  %255 = vst [vmem:[%s9881_s6 + $0x38] sm:$0xf] %v254_v14 }
  0x1e   : > { %257 = vst [vmem:[%s9881_s6 + $0x3c] sm:$0xf] %v256_v15  ;;  %259 = vst [vmem:[%s9881_s6 + $0x40] sm:$0xf] %v258_v16  ;;  %v260_v17 = vld [vmem:[%s9874_s5 + $0x110] sm:$0xf] }
  0x1f   : > { %v262_v18 = vld [vmem:[%s9874_s5 + $0x120] sm:$0xf]  ;;  %v264_v19 = vld [vmem:[%s9874_s5 + $0x130] sm:$0xf]  ;;  %261 = vst [vmem:[%s9881_s6 + $0x44] sm:$0xf] %v260_v17 }
  0x20   : > { %263 = vst [vmem:[%s9881_s6 + $0x48] sm:$0xf] %v262_v18  ;;  %265 = vst [vmem:[%s9881_s6 + $0x4c] sm:$0xf] %v264_v19  ;;  %v266_v20 = vld [vmem:[%s9874_s5 + $0x140] sm:$0xf] }
  0x21   : > { %v268_v21 = vld [vmem:[%s9874_s5 + $0x150] sm:$0xf]  ;;  %v270_v22 = vld [vmem:[%s9874_s5 + $0x160] sm:$0xf]  ;;  %267 = vst [vmem:[%s9881_s6 + $0x50] sm:$0xf] %v266_v20 }
  0x22   : > { %269 = vst [vmem:[%s9881_s6 + $0x54] sm:$0xf] %v268_v21  ;;  %271 = vst [vmem:[%s9881_s6 + $0x58] sm:$0xf] %v270_v22  ;;  %v272_v23 = vld [vmem:[%s9874_s5 + $0x170] sm:$0xf] }
  0x23   : > { %v274_v24 = vld [vmem:[%s9874_s5 + $0x180] sm:$0xf]  ;;  %v276_v25 = vld [vmem:[%s9874_s5 + $0x190] sm:$0xf]  ;;  %273 = vst [vmem:[%s9881_s6 + $0x5c] sm:$0xf] %v272_v23 }
  0x24   : > { %275 = vst [vmem:[%s9881_s6 + $0x60] sm:$0xf] %v274_v24  ;;  %277 = vst [vmem:[%s9881_s6 + $0x64] sm:$0xf] %v276_v25  ;;  %v278_v26 = vld [vmem:[%s9874_s5 + $0x1a0] sm:$0xf] }
  0x25   : > { %v280_v27 = vld [vmem:[%s9874_s5 + $0x1b0] sm:$0xf]  ;;  %v282_v28 = vld [vmem:[%s9874_s5 + $0x1c0] sm:$0xf]  ;;  %279 = vst [vmem:[%s9881_s6 + $0x68] sm:$0xf] %v278_v26 }
  0x26   : > { %281 = vst [vmem:[%s9881_s6 + $0x6c] sm:$0xf] %v280_v27  ;;  %283 = vst [vmem:[%s9881_s6 + $0x70] sm:$0xf] %v282_v28  ;;  %v284_v29 = vld [vmem:[%s9874_s5 + $0x1d0] sm:$0xf] }
  0x27   : > { %v286_v30 = vld [vmem:[%s9874_s5 + $0x1e0] sm:$0xf]  ;;  %v288_v31 = vld [vmem:[%s9874_s5 + $0x1f0] sm:$0xf]  ;;  %285 = vst [vmem:[%s9881_s6 + $0x74] sm:$0xf] %v284_v29 }
  0x28   : > { %287 = vst [vmem:[%s9881_s6 + $0x78] sm:$0xf] %v286_v30  ;;  %289 = vst [vmem:[%s9881_s6 + $0x7c] sm:$0xf] %v288_v31  ;;  %v290_v32 = vld [vmem:[%s9874_s5 + $0x200] sm:$0xf] }
  0x29   : > { %v292_v33 = vld [vmem:[%s9874_s5 + $0x210] sm:$0xf]  ;;  %v294_v34 = vld [vmem:[%s9874_s5 + $0x220] sm:$0xf]  ;;  %291 = vst [vmem:[%s9881_s6 + $0x80] sm:$0xf] %v290_v32 }
  0x2a   : > { %293 = vst [vmem:[%s9881_s6 + $0x84] sm:$0xf] %v292_v33  ;;  %295 = vst [vmem:[%s9881_s6 + $0x88] sm:$0xf] %v294_v34  ;;  %v296_v35 = vld [vmem:[%s9874_s5 + $0x230] sm:$0xf] }
  0x2b   : > { %v298_v36 = vld [vmem:[%s9874_s5 + $0x240] sm:$0xf]  ;;  %v300_v37 = vld [vmem:[%s9874_s5 + $0x250] sm:$0xf]  ;;  %297 = vst [vmem:[%s9881_s6 + $0x8c] sm:$0xf] %v296_v35 }
  0x2c   : > { %299 = vst [vmem:[%s9881_s6 + $0x90] sm:$0xf] %v298_v36  ;;  %301 = vst [vmem:[%s9881_s6 + $0x94] sm:$0xf] %v300_v37  ;;  %v302_v38 = vld [vmem:[%s9874_s5 + $0x260] sm:$0xf] }
  0x2d   : > { %v304_v39 = vld [vmem:[%s9874_s5 + $0x270] sm:$0xf]  ;;  %v306_v40 = vld [vmem:[%s9874_s5 + $0x280] sm:$0xf]  ;;  %303 = vst [vmem:[%s9881_s6 + $0x98] sm:$0xf] %v302_v38 }
  0x2e   : > { %305 = vst [vmem:[%s9881_s6 + $0x9c] sm:$0xf] %v304_v39  ;;  %307 = vst [vmem:[%s9881_s6 + $0xa0] sm:$0xf] %v306_v40  ;;  %v308_v41 = vld [vmem:[%s9874_s5 + $0x290] sm:$0xf] }
  0x2f   : > { %v310_v42 = vld [vmem:[%s9874_s5 + $0x2a0] sm:$0xf]  ;;  %v312_v43 = vld [vmem:[%s9874_s5 + $0x2b0] sm:$0xf]  ;;  %309 = vst [vmem:[%s9881_s6 + $0xa4] sm:$0xf] %v308_v41 }
  0x30   : > { %311 = vst [vmem:[%s9881_s6 + $0xa8] sm:$0xf] %v310_v42  ;;  %313 = vst [vmem:[%s9881_s6 + $0xac] sm:$0xf] %v312_v43  ;;  %v314_v44 = vld [vmem:[%s9874_s5 + $0x2c0] sm:$0xf] }
  0x31   : > { %v316_v45 = vld [vmem:[%s9874_s5 + $0x2d0] sm:$0xf]  ;;  %v318_v46 = vld [vmem:[%s9874_s5 + $0x2e0] sm:$0xf]  ;;  %315 = vst [vmem:[%s9881_s6 + $0xb0] sm:$0xf] %v314_v44 }
  0x32   : > { %317 = vst [vmem:[%s9881_s6 + $0xb4] sm:$0xf] %v316_v45  ;;  %319 = vst [vmem:[%s9881_s6 + $0xb8] sm:$0xf] %v318_v46  ;;  %v320_v47 = vld [vmem:[%s9874_s5 + $0x2f0] sm:$0xf] }
  0x33   : > { %v322_v48 = vld [vmem:[%s9874_s5 + $0x300] sm:$0xf]  ;;  %v324_v49 = vld [vmem:[%s9874_s5 + $0x310] sm:$0xf]  ;;  %321 = vst [vmem:[%s9881_s6 + $0xbc] sm:$0xf] %v320_v47 }
  0x34   : > { %323 = vst [vmem:[%s9881_s6 + $0xc0] sm:$0xf] %v322_v48  ;;  %325 = vst [vmem:[%s9881_s6 + $0xc4] sm:$0xf] %v324_v49  ;;  %v326_v50 = vld [vmem:[%s9874_s5 + $0x320] sm:$0xf] }
  0x35   : > { %v328_v51 = vld [vmem:[%s9874_s5 + $0x330] sm:$0xf]  ;;  %v330_v52 = vld [vmem:[%s9874_s5 + $0x340] sm:$0xf]  ;;  %327 = vst [vmem:[%s9881_s6 + $0xc8] sm:$0xf] %v326_v50 }
  0x36   : > { %329 = vst [vmem:[%s9881_s6 + $0xcc] sm:$0xf] %v328_v51  ;;  %331 = vst [vmem:[%s9881_s6 + $0xd0] sm:$0xf] %v330_v52  ;;  %v332_v53 = vld [vmem:[%s9874_s5 + $0x350] sm:$0xf] }
  0x37   : > { %v334_v54 = vld [vmem:[%s9874_s5 + $0x360] sm:$0xf]  ;;  %v336_v55 = vld [vmem:[%s9874_s5 + $0x370] sm:$0xf]  ;;  %333 = vst [vmem:[%s9881_s6 + $0xd4] sm:$0xf] %v332_v53 }
  0x38   : > { %335 = vst [vmem:[%s9881_s6 + $0xd8] sm:$0xf] %v334_v54  ;;  %337 = vst [vmem:[%s9881_s6 + $0xdc] sm:$0xf] %v336_v55  ;;  %v338_v56 = vld [vmem:[%s9874_s5 + $0x380] sm:$0xf] }
  0x39   : > { %v340_v57 = vld [vmem:[%s9874_s5 + $0x390] sm:$0xf]  ;;  %v342_v58 = vld [vmem:[%s9874_s5 + $0x3a0] sm:$0xf]  ;;  %339 = vst [vmem:[%s9881_s6 + $0xe0] sm:$0xf] %v338_v56 }
  0x3a   : > { %341 = vst [vmem:[%s9881_s6 + $0xe4] sm:$0xf] %v340_v57  ;;  %343 = vst [vmem:[%s9881_s6 + $0xe8] sm:$0xf] %v342_v58  ;;  %v344_v59 = vld [vmem:[%s9874_s5 + $0x3b0] sm:$0xf] }
  0x3b   : > { %v346_v60 = vld [vmem:[%s9874_s5 + $0x3c0] sm:$0xf]  ;;  %v348_v61 = vld [vmem:[%s9874_s5 + $0x3d0] sm:$0xf]  ;;  %345 = vst [vmem:[%s9881_s6 + $0xec] sm:$0xf] %v344_v59 }
  0x3c   : > { %347 = vst [vmem:[%s9881_s6 + $0xf0] sm:$0xf] %v346_v60  ;;  %349 = vst [vmem:[%s9881_s6 + $0xf4] sm:$0xf] %v348_v61  ;;  %v350_v62 = vld [vmem:[%s9874_s5 + $0x3e0] sm:$0xf] }
  0x3d   : > { %v352_v63 = vld [vmem:[%s9874_s5 + $0x3f0] sm:$0xf]  ;;  %v354_v0 = vld [vmem:[%s9874_s5 + $0x400] sm:$0xf]  ;;  %351 = vst [vmem:[%s9881_s6 + $0xf8] sm:$0xf] %v350_v62 }
  0x3e   : > { %353 = vst [vmem:[%s9881_s6 + $0xfc] sm:$0xf] %v352_v63  ;;  %355 = vst [vmem:[%s9881_s6 + $0x100] sm:$0xf] %v354_v0  ;;  %v356_v1 = vld [vmem:[%s9874_s5 + $0x410] sm:$0xf] }
  0x3f   : > { %v358_v2 = vld [vmem:[%s9874_s5 + $0x420] sm:$0xf]  ;;  %v360_v3 = vld [vmem:[%s9874_s5 + $0x430] sm:$0xf]  ;;  %357 = vst [vmem:[%s9881_s6 + $0x104] sm:$0xf] %v356_v1 }
  0x40   : > { %359 = vst [vmem:[%s9881_s6 + $0x108] sm:$0xf] %v358_v2  ;;  %361 = vst [vmem:[%s9881_s6 + $0x10c] sm:$0xf] %v360_v3  ;;  %v362_v4 = vld [vmem:[%s9874_s5 + $0x440] sm:$0xf] }
  0x41   : > { %v364_v5 = vld [vmem:[%s9874_s5 + $0x450] sm:$0xf]  ;;  %v366_v6 = vld [vmem:[%s9874_s5 + $0x460] sm:$0xf]  ;;  %363 = vst [vmem:[%s9881_s6 + $0x110] sm:$0xf] %v362_v4 }
  0x42   : > { %365 = vst [vmem:[%s9881_s6 + $0x114] sm:$0xf] %v364_v5  ;;  %367 = vst [vmem:[%s9881_s6 + $0x118] sm:$0xf] %v366_v6  ;;  %v368_v7 = vld [vmem:[%s9874_s5 + $0x470] sm:$0xf] }
  0x43   : > { %v370_v8 = vld [vmem:[%s9874_s5 + $0x480] sm:$0xf]  ;;  %v372_v9 = vld [vmem:[%s9874_s5 + $0x490] sm:$0xf]  ;;  %369 = vst [vmem:[%s9881_s6 + $0x11c] sm:$0xf] %v368_v7 }
  0x44   : > { %371 = vst [vmem:[%s9881_s6 + $0x120] sm:$0xf] %v370_v8  ;;  %373 = vst [vmem:[%s9881_s6 + $0x124] sm:$0xf] %v372_v9  ;;  %v374_v10 = vld [vmem:[%s9874_s5 + $0x4a0] sm:$0xf] }
  0x45   : > { %v376_v11 = vld [vmem:[%s9874_s5 + $0x4b0] sm:$0xf]  ;;  %v378_v12 = vld [vmem:[%s9874_s5 + $0x4c0] sm:$0xf]  ;;  %375 = vst [vmem:[%s9881_s6 + $0x128] sm:$0xf] %v374_v10 }
  0x46   : > { %377 = vst [vmem:[%s9881_s6 + $0x12c] sm:$0xf] %v376_v11  ;;  %379 = vst [vmem:[%s9881_s6 + $0x130] sm:$0xf] %v378_v12  ;;  %v380_v13 = vld [vmem:[%s9874_s5 + $0x4d0] sm:$0xf] }
  0x47   : > { %v382_v14 = vld [vmem:[%s9874_s5 + $0x4e0] sm:$0xf]  ;;  %v384_v15 = vld [vmem:[%s9874_s5 + $0x4f0] sm:$0xf]  ;;  %381 = vst [vmem:[%s9881_s6 + $0x134] sm:$0xf] %v380_v13 }
  0x48   : > { %383 = vst [vmem:[%s9881_s6 + $0x138] sm:$0xf] %v382_v14  ;;  %385 = vst [vmem:[%s9881_s6 + $0x13c] sm:$0xf] %v384_v15  ;;  %v386_v16 = vld [vmem:[%s9874_s5 + $0x500] sm:$0xf] }
  0x49   : > { %v388_v17 = vld [vmem:[%s9874_s5 + $0x510] sm:$0xf]  ;;  %v390_v18 = vld [vmem:[%s9874_s5 + $0x520] sm:$0xf]  ;;  %387 = vst [vmem:[%s9881_s6 + $0x140] sm:$0xf] %v386_v16 }
  0x4a   : > { %389 = vst [vmem:[%s9881_s6 + $0x144] sm:$0xf] %v388_v17  ;;  %391 = vst [vmem:[%s9881_s6 + $0x148] sm:$0xf] %v390_v18  ;;  %v392_v19 = vld [vmem:[%s9874_s5 + $0x530] sm:$0xf] }
  0x4b   : > { %v394_v20 = vld [vmem:[%s9874_s5 + $0x540] sm:$0xf]  ;;  %v396_v21 = vld [vmem:[%s9874_s5 + $0x550] sm:$0xf]  ;;  %393 = vst [vmem:[%s9881_s6 + $0x14c] sm:$0xf] %v392_v19 }
  0x4c   : > { %395 = vst [vmem:[%s9881_s6 + $0x150] sm:$0xf] %v394_v20  ;;  %397 = vst [vmem:[%s9881_s6 + $0x154] sm:$0xf] %v396_v21  ;;  %v398_v22 = vld [vmem:[%s9874_s5 + $0x560] sm:$0xf] }
  0x4d   : > { %v400_v23 = vld [vmem:[%s9874_s5 + $0x570] sm:$0xf]  ;;  %v402_v24 = vld [vmem:[%s9874_s5 + $0x580] sm:$0xf]  ;;  %399 = vst [vmem:[%s9881_s6 + $0x158] sm:$0xf] %v398_v22 }
  0x4e   : > { %401 = vst [vmem:[%s9881_s6 + $0x15c] sm:$0xf] %v400_v23  ;;  %403 = vst [vmem:[%s9881_s6 + $0x160] sm:$0xf] %v402_v24  ;;  %v404_v25 = vld [vmem:[%s9874_s5 + $0x590] sm:$0xf] }
  0x4f   : > { %v406_v26 = vld [vmem:[%s9874_s5 + $0x5a0] sm:$0xf]  ;;  %v408_v27 = vld [vmem:[%s9874_s5 + $0x5b0] sm:$0xf]  ;;  %405 = vst [vmem:[%s9881_s6 + $0x164] sm:$0xf] %v404_v25 }
  0x50   : > { %407 = vst [vmem:[%s9881_s6 + $0x168] sm:$0xf] %v406_v26  ;;  %409 = vst [vmem:[%s9881_s6 + $0x16c] sm:$0xf] %v408_v27  ;;  %v410_v28 = vld [vmem:[%s9874_s5 + $0x5c0] sm:$0xf] }
  0x51   : > { %v412_v29 = vld [vmem:[%s9874_s5 + $0x5d0] sm:$0xf]  ;;  %v414_v30 = vld [vmem:[%s9874_s5 + $0x5e0] sm:$0xf]  ;;  %411 = vst [vmem:[%s9881_s6 + $0x170] sm:$0xf] %v410_v28 }
  0x52   : > { %413 = vst [vmem:[%s9881_s6 + $0x174] sm:$0xf] %v412_v29  ;;  %415 = vst [vmem:[%s9881_s6 + $0x178] sm:$0xf] %v414_v30  ;;  %v416_v31 = vld [vmem:[%s9874_s5 + $0x5f0] sm:$0xf] }
  0x53   : > { %v418_v32 = vld [vmem:[%s9874_s5 + $0x600] sm:$0xf]  ;;  %v420_v33 = vld [vmem:[%s9874_s5 + $0x610] sm:$0xf]  ;;  %417 = vst [vmem:[%s9881_s6 + $0x17c] sm:$0xf] %v416_v31 }
  0x54   : > { %419 = vst [vmem:[%s9881_s6 + $0x180] sm:$0xf] %v418_v32  ;;  %421 = vst [vmem:[%s9881_s6 + $0x184] sm:$0xf] %v420_v33  ;;  %v422_v34 = vld [vmem:[%s9874_s5 + $0x620] sm:$0xf] }
  0x55   : > { %v424_v35 = vld [vmem:[%s9874_s5 + $0x630] sm:$0xf]  ;;  %v426_v36 = vld [vmem:[%s9874_s5 + $0x640] sm:$0xf]  ;;  %423 = vst [vmem:[%s9881_s6 + $0x188] sm:$0xf] %v422_v34 }
  0x56   : > { %425 = vst [vmem:[%s9881_s6 + $0x18c] sm:$0xf] %v424_v35  ;;  %427 = vst [vmem:[%s9881_s6 + $0x190] sm:$0xf] %v426_v36  ;;  %v428_v37 = vld [vmem:[%s9874_s5 + $0x650] sm:$0xf] }
  0x57   : > { %v430_v38 = vld [vmem:[%s9874_s5 + $0x660] sm:$0xf]  ;;  %v432_v39 = vld [vmem:[%s9874_s5 + $0x670] sm:$0xf]  ;;  %429 = vst [vmem:[%s9881_s6 + $0x194] sm:$0xf] %v428_v37 }
  0x58   : > { %431 = vst [vmem:[%s9881_s6 + $0x198] sm:$0xf] %v430_v38  ;;  %433 = vst [vmem:[%s9881_s6 + $0x19c] sm:$0xf] %v432_v39  ;;  %v434_v40 = vld [vmem:[%s9874_s5 + $0x680] sm:$0xf] }
  0x59   : > { %v436_v41 = vld [vmem:[%s9874_s5 + $0x690] sm:$0xf]  ;;  %v438_v42 = vld [vmem:[%s9874_s5 + $0x6a0] sm:$0xf]  ;;  %435 = vst [vmem:[%s9881_s6 + $0x1a0] sm:$0xf] %v434_v40 }
  0x5a   : > { %437 = vst [vmem:[%s9881_s6 + $0x1a4] sm:$0xf] %v436_v41  ;;  %439 = vst [vmem:[%s9881_s6 + $0x1a8] sm:$0xf] %v438_v42  ;;  %v440_v43 = vld [vmem:[%s9874_s5 + $0x6b0] sm:$0xf] }
  0x5b   : > { %v442_v44 = vld [vmem:[%s9874_s5 + $0x6c0] sm:$0xf]  ;;  %v444_v45 = vld [vmem:[%s9874_s5 + $0x6d0] sm:$0xf]  ;;  %441 = vst [vmem:[%s9881_s6 + $0x1ac] sm:$0xf] %v440_v43 }
  0x5c   : > { %443 = vst [vmem:[%s9881_s6 + $0x1b0] sm:$0xf] %v442_v44  ;;  %445 = vst [vmem:[%s9881_s6 + $0x1b4] sm:$0xf] %v444_v45  ;;  %v446_v46 = vld [vmem:[%s9874_s5 + $0x6e0] sm:$0xf] }
  0x5d   : > { %v448_v47 = vld [vmem:[%s9874_s5 + $0x6f0] sm:$0xf]  ;;  %v450_v48 = vld [vmem:[%s9874_s5 + $0x700] sm:$0xf]  ;;  %447 = vst [vmem:[%s9881_s6 + $0x1b8] sm:$0xf] %v446_v46 }
  0x5e   : > { %449 = vst [vmem:[%s9881_s6 + $0x1bc] sm:$0xf] %v448_v47  ;;  %451 = vst [vmem:[%s9881_s6 + $0x1c0] sm:$0xf] %v450_v48  ;;  %v452_v49 = vld [vmem:[%s9874_s5 + $0x710] sm:$0xf] }
  0x5f   : > { %v454_v50 = vld [vmem:[%s9874_s5 + $0x720] sm:$0xf]  ;;  %v456_v51 = vld [vmem:[%s9874_s5 + $0x730] sm:$0xf]  ;;  %453 = vst [vmem:[%s9881_s6 + $0x1c4] sm:$0xf] %v452_v49 }
  0x60   : > { %455 = vst [vmem:[%s9881_s6 + $0x1c8] sm:$0xf] %v454_v50  ;;  %457 = vst [vmem:[%s9881_s6 + $0x1cc] sm:$0xf] %v456_v51  ;;  %v458_v52 = vld [vmem:[%s9874_s5 + $0x740] sm:$0xf] }
  0x61   : > { %v460_v53 = vld [vmem:[%s9874_s5 + $0x750] sm:$0xf]  ;;  %v462_v54 = vld [vmem:[%s9874_s5 + $0x760] sm:$0xf]  ;;  %459 = vst [vmem:[%s9881_s6 + $0x1d0] sm:$0xf] %v458_v52 }
  0x62   : > { %461 = vst [vmem:[%s9881_s6 + $0x1d4] sm:$0xf] %v460_v53  ;;  %463 = vst [vmem:[%s9881_s6 + $0x1d8] sm:$0xf] %v462_v54  ;;  %v464_v55 = vld [vmem:[%s9874_s5 + $0x770] sm:$0xf] }
  0x63   : > { %v466_v56 = vld [vmem:[%s9874_s5 + $0x780] sm:$0xf]  ;;  %v468_v57 = vld [vmem:[%s9874_s5 + $0x790] sm:$0xf]  ;;  %465 = vst [vmem:[%s9881_s6 + $0x1dc] sm:$0xf] %v464_v55 }
  0x64   : > { %467 = vst [vmem:[%s9881_s6 + $0x1e0] sm:$0xf] %v466_v56  ;;  %469 = vst [vmem:[%s9881_s6 + $0x1e4] sm:$0xf] %v468_v57  ;;  %v470_v58 = vld [vmem:[%s9874_s5 + $0x7a0] sm:$0xf] }
  0x65   : > { %v472_v59 = vld [vmem:[%s9874_s5 + $0x7b0] sm:$0xf]  ;;  %v474_v60 = vld [vmem:[%s9874_s5 + $0x7c0] sm:$0xf]  ;;  %471 = vst [vmem:[%s9881_s6 + $0x1e8] sm:$0xf] %v470_v58 }
  0x66   : > { %473 = vst [vmem:[%s9881_s6 + $0x1ec] sm:$0xf] %v472_v59  ;;  %475 = vst [vmem:[%s9881_s6 + $0x1f0] sm:$0xf] %v474_v60  ;;  %v476_v61 = vld [vmem:[%s9874_s5 + $0x7d0] sm:$0xf] }
  0x67   : > { %v478_v62 = vld [vmem:[%s9874_s5 + $0x7e0] sm:$0xf]  ;;  %v480_v63 = vld [vmem:[%s9874_s5 + $0x7f0] sm:$0xf]  ;;  %477 = vst [vmem:[%s9881_s6 + $0x1f4] sm:$0xf] %v476_v61 }
  0x68   : > { %479 = vst [vmem:[%s9881_s6 + $0x1f8] sm:$0xf] %v478_v62  ;;  %481 = vst [vmem:[%s9881_s6 + $0x1fc] sm:$0xf] %v480_v63  ;;  %v482_v0 = vld [vmem:[%s9874_s5 + $0x800] sm:$0xf] }
  0x69   : > { %v484_v1 = vld [vmem:[%s9874_s5 + $0x810] sm:$0xf]  ;;  %v486_v2 = vld [vmem:[%s9874_s5 + $0x820] sm:$0xf]  ;;  %483 = vst [vmem:[%s9881_s6 + $0x200] sm:$0xf] %v482_v0 }
  0x6a   : > { %485 = vst [vmem:[%s9881_s6 + $0x204] sm:$0xf] %v484_v1  ;;  %487 = vst [vmem:[%s9881_s6 + $0x208] sm:$0xf] %v486_v2  ;;  %v488_v3 = vld [vmem:[%s9874_s5 + $0x830] sm:$0xf] }
  0x6b   : > { %v490_v4 = vld [vmem:[%s9874_s5 + $0x840] sm:$0xf]  ;;  %v492_v5 = vld [vmem:[%s9874_s5 + $0x850] sm:$0xf]  ;;  %489 = vst [vmem:[%s9881_s6 + $0x20c] sm:$0xf] %v488_v3 }
  0x6c   : > { %491 = vst [vmem:[%s9881_s6 + $0x210] sm:$0xf] %v490_v4  ;;  %493 = vst [vmem:[%s9881_s6 + $0x214] sm:$0xf] %v492_v5  ;;  %v494_v6 = vld [vmem:[%s9874_s5 + $0x860] sm:$0xf] }
  0x6d   : > { %v496_v7 = vld [vmem:[%s9874_s5 + $0x870] sm:$0xf]  ;;  %v498_v8 = vld [vmem:[%s9874_s5 + $0x880] sm:$0xf]  ;;  %495 = vst [vmem:[%s9881_s6 + $0x218] sm:$0xf] %v494_v6 }
  0x6e   : > { %497 = vst [vmem:[%s9881_s6 + $0x21c] sm:$0xf] %v496_v7  ;;  %499 = vst [vmem:[%s9881_s6 + $0x220] sm:$0xf] %v498_v8  ;;  %v500_v9 = vld [vmem:[%s9874_s5 + $0x890] sm:$0xf] }
  0x6f   : > { %v502_v10 = vld [vmem:[%s9874_s5 + $0x8a0] sm:$0xf]  ;;  %v504_v11 = vld [vmem:[%s9874_s5 + $0x8b0] sm:$0xf]  ;;  %501 = vst [vmem:[%s9881_s6 + $0x224] sm:$0xf] %v500_v9 }
  0x70   : > { %503 = vst [vmem:[%s9881_s6 + $0x228] sm:$0xf] %v502_v10  ;;  %505 = vst [vmem:[%s9881_s6 + $0x22c] sm:$0xf] %v504_v11  ;;  %v506_v12 = vld [vmem:[%s9874_s5 + $0x8c0] sm:$0xf] }
  0x71   : > { %v508_v13 = vld [vmem:[%s9874_s5 + $0x8d0] sm:$0xf]  ;;  %v510_v14 = vld [vmem:[%s9874_s5 + $0x8e0] sm:$0xf]  ;;  %507 = vst [vmem:[%s9881_s6 + $0x230] sm:$0xf] %v506_v12 }
  0x72   : > { %509 = vst [vmem:[%s9881_s6 + $0x234] sm:$0xf] %v508_v13  ;;  %511 = vst [vmem:[%s9881_s6 + $0x238] sm:$0xf] %v510_v14  ;;  %v512_v15 = vld [vmem:[%s9874_s5 + $0x8f0] sm:$0xf] }
  0x73   : > { %v514_v16 = vld [vmem:[%s9874_s5 + $0x900] sm:$0xf]  ;;  %v516_v17 = vld [vmem:[%s9874_s5 + $0x910] sm:$0xf]  ;;  %513 = vst [vmem:[%s9881_s6 + $0x23c] sm:$0xf] %v512_v15 }
  0x74   : > { %515 = vst [vmem:[%s9881_s6 + $0x240] sm:$0xf] %v514_v16  ;;  %517 = vst [vmem:[%s9881_s6 + $0x244] sm:$0xf] %v516_v17  ;;  %v518_v18 = vld [vmem:[%s9874_s5 + $0x920] sm:$0xf] }
  0x75   : > { %v520_v19 = vld [vmem:[%s9874_s5 + $0x930] sm:$0xf]  ;;  %v522_v20 = vld [vmem:[%s9874_s5 + $0x940] sm:$0xf]  ;;  %519 = vst [vmem:[%s9881_s6 + $0x248] sm:$0xf] %v518_v18 }
  0x76   : > { %521 = vst [vmem:[%s9881_s6 + $0x24c] sm:$0xf] %v520_v19  ;;  %523 = vst [vmem:[%s9881_s6 + $0x250] sm:$0xf] %v522_v20  ;;  %v524_v21 = vld [vmem:[%s9874_s5 + $0x950] sm:$0xf] }
  0x77   : > { %v526_v22 = vld [vmem:[%s9874_s5 + $0x960] sm:$0xf]  ;;  %v528_v23 = vld [vmem:[%s9874_s5 + $0x970] sm:$0xf]  ;;  %525 = vst [vmem:[%s9881_s6 + $0x254] sm:$0xf] %v524_v21 }
  0x78   : > { %527 = vst [vmem:[%s9881_s6 + $0x258] sm:$0xf] %v526_v22  ;;  %529 = vst [vmem:[%s9881_s6 + $0x25c] sm:$0xf] %v528_v23  ;;  %v530_v24 = vld [vmem:[%s9874_s5 + $0x980] sm:$0xf] }
  0x79   : > { %v532_v25 = vld [vmem:[%s9874_s5 + $0x990] sm:$0xf]  ;;  %v534_v26 = vld [vmem:[%s9874_s5 + $0x9a0] sm:$0xf]  ;;  %531 = vst [vmem:[%s9881_s6 + $0x260] sm:$0xf] %v530_v24 }
  0x7a   : > { %533 = vst [vmem:[%s9881_s6 + $0x264] sm:$0xf] %v532_v25  ;;  %535 = vst [vmem:[%s9881_s6 + $0x268] sm:$0xf] %v534_v26  ;;  %v536_v27 = vld [vmem:[%s9874_s5 + $0x9b0] sm:$0xf] }
  0x7b   : > { %v538_v28 = vld [vmem:[%s9874_s5 + $0x9c0] sm:$0xf]  ;;  %v540_v29 = vld [vmem:[%s9874_s5 + $0x9d0] sm:$0xf]  ;;  %537 = vst [vmem:[%s9881_s6 + $0x26c] sm:$0xf] %v536_v27 }
  0x7c   : > { %539 = vst [vmem:[%s9881_s6 + $0x270] sm:$0xf] %v538_v28  ;;  %541 = vst [vmem:[%s9881_s6 + $0x274] sm:$0xf] %v540_v29  ;;  %v542_v30 = vld [vmem:[%s9874_s5 + $0x9e0] sm:$0xf] }
  0x7d   : > { %v544_v31 = vld [vmem:[%s9874_s5 + $0x9f0] sm:$0xf]  ;;  %v546_v32 = vld [vmem:[%s9874_s5 + $0xa00] sm:$0xf]  ;;  %543 = vst [vmem:[%s9881_s6 + $0x278] sm:$0xf] %v542_v30 }
  0x7e   : > { %545 = vst [vmem:[%s9881_s6 + $0x27c] sm:$0xf] %v544_v31  ;;  %547 = vst [vmem:[%s9881_s6 + $0x280] sm:$0xf] %v546_v32  ;;  %v548_v33 = vld [vmem:[%s9874_s5 + $0xa10] sm:$0xf] }
  0x7f   : > { %v550_v34 = vld [vmem:[%s9874_s5 + $0xa20] sm:$0xf]  ;;  %v552_v35 = vld [vmem:[%s9874_s5 + $0xa30] sm:$0xf]  ;;  %549 = vst [vmem:[%s9881_s6 + $0x284] sm:$0xf] %v548_v33 }
  0x80   : > { %551 = vst [vmem:[%s9881_s6 + $0x288] sm:$0xf] %v550_v34  ;;  %553 = vst [vmem:[%s9881_s6 + $0x28c] sm:$0xf] %v552_v35  ;;  %v554_v36 = vld [vmem:[%s9874_s5 + $0xa40] sm:$0xf] }
  0x81   : > { %v556_v37 = vld [vmem:[%s9874_s5 + $0xa50] sm:$0xf]  ;;  %v558_v38 = vld [vmem:[%s9874_s5 + $0xa60] sm:$0xf]  ;;  %555 = vst [vmem:[%s9881_s6 + $0x290] sm:$0xf] %v554_v36 }
  0x82   : > { %557 = vst [vmem:[%s9881_s6 + $0x294] sm:$0xf] %v556_v37  ;;  %559 = vst [vmem:[%s9881_s6 + $0x298] sm:$0xf] %v558_v38  ;;  %v560_v39 = vld [vmem:[%s9874_s5 + $0xa70] sm:$0xf] }
  0x83   : > { %v562_v40 = vld [vmem:[%s9874_s5 + $0xa80] sm:$0xf]  ;;  %v564_v41 = vld [vmem:[%s9874_s5 + $0xa90] sm:$0xf]  ;;  %561 = vst [vmem:[%s9881_s6 + $0x29c] sm:$0xf] %v560_v39 }
  0x84   : > { %563 = vst [vmem:[%s9881_s6 + $0x2a0] sm:$0xf] %v562_v40  ;;  %565 = vst [vmem:[%s9881_s6 + $0x2a4] sm:$0xf] %v564_v41  ;;  %v566_v42 = vld [vmem:[%s9874_s5 + $0xaa0] sm:$0xf] }
  0x85   : > { %v568_v43 = vld [vmem:[%s9874_s5 + $0xab0] sm:$0xf]  ;;  %v570_v44 = vld [vmem:[%s9874_s5 + $0xac0] sm:$0xf]  ;;  %567 = vst [vmem:[%s9881_s6 + $0x2a8] sm:$0xf] %v566_v42 }
  0x86   : > { %569 = vst [vmem:[%s9881_s6 + $0x2ac] sm:$0xf] %v568_v43  ;;  %571 = vst [vmem:[%s9881_s6 + $0x2b0] sm:$0xf] %v570_v44  ;;  %v572_v45 = vld [vmem:[%s9874_s5 + $0xad0] sm:$0xf] }
  0x87   : > { %v574_v46 = vld [vmem:[%s9874_s5 + $0xae0] sm:$0xf]  ;;  %v576_v47 = vld [vmem:[%s9874_s5 + $0xaf0] sm:$0xf]  ;;  %573 = vst [vmem:[%s9881_s6 + $0x2b4] sm:$0xf] %v572_v45 }
  0x88   : > { %575 = vst [vmem:[%s9881_s6 + $0x2b8] sm:$0xf] %v574_v46  ;;  %577 = vst [vmem:[%s9881_s6 + $0x2bc] sm:$0xf] %v576_v47  ;;  %v578_v48 = vld [vmem:[%s9874_s5 + $0xb00] sm:$0xf] }
  0x89   : > { %v580_v49 = vld [vmem:[%s9874_s5 + $0xb10] sm:$0xf]  ;;  %v582_v50 = vld [vmem:[%s9874_s5 + $0xb20] sm:$0xf]  ;;  %579 = vst [vmem:[%s9881_s6 + $0x2c0] sm:$0xf] %v578_v48 }
  0x8a   : > { %581 = vst [vmem:[%s9881_s6 + $0x2c4] sm:$0xf] %v580_v49  ;;  %583 = vst [vmem:[%s9881_s6 + $0x2c8] sm:$0xf] %v582_v50  ;;  %v584_v51 = vld [vmem:[%s9874_s5 + $0xb30] sm:$0xf] }
  0x8b   : > { %v586_v52 = vld [vmem:[%s9874_s5 + $0xb40] sm:$0xf]  ;;  %v588_v53 = vld [vmem:[%s9874_s5 + $0xb50] sm:$0xf]  ;;  %585 = vst [vmem:[%s9881_s6 + $0x2cc] sm:$0xf] %v584_v51 }
  0x8c   : > { %587 = vst [vmem:[%s9881_s6 + $0x2d0] sm:$0xf] %v586_v52  ;;  %589 = vst [vmem:[%s9881_s6 + $0x2d4] sm:$0xf] %v588_v53  ;;  %v590_v54 = vld [vmem:[%s9874_s5 + $0xb60] sm:$0xf] }
  0x8d   : > { %v592_v55 = vld [vmem:[%s9874_s5 + $0xb70] sm:$0xf]  ;;  %v594_v56 = vld [vmem:[%s9874_s5 + $0xb80] sm:$0xf]  ;;  %591 = vst [vmem:[%s9881_s6 + $0x2d8] sm:$0xf] %v590_v54 }
  0x8e   : > { %593 = vst [vmem:[%s9881_s6 + $0x2dc] sm:$0xf] %v592_v55  ;;  %595 = vst [vmem:[%s9881_s6 + $0x2e0] sm:$0xf] %v594_v56  ;;  %v596_v57 = vld [vmem:[%s9874_s5 + $0xb90] sm:$0xf] }
  0x8f   : > { %v598_v58 = vld [vmem:[%s9874_s5 + $0xba0] sm:$0xf]  ;;  %v600_v59 = vld [vmem:[%s9874_s5 + $0xbb0] sm:$0xf]  ;;  %597 = vst [vmem:[%s9881_s6 + $0x2e4] sm:$0xf] %v596_v57 }
  0x90   : > { %599 = vst [vmem:[%s9881_s6 + $0x2e8] sm:$0xf] %v598_v58  ;;  %601 = vst [vmem:[%s9881_s6 + $0x2ec] sm:$0xf] %v600_v59  ;;  %v602_v60 = vld [vmem:[%s9874_s5 + $0xbc0] sm:$0xf] }
  0x91   : > { %v604_v61 = vld [vmem:[%s9874_s5 + $0xbd0] sm:$0xf]  ;;  %v606_v62 = vld [vmem:[%s9874_s5 + $0xbe0] sm:$0xf]  ;;  %603 = vst [vmem:[%s9881_s6 + $0x2f0] sm:$0xf] %v602_v60 }
  0x92   : > { %605 = vst [vmem:[%s9881_s6 + $0x2f4] sm:$0xf] %v604_v61  ;;  %607 = vst [vmem:[%s9881_s6 + $0x2f8] sm:$0xf] %v606_v62  ;;  %v608_v63 = vld [vmem:[%s9874_s5 + $0xbf0] sm:$0xf] }
  0x93   : > { %v610_v0 = vld [vmem:[%s9874_s5 + $0xc00] sm:$0xf]  ;;  %v612_v1 = vld [vmem:[%s9874_s5 + $0xc10] sm:$0xf]  ;;  %609 = vst [vmem:[%s9881_s6 + $0x2fc] sm:$0xf] %v608_v63 }
  0x94   : > { %611 = vst [vmem:[%s9881_s6 + $0x300] sm:$0xf] %v610_v0  ;;  %613 = vst [vmem:[%s9881_s6 + $0x304] sm:$0xf] %v612_v1  ;;  %v614_v2 = vld [vmem:[%s9874_s5 + $0xc20] sm:$0xf] }
  0x95   : > { %v616_v3 = vld [vmem:[%s9874_s5 + $0xc30] sm:$0xf]  ;;  %v618_v4 = vld [vmem:[%s9874_s5 + $0xc40] sm:$0xf]  ;;  %615 = vst [vmem:[%s9881_s6 + $0x308] sm:$0xf] %v614_v2 }
  0x96   : > { %617 = vst [vmem:[%s9881_s6 + $0x30c] sm:$0xf] %v616_v3  ;;  %619 = vst [vmem:[%s9881_s6 + $0x310] sm:$0xf] %v618_v4  ;;  %v620_v5 = vld [vmem:[%s9874_s5 + $0xc50] sm:$0xf] }
  0x97   : > { %v622_v6 = vld [vmem:[%s9874_s5 + $0xc60] sm:$0xf]  ;;  %v624_v7 = vld [vmem:[%s9874_s5 + $0xc70] sm:$0xf]  ;;  %621 = vst [vmem:[%s9881_s6 + $0x314] sm:$0xf] %v620_v5 }
  0x98   : > { %623 = vst [vmem:[%s9881_s6 + $0x318] sm:$0xf] %v622_v6  ;;  %625 = vst [vmem:[%s9881_s6 + $0x31c] sm:$0xf] %v624_v7  ;;  %v626_v8 = vld [vmem:[%s9874_s5 + $0xc80] sm:$0xf] }
  0x99   : > { %v628_v9 = vld [vmem:[%s9874_s5 + $0xc90] sm:$0xf]  ;;  %v630_v10 = vld [vmem:[%s9874_s5 + $0xca0] sm:$0xf]  ;;  %627 = vst [vmem:[%s9881_s6 + $0x320] sm:$0xf] %v626_v8 }
  0x9a   : > { %629 = vst [vmem:[%s9881_s6 + $0x324] sm:$0xf] %v628_v9  ;;  %631 = vst [vmem:[%s9881_s6 + $0x328] sm:$0xf] %v630_v10  ;;  %v632_v11 = vld [vmem:[%s9874_s5 + $0xcb0] sm:$0xf] }
  0x9b   : > { %v634_v12 = vld [vmem:[%s9874_s5 + $0xcc0] sm:$0xf]  ;;  %v636_v13 = vld [vmem:[%s9874_s5 + $0xcd0] sm:$0xf]  ;;  %633 = vst [vmem:[%s9881_s6 + $0x32c] sm:$0xf] %v632_v11 }
  0x9c   : > { %635 = vst [vmem:[%s9881_s6 + $0x330] sm:$0xf] %v634_v12  ;;  %637 = vst [vmem:[%s9881_s6 + $0x334] sm:$0xf] %v636_v13  ;;  %v638_v14 = vld [vmem:[%s9874_s5 + $0xce0] sm:$0xf] }
  0x9d   : > { %v640_v15 = vld [vmem:[%s9874_s5 + $0xcf0] sm:$0xf]  ;;  %v642_v16 = vld [vmem:[%s9874_s5 + $0xd00] sm:$0xf]  ;;  %639 = vst [vmem:[%s9881_s6 + $0x338] sm:$0xf] %v638_v14 }
  0x9e   : > { %641 = vst [vmem:[%s9881_s6 + $0x33c] sm:$0xf] %v640_v15  ;;  %643 = vst [vmem:[%s9881_s6 + $0x340] sm:$0xf] %v642_v16  ;;  %v644_v17 = vld [vmem:[%s9874_s5 + $0xd10] sm:$0xf] }
  0x9f   : > { %v646_v18 = vld [vmem:[%s9874_s5 + $0xd20] sm:$0xf]  ;;  %v648_v19 = vld [vmem:[%s9874_s5 + $0xd30] sm:$0xf]  ;;  %645 = vst [vmem:[%s9881_s6 + $0x344] sm:$0xf] %v644_v17 }
  0xa0   : > { %647 = vst [vmem:[%s9881_s6 + $0x348] sm:$0xf] %v646_v18  ;;  %649 = vst [vmem:[%s9881_s6 + $0x34c] sm:$0xf] %v648_v19  ;;  %v650_v20 = vld [vmem:[%s9874_s5 + $0xd40] sm:$0xf] }
  0xa1   : > { %v652_v21 = vld [vmem:[%s9874_s5 + $0xd50] sm:$0xf]  ;;  %v654_v22 = vld [vmem:[%s9874_s5 + $0xd60] sm:$0xf]  ;;  %651 = vst [vmem:[%s9881_s6 + $0x350] sm:$0xf] %v650_v20 }
  0xa2   : > { %653 = vst [vmem:[%s9881_s6 + $0x354] sm:$0xf] %v652_v21  ;;  %655 = vst [vmem:[%s9881_s6 + $0x358] sm:$0xf] %v654_v22  ;;  %v656_v23 = vld [vmem:[%s9874_s5 + $0xd70] sm:$0xf] }
  0xa3   : > { %v658_v24 = vld [vmem:[%s9874_s5 + $0xd80] sm:$0xf]  ;;  %v660_v25 = vld [vmem:[%s9874_s5 + $0xd90] sm:$0xf]  ;;  %657 = vst [vmem:[%s9881_s6 + $0x35c] sm:$0xf] %v656_v23 }
  0xa4   : > { %659 = vst [vmem:[%s9881_s6 + $0x360] sm:$0xf] %v658_v24  ;;  %661 = vst [vmem:[%s9881_s6 + $0x364] sm:$0xf] %v660_v25  ;;  %v662_v26 = vld [vmem:[%s9874_s5 + $0xda0] sm:$0xf] }
  0xa5   : > { %v664_v27 = vld [vmem:[%s9874_s5 + $0xdb0] sm:$0xf]  ;;  %v666_v28 = vld [vmem:[%s9874_s5 + $0xdc0] sm:$0xf]  ;;  %663 = vst [vmem:[%s9881_s6 + $0x368] sm:$0xf] %v662_v26 }
  0xa6   : > { %665 = vst [vmem:[%s9881_s6 + $0x36c] sm:$0xf] %v664_v27  ;;  %667 = vst [vmem:[%s9881_s6 + $0x370] sm:$0xf] %v666_v28  ;;  %v668_v29 = vld [vmem:[%s9874_s5 + $0xdd0] sm:$0xf] }
  0xa7   : > { %v670_v30 = vld [vmem:[%s9874_s5 + $0xde0] sm:$0xf]  ;;  %v672_v31 = vld [vmem:[%s9874_s5 + $0xdf0] sm:$0xf]  ;;  %669 = vst [vmem:[%s9881_s6 + $0x374] sm:$0xf] %v668_v29 }
  0xa8   : > { %671 = vst [vmem:[%s9881_s6 + $0x378] sm:$0xf] %v670_v30  ;;  %673 = vst [vmem:[%s9881_s6 + $0x37c] sm:$0xf] %v672_v31  ;;  %v674_v32 = vld [vmem:[%s9874_s5 + $0xe00] sm:$0xf] }
  0xa9   : > { %v676_v33 = vld [vmem:[%s9874_s5 + $0xe10] sm:$0xf]  ;;  %v678_v34 = vld [vmem:[%s9874_s5 + $0xe20] sm:$0xf]  ;;  %675 = vst [vmem:[%s9881_s6 + $0x380] sm:$0xf] %v674_v32 }
  0xaa   : > { %677 = vst [vmem:[%s9881_s6 + $0x384] sm:$0xf] %v676_v33  ;;  %679 = vst [vmem:[%s9881_s6 + $0x388] sm:$0xf] %v678_v34  ;;  %v680_v35 = vld [vmem:[%s9874_s5 + $0xe30] sm:$0xf] }
  0xab   : > { %v682_v36 = vld [vmem:[%s9874_s5 + $0xe40] sm:$0xf]  ;;  %v684_v37 = vld [vmem:[%s9874_s5 + $0xe50] sm:$0xf]  ;;  %681 = vst [vmem:[%s9881_s6 + $0x38c] sm:$0xf] %v680_v35 }
  0xac   : > { %683 = vst [vmem:[%s9881_s6 + $0x390] sm:$0xf] %v682_v36  ;;  %685 = vst [vmem:[%s9881_s6 + $0x394] sm:$0xf] %v684_v37  ;;  %v686_v38 = vld [vmem:[%s9874_s5 + $0xe60] sm:$0xf] }
  0xad   : > { %v688_v39 = vld [vmem:[%s9874_s5 + $0xe70] sm:$0xf]  ;;  %v690_v40 = vld [vmem:[%s9874_s5 + $0xe80] sm:$0xf]  ;;  %687 = vst [vmem:[%s9881_s6 + $0x398] sm:$0xf] %v686_v38 }
  0xae   : > { %689 = vst [vmem:[%s9881_s6 + $0x39c] sm:$0xf] %v688_v39  ;;  %691 = vst [vmem:[%s9881_s6 + $0x3a0] sm:$0xf] %v690_v40  ;;  %v692_v41 = vld [vmem:[%s9874_s5 + $0xe90] sm:$0xf] }
  0xaf   : > { %v694_v42 = vld [vmem:[%s9874_s5 + $0xea0] sm:$0xf]  ;;  %v696_v43 = vld [vmem:[%s9874_s5 + $0xeb0] sm:$0xf]  ;;  %693 = vst [vmem:[%s9881_s6 + $0x3a4] sm:$0xf] %v692_v41 }
  0xb0   : > { %695 = vst [vmem:[%s9881_s6 + $0x3a8] sm:$0xf] %v694_v42  ;;  %697 = vst [vmem:[%s9881_s6 + $0x3ac] sm:$0xf] %v696_v43  ;;  %v698_v44 = vld [vmem:[%s9874_s5 + $0xec0] sm:$0xf] }
  0xb1   : > { %v700_v45 = vld [vmem:[%s9874_s5 + $0xed0] sm:$0xf]  ;;  %v702_v46 = vld [vmem:[%s9874_s5 + $0xee0] sm:$0xf]  ;;  %699 = vst [vmem:[%s9881_s6 + $0x3b0] sm:$0xf] %v698_v44 }
  0xb2   : > { %701 = vst [vmem:[%s9881_s6 + $0x3b4] sm:$0xf] %v700_v45  ;;  %703 = vst [vmem:[%s9881_s6 + $0x3b8] sm:$0xf] %v702_v46  ;;  %v704_v47 = vld [vmem:[%s9874_s5 + $0xef0] sm:$0xf] }
  0xb3   : > { %v706_v48 = vld [vmem:[%s9874_s5 + $0xf00] sm:$0xf]  ;;  %v708_v49 = vld [vmem:[%s9874_s5 + $0xf10] sm:$0xf]  ;;  %705 = vst [vmem:[%s9881_s6 + $0x3bc] sm:$0xf] %v704_v47 }
  0xb4   : > { %707 = vst [vmem:[%s9881_s6 + $0x3c0] sm:$0xf] %v706_v48  ;;  %709 = vst [vmem:[%s9881_s6 + $0x3c4] sm:$0xf] %v708_v49  ;;  %v710_v50 = vld [vmem:[%s9874_s5 + $0xf20] sm:$0xf] }
  0xb5   : > { %v712_v51 = vld [vmem:[%s9874_s5 + $0xf30] sm:$0xf]  ;;  %v714_v52 = vld [vmem:[%s9874_s5 + $0xf40] sm:$0xf]  ;;  %711 = vst [vmem:[%s9881_s6 + $0x3c8] sm:$0xf] %v710_v50 }
  0xb6   : > { %713 = vst [vmem:[%s9881_s6 + $0x3cc] sm:$0xf] %v712_v51  ;;  %715 = vst [vmem:[%s9881_s6 + $0x3d0] sm:$0xf] %v714_v52  ;;  %v716_v53 = vld [vmem:[%s9874_s5 + $0xf50] sm:$0xf] }
  0xb7   : > { %v718_v54 = vld [vmem:[%s9874_s5 + $0xf60] sm:$0xf]  ;;  %v720_v55 = vld [vmem:[%s9874_s5 + $0xf70] sm:$0xf]  ;;  %717 = vst [vmem:[%s9881_s6 + $0x3d4] sm:$0xf] %v716_v53 }
  0xb8   : > { %719 = vst [vmem:[%s9881_s6 + $0x3d8] sm:$0xf] %v718_v54  ;;  %721 = vst [vmem:[%s9881_s6 + $0x3dc] sm:$0xf] %v720_v55  ;;  %v722_v56 = vld [vmem:[%s9874_s5 + $0xf80] sm:$0xf] }
  0xb9   : > { %v724_v57 = vld [vmem:[%s9874_s5 + $0xf90] sm:$0xf]  ;;  %v726_v58 = vld [vmem:[%s9874_s5 + $0xfa0] sm:$0xf]  ;;  %723 = vst [vmem:[%s9881_s6 + $0x3e0] sm:$0xf] %v722_v56 }
  0xba   : > { %725 = vst [vmem:[%s9881_s6 + $0x3e4] sm:$0xf] %v724_v57  ;;  %727 = vst [vmem:[%s9881_s6 + $0x3e8] sm:$0xf] %v726_v58  ;;  %v728_v59 = vld [vmem:[%s9874_s5 + $0xfb0] sm:$0xf] }
  0xbb   : > { %v730_v60 = vld [vmem:[%s9874_s5 + $0xfc0] sm:$0xf]  ;;  %v732_v61 = vld [vmem:[%s9874_s5 + $0xfd0] sm:$0xf]  ;;  %729 = vst [vmem:[%s9881_s6 + $0x3ec] sm:$0xf] %v728_v59 }
  0xbc   : > { %731 = vst [vmem:[%s9881_s6 + $0x3f0] sm:$0xf] %v730_v60  ;;  %733 = vst [vmem:[%s9881_s6 + $0x3f4] sm:$0xf] %v732_v61  ;;  %v734_v62 = vld [vmem:[%s9874_s5 + $0xfe0] sm:$0xf] }
  0xbd   : > { %v736_v63 = vld [vmem:[%s9874_s5 + $0xff0] sm:$0xf]  ;;  %v738_v0 = vld [vmem:[%s9874_s5 + $0x1000] sm:$0xf]  ;;  %735 = vst [vmem:[%s9881_s6 + $0x3f8] sm:$0xf] %v734_v62 }
  0xbe   : > { %737 = vst [vmem:[%s9881_s6 + $0x3fc] sm:$0xf] %v736_v63  ;;  %739 = vst [vmem:[%s9881_s6 + $0x400] sm:$0xf] %v738_v0  ;;  %v740_v1 = vld [vmem:[%s9874_s5 + $0x1010] sm:$0xf] }
  0xbf   : > { %v742_v2 = vld [vmem:[%s9874_s5 + $0x1020] sm:$0xf]  ;;  %v744_v3 = vld [vmem:[%s9874_s5 + $0x1030] sm:$0xf]  ;;  %741 = vst [vmem:[%s9881_s6 + $0x404] sm:$0xf] %v740_v1 }
  0xc0   : > { %743 = vst [vmem:[%s9881_s6 + $0x408] sm:$0xf] %v742_v2  ;;  %745 = vst [vmem:[%s9881_s6 + $0x40c] sm:$0xf] %v744_v3  ;;  %v746_v4 = vld [vmem:[%s9874_s5 + $0x1040] sm:$0xf] }
  0xc1   : > { %v748_v5 = vld [vmem:[%s9874_s5 + $0x1050] sm:$0xf]  ;;  %v750_v6 = vld [vmem:[%s9874_s5 + $0x1060] sm:$0xf]  ;;  %747 = vst [vmem:[%s9881_s6 + $0x410] sm:$0xf] %v746_v4 }
  0xc2   : > { %749 = vst [vmem:[%s9881_s6 + $0x414] sm:$0xf] %v748_v5  ;;  %751 = vst [vmem:[%s9881_s6 + $0x418] sm:$0xf] %v750_v6  ;;  %v752_v7 = vld [vmem:[%s9874_s5 + $0x1070] sm:$0xf] }
  0xc3   : > { %v754_v8 = vld [vmem:[%s9874_s5 + $0x1080] sm:$0xf]  ;;  %v756_v9 = vld [vmem:[%s9874_s5 + $0x1090] sm:$0xf]  ;;  %753 = vst [vmem:[%s9881_s6 + $0x41c] sm:$0xf] %v752_v7 }
  0xc4   : > { %755 = vst [vmem:[%s9881_s6 + $0x420] sm:$0xf] %v754_v8  ;;  %757 = vst [vmem:[%s9881_s6 + $0x424] sm:$0xf] %v756_v9  ;;  %v758_v10 = vld [vmem:[%s9874_s5 + $0x10a0] sm:$0xf] }
  0xc5   : > { %v760_v11 = vld [vmem:[%s9874_s5 + $0x10b0] sm:$0xf]  ;;  %v762_v12 = vld [vmem:[%s9874_s5 + $0x10c0] sm:$0xf]  ;;  %759 = vst [vmem:[%s9881_s6 + $0x428] sm:$0xf] %v758_v10 }
  0xc6   : > { %761 = vst [vmem:[%s9881_s6 + $0x42c] sm:$0xf] %v760_v11  ;;  %763 = vst [vmem:[%s9881_s6 + $0x430] sm:$0xf] %v762_v12  ;;  %v764_v13 = vld [vmem:[%s9874_s5 + $0x10d0] sm:$0xf] }
  0xc7   : > { %v766_v14 = vld [vmem:[%s9874_s5 + $0x10e0] sm:$0xf]  ;;  %v768_v15 = vld [vmem:[%s9874_s5 + $0x10f0] sm:$0xf]  ;;  %765 = vst [vmem:[%s9881_s6 + $0x434] sm:$0xf] %v764_v13 }
  0xc8   : > { %767 = vst [vmem:[%s9881_s6 + $0x438] sm:$0xf] %v766_v14  ;;  %769 = vst [vmem:[%s9881_s6 + $0x43c] sm:$0xf] %v768_v15  ;;  %v770_v16 = vld [vmem:[%s9874_s5 + $0x1100] sm:$0xf] }
  0xc9   : > { %v772_v17 = vld [vmem:[%s9874_s5 + $0x1110] sm:$0xf]  ;;  %v774_v18 = vld [vmem:[%s9874_s5 + $0x1120] sm:$0xf]  ;;  %771 = vst [vmem:[%s9881_s6 + $0x440] sm:$0xf] %v770_v16 }
  0xca   : > { %773 = vst [vmem:[%s9881_s6 + $0x444] sm:$0xf] %v772_v17  ;;  %775 = vst [vmem:[%s9881_s6 + $0x448] sm:$0xf] %v774_v18  ;;  %v776_v19 = vld [vmem:[%s9874_s5 + $0x1130] sm:$0xf] }
  0xcb   : > { %v778_v20 = vld [vmem:[%s9874_s5 + $0x1140] sm:$0xf]  ;;  %v780_v21 = vld [vmem:[%s9874_s5 + $0x1150] sm:$0xf]  ;;  %777 = vst [vmem:[%s9881_s6 + $0x44c] sm:$0xf] %v776_v19 }
  0xcc   : > { %779 = vst [vmem:[%s9881_s6 + $0x450] sm:$0xf] %v778_v20  ;;  %781 = vst [vmem:[%s9881_s6 + $0x454] sm:$0xf] %v780_v21  ;;  %v782_v22 = vld [vmem:[%s9874_s5 + $0x1160] sm:$0xf] }
  0xcd   : > { %v784_v23 = vld [vmem:[%s9874_s5 + $0x1170] sm:$0xf]  ;;  %v786_v24 = vld [vmem:[%s9874_s5 + $0x1180] sm:$0xf]  ;;  %783 = vst [vmem:[%s9881_s6 + $0x458] sm:$0xf] %v782_v22 }
  0xce   : > { %785 = vst [vmem:[%s9881_s6 + $0x45c] sm:$0xf] %v784_v23  ;;  %787 = vst [vmem:[%s9881_s6 + $0x460] sm:$0xf] %v786_v24  ;;  %v788_v25 = vld [vmem:[%s9874_s5 + $0x1190] sm:$0xf] }
  0xcf   : > { %v790_v26 = vld [vmem:[%s9874_s5 + $0x11a0] sm:$0xf]  ;;  %v792_v27 = vld [vmem:[%s9874_s5 + $0x11b0] sm:$0xf]  ;;  %789 = vst [vmem:[%s9881_s6 + $0x464] sm:$0xf] %v788_v25 }
  0xd0   : > { %791 = vst [vmem:[%s9881_s6 + $0x468] sm:$0xf] %v790_v26  ;;  %793 = vst [vmem:[%s9881_s6 + $0x46c] sm:$0xf] %v792_v27  ;;  %v794_v28 = vld [vmem:[%s9874_s5 + $0x11c0] sm:$0xf] }
  0xd1   : > { %v796_v29 = vld [vmem:[%s9874_s5 + $0x11d0] sm:$0xf]  ;;  %v798_v30 = vld [vmem:[%s9874_s5 + $0x11e0] sm:$0xf]  ;;  %795 = vst [vmem:[%s9881_s6 + $0x470] sm:$0xf] %v794_v28 }
  0xd2   : > { %797 = vst [vmem:[%s9881_s6 + $0x474] sm:$0xf] %v796_v29  ;;  %799 = vst [vmem:[%s9881_s6 + $0x478] sm:$0xf] %v798_v30  ;;  %v800_v31 = vld [vmem:[%s9874_s5 + $0x11f0] sm:$0xf] }
  0xd3   : > { %v802_v32 = vld [vmem:[%s9874_s5 + $0x1200] sm:$0xf]  ;;  %v804_v33 = vld [vmem:[%s9874_s5 + $0x1210] sm:$0xf]  ;;  %801 = vst [vmem:[%s9881_s6 + $0x47c] sm:$0xf] %v800_v31 }
  0xd4   : > { %803 = vst [vmem:[%s9881_s6 + $0x480] sm:$0xf] %v802_v32  ;;  %805 = vst [vmem:[%s9881_s6 + $0x484] sm:$0xf] %v804_v33  ;;  %v806_v34 = vld [vmem:[%s9874_s5 + $0x1220] sm:$0xf] }
  0xd5   : > { %v808_v35 = vld [vmem:[%s9874_s5 + $0x1230] sm:$0xf]  ;;  %v810_v36 = vld [vmem:[%s9874_s5 + $0x1240] sm:$0xf]  ;;  %807 = vst [vmem:[%s9881_s6 + $0x488] sm:$0xf] %v806_v34 }
  0xd6   : > { %809 = vst [vmem:[%s9881_s6 + $0x48c] sm:$0xf] %v808_v35  ;;  %811 = vst [vmem:[%s9881_s6 + $0x490] sm:$0xf] %v810_v36  ;;  %v812_v37 = vld [vmem:[%s9874_s5 + $0x1250] sm:$0xf] }
  0xd7   : > { %v814_v38 = vld [vmem:[%s9874_s5 + $0x1260] sm:$0xf]  ;;  %v816_v39 = vld [vmem:[%s9874_s5 + $0x1270] sm:$0xf]  ;;  %813 = vst [vmem:[%s9881_s6 + $0x494] sm:$0xf] %v812_v37 }
  0xd8   : > { %815 = vst [vmem:[%s9881_s6 + $0x498] sm:$0xf] %v814_v38  ;;  %817 = vst [vmem:[%s9881_s6 + $0x49c] sm:$0xf] %v816_v39  ;;  %v818_v40 = vld [vmem:[%s9874_s5 + $0x1280] sm:$0xf] }
  0xd9   : > { %v820_v41 = vld [vmem:[%s9874_s5 + $0x1290] sm:$0xf]  ;;  %v822_v42 = vld [vmem:[%s9874_s5 + $0x12a0] sm:$0xf]  ;;  %819 = vst [vmem:[%s9881_s6 + $0x4a0] sm:$0xf] %v818_v40 }
  0xda   : > { %821 = vst [vmem:[%s9881_s6 + $0x4a4] sm:$0xf] %v820_v41  ;;  %823 = vst [vmem:[%s9881_s6 + $0x4a8] sm:$0xf] %v822_v42  ;;  %v824_v43 = vld [vmem:[%s9874_s5 + $0x12b0] sm:$0xf] }
  0xdb   : > { %v826_v44 = vld [vmem:[%s9874_s5 + $0x12c0] sm:$0xf]  ;;  %v828_v45 = vld [vmem:[%s9874_s5 + $0x12d0] sm:$0xf]  ;;  %825 = vst [vmem:[%s9881_s6 + $0x4ac] sm:$0xf] %v824_v43 }
  0xdc   : > { %827 = vst [vmem:[%s9881_s6 + $0x4b0] sm:$0xf] %v826_v44  ;;  %829 = vst [vmem:[%s9881_s6 + $0x4b4] sm:$0xf] %v828_v45  ;;  %v830_v46 = vld [vmem:[%s9874_s5 + $0x12e0] sm:$0xf] }
  0xdd   : > { %v832_v47 = vld [vmem:[%s9874_s5 + $0x12f0] sm:$0xf]  ;;  %v834_v48 = vld [vmem:[%s9874_s5 + $0x1300] sm:$0xf]  ;;  %831 = vst [vmem:[%s9881_s6 + $0x4b8] sm:$0xf] %v830_v46 }
  0xde   : > { %833 = vst [vmem:[%s9881_s6 + $0x4bc] sm:$0xf] %v832_v47  ;;  %835 = vst [vmem:[%s9881_s6 + $0x4c0] sm:$0xf] %v834_v48  ;;  %v836_v49 = vld [vmem:[%s9874_s5 + $0x1310] sm:$0xf] }
  0xdf   : > { %v838_v50 = vld [vmem:[%s9874_s5 + $0x1320] sm:$0xf]  ;;  %v840_v51 = vld [vmem:[%s9874_s5 + $0x1330] sm:$0xf]  ;;  %837 = vst [vmem:[%s9881_s6 + $0x4c4] sm:$0xf] %v836_v49 }
  0xe0   : > { %839 = vst [vmem:[%s9881_s6 + $0x4c8] sm:$0xf] %v838_v50  ;;  %841 = vst [vmem:[%s9881_s6 + $0x4cc] sm:$0xf] %v840_v51  ;;  %v842_v52 = vld [vmem:[%s9874_s5 + $0x1340] sm:$0xf] }
  0xe1   : > { %v844_v53 = vld [vmem:[%s9874_s5 + $0x1350] sm:$0xf]  ;;  %v846_v54 = vld [vmem:[%s9874_s5 + $0x1360] sm:$0xf]  ;;  %843 = vst [vmem:[%s9881_s6 + $0x4d0] sm:$0xf] %v842_v52 }
  0xe2   : > { %845 = vst [vmem:[%s9881_s6 + $0x4d4] sm:$0xf] %v844_v53  ;;  %847 = vst [vmem:[%s9881_s6 + $0x4d8] sm:$0xf] %v846_v54  ;;  %v848_v55 = vld [vmem:[%s9874_s5 + $0x1370] sm:$0xf] }
  0xe3   : > { %v850_v56 = vld [vmem:[%s9874_s5 + $0x1380] sm:$0xf]  ;;  %v852_v57 = vld [vmem:[%s9874_s5 + $0x1390] sm:$0xf]  ;;  %849 = vst [vmem:[%s9881_s6 + $0x4dc] sm:$0xf] %v848_v55 }
  0xe4   : > { %851 = vst [vmem:[%s9881_s6 + $0x4e0] sm:$0xf] %v850_v56  ;;  %853 = vst [vmem:[%s9881_s6 + $0x4e4] sm:$0xf] %v852_v57  ;;  %v854_v58 = vld [vmem:[%s9874_s5 + $0x13a0] sm:$0xf] }
  0xe5   : > { %v856_v59 = vld [vmem:[%s9874_s5 + $0x13b0] sm:$0xf]  ;;  %v858_v60 = vld [vmem:[%s9874_s5 + $0x13c0] sm:$0xf]  ;;  %855 = vst [vmem:[%s9881_s6 + $0x4e8] sm:$0xf] %v854_v58 }
  0xe6   : > { %857 = vst [vmem:[%s9881_s6 + $0x4ec] sm:$0xf] %v856_v59  ;;  %859 = vst [vmem:[%s9881_s6 + $0x4f0] sm:$0xf] %v858_v60  ;;  %v860_v61 = vld [vmem:[%s9874_s5 + $0x13d0] sm:$0xf] }
  0xe7   : > { %v862_v62 = vld [vmem:[%s9874_s5 + $0x13e0] sm:$0xf]  ;;  %v864_v63 = vld [vmem:[%s9874_s5 + $0x13f0] sm:$0xf]  ;;  %861 = vst [vmem:[%s9881_s6 + $0x4f4] sm:$0xf] %v860_v61 }
  0xe8   : > { %863 = vst [vmem:[%s9881_s6 + $0x4f8] sm:$0xf] %v862_v62  ;;  %865 = vst [vmem:[%s9881_s6 + $0x4fc] sm:$0xf] %v864_v63  ;;  %v866_v0 = vld [vmem:[%s9874_s5 + $0x1400] sm:$0xf] }
  0xe9   : > { %v868_v1 = vld [vmem:[%s9874_s5 + $0x1410] sm:$0xf]  ;;  %v870_v2 = vld [vmem:[%s9874_s5 + $0x1420] sm:$0xf]  ;;  %867 = vst [vmem:[%s9881_s6 + $0x500] sm:$0xf] %v866_v0 }
  0xea   : > { %869 = vst [vmem:[%s9881_s6 + $0x504] sm:$0xf] %v868_v1  ;;  %871 = vst [vmem:[%s9881_s6 + $0x508] sm:$0xf] %v870_v2  ;;  %v872_v3 = vld [vmem:[%s9874_s5 + $0x1430] sm:$0xf] }
  0xeb   : > { %v874_v4 = vld [vmem:[%s9874_s5 + $0x1440] sm:$0xf]  ;;  %v876_v5 = vld [vmem:[%s9874_s5 + $0x1450] sm:$0xf]  ;;  %873 = vst [vmem:[%s9881_s6 + $0x50c] sm:$0xf] %v872_v3 }
  0xec   : > { %875 = vst [vmem:[%s9881_s6 + $0x510] sm:$0xf] %v874_v4  ;;  %877 = vst [vmem:[%s9881_s6 + $0x514] sm:$0xf] %v876_v5  ;;  %v878_v6 = vld [vmem:[%s9874_s5 + $0x1460] sm:$0xf] }
  0xed   : > { %v880_v7 = vld [vmem:[%s9874_s5 + $0x1470] sm:$0xf]  ;;  %v882_v8 = vld [vmem:[%s9874_s5 + $0x1480] sm:$0xf]  ;;  %879 = vst [vmem:[%s9881_s6 + $0x518] sm:$0xf] %v878_v6 }
  0xee   : > { %881 = vst [vmem:[%s9881_s6 + $0x51c] sm:$0xf] %v880_v7  ;;  %883 = vst [vmem:[%s9881_s6 + $0x520] sm:$0xf] %v882_v8  ;;  %v884_v9 = vld [vmem:[%s9874_s5 + $0x1490] sm:$0xf] }
  0xef   : > { %v886_v10 = vld [vmem:[%s9874_s5 + $0x14a0] sm:$0xf]  ;;  %v888_v11 = vld [vmem:[%s9874_s5 + $0x14b0] sm:$0xf]  ;;  %885 = vst [vmem:[%s9881_s6 + $0x524] sm:$0xf] %v884_v9 }
  0xf0   : > { %887 = vst [vmem:[%s9881_s6 + $0x528] sm:$0xf] %v886_v10  ;;  %889 = vst [vmem:[%s9881_s6 + $0x52c] sm:$0xf] %v888_v11  ;;  %v890_v12 = vld [vmem:[%s9874_s5 + $0x14c0] sm:$0xf] }
  0xf1   : > { %v892_v13 = vld [vmem:[%s9874_s5 + $0x14d0] sm:$0xf]  ;;  %v894_v14 = vld [vmem:[%s9874_s5 + $0x14e0] sm:$0xf]  ;;  %891 = vst [vmem:[%s9881_s6 + $0x530] sm:$0xf] %v890_v12 }
  0xf2   : > { %893 = vst [vmem:[%s9881_s6 + $0x534] sm:$0xf] %v892_v13  ;;  %895 = vst [vmem:[%s9881_s6 + $0x538] sm:$0xf] %v894_v14  ;;  %v896_v15 = vld [vmem:[%s9874_s5 + $0x14f0] sm:$0xf] }
  0xf3   : > { %v898_v16 = vld [vmem:[%s9874_s5 + $0x1500] sm:$0xf]  ;;  %v900_v17 = vld [vmem:[%s9874_s5 + $0x1510] sm:$0xf]  ;;  %897 = vst [vmem:[%s9881_s6 + $0x53c] sm:$0xf] %v896_v15 }
  0xf4   : > { %899 = vst [vmem:[%s9881_s6 + $0x540] sm:$0xf] %v898_v16  ;;  %901 = vst [vmem:[%s9881_s6 + $0x544] sm:$0xf] %v900_v17  ;;  %v902_v18 = vld [vmem:[%s9874_s5 + $0x1520] sm:$0xf] }
  0xf5   : > { %v904_v19 = vld [vmem:[%s9874_s5 + $0x1530] sm:$0xf]  ;;  %v906_v20 = vld [vmem:[%s9874_s5 + $0x1540] sm:$0xf]  ;;  %903 = vst [vmem:[%s9881_s6 + $0x548] sm:$0xf] %v902_v18 }
  0xf6   : > { %905 = vst [vmem:[%s9881_s6 + $0x54c] sm:$0xf] %v904_v19  ;;  %907 = vst [vmem:[%s9881_s6 + $0x550] sm:$0xf] %v906_v20  ;;  %v908_v21 = vld [vmem:[%s9874_s5 + $0x1550] sm:$0xf] }
  0xf7   : > { %v910_v22 = vld [vmem:[%s9874_s5 + $0x1560] sm:$0xf]  ;;  %v912_v23 = vld [vmem:[%s9874_s5 + $0x1570] sm:$0xf]  ;;  %909 = vst [vmem:[%s9881_s6 + $0x554] sm:$0xf] %v908_v21 }
  0xf8   : > { %911 = vst [vmem:[%s9881_s6 + $0x558] sm:$0xf] %v910_v22  ;;  %913 = vst [vmem:[%s9881_s6 + $0x55c] sm:$0xf] %v912_v23  ;;  %v914_v24 = vld [vmem:[%s9874_s5 + $0x1580] sm:$0xf] }
  0xf9   : > { %v916_v25 = vld [vmem:[%s9874_s5 + $0x1590] sm:$0xf]  ;;  %v918_v26 = vld [vmem:[%s9874_s5 + $0x15a0] sm:$0xf]  ;;  %915 = vst [vmem:[%s9881_s6 + $0x560] sm:$0xf] %v914_v24 }
  0xfa   : > { %917 = vst [vmem:[%s9881_s6 + $0x564] sm:$0xf] %v916_v25  ;;  %919 = vst [vmem:[%s9881_s6 + $0x568] sm:$0xf] %v918_v26  ;;  %v920_v27 = vld [vmem:[%s9874_s5 + $0x15b0] sm:$0xf] }
  0xfb   : > { %v922_v28 = vld [vmem:[%s9874_s5 + $0x15c0] sm:$0xf]  ;;  %v924_v29 = vld [vmem:[%s9874_s5 + $0x15d0] sm:$0xf]  ;;  %921 = vst [vmem:[%s9881_s6 + $0x56c] sm:$0xf] %v920_v27 }
  0xfc   : > { %923 = vst [vmem:[%s9881_s6 + $0x570] sm:$0xf] %v922_v28  ;;  %925 = vst [vmem:[%s9881_s6 + $0x574] sm:$0xf] %v924_v29  ;;  %v926_v30 = vld [vmem:[%s9874_s5 + $0x15e0] sm:$0xf] }
  0xfd   : > { %v928_v31 = vld [vmem:[%s9874_s5 + $0x15f0] sm:$0xf]  ;;  %v930_v32 = vld [vmem:[%s9874_s5 + $0x1600] sm:$0xf]  ;;  %927 = vst [vmem:[%s9881_s6 + $0x578] sm:$0xf] %v926_v30 }
  0xfe   : > { %929 = vst [vmem:[%s9881_s6 + $0x57c] sm:$0xf] %v928_v31  ;;  %931 = vst [vmem:[%s9881_s6 + $0x580] sm:$0xf] %v930_v32  ;;  %v932_v33 = vld [vmem:[%s9874_s5 + $0x1610] sm:$0xf] }
  0xff   : > { %v934_v34 = vld [vmem:[%s9874_s5 + $0x1620] sm:$0xf]  ;;  %v936_v35 = vld [vmem:[%s9874_s5 + $0x1630] sm:$0xf]  ;;  %933 = vst [vmem:[%s9881_s6 + $0x584] sm:$0xf] %v932_v33 }
 0x100   : > { %935 = vst [vmem:[%s9881_s6 + $0x588] sm:$0xf] %v934_v34  ;;  %937 = vst [vmem:[%s9881_s6 + $0x58c] sm:$0xf] %v936_v35  ;;  %v938_v36 = vld [vmem:[%s9874_s5 + $0x1640] sm:$0xf] }
 0x101   : > { %v940_v37 = vld [vmem:[%s9874_s5 + $0x1650] sm:$0xf]  ;;  %v942_v38 = vld [vmem:[%s9874_s5 + $0x1660] sm:$0xf]  ;;  %939 = vst [vmem:[%s9881_s6 + $0x590] sm:$0xf] %v938_v36 }
 0x102   : > { %941 = vst [vmem:[%s9881_s6 + $0x594] sm:$0xf] %v940_v37  ;;  %943 = vst [vmem:[%s9881_s6 + $0x598] sm:$0xf] %v942_v38  ;;  %v944_v39 = vld [vmem:[%s9874_s5 + $0x1670] sm:$0xf] }
 0x103   : > { %v946_v40 = vld [vmem:[%s9874_s5 + $0x1680] sm:$0xf]  ;;  %v948_v41 = vld [vmem:[%s9874_s5 + $0x1690] sm:$0xf]  ;;  %945 = vst [vmem:[%s9881_s6 + $0x59c] sm:$0xf] %v944_v39 }
 0x104   : > { %947 = vst [vmem:[%s9881_s6 + $0x5a0] sm:$0xf] %v946_v40  ;;  %949 = vst [vmem:[%s9881_s6 + $0x5a4] sm:$0xf] %v948_v41  ;;  %v950_v42 = vld [vmem:[%s9874_s5 + $0x16a0] sm:$0xf] }
 0x105   : > { %v952_v43 = vld [vmem:[%s9874_s5 + $0x16b0] sm:$0xf]  ;;  %v954_v44 = vld [vmem:[%s9874_s5 + $0x16c0] sm:$0xf]  ;;  %951 = vst [vmem:[%s9881_s6 + $0x5a8] sm:$0xf] %v950_v42 }
 0x106   : > { %953 = vst [vmem:[%s9881_s6 + $0x5ac] sm:$0xf] %v952_v43  ;;  %955 = vst [vmem:[%s9881_s6 + $0x5b0] sm:$0xf] %v954_v44  ;;  %v956_v45 = vld [vmem:[%s9874_s5 + $0x16d0] sm:$0xf] }
 0x107   : > { %v958_v46 = vld [vmem:[%s9874_s5 + $0x16e0] sm:$0xf]  ;;  %v960_v47 = vld [vmem:[%s9874_s5 + $0x16f0] sm:$0xf]  ;;  %957 = vst [vmem:[%s9881_s6 + $0x5b4] sm:$0xf] %v956_v45 }
 0x108   : > { %959 = vst [vmem:[%s9881_s6 + $0x5b8] sm:$0xf] %v958_v46  ;;  %961 = vst [vmem:[%s9881_s6 + $0x5bc] sm:$0xf] %v960_v47  ;;  %v962_v48 = vld [vmem:[%s9874_s5 + $0x1700] sm:$0xf] }
 0x109   : > { %v964_v49 = vld [vmem:[%s9874_s5 + $0x1710] sm:$0xf]  ;;  %v966_v50 = vld [vmem:[%s9874_s5 + $0x1720] sm:$0xf]  ;;  %963 = vst [vmem:[%s9881_s6 + $0x5c0] sm:$0xf] %v962_v48 }
 0x10a   : > { %965 = vst [vmem:[%s9881_s6 + $0x5c4] sm:$0xf] %v964_v49  ;;  %967 = vst [vmem:[%s9881_s6 + $0x5c8] sm:$0xf] %v966_v50  ;;  %v968_v51 = vld [vmem:[%s9874_s5 + $0x1730] sm:$0xf] }
 0x10b   : > { %v970_v52 = vld [vmem:[%s9874_s5 + $0x1740] sm:$0xf]  ;;  %v972_v53 = vld [vmem:[%s9874_s5 + $0x1750] sm:$0xf]  ;;  %969 = vst [vmem:[%s9881_s6 + $0x5cc] sm:$0xf] %v968_v51 }
 0x10c   : > { %971 = vst [vmem:[%s9881_s6 + $0x5d0] sm:$0xf] %v970_v52  ;;  %973 = vst [vmem:[%s9881_s6 + $0x5d4] sm:$0xf] %v972_v53  ;;  %v974_v54 = vld [vmem:[%s9874_s5 + $0x1760] sm:$0xf] }
 0x10d   : > { %v976_v55 = vld [vmem:[%s9874_s5 + $0x1770] sm:$0xf]  ;;  %v978_v56 = vld [vmem:[%s9874_s5 + $0x1780] sm:$0xf]  ;;  %975 = vst [vmem:[%s9881_s6 + $0x5d8] sm:$0xf] %v974_v54 }
 0x10e   : > { %977 = vst [vmem:[%s9881_s6 + $0x5dc] sm:$0xf] %v976_v55  ;;  %979 = vst [vmem:[%s9881_s6 + $0x5e0] sm:$0xf] %v978_v56  ;;  %v980_v57 = vld [vmem:[%s9874_s5 + $0x1790] sm:$0xf] }
 0x10f   : > { %v982_v58 = vld [vmem:[%s9874_s5 + $0x17a0] sm:$0xf]  ;;  %v984_v59 = vld [vmem:[%s9874_s5 + $0x17b0] sm:$0xf]  ;;  %981 = vst [vmem:[%s9881_s6 + $0x5e4] sm:$0xf] %v980_v57 }
 0x110   : > { %983 = vst [vmem:[%s9881_s6 + $0x5e8] sm:$0xf] %v982_v58  ;;  %985 = vst [vmem:[%s9881_s6 + $0x5ec] sm:$0xf] %v984_v59  ;;  %v986_v60 = vld [vmem:[%s9874_s5 + $0x17c0] sm:$0xf] }
 0x111   : > { %v988_v61 = vld [vmem:[%s9874_s5 + $0x17d0] sm:$0xf]  ;;  %v990_v62 = vld [vmem:[%s9874_s5 + $0x17e0] sm:$0xf]  ;;  %987 = vst [vmem:[%s9881_s6 + $0x5f0] sm:$0xf] %v986_v60 }
 0x112   : > { %989 = vst [vmem:[%s9881_s6 + $0x5f4] sm:$0xf] %v988_v61  ;;  %991 = vst [vmem:[%s9881_s6 + $0x5f8] sm:$0xf] %v990_v62  ;;  %v992_v63 = vld [vmem:[%s9874_s5 + $0x17f0] sm:$0xf] }
 0x113   : > { %v994_v0 = vld [vmem:[%s9874_s5 + $0x1800] sm:$0xf]  ;;  %v996_v1 = vld [vmem:[%s9874_s5 + $0x1810] sm:$0xf]  ;;  %993 = vst [vmem:[%s9881_s6 + $0x5fc] sm:$0xf] %v992_v63 }
 0x114   : > { %995 = vst [vmem:[%s9881_s6 + $0x600] sm:$0xf] %v994_v0  ;;  %997 = vst [vmem:[%s9881_s6 + $0x604] sm:$0xf] %v996_v1  ;;  %v998_v2 = vld [vmem:[%s9874_s5 + $0x1820] sm:$0xf] }
 0x115   : > { %v1000_v3 = vld [vmem:[%s9874_s5 + $0x1830] sm:$0xf]  ;;  %v1002_v4 = vld [vmem:[%s9874_s5 + $0x1840] sm:$0xf]  ;;  %999 = vst [vmem:[%s9881_s6 + $0x608] sm:$0xf] %v998_v2 }
 0x116   : > { %1001 = vst [vmem:[%s9881_s6 + $0x60c] sm:$0xf] %v1000_v3  ;;  %1003 = vst [vmem:[%s9881_s6 + $0x610] sm:$0xf] %v1002_v4  ;;  %v1004_v5 = vld [vmem:[%s9874_s5 + $0x1850] sm:$0xf] }
 0x117   : > { %v1006_v6 = vld [vmem:[%s9874_s5 + $0x1860] sm:$0xf]  ;;  %v1008_v7 = vld [vmem:[%s9874_s5 + $0x1870] sm:$0xf]  ;;  %1005 = vst [vmem:[%s9881_s6 + $0x614] sm:$0xf] %v1004_v5 }
 0x118   : > { %1007 = vst [vmem:[%s9881_s6 + $0x618] sm:$0xf] %v1006_v6  ;;  %1009 = vst [vmem:[%s9881_s6 + $0x61c] sm:$0xf] %v1008_v7  ;;  %v1010_v8 = vld [vmem:[%s9874_s5 + $0x1880] sm:$0xf] }
 0x119   : > { %v1012_v9 = vld [vmem:[%s9874_s5 + $0x1890] sm:$0xf]  ;;  %v1014_v10 = vld [vmem:[%s9874_s5 + $0x18a0] sm:$0xf]  ;;  %1011 = vst [vmem:[%s9881_s6 + $0x620] sm:$0xf] %v1010_v8 }
 0x11a   : > { %1013 = vst [vmem:[%s9881_s6 + $0x624] sm:$0xf] %v1012_v9  ;;  %1015 = vst [vmem:[%s9881_s6 + $0x628] sm:$0xf] %v1014_v10  ;;  %v1016_v11 = vld [vmem:[%s9874_s5 + $0x18b0] sm:$0xf] }
 0x11b   : > { %v1018_v12 = vld [vmem:[%s9874_s5 + $0x18c0] sm:$0xf]  ;;  %v1020_v13 = vld [vmem:[%s9874_s5 + $0x18d0] sm:$0xf]  ;;  %1017 = vst [vmem:[%s9881_s6 + $0x62c] sm:$0xf] %v1016_v11 }
 0x11c   : > { %1019 = vst [vmem:[%s9881_s6 + $0x630] sm:$0xf] %v1018_v12  ;;  %1021 = vst [vmem:[%s9881_s6 + $0x634] sm:$0xf] %v1020_v13  ;;  %v1022_v14 = vld [vmem:[%s9874_s5 + $0x18e0] sm:$0xf] }
 0x11d   : > { %v1024_v15 = vld [vmem:[%s9874_s5 + $0x18f0] sm:$0xf]  ;;  %v1026_v16 = vld [vmem:[%s9874_s5 + $0x1900] sm:$0xf]  ;;  %1023 = vst [vmem:[%s9881_s6 + $0x638] sm:$0xf] %v1022_v14 }
 0x11e   : > { %1025 = vst [vmem:[%s9881_s6 + $0x63c] sm:$0xf] %v1024_v15  ;;  %1027 = vst [vmem:[%s9881_s6 + $0x640] sm:$0xf] %v1026_v16  ;;  %v1028_v17 = vld [vmem:[%s9874_s5 + $0x1910] sm:$0xf] }
 0x11f   : > { %v1030_v18 = vld [vmem:[%s9874_s5 + $0x1920] sm:$0xf]  ;;  %v1032_v19 = vld [vmem:[%s9874_s5 + $0x1930] sm:$0xf]  ;;  %1029 = vst [vmem:[%s9881_s6 + $0x644] sm:$0xf] %v1028_v17 }
 0x120   : > { %1031 = vst [vmem:[%s9881_s6 + $0x648] sm:$0xf] %v1030_v18  ;;  %1033 = vst [vmem:[%s9881_s6 + $0x64c] sm:$0xf] %v1032_v19  ;;  %v1034_v20 = vld [vmem:[%s9874_s5 + $0x1940] sm:$0xf] }
 0x121   : > { %v1036_v21 = vld [vmem:[%s9874_s5 + $0x1950] sm:$0xf]  ;;  %v1038_v22 = vld [vmem:[%s9874_s5 + $0x1960] sm:$0xf]  ;;  %1035 = vst [vmem:[%s9881_s6 + $0x650] sm:$0xf] %v1034_v20 }
 0x122   : > { %1037 = vst [vmem:[%s9881_s6 + $0x654] sm:$0xf] %v1036_v21  ;;  %1039 = vst [vmem:[%s9881_s6 + $0x658] sm:$0xf] %v1038_v22  ;;  %v1040_v23 = vld [vmem:[%s9874_s5 + $0x1970] sm:$0xf] }
 0x123   : > { %v1042_v24 = vld [vmem:[%s9874_s5 + $0x1980] sm:$0xf]  ;;  %v1044_v25 = vld [vmem:[%s9874_s5 + $0x1990] sm:$0xf]  ;;  %1041 = vst [vmem:[%s9881_s6 + $0x65c] sm:$0xf] %v1040_v23 }
 0x124   : > { %1043 = vst [vmem:[%s9881_s6 + $0x660] sm:$0xf] %v1042_v24  ;;  %1045 = vst [vmem:[%s9881_s6 + $0x664] sm:$0xf] %v1044_v25  ;;  %v1046_v26 = vld [vmem:[%s9874_s5 + $0x19a0] sm:$0xf] }
 0x125   : > { %v1048_v27 = vld [vmem:[%s9874_s5 + $0x19b0] sm:$0xf]  ;;  %v1050_v28 = vld [vmem:[%s9874_s5 + $0x19c0] sm:$0xf]  ;;  %1047 = vst [vmem:[%s9881_s6 + $0x668] sm:$0xf] %v1046_v26 }
 0x126   : > { %1049 = vst [vmem:[%s9881_s6 + $0x66c] sm:$0xf] %v1048_v27  ;;  %1051 = vst [vmem:[%s9881_s6 + $0x670] sm:$0xf] %v1050_v28  ;;  %v1052_v29 = vld [vmem:[%s9874_s5 + $0x19d0] sm:$0xf] }
 0x127   : > { %v1054_v30 = vld [vmem:[%s9874_s5 + $0x19e0] sm:$0xf]  ;;  %v1056_v31 = vld [vmem:[%s9874_s5 + $0x19f0] sm:$0xf]  ;;  %1053 = vst [vmem:[%s9881_s6 + $0x674] sm:$0xf] %v1052_v29 }
 0x128   : > { %1055 = vst [vmem:[%s9881_s6 + $0x678] sm:$0xf] %v1054_v30  ;;  %1057 = vst [vmem:[%s9881_s6 + $0x67c] sm:$0xf] %v1056_v31  ;;  %v1058_v32 = vld [vmem:[%s9874_s5 + $0x1a00] sm:$0xf] }
 0x129   : > { %v1060_v33 = vld [vmem:[%s9874_s5 + $0x1a10] sm:$0xf]  ;;  %v1062_v34 = vld [vmem:[%s9874_s5 + $0x1a20] sm:$0xf]  ;;  %1059 = vst [vmem:[%s9881_s6 + $0x680] sm:$0xf] %v1058_v32 }
 0x12a   : > { %1061 = vst [vmem:[%s9881_s6 + $0x684] sm:$0xf] %v1060_v33  ;;  %1063 = vst [vmem:[%s9881_s6 + $0x688] sm:$0xf] %v1062_v34  ;;  %v1064_v35 = vld [vmem:[%s9874_s5 + $0x1a30] sm:$0xf] }
 0x12b   : > { %v1066_v36 = vld [vmem:[%s9874_s5 + $0x1a40] sm:$0xf]  ;;  %v1068_v37 = vld [vmem:[%s9874_s5 + $0x1a50] sm:$0xf]  ;;  %1065 = vst [vmem:[%s9881_s6 + $0x68c] sm:$0xf] %v1064_v35 }
 0x12c   : > { %1067 = vst [vmem:[%s9881_s6 + $0x690] sm:$0xf] %v1066_v36  ;;  %1069 = vst [vmem:[%s9881_s6 + $0x694] sm:$0xf] %v1068_v37  ;;  %v1070_v38 = vld [vmem:[%s9874_s5 + $0x1a60] sm:$0xf] }
 0x12d   : > { %v1072_v39 = vld [vmem:[%s9874_s5 + $0x1a70] sm:$0xf]  ;;  %v1074_v40 = vld [vmem:[%s9874_s5 + $0x1a80] sm:$0xf]  ;;  %1071 = vst [vmem:[%s9881_s6 + $0x698] sm:$0xf] %v1070_v38 }
 0x12e   : > { %1073 = vst [vmem:[%s9881_s6 + $0x69c] sm:$0xf] %v1072_v39  ;;  %1075 = vst [vmem:[%s9881_s6 + $0x6a0] sm:$0xf] %v1074_v40  ;;  %v1076_v41 = vld [vmem:[%s9874_s5 + $0x1a90] sm:$0xf] }
 0x12f   : > { %v1078_v42 = vld [vmem:[%s9874_s5 + $0x1aa0] sm:$0xf]  ;;  %v1080_v43 = vld [vmem:[%s9874_s5 + $0x1ab0] sm:$0xf]  ;;  %1077 = vst [vmem:[%s9881_s6 + $0x6a4] sm:$0xf] %v1076_v41 }
 0x130   : > { %1079 = vst [vmem:[%s9881_s6 + $0x6a8] sm:$0xf] %v1078_v42  ;;  %1081 = vst [vmem:[%s9881_s6 + $0x6ac] sm:$0xf] %v1080_v43  ;;  %v1082_v44 = vld [vmem:[%s9874_s5 + $0x1ac0] sm:$0xf] }
 0x131   : > { %v1084_v45 = vld [vmem:[%s9874_s5 + $0x1ad0] sm:$0xf]  ;;  %v1086_v46 = vld [vmem:[%s9874_s5 + $0x1ae0] sm:$0xf]  ;;  %1083 = vst [vmem:[%s9881_s6 + $0x6b0] sm:$0xf] %v1082_v44 }
 0x132   : > { %1085 = vst [vmem:[%s9881_s6 + $0x6b4] sm:$0xf] %v1084_v45  ;;  %1087 = vst [vmem:[%s9881_s6 + $0x6b8] sm:$0xf] %v1086_v46  ;;  %v1088_v47 = vld [vmem:[%s9874_s5 + $0x1af0] sm:$0xf] }
 0x133   : > { %v1090_v48 = vld [vmem:[%s9874_s5 + $0x1b00] sm:$0xf]  ;;  %v1092_v49 = vld [vmem:[%s9874_s5 + $0x1b10] sm:$0xf]  ;;  %1089 = vst [vmem:[%s9881_s6 + $0x6bc] sm:$0xf] %v1088_v47 }
 0x134   : > { %1091 = vst [vmem:[%s9881_s6 + $0x6c0] sm:$0xf] %v1090_v48  ;;  %1093 = vst [vmem:[%s9881_s6 + $0x6c4] sm:$0xf] %v1092_v49  ;;  %v1094_v50 = vld [vmem:[%s9874_s5 + $0x1b20] sm:$0xf] }
 0x135   : > { %v1096_v51 = vld [vmem:[%s9874_s5 + $0x1b30] sm:$0xf]  ;;  %v1098_v52 = vld [vmem:[%s9874_s5 + $0x1b40] sm:$0xf]  ;;  %1095 = vst [vmem:[%s9881_s6 + $0x6c8] sm:$0xf] %v1094_v50 }
 0x136   : > { %1097 = vst [vmem:[%s9881_s6 + $0x6cc] sm:$0xf] %v1096_v51  ;;  %1099 = vst [vmem:[%s9881_s6 + $0x6d0] sm:$0xf] %v1098_v52  ;;  %v1100_v53 = vld [vmem:[%s9874_s5 + $0x1b50] sm:$0xf] }
 0x137   : > { %v1102_v54 = vld [vmem:[%s9874_s5 + $0x1b60] sm:$0xf]  ;;  %v1104_v55 = vld [vmem:[%s9874_s5 + $0x1b70] sm:$0xf]  ;;  %1101 = vst [vmem:[%s9881_s6 + $0x6d4] sm:$0xf] %v1100_v53 }
 0x138   : > { %1103 = vst [vmem:[%s9881_s6 + $0x6d8] sm:$0xf] %v1102_v54  ;;  %1105 = vst [vmem:[%s9881_s6 + $0x6dc] sm:$0xf] %v1104_v55  ;;  %v1106_v56 = vld [vmem:[%s9874_s5 + $0x1b80] sm:$0xf] }
 0x139   : > { %v1108_v57 = vld [vmem:[%s9874_s5 + $0x1b90] sm:$0xf]  ;;  %v1110_v58 = vld [vmem:[%s9874_s5 + $0x1ba0] sm:$0xf]  ;;  %1107 = vst [vmem:[%s9881_s6 + $0x6e0] sm:$0xf] %v1106_v56 }
 0x13a   : > { %1109 = vst [vmem:[%s9881_s6 + $0x6e4] sm:$0xf] %v1108_v57  ;;  %1111 = vst [vmem:[%s9881_s6 + $0x6e8] sm:$0xf] %v1110_v58  ;;  %v1112_v59 = vld [vmem:[%s9874_s5 + $0x1bb0] sm:$0xf] }
 0x13b   : > { %v1114_v60 = vld [vmem:[%s9874_s5 + $0x1bc0] sm:$0xf]  ;;  %v1116_v61 = vld [vmem:[%s9874_s5 + $0x1bd0] sm:$0xf]  ;;  %1113 = vst [vmem:[%s9881_s6 + $0x6ec] sm:$0xf] %v1112_v59 }
 0x13c   : > { %1115 = vst [vmem:[%s9881_s6 + $0x6f0] sm:$0xf] %v1114_v60  ;;  %1117 = vst [vmem:[%s9881_s6 + $0x6f4] sm:$0xf] %v1116_v61  ;;  %v1118_v62 = vld [vmem:[%s9874_s5 + $0x1be0] sm:$0xf] }
 0x13d   : > { %v1120_v63 = vld [vmem:[%s9874_s5 + $0x1bf0] sm:$0xf]  ;;  %v1122_v0 = vld [vmem:[%s9874_s5 + $0x1c00] sm:$0xf]  ;;  %1119 = vst [vmem:[%s9881_s6 + $0x6f8] sm:$0xf] %v1118_v62 }
 0x13e   : > { %1121 = vst [vmem:[%s9881_s6 + $0x6fc] sm:$0xf] %v1120_v63  ;;  %1123 = vst [vmem:[%s9881_s6 + $0x700] sm:$0xf] %v1122_v0  ;;  %v1124_v1 = vld [vmem:[%s9874_s5 + $0x1c10] sm:$0xf] }
 0x13f   : > { %v1126_v2 = vld [vmem:[%s9874_s5 + $0x1c20] sm:$0xf]  ;;  %v1128_v3 = vld [vmem:[%s9874_s5 + $0x1c30] sm:$0xf]  ;;  %1125 = vst [vmem:[%s9881_s6 + $0x704] sm:$0xf] %v1124_v1 }
 0x140   : > { %1127 = vst [vmem:[%s9881_s6 + $0x708] sm:$0xf] %v1126_v2  ;;  %1129 = vst [vmem:[%s9881_s6 + $0x70c] sm:$0xf] %v1128_v3  ;;  %v1130_v4 = vld [vmem:[%s9874_s5 + $0x1c40] sm:$0xf] }
 0x141   : > { %v1132_v5 = vld [vmem:[%s9874_s5 + $0x1c50] sm:$0xf]  ;;  %v1134_v6 = vld [vmem:[%s9874_s5 + $0x1c60] sm:$0xf]  ;;  %1131 = vst [vmem:[%s9881_s6 + $0x710] sm:$0xf] %v1130_v4 }
 0x142   : > { %1133 = vst [vmem:[%s9881_s6 + $0x714] sm:$0xf] %v1132_v5  ;;  %1135 = vst [vmem:[%s9881_s6 + $0x718] sm:$0xf] %v1134_v6  ;;  %v1136_v7 = vld [vmem:[%s9874_s5 + $0x1c70] sm:$0xf] }
 0x143   : > { %v1138_v8 = vld [vmem:[%s9874_s5 + $0x1c80] sm:$0xf]  ;;  %v1140_v9 = vld [vmem:[%s9874_s5 + $0x1c90] sm:$0xf]  ;;  %1137 = vst [vmem:[%s9881_s6 + $0x71c] sm:$0xf] %v1136_v7 }
 0x144   : > { %1139 = vst [vmem:[%s9881_s6 + $0x720] sm:$0xf] %v1138_v8  ;;  %1141 = vst [vmem:[%s9881_s6 + $0x724] sm:$0xf] %v1140_v9  ;;  %v1142_v10 = vld [vmem:[%s9874_s5 + $0x1ca0] sm:$0xf] }
 0x145   : > { %v1144_v11 = vld [vmem:[%s9874_s5 + $0x1cb0] sm:$0xf]  ;;  %v1146_v12 = vld [vmem:[%s9874_s5 + $0x1cc0] sm:$0xf]  ;;  %1143 = vst [vmem:[%s9881_s6 + $0x728] sm:$0xf] %v1142_v10 }
 0x146   : > { %1145 = vst [vmem:[%s9881_s6 + $0x72c] sm:$0xf] %v1144_v11  ;;  %1147 = vst [vmem:[%s9881_s6 + $0x730] sm:$0xf] %v1146_v12  ;;  %v1148_v13 = vld [vmem:[%s9874_s5 + $0x1cd0] sm:$0xf] }
 0x147   : > { %v1150_v14 = vld [vmem:[%s9874_s5 + $0x1ce0] sm:$0xf]  ;;  %v1152_v15 = vld [vmem:[%s9874_s5 + $0x1cf0] sm:$0xf]  ;;  %1149 = vst [vmem:[%s9881_s6 + $0x734] sm:$0xf] %v1148_v13 }
 0x148   : > { %1151 = vst [vmem:[%s9881_s6 + $0x738] sm:$0xf] %v1150_v14  ;;  %1153 = vst [vmem:[%s9881_s6 + $0x73c] sm:$0xf] %v1152_v15  ;;  %v1154_v16 = vld [vmem:[%s9874_s5 + $0x1d00] sm:$0xf] }
 0x149   : > { %v1156_v17 = vld [vmem:[%s9874_s5 + $0x1d10] sm:$0xf]  ;;  %v1158_v18 = vld [vmem:[%s9874_s5 + $0x1d20] sm:$0xf]  ;;  %1155 = vst [vmem:[%s9881_s6 + $0x740] sm:$0xf] %v1154_v16 }
 0x14a   : > { %1157 = vst [vmem:[%s9881_s6 + $0x744] sm:$0xf] %v1156_v17  ;;  %1159 = vst [vmem:[%s9881_s6 + $0x748] sm:$0xf] %v1158_v18  ;;  %v1160_v19 = vld [vmem:[%s9874_s5 + $0x1d30] sm:$0xf] }
 0x14b   : > { %v1162_v20 = vld [vmem:[%s9874_s5 + $0x1d40] sm:$0xf]  ;;  %v1164_v21 = vld [vmem:[%s9874_s5 + $0x1d50] sm:$0xf]  ;;  %1161 = vst [vmem:[%s9881_s6 + $0x74c] sm:$0xf] %v1160_v19 }
 0x14c   : > { %1163 = vst [vmem:[%s9881_s6 + $0x750] sm:$0xf] %v1162_v20  ;;  %1165 = vst [vmem:[%s9881_s6 + $0x754] sm:$0xf] %v1164_v21  ;;  %v1166_v22 = vld [vmem:[%s9874_s5 + $0x1d60] sm:$0xf] }
 0x14d   : > { %v1168_v23 = vld [vmem:[%s9874_s5 + $0x1d70] sm:$0xf]  ;;  %v1170_v24 = vld [vmem:[%s9874_s5 + $0x1d80] sm:$0xf]  ;;  %1167 = vst [vmem:[%s9881_s6 + $0x758] sm:$0xf] %v1166_v22 }
 0x14e   : > { %1169 = vst [vmem:[%s9881_s6 + $0x75c] sm:$0xf] %v1168_v23  ;;  %1171 = vst [vmem:[%s9881_s6 + $0x760] sm:$0xf] %v1170_v24  ;;  %v1172_v25 = vld [vmem:[%s9874_s5 + $0x1d90] sm:$0xf] }
 0x14f   : > { %v1174_v26 = vld [vmem:[%s9874_s5 + $0x1da0] sm:$0xf]  ;;  %v1176_v27 = vld [vmem:[%s9874_s5 + $0x1db0] sm:$0xf]  ;;  %1173 = vst [vmem:[%s9881_s6 + $0x764] sm:$0xf] %v1172_v25 }
 0x150   : > { %1175 = vst [vmem:[%s9881_s6 + $0x768] sm:$0xf] %v1174_v26  ;;  %1177 = vst [vmem:[%s9881_s6 + $0x76c] sm:$0xf] %v1176_v27  ;;  %v1178_v28 = vld [vmem:[%s9874_s5 + $0x1dc0] sm:$0xf] }
 0x151   : > { %v1180_v29 = vld [vmem:[%s9874_s5 + $0x1dd0] sm:$0xf]  ;;  %v1182_v30 = vld [vmem:[%s9874_s5 + $0x1de0] sm:$0xf]  ;;  %1179 = vst [vmem:[%s9881_s6 + $0x770] sm:$0xf] %v1178_v28 }
 0x152   : > { %1181 = vst [vmem:[%s9881_s6 + $0x774] sm:$0xf] %v1180_v29  ;;  %1183 = vst [vmem:[%s9881_s6 + $0x778] sm:$0xf] %v1182_v30  ;;  %v1184_v31 = vld [vmem:[%s9874_s5 + $0x1df0] sm:$0xf] }
 0x153   : > { %v1186_v32 = vld [vmem:[%s9874_s5 + $0x1e00] sm:$0xf]  ;;  %v1188_v33 = vld [vmem:[%s9874_s5 + $0x1e10] sm:$0xf]  ;;  %1185 = vst [vmem:[%s9881_s6 + $0x77c] sm:$0xf] %v1184_v31 }
 0x154   : > { %1187 = vst [vmem:[%s9881_s6 + $0x780] sm:$0xf] %v1186_v32  ;;  %1189 = vst [vmem:[%s9881_s6 + $0x784] sm:$0xf] %v1188_v33  ;;  %v1190_v34 = vld [vmem:[%s9874_s5 + $0x1e20] sm:$0xf] }
 0x155   : > { %v1192_v35 = vld [vmem:[%s9874_s5 + $0x1e30] sm:$0xf]  ;;  %v1194_v36 = vld [vmem:[%s9874_s5 + $0x1e40] sm:$0xf]  ;;  %1191 = vst [vmem:[%s9881_s6 + $0x788] sm:$0xf] %v1190_v34 }
 0x156   : > { %1193 = vst [vmem:[%s9881_s6 + $0x78c] sm:$0xf] %v1192_v35  ;;  %1195 = vst [vmem:[%s9881_s6 + $0x790] sm:$0xf] %v1194_v36  ;;  %v1196_v37 = vld [vmem:[%s9874_s5 + $0x1e50] sm:$0xf] }
 0x157   : > { %v1198_v38 = vld [vmem:[%s9874_s5 + $0x1e60] sm:$0xf]  ;;  %v1200_v39 = vld [vmem:[%s9874_s5 + $0x1e70] sm:$0xf]  ;;  %1197 = vst [vmem:[%s9881_s6 + $0x794] sm:$0xf] %v1196_v37 }
 0x158   : > { %1199 = vst [vmem:[%s9881_s6 + $0x798] sm:$0xf] %v1198_v38  ;;  %1201 = vst [vmem:[%s9881_s6 + $0x79c] sm:$0xf] %v1200_v39  ;;  %v1202_v40 = vld [vmem:[%s9874_s5 + $0x1e80] sm:$0xf] }
 0x159   : > { %v1204_v41 = vld [vmem:[%s9874_s5 + $0x1e90] sm:$0xf]  ;;  %v1206_v42 = vld [vmem:[%s9874_s5 + $0x1ea0] sm:$0xf]  ;;  %1203 = vst [vmem:[%s9881_s6 + $0x7a0] sm:$0xf] %v1202_v40 }
 0x15a   : > { %1205 = vst [vmem:[%s9881_s6 + $0x7a4] sm:$0xf] %v1204_v41  ;;  %1207 = vst [vmem:[%s9881_s6 + $0x7a8] sm:$0xf] %v1206_v42  ;;  %v1208_v43 = vld [vmem:[%s9874_s5 + $0x1eb0] sm:$0xf] }
 0x15b   : > { %v1210_v44 = vld [vmem:[%s9874_s5 + $0x1ec0] sm:$0xf]  ;;  %v1212_v45 = vld [vmem:[%s9874_s5 + $0x1ed0] sm:$0xf]  ;;  %1209 = vst [vmem:[%s9881_s6 + $0x7ac] sm:$0xf] %v1208_v43 }
 0x15c   : > { %1211 = vst [vmem:[%s9881_s6 + $0x7b0] sm:$0xf] %v1210_v44  ;;  %1213 = vst [vmem:[%s9881_s6 + $0x7b4] sm:$0xf] %v1212_v45  ;;  %v1214_v46 = vld [vmem:[%s9874_s5 + $0x1ee0] sm:$0xf] }
 0x15d   : > { %v1216_v47 = vld [vmem:[%s9874_s5 + $0x1ef0] sm:$0xf]  ;;  %v1218_v48 = vld [vmem:[%s9874_s5 + $0x1f00] sm:$0xf]  ;;  %1215 = vst [vmem:[%s9881_s6 + $0x7b8] sm:$0xf] %v1214_v46 }
 0x15e   : > { %1217 = vst [vmem:[%s9881_s6 + $0x7bc] sm:$0xf] %v1216_v47  ;;  %1219 = vst [vmem:[%s9881_s6 + $0x7c0] sm:$0xf] %v1218_v48  ;;  %v1220_v49 = vld [vmem:[%s9874_s5 + $0x1f10] sm:$0xf] }
 0x15f   : > { %v1222_v50 = vld [vmem:[%s9874_s5 + $0x1f20] sm:$0xf]  ;;  %v1224_v51 = vld [vmem:[%s9874_s5 + $0x1f30] sm:$0xf]  ;;  %1221 = vst [vmem:[%s9881_s6 + $0x7c4] sm:$0xf] %v1220_v49 }
 0x160   : > { %1223 = vst [vmem:[%s9881_s6 + $0x7c8] sm:$0xf] %v1222_v50  ;;  %1225 = vst [vmem:[%s9881_s6 + $0x7cc] sm:$0xf] %v1224_v51  ;;  %v1226_v52 = vld [vmem:[%s9874_s5 + $0x1f40] sm:$0xf] }
 0x161   : > { %v1228_v53 = vld [vmem:[%s9874_s5 + $0x1f50] sm:$0xf]  ;;  %v1230_v54 = vld [vmem:[%s9874_s5 + $0x1f60] sm:$0xf]  ;;  %1227 = vst [vmem:[%s9881_s6 + $0x7d0] sm:$0xf] %v1226_v52 }
 0x162   : > { %1229 = vst [vmem:[%s9881_s6 + $0x7d4] sm:$0xf] %v1228_v53  ;;  %1231 = vst [vmem:[%s9881_s6 + $0x7d8] sm:$0xf] %v1230_v54  ;;  %v1232_v55 = vld [vmem:[%s9874_s5 + $0x1f70] sm:$0xf] }
 0x163   : > { %v1234_v56 = vld [vmem:[%s9874_s5 + $0x1f80] sm:$0xf]  ;;  %v1236_v57 = vld [vmem:[%s9874_s5 + $0x1f90] sm:$0xf]  ;;  %1233 = vst [vmem:[%s9881_s6 + $0x7dc] sm:$0xf] %v1232_v55 }
 0x164   : > { %1235 = vst [vmem:[%s9881_s6 + $0x7e0] sm:$0xf] %v1234_v56  ;;  %1237 = vst [vmem:[%s9881_s6 + $0x7e4] sm:$0xf] %v1236_v57  ;;  %v1238_v58 = vld [vmem:[%s9874_s5 + $0x1fa0] sm:$0xf] }
 0x165   : > { %v1240_v59 = vld [vmem:[%s9874_s5 + $0x1fb0] sm:$0xf]  ;;  %v1242_v60 = vld [vmem:[%s9874_s5 + $0x1fc0] sm:$0xf]  ;;  %1239 = vst [vmem:[%s9881_s6 + $0x7e8] sm:$0xf] %v1238_v58 }
 0x166   : > { %1241 = vst [vmem:[%s9881_s6 + $0x7ec] sm:$0xf] %v1240_v59  ;;  %1243 = vst [vmem:[%s9881_s6 + $0x7f0] sm:$0xf] %v1242_v60  ;;  %v1244_v61 = vld [vmem:[%s9874_s5 + $0x1fd0] sm:$0xf] }
 0x167   : > { %v1246_v62 = vld [vmem:[%s9874_s5 + $0x1fe0] sm:$0xf]  ;;  %v1248_v63 = vld [vmem:[%s9874_s5 + $0x1ff0] sm:$0xf]  ;;  %1245 = vst [vmem:[%s9881_s6 + $0x7f4] sm:$0xf] %v1244_v61 }
 0x168   : > { %1247 = vst [vmem:[%s9881_s6 + $0x7f8] sm:$0xf] %v1246_v62  ;;  %1249 = vst [vmem:[%s9881_s6 + $0x7fc] sm:$0xf] %v1248_v63  ;;  %v1250_v0 = vld [vmem:[%s9874_s5 + $0x2000] sm:$0xf] }
 0x169   : > { %v1252_v1 = vld [vmem:[%s9874_s5 + $0x2010] sm:$0xf]  ;;  %v1254_v2 = vld [vmem:[%s9874_s5 + $0x2020] sm:$0xf]  ;;  %1251 = vst [vmem:[%s9881_s6 + $0x800] sm:$0xf] %v1250_v0 }
 0x16a   : > { %1253 = vst [vmem:[%s9881_s6 + $0x804] sm:$0xf] %v1252_v1  ;;  %1255 = vst [vmem:[%s9881_s6 + $0x808] sm:$0xf] %v1254_v2  ;;  %v1256_v3 = vld [vmem:[%s9874_s5 + $0x2030] sm:$0xf] }
 0x16b   : > { %v1258_v4 = vld [vmem:[%s9874_s5 + $0x2040] sm:$0xf]  ;;  %v1260_v5 = vld [vmem:[%s9874_s5 + $0x2050] sm:$0xf]  ;;  %1257 = vst [vmem:[%s9881_s6 + $0x80c] sm:$0xf] %v1256_v3 }
 0x16c   : > { %1259 = vst [vmem:[%s9881_s6 + $0x810] sm:$0xf] %v1258_v4  ;;  %1261 = vst [vmem:[%s9881_s6 + $0x814] sm:$0xf] %v1260_v5  ;;  %v1262_v6 = vld [vmem:[%s9874_s5 + $0x2060] sm:$0xf] }
 0x16d   : > { %v1264_v7 = vld [vmem:[%s9874_s5 + $0x2070] sm:$0xf]  ;;  %v1266_v8 = vld [vmem:[%s9874_s5 + $0x2080] sm:$0xf]  ;;  %1263 = vst [vmem:[%s9881_s6 + $0x818] sm:$0xf] %v1262_v6 }
 0x16e   : > { %1265 = vst [vmem:[%s9881_s6 + $0x81c] sm:$0xf] %v1264_v7  ;;  %1267 = vst [vmem:[%s9881_s6 + $0x820] sm:$0xf] %v1266_v8  ;;  %v1268_v9 = vld [vmem:[%s9874_s5 + $0x2090] sm:$0xf] }
 0x16f   : > { %v1270_v10 = vld [vmem:[%s9874_s5 + $0x20a0] sm:$0xf]  ;;  %v1272_v11 = vld [vmem:[%s9874_s5 + $0x20b0] sm:$0xf]  ;;  %1269 = vst [vmem:[%s9881_s6 + $0x824] sm:$0xf] %v1268_v9 }
 0x170   : > { %1271 = vst [vmem:[%s9881_s6 + $0x828] sm:$0xf] %v1270_v10  ;;  %1273 = vst [vmem:[%s9881_s6 + $0x82c] sm:$0xf] %v1272_v11  ;;  %v1274_v12 = vld [vmem:[%s9874_s5 + $0x20c0] sm:$0xf] }
 0x171   : > { %v1276_v13 = vld [vmem:[%s9874_s5 + $0x20d0] sm:$0xf]  ;;  %v1278_v14 = vld [vmem:[%s9874_s5 + $0x20e0] sm:$0xf]  ;;  %1275 = vst [vmem:[%s9881_s6 + $0x830] sm:$0xf] %v1274_v12 }
 0x172   : > { %1277 = vst [vmem:[%s9881_s6 + $0x834] sm:$0xf] %v1276_v13  ;;  %1279 = vst [vmem:[%s9881_s6 + $0x838] sm:$0xf] %v1278_v14  ;;  %v1280_v15 = vld [vmem:[%s9874_s5 + $0x20f0] sm:$0xf] }
 0x173   : > { %v1282_v16 = vld [vmem:[%s9874_s5 + $0x2100] sm:$0xf]  ;;  %v1284_v17 = vld [vmem:[%s9874_s5 + $0x2110] sm:$0xf]  ;;  %1281 = vst [vmem:[%s9881_s6 + $0x83c] sm:$0xf] %v1280_v15 }
 0x174   : > { %1283 = vst [vmem:[%s9881_s6 + $0x840] sm:$0xf] %v1282_v16  ;;  %1285 = vst [vmem:[%s9881_s6 + $0x844] sm:$0xf] %v1284_v17  ;;  %v1286_v18 = vld [vmem:[%s9874_s5 + $0x2120] sm:$0xf] }
 0x175   : > { %v1288_v19 = vld [vmem:[%s9874_s5 + $0x2130] sm:$0xf]  ;;  %v1290_v20 = vld [vmem:[%s9874_s5 + $0x2140] sm:$0xf]  ;;  %1287 = vst [vmem:[%s9881_s6 + $0x848] sm:$0xf] %v1286_v18 }
 0x176   : > { %1289 = vst [vmem:[%s9881_s6 + $0x84c] sm:$0xf] %v1288_v19  ;;  %1291 = vst [vmem:[%s9881_s6 + $0x850] sm:$0xf] %v1290_v20  ;;  %v1292_v21 = vld [vmem:[%s9874_s5 + $0x2150] sm:$0xf] }
 0x177   : > { %v1294_v22 = vld [vmem:[%s9874_s5 + $0x2160] sm:$0xf]  ;;  %v1296_v23 = vld [vmem:[%s9874_s5 + $0x2170] sm:$0xf]  ;;  %1293 = vst [vmem:[%s9881_s6 + $0x854] sm:$0xf] %v1292_v21 }
 0x178   : > { %1295 = vst [vmem:[%s9881_s6 + $0x858] sm:$0xf] %v1294_v22  ;;  %1297 = vst [vmem:[%s9881_s6 + $0x85c] sm:$0xf] %v1296_v23  ;;  %v1298_v24 = vld [vmem:[%s9874_s5 + $0x2180] sm:$0xf] }
 0x179   : > { %v1300_v25 = vld [vmem:[%s9874_s5 + $0x2190] sm:$0xf]  ;;  %v1302_v26 = vld [vmem:[%s9874_s5 + $0x21a0] sm:$0xf]  ;;  %1299 = vst [vmem:[%s9881_s6 + $0x860] sm:$0xf] %v1298_v24 }
 0x17a   : > { %1301 = vst [vmem:[%s9881_s6 + $0x864] sm:$0xf] %v1300_v25  ;;  %1303 = vst [vmem:[%s9881_s6 + $0x868] sm:$0xf] %v1302_v26  ;;  %v1304_v27 = vld [vmem:[%s9874_s5 + $0x21b0] sm:$0xf] }
 0x17b   : > { %v1306_v28 = vld [vmem:[%s9874_s5 + $0x21c0] sm:$0xf]  ;;  %v1308_v29 = vld [vmem:[%s9874_s5 + $0x21d0] sm:$0xf]  ;;  %1305 = vst [vmem:[%s9881_s6 + $0x86c] sm:$0xf] %v1304_v27 }
 0x17c   : > { %1307 = vst [vmem:[%s9881_s6 + $0x870] sm:$0xf] %v1306_v28  ;;  %1309 = vst [vmem:[%s9881_s6 + $0x874] sm:$0xf] %v1308_v29  ;;  %v1310_v30 = vld [vmem:[%s9874_s5 + $0x21e0] sm:$0xf] }
 0x17d   : > { %v1312_v31 = vld [vmem:[%s9874_s5 + $0x21f0] sm:$0xf]  ;;  %v1314_v32 = vld [vmem:[%s9874_s5 + $0x2200] sm:$0xf]  ;;  %1311 = vst [vmem:[%s9881_s6 + $0x878] sm:$0xf] %v1310_v30 }
 0x17e   : > { %1313 = vst [vmem:[%s9881_s6 + $0x87c] sm:$0xf] %v1312_v31  ;;  %1315 = vst [vmem:[%s9881_s6 + $0x880] sm:$0xf] %v1314_v32  ;;  %v1316_v33 = vld [vmem:[%s9874_s5 + $0x2210] sm:$0xf] }
 0x17f   : > { %v1318_v34 = vld [vmem:[%s9874_s5 + $0x2220] sm:$0xf]  ;;  %v1320_v35 = vld [vmem:[%s9874_s5 + $0x2230] sm:$0xf]  ;;  %1317 = vst [vmem:[%s9881_s6 + $0x884] sm:$0xf] %v1316_v33 }
 0x180   : > { %1319 = vst [vmem:[%s9881_s6 + $0x888] sm:$0xf] %v1318_v34  ;;  %1321 = vst [vmem:[%s9881_s6 + $0x88c] sm:$0xf] %v1320_v35  ;;  %v1322_v36 = vld [vmem:[%s9874_s5 + $0x2240] sm:$0xf] }
 0x181   : > { %v1324_v37 = vld [vmem:[%s9874_s5 + $0x2250] sm:$0xf]  ;;  %v1326_v38 = vld [vmem:[%s9874_s5 + $0x2260] sm:$0xf]  ;;  %1323 = vst [vmem:[%s9881_s6 + $0x890] sm:$0xf] %v1322_v36 }
 0x182   : > { %1325 = vst [vmem:[%s9881_s6 + $0x894] sm:$0xf] %v1324_v37  ;;  %1327 = vst [vmem:[%s9881_s6 + $0x898] sm:$0xf] %v1326_v38  ;;  %v1328_v39 = vld [vmem:[%s9874_s5 + $0x2270] sm:$0xf] }
 0x183   : > { %v1330_v40 = vld [vmem:[%s9874_s5 + $0x2280] sm:$0xf]  ;;  %v1332_v41 = vld [vmem:[%s9874_s5 + $0x2290] sm:$0xf]  ;;  %1329 = vst [vmem:[%s9881_s6 + $0x89c] sm:$0xf] %v1328_v39 }
 0x184   : > { %1331 = vst [vmem:[%s9881_s6 + $0x8a0] sm:$0xf] %v1330_v40  ;;  %1333 = vst [vmem:[%s9881_s6 + $0x8a4] sm:$0xf] %v1332_v41  ;;  %v1334_v42 = vld [vmem:[%s9874_s5 + $0x22a0] sm:$0xf] }
 0x185   : > { %v1336_v43 = vld [vmem:[%s9874_s5 + $0x22b0] sm:$0xf]  ;;  %v1338_v44 = vld [vmem:[%s9874_s5 + $0x22c0] sm:$0xf]  ;;  %1335 = vst [vmem:[%s9881_s6 + $0x8a8] sm:$0xf] %v1334_v42 }
 0x186   : > { %1337 = vst [vmem:[%s9881_s6 + $0x8ac] sm:$0xf] %v1336_v43  ;;  %1339 = vst [vmem:[%s9881_s6 + $0x8b0] sm:$0xf] %v1338_v44  ;;  %v1340_v45 = vld [vmem:[%s9874_s5 + $0x22d0] sm:$0xf] }
 0x187   : > { %v1342_v46 = vld [vmem:[%s9874_s5 + $0x22e0] sm:$0xf]  ;;  %v1344_v47 = vld [vmem:[%s9874_s5 + $0x22f0] sm:$0xf]  ;;  %1341 = vst [vmem:[%s9881_s6 + $0x8b4] sm:$0xf] %v1340_v45 }
 0x188   : > { %1343 = vst [vmem:[%s9881_s6 + $0x8b8] sm:$0xf] %v1342_v46  ;;  %1345 = vst [vmem:[%s9881_s6 + $0x8bc] sm:$0xf] %v1344_v47  ;;  %v1346_v48 = vld [vmem:[%s9874_s5 + $0x2300] sm:$0xf] }
 0x189   : > { %v1348_v49 = vld [vmem:[%s9874_s5 + $0x2310] sm:$0xf]  ;;  %v1350_v50 = vld [vmem:[%s9874_s5 + $0x2320] sm:$0xf]  ;;  %1347 = vst [vmem:[%s9881_s6 + $0x8c0] sm:$0xf] %v1346_v48 }
 0x18a   : > { %1349 = vst [vmem:[%s9881_s6 + $0x8c4] sm:$0xf] %v1348_v49  ;;  %1351 = vst [vmem:[%s9881_s6 + $0x8c8] sm:$0xf] %v1350_v50  ;;  %v1352_v51 = vld [vmem:[%s9874_s5 + $0x2330] sm:$0xf] }
 0x18b   : > { %v1354_v52 = vld [vmem:[%s9874_s5 + $0x2340] sm:$0xf]  ;;  %v1356_v53 = vld [vmem:[%s9874_s5 + $0x2350] sm:$0xf]  ;;  %1353 = vst [vmem:[%s9881_s6 + $0x8cc] sm:$0xf] %v1352_v51 }
 0x18c   : > { %1355 = vst [vmem:[%s9881_s6 + $0x8d0] sm:$0xf] %v1354_v52  ;;  %1357 = vst [vmem:[%s9881_s6 + $0x8d4] sm:$0xf] %v1356_v53  ;;  %v1358_v54 = vld [vmem:[%s9874_s5 + $0x2360] sm:$0xf] }
 0x18d   : > { %v1360_v55 = vld [vmem:[%s9874_s5 + $0x2370] sm:$0xf]  ;;  %v1362_v56 = vld [vmem:[%s9874_s5 + $0x2380] sm:$0xf]  ;;  %1359 = vst [vmem:[%s9881_s6 + $0x8d8] sm:$0xf] %v1358_v54 }
 0x18e   : > { %1361 = vst [vmem:[%s9881_s6 + $0x8dc] sm:$0xf] %v1360_v55  ;;  %1363 = vst [vmem:[%s9881_s6 + $0x8e0] sm:$0xf] %v1362_v56  ;;  %v1364_v57 = vld [vmem:[%s9874_s5 + $0x2390] sm:$0xf] }
 0x18f   : > { %v1366_v58 = vld [vmem:[%s9874_s5 + $0x23a0] sm:$0xf]  ;;  %v1368_v59 = vld [vmem:[%s9874_s5 + $0x23b0] sm:$0xf]  ;;  %1365 = vst [vmem:[%s9881_s6 + $0x8e4] sm:$0xf] %v1364_v57 }
 0x190   : > { %1367 = vst [vmem:[%s9881_s6 + $0x8e8] sm:$0xf] %v1366_v58  ;;  %1369 = vst [vmem:[%s9881_s6 + $0x8ec] sm:$0xf] %v1368_v59  ;;  %v1370_v60 = vld [vmem:[%s9874_s5 + $0x23c0] sm:$0xf] }
 0x191   : > { %v1372_v61 = vld [vmem:[%s9874_s5 + $0x23d0] sm:$0xf]  ;;  %v1374_v62 = vld [vmem:[%s9874_s5 + $0x23e0] sm:$0xf]  ;;  %1371 = vst [vmem:[%s9881_s6 + $0x8f0] sm:$0xf] %v1370_v60 }
 0x192   : > { %1373 = vst [vmem:[%s9881_s6 + $0x8f4] sm:$0xf] %v1372_v61  ;;  %1375 = vst [vmem:[%s9881_s6 + $0x8f8] sm:$0xf] %v1374_v62  ;;  %v1376_v63 = vld [vmem:[%s9874_s5 + $0x23f0] sm:$0xf] }
 0x193   : > { %v1378_v0 = vld [vmem:[%s9874_s5 + $0x2400] sm:$0xf]  ;;  %v1380_v1 = vld [vmem:[%s9874_s5 + $0x2410] sm:$0xf]  ;;  %1377 = vst [vmem:[%s9881_s6 + $0x8fc] sm:$0xf] %v1376_v63 }
 0x194   : > { %1379 = vst [vmem:[%s9881_s6 + $0x900] sm:$0xf] %v1378_v0  ;;  %1381 = vst [vmem:[%s9881_s6 + $0x904] sm:$0xf] %v1380_v1  ;;  %v1382_v2 = vld [vmem:[%s9874_s5 + $0x2420] sm:$0xf] }
 0x195   : > { %v1384_v3 = vld [vmem:[%s9874_s5 + $0x2430] sm:$0xf]  ;;  %v1386_v4 = vld [vmem:[%s9874_s5 + $0x2440] sm:$0xf]  ;;  %1383 = vst [vmem:[%s9881_s6 + $0x908] sm:$0xf] %v1382_v2 }
 0x196   : > { %1385 = vst [vmem:[%s9881_s6 + $0x90c] sm:$0xf] %v1384_v3  ;;  %1387 = vst [vmem:[%s9881_s6 + $0x910] sm:$0xf] %v1386_v4  ;;  %v1388_v5 = vld [vmem:[%s9874_s5 + $0x2450] sm:$0xf] }
 0x197   : > { %v1390_v6 = vld [vmem:[%s9874_s5 + $0x2460] sm:$0xf]  ;;  %v1392_v7 = vld [vmem:[%s9874_s5 + $0x2470] sm:$0xf]  ;;  %1389 = vst [vmem:[%s9881_s6 + $0x914] sm:$0xf] %v1388_v5 }
 0x198   : > { %1391 = vst [vmem:[%s9881_s6 + $0x918] sm:$0xf] %v1390_v6  ;;  %1393 = vst [vmem:[%s9881_s6 + $0x91c] sm:$0xf] %v1392_v7  ;;  %v1394_v8 = vld [vmem:[%s9874_s5 + $0x2480] sm:$0xf] }
 0x199   : > { %1395 = vst [vmem:[%s9881_s6 + $0x920] sm:$0xf] %v1394_v8 }
 0x19a PF: > { %p8601_p8 = scmp.ge.s32.totalorder %s9796_s19, 1  ;;  %p4958_p9 = scmp.lt.s32.totalorder %s9796_s19, 5 }
 0x19c   : > { %p4959_p10 = pnand %p8601_p8, %p4958_p9 }
 0x19d   : > { %s4965_s7 = sand.u32 (!%p4959_p10), 1, %s9780_s15  }
 0x19e   : > { %4962 = sbr.rel (%p4959_p10) target bundleno = 946 (0x3b2), region = 84 }
 0x19f   : > { %s9364_s8 = smul.u32 (!%p4959_p10), 2340, %s4965_s7 }
 0x1a1   : > { %s11059_s13 = scalar_lea.vmem (!%p4959_p10), [#allocation2], %s9364_s8 }
 0x1a3   : > { %v9444_v9 = vld [vmem:[%s11494_s0 + $0x4] ss:$148 sps:$4 sm:$0xff]   ;;  %v9447_v10 = vld [vmem:[%s11494_s0 + $0xc] ss:$148 sps:$4 sm:$0xff]   ;;  %v9445_v43 = vld [vmem:[%s11494_s0 + $0x8] ss:$148 sps:$4 sm:$0xff]  }
 0x1a4   : > { %7629 = vmatprep.mubr.bf16.mxu0 %v9444_v9  ;;  %v9410_v11 = vld [vmem:[%s11059_s13 + $0x78] sm:$0xff]   ;;  %7670 = vmatprep.mubr.bf16.mxu1 %v9447_v10  ;;  %v9414_v15 = vld [vmem:[%s11059_s13 + $0x70] sm:$0xff]   ;;  %v9418_v19 = vld [vmem:[%s11059_s13 + $0x68] sm:$0xff]   ;;  %vm7593_vm0 = vcmask 1043456   ;;  %vm9800_vm1 = vmmov 0   ;;  %vm7589_vm2 = vcmask 588800  }
 0x1a5   : > { %v9411_v12 = vld [vmem:[%s11059_s13 + $0xf8] sm:$0xff]   ;;  %8947 = vmatprep.subr.bf16.mxu0 %v9410_v11  ;;  %v9415_v16 = vld [vmem:[%s11059_s13 + $0xf0] sm:$0xff]   ;;  %v9419_v20 = vld [vmem:[%s11059_s13 + $0xe8] sm:$0xff]   ;;  %s8937_s12 = sshll.u32 (%p9861_p6), %s9788_s17, 2 }
 0x1a6   : > { %v9412_v13 = vld [vmem:[%s11059_s13 + $0x38] sm:$0xff]   ;;  %8969 = vmatprep.subr.bf16.mxu1 %v9411_v12  ;;  %v9416_v17 = vld [vmem:[%s11059_s13 + $0x30] sm:$0xff]   ;;  %v9420_v21 = vld [vmem:[%s11059_s13 + $0x28] sm:$0xff]   ;;  %s8427_s22 = scalar_lea.vmem (%p9861_p6), %s11498_s4, %s8937_s12 }
 0x1a7   : > { %v9413_v14 = vld [vmem:[%s11059_s13 + $0xb8] sm:$0xff]   ;;  %8948 = vmatpush3.bf16.msra.mxu0 %v9412_v13  ;;  %v9417_v18 = vld [vmem:[%s11059_s13 + $0xb0] sm:$0xff]   ;;  %v9421_v22 = vld [vmem:[%s11059_s13 + $0xa8] sm:$0xff]  }
 0x1a8   : > { %8970 = vmatpush3.bf16.msra.mxu1 %v9413_v14  ;;  %8949 = vmatprep.subr.bf16.mxu0 %v9414_v15  ;;  %v9422_v23 = vld [vmem:[%s11059_s13 + $0x60] sm:$0xff]   ;;  %v9426_v27 = vld [vmem:[%s11059_s13 + $0x58] sm:$0xff]   ;;  %v9430_v31 = vld [vmem:[%s11059_s13 + $0x50] sm:$0xff]  }
 0x1a9   : > { %8971 = vmatprep.subr.bf16.mxu1 %v9415_v16  ;;  %v9423_v24 = vld [vmem:[%s11059_s13 + $0xe0] sm:$0xff]   ;;  %v9427_v28 = vld [vmem:[%s11059_s13 + $0xd8] sm:$0xff]   ;;  %v9431_v32 = vld [vmem:[%s11059_s13 + $0xd0] sm:$0xff]  }
 0x1aa   : > { %v9424_v25 = vld [vmem:[%s11059_s13 + $0x20] sm:$0xff]   ;;  %v9428_v29 = vld [vmem:[%s11059_s13 + $0x18] sm:$0xff]   ;;  %v9432_v33 = vld [vmem:[%s11059_s13 + $0x10] sm:$0xff]  }
 0x1ab   : > { %8950 = vmatpush3.bf16.msra.mxu0 %v9416_v17  ;;  %v9425_v26 = vld [vmem:[%s11059_s13 + $0xa0] sm:$0xff]   ;;  %v9429_v30 = vld [vmem:[%s11059_s13 + $0x98] sm:$0xff]   ;;  %v9433_v34 = vld [vmem:[%s11059_s13 + $0x90] sm:$0xff]  }
 0x1ac   : > { %8972 = vmatpush3.bf16.msra.mxu1 %v9417_v18  ;;  %8951 = vmatprep.subr.bf16.mxu0 %v9418_v19  ;;  %v9434_v35 = vld [vmem:[%s11059_s13 + $0x48] sm:$0xff]   ;;  %v9438_v39 = vld [vmem:[%s11059_s13 + $0x40] sm:$0xff]   ;;  %v9448_v46 = vld [vmem:[%s11059_s13 + $0x178] sm:$0xff]  }
 0x1ad   : > { %8973 = vmatprep.subr.bf16.mxu1 %v9419_v20  ;;  %v9435_v36 = vld [vmem:[%s11059_s13 + $0xc8] sm:$0xff]   ;;  %v9439_v40 = vld [vmem:[%s11059_s13 + $0xc0] sm:$0xff]   ;;  %v9449_v47 = vld [vmem:[%s11059_s13 + $0x138] sm:$0xff]  }
 0x1ae   : > { %v9436_v37 = vld [vmem:[%s11059_s13 + $0x8] sm:$0xff]   ;;  %v9442_v41 = vld [vmem:[%s11494_s0] ss:$148 sps:$4 sm:$0xff]  }
 0x1af   : > { %8952 = vmatpush3.bf16.msra.mxu0 %v9420_v21  ;;  %v9437_v38 = vld [vmem:[%s11059_s13 + $0x88] sm:$0xff]   ;;  %v9440_v42 = vld [vmem:[%s11059_s13] sm:$0xff]   ;;  %v9450_v48 = vld [vmem:[%s11059_s13 + $0x1f8] sm:$0xff]  }
 0x1b0   : > { %8974 = vmatpush3.bf16.msra.mxu1 %v9421_v22  ;;  %8953 = vmatprep.subr.bf16.mxu0 %v9422_v23  ;;  %v9441_v44 = vld [vmem:[%s11059_s13 + $0x80] sm:$0xff]   ;;  %v9451_v49 = vld [vmem:[%s11059_s13 + $0x1b8] sm:$0xff]   ;;  %v9452_v50 = vld [vmem:[%s11059_s13 + $0x170] sm:$0xff]  }
 0x1b1   : > { %8975 = vmatprep.subr.bf16.mxu1 %v9423_v24  ;;  %v9481_v45 = vld [vmem:[%s11494_s0 + $0x14] ss:$148 sps:$4 sm:$0xff]   ;;  %v9464_v62 = vld [vmem:[%s11059_s13 + $0x158] sm:$0xff]   ;;  %v9479_v12 = vld [vmem:[%s11494_s0 + $0x10] ss:$148 sps:$4 sm:$0xff]  }
 0x1b2   : > { %v9453_v51 = vld [vmem:[%s11059_s13 + $0x130] sm:$0xff]   ;;  %v9456_v54 = vld [vmem:[%s11059_s13 + $0x168] sm:$0xff]   ;;  %v9460_v58 = vld [vmem:[%s11059_s13 + $0x160] sm:$0xff]  }
 0x1b3   : > { %8954 = vmatpush3.bf16.msra.mxu0 %v9424_v25  ;;  %v9454_v52 = vld [vmem:[%s11059_s13 + $0x1f0] sm:$0xff]   ;;  %v9457_v55 = vld [vmem:[%s11059_s13 + $0x128] sm:$0xff]   ;;  %v9461_v59 = vld [vmem:[%s11059_s13 + $0x120] sm:$0xff]  }
 0x1b4   : > { %8976 = vmatpush3.bf16.msra.mxu1 %v9425_v26  ;;  %8955 = vmatprep.subr.bf16.mxu0 %v9426_v27  ;;  %v9455_v53 = vld [vmem:[%s11059_s13 + $0x1b0] sm:$0xff]   ;;  %v9458_v56 = vld [vmem:[%s11059_s13 + $0x1e8] sm:$0xff]   ;;  %v9462_v60 = vld [vmem:[%s11059_s13 + $0x1e0] sm:$0xff]  }
 0x1b5   : > { %8977 = vmatprep.subr.bf16.mxu1 %v9427_v28  ;;  %v9459_v57 = vld [vmem:[%s11059_s13 + $0x1a8] sm:$0xff]   ;;  %v9463_v61 = vld [vmem:[%s11059_s13 + $0x1a0] sm:$0xff]   ;;  %v9465_v63 = vld [vmem:[%s11059_s13 + $0x118] sm:$0xff]  }
 0x1b6   : > { %v9466_v0 = vld [vmem:[%s11059_s13 + $0x1d8] sm:$0xff]   ;;  %v9468_v2 = vld [vmem:[%s11059_s13 + $0x150] sm:$0xff]   ;;  %v9472_v6 = vld [vmem:[%s11059_s13 + $0x148] sm:$0xff]  }
 0x1b7   : > { %8956 = vmatpush3.bf16.msra.mxu0 %v9428_v29  ;;  %v9467_v1 = vld [vmem:[%s11059_s13 + $0x198] sm:$0xff]   ;;  %v9469_v3 = vld [vmem:[%s11059_s13 + $0x110] sm:$0xff]   ;;  %v9473_v7 = vld [vmem:[%s11059_s13 + $0x108] sm:$0xff]  }
 0x1b8   : > { %8978 = vmatpush3.bf16.msra.mxu1 %v9429_v30  ;;  %8957 = vmatprep.subr.bf16.mxu0 %v9430_v31  ;;  %v9470_v4 = vld [vmem:[%s11059_s13 + $0x1d0] sm:$0xff]   ;;  %v9474_v8 = vld [vmem:[%s11059_s13 + $0x1c8] sm:$0xff]   ;;  %v9476_v10 = vld [vmem:[%s11059_s13 + $0x140] sm:$0xff]  }
 0x1b9   : > { %8979 = vmatprep.subr.bf16.mxu1 %v9431_v32  ;;  %v9471_v5 = vld [vmem:[%s11059_s13 + $0x190] sm:$0xff]   ;;  %v9475_v9 = vld [vmem:[%s11059_s13 + $0x188] sm:$0xff]   ;;  %v9477_v11 = vld [vmem:[%s11059_s13 + $0x100] sm:$0xff]  }
 0x1ba   : > { %v9478_v13 = vld [vmem:[%s11059_s13 + $0x1c0] sm:$0xff]   ;;  %v9483_v15 = vld [vmem:[%s11059_s13 + $0x278] sm:$0xff]   ;;  %v9490_v21 = vld [vmem:[%s11059_s13 + $0x270] sm:$0xff]  }
 0x1bb   : > { %8958 = vmatpush3.bf16.msra.mxu0 %v9432_v33  ;;  %v9482_v14 = vld [vmem:[%s11059_s13 + $0x180] sm:$0xff]   ;;  %v9484_v16 = vld [vmem:[%s11494_s0 + $0x18] ss:$148 sps:$4 sm:$0xff]   ;;  %v9486_v17 = vld [vmem:[%s11494_s0 + $0x1c] ss:$148 sps:$4 sm:$0xff]  }
 0x1bc   : > { %8980 = vmatpush3.bf16.msra.mxu1 %v9433_v34  ;;  %8959 = vmatprep.subr.bf16.mxu0 %v9434_v35  ;;  %v9487_v18 = vld [vmem:[%s11059_s13 + $0x238] sm:$0xff]   ;;  %v9491_v22 = vld [vmem:[%s11059_s13 + $0x230] sm:$0xff]   ;;  %v9494_v25 = vld [vmem:[%s11059_s13 + $0x268] sm:$0xff]  }
 0x1bd   : > { %8981 = vmatprep.subr.bf16.mxu1 %v9435_v36  ;;  %v9488_v19 = vld [vmem:[%s11059_s13 + $0x2f8] sm:$0xff]   ;;  %v9492_v23 = vld [vmem:[%s11059_s13 + $0x2f0] sm:$0xff]   ;;  %v9495_v26 = vld [vmem:[%s11059_s13 + $0x228] sm:$0xff]  }
 0x1be   : > { %v9489_v20 = vld [vmem:[%s11059_s13 + $0x2b8] sm:$0xff]   ;;  %v9493_v24 = vld [vmem:[%s11059_s13 + $0x2b0] sm:$0xff]   ;;  %v9496_v27 = vld [vmem:[%s11059_s13 + $0x2e8] sm:$0xff]  }
 0x1bf   : > { %8960 = vmatpush3.bf16.msra.mxu0 %v9436_v37  ;;  %v9497_v28 = vld [vmem:[%s11059_s13 + $0x2a8] sm:$0xff]   ;;  %v9498_v29 = vld [vmem:[%s11059_s13 + $0x260] sm:$0xff]   ;;  %v9502_v33 = vld [vmem:[%s11059_s13 + $0x258] sm:$0xff]  }
 0x1c0   : > { %8982 = vmatpush3.bf16.msra.mxu1 %v9437_v38  ;;  %8961 = vmatprep.subr.bf16.mxu0 %v9438_v39  ;;  %v9499_v30 = vld [vmem:[%s11059_s13 + $0x220] sm:$0xff]   ;;  %v9503_v34 = vld [vmem:[%s11059_s13 + $0x218] sm:$0xff]   ;;  %v9506_v37 = vld [vmem:[%s11059_s13 + $0x250] sm:$0xff]  }
 0x1c1   : > { %8983 = vmatprep.subr.bf16.mxu1 %v9439_v40  ;;  %v9500_v31 = vld [vmem:[%s11059_s13 + $0x2e0] sm:$0xff]   ;;  %v9504_v35 = vld [vmem:[%s11059_s13 + $0x2d8] sm:$0xff]   ;;  %v9507_v38 = vld [vmem:[%s11059_s13 + $0x210] sm:$0xff]  }
 0x1c2   : > { %v9501_v32 = vld [vmem:[%s11059_s13 + $0x2a0] sm:$0xff]   ;;  %v9505_v36 = vld [vmem:[%s11059_s13 + $0x298] sm:$0xff]   ;;  %v9508_v39 = vld [vmem:[%s11059_s13 + $0x2d0] sm:$0xff]  }
 0x1c3   : > { %8962 = vmatpush3.bf16.msra.mxu0 %v9440_v42  ;;  %v9509_v40 = vld [vmem:[%s11059_s13 + $0x290] sm:$0xff]   ;;  %v9511_v42 = vld [vmem:[%s11059_s13 + $0x208] sm:$0xff]  }
 0x1c4   : > { %8984 = vmatpush3.bf16.msra.mxu1 %v9441_v44  ;;  %8991 = vmatprep.subr.bf16.mxu0 %v9448_v46  ;;  %v9513_v44 = vld [vmem:[%s11059_s13 + $0x288] sm:$0xff]   ;;  %v9515_v46 = vld [vmem:[%s11059_s13 + $0x200] sm:$0xff]  }
 0x1c5   : > { %9013 = vmatprep.subr.bf16.mxu1 %v9450_v48  ;;  %v9517_v48 = vld [vmem:[%s11494_s0 + $0x20] ss:$148 sps:$4 sm:$0xff]  }
 0x1c6   : > { %7630 = vmatmul.mubr.bf16.vlgmr.msra.gmra.mxu0 %v9442_v41  ;;  %v9510_v41 = vld [vmem:[%s11059_s13 + $0x248] sm:$0xff]  }
 0x1c7   : > { %7671 = vmatmul.mubr.bf16.vlgmr.msra.gmra.mxu1 %v9445_v43  ;;  %8992 = vmatpush3.bf16.msra.mxu0 %v9449_v47  ;;  %v9512_v43 = vld [vmem:[%s11059_s13 + $0x2c8] sm:$0xff]   ;;  %v9516_v47 = vld [vmem:[%s11059_s13 + $0x2c0] sm:$0xff]  }
 0x1c8   : > { %7711 = vmatprep.mubr.bf16.mxu0 %v9481_v45  ;;  %9014 = vmatpush3.bf16.msra.mxu1 %v9451_v49  ;;  %v9514_v45 = vld [vmem:[%s11059_s13 + $0x240] sm:$0xff]  }
 0x1c9   : > { %8993 = vmatprep.subr.bf16.mxu0 %v9452_v50  ;;  %9015 = vmatprep.subr.bf16.mxu1 %v9454_v52  ;;  %v9519_v49 = vld [vmem:[%s11494_s0 + $0x24] ss:$148 sps:$4 sm:$0xff]   ;;  %v9522_v52 = vld [vmem:[%s11494_s0 + $0x28] ss:$148 sps:$4 sm:$0xff]  }
 0x1ca   : > { %7752 = vmatprep.mubr.bf16.mxu1 %v9486_v17  ;;  %v9520_v50 = vld [vmem:[%s11059_s13 + $0x280] sm:$0xff]  }
 0x1cb   : > { %8994 = vmatpush3.bf16.msra.mxu0 %v9453_v51  ;;  %v9521_v51 = vld [vmem:[%s11059_s13 + $0x378] sm:$0xff]   ;;  %v9552_v17 = vld [vmem:[%s11059_s13 + $0x340] sm:$0xff]  }
 0x1cc   : > { %9016 = vmatpush3.bf16.msra.mxu1 %v9455_v53  ;;  %8995 = vmatprep.subr.bf16.mxu0 %v9456_v54  ;;  %v9524_v53 = vld [vmem:[%s11494_s0 + $0x2c] ss:$148 sps:$4 sm:$0xff]  }
 0x1cd   : > { %9017 = vmatprep.subr.bf16.mxu1 %v9458_v56  ;;  %v9525_v54 = vld [vmem:[%s11059_s13 + $0x338] sm:$0xff]  }
 0x1ce   : > { %v9527_v56 = vld [vmem:[%s11059_s13 + $0x3b8] sm:$0xff]  }
 0x1cf   : > { %8996 = vmatpush3.bf16.msra.mxu0 %v9457_v55  ;;  %v9526_v55 = vld [vmem:[%s11059_s13 + $0x3f8] sm:$0xff]  }
 0x1d0   : > { %9018 = vmatpush3.bf16.msra.mxu1 %v9459_v57  ;;  %8997 = vmatprep.subr.bf16.mxu0 %v9460_v58  ;;  %v9528_v57 = vld [vmem:[%s11059_s13 + $0x370] sm:$0xff]  }
 0x1d1   : > { %9019 = vmatprep.subr.bf16.mxu1 %v9462_v60  ;;  %v9529_v58 = vld [vmem:[%s11059_s13 + $0x330] sm:$0xff]  }
 0x1d2   : > { %v9531_v60 = vld [vmem:[%s11059_s13 + $0x3b0] sm:$0xff]  }
 0x1d3   : > { %8998 = vmatpush3.bf16.msra.mxu0 %v9461_v59  ;;  %v9530_v59 = vld [vmem:[%s11059_s13 + $0x3f0] sm:$0xff]  }
 0x1d4   : > { %9020 = vmatpush3.bf16.msra.mxu1 %v9463_v61  ;;  %8999 = vmatprep.subr.bf16.mxu0 %v9464_v62  ;;  %v9532_v61 = vld [vmem:[%s11059_s13 + $0x368] sm:$0xff]  }
 0x1d5   : > { %9021 = vmatprep.subr.bf16.mxu1 %v9466_v0  ;;  %v9533_v62 = vld [vmem:[%s11059_s13 + $0x328] sm:$0xff]  }
 0x1d6   : > { %v9535_v0 = vld [vmem:[%s11059_s13 + $0x3a8] sm:$0xff]  }
 0x1d7   : > { %9000 = vmatpush3.bf16.msra.mxu0 %v9465_v63  ;;  %v9534_v63 = vld [vmem:[%s11059_s13 + $0x3e8] sm:$0xff]  }
 0x1d8   : > { %9022 = vmatpush3.bf16.msra.mxu1 %v9467_v1  ;;  %9001 = vmatprep.subr.bf16.mxu0 %v9468_v2  ;;  %v9536_v1 = vld [vmem:[%s11059_s13 + $0x360] sm:$0xff]  }
 0x1d9   : > { %9023 = vmatprep.subr.bf16.mxu1 %v9470_v4  ;;  %v9537_v2 = vld [vmem:[%s11059_s13 + $0x320] sm:$0xff]  }
 0x1da   : > { %v9539_v4 = vld [vmem:[%s11059_s13 + $0x3a0] sm:$0xff]  }
 0x1db   : > { %9002 = vmatpush3.bf16.msra.mxu0 %v9469_v3  ;;  %v9538_v3 = vld [vmem:[%s11059_s13 + $0x3e0] sm:$0xff]  }
 0x1dc   : > { %9024 = vmatpush3.bf16.msra.mxu1 %v9471_v5  ;;  %9003 = vmatprep.subr.bf16.mxu0 %v9472_v6  ;;  %v9540_v5 = vld [vmem:[%s11059_s13 + $0x358] sm:$0xff]  }
 0x1dd   : > { %9025 = vmatprep.subr.bf16.mxu1 %v9474_v8  ;;  %v9541_v6 = vld [vmem:[%s11059_s13 + $0x318] sm:$0xff]  }
 0x1de   : > { %v9543_v8 = vld [vmem:[%s11059_s13 + $0x398] sm:$0xff]  }
 0x1df   : > { %9004 = vmatpush3.bf16.msra.mxu0 %v9473_v7  ;;  %v9542_v7 = vld [vmem:[%s11059_s13 + $0x3d8] sm:$0xff]  }
 0x1e0   : > { %9026 = vmatpush3.bf16.msra.mxu1 %v9475_v9  ;;  %9005 = vmatprep.subr.bf16.mxu0 %v9476_v10  ;;  %v9544_v9 = vld [vmem:[%s11059_s13 + $0x350] sm:$0xff]  }
 0x1e1   : > { %9027 = vmatprep.subr.bf16.mxu1 %v9478_v13  ;;  %v9545_v10 = vld [vmem:[%s11059_s13 + $0x310] sm:$0xff]   ;;  %v9548_v13 = vld [vmem:[%s11059_s13 + $0x348] sm:$0xff]  }
 0x1e3   : > { %9006 = vmatpush3.bf16.msra.mxu0 %v9477_v11  ;;  %v9546_v11 = vld [vmem:[%s11059_s13 + $0x3d0] sm:$0xff]  }
 0x1e4   : > { %9028 = vmatpush3.bf16.msra.mxu1 %v9482_v14  ;;  %9035 = vmatprep.subr.bf16.mxu0 %v9483_v15  ;;  %v9549_v14 = vld [vmem:[%s11059_s13 + $0x308] sm:$0xff]  }
 0x1e5   : > { %9057 = vmatprep.subr.bf16.mxu1 %v9488_v19  ;;  %v9550_v15 = vld [vmem:[%s11059_s13 + $0x3c8] sm:$0xff]   ;;  %v9554_v19 = vld [vmem:[%s11059_s13 + $0x3c0] sm:$0xff]  }
 0x1e6   : > { %7712 = vmatmul.mubr.bf16.vlgmr.msra.gmra.mxu0 %v9479_v12  ;;  %v9547_v12 = vld [vmem:[%s11059_s13 + $0x390] sm:$0xff]  }
 0x1e7   : > { %9036 = vmatpush3.bf16.msra.mxu0 %v9487_v18  ;;  %7753 = vmatmul.mubr.bf16.vlgmr.msra.gmra.mxu1 %v9484_v16  ;;  %v9551_v16 = vld [vmem:[%s11059_s13 + $0x388] sm:$0xff]   ;;  %v9553_v18 = vld [vmem:[%s11059_s13 + $0x300] sm:$0xff]  }
 0x1e8   : > { %9058 = vmatpush3.bf16.msra.mxu1 %v9489_v20  ;;  %9037 = vmatprep.subr.bf16.mxu0 %v9490_v21  ;;  %v9555_v20 = vld [vmem:[%s11494_s0 + $0x30] ss:$148 sps:$4 sm:$0xff]   ;;  %v9557_v21 = vld [vmem:[%s11494_s0 + $0x34] ss:$148 sps:$4 sm:$0xff]  }
 0x1e9   : > { %9059 = vmatprep.subr.bf16.mxu1 %v9492_v23  ;;  %7793 = vmatprep.mubr.bf16.mxu0 %v9519_v49  ;;  %v9559_v23 = vld [vmem:[%s11059_s13 + $0x478] sm:$0xff]   ;;  %v9586_v49 = vld [vmem:[%s11059_s13 + $0x448] sm:$0xff]  }
 0x1ea   : > { %7834 = vmatprep.mubr.bf16.mxu1 %v9524_v53  ;;  %v9590_v53 = vld [vmem:[%s11059_s13 + $0x440] sm:$0xff]  }
 0x1eb   : > { %9038 = vmatpush3.bf16.msra.mxu0 %v9491_v22  ;;  %v9558_v22 = vld [vmem:[%s11059_s13 + $0x380] sm:$0xff]  }
 0x1ec   : > { %9060 = vmatpush3.bf16.msra.mxu1 %v9493_v24  ;;  %9039 = vmatprep.subr.bf16.mxu0 %v9494_v25  ;;  %v9560_v24 = vld [vmem:[%s11494_s0 + $0x38] ss:$148 sps:$4 sm:$0xff]   ;;  %v9562_v25 = vld [vmem:[%s11494_s0 + $0x3c] ss:$148 sps:$4 sm:$0xff]  }
 0x1ed   : > { %9061 = vmatprep.subr.bf16.mxu1 %v9496_v27  ;;  %v9564_v27 = vld [vmem:[%s11059_s13 + $0x4f8] sm:$0xff]  }
 0x1ef   : > { %9040 = vmatpush3.bf16.msra.mxu0 %v9495_v26  ;;  %v9563_v26 = vld [vmem:[%s11059_s13 + $0x438] sm:$0xff]  }
 0x1f0   : > { %9062 = vmatpush3.bf16.msra.mxu1 %v9497_v28  ;;  %9041 = vmatprep.subr.bf16.mxu0 %v9498_v29  ;;  %v9565_v28 = vld [vmem:[%s11059_s13 + $0x4b8] sm:$0xff]   ;;  %v9566_v29 = vld [vmem:[%s11059_s13 + $0x470] sm:$0xff]  }
 0x1f1   : > { %9063 = vmatprep.subr.bf16.mxu1 %v9500_v31  ;;  %v9568_v31 = vld [vmem:[%s11059_s13 + $0x4f0] sm:$0xff]  }
 0x1f3   : > { %9042 = vmatpush3.bf16.msra.mxu0 %v9499_v30  ;;  %v9567_v30 = vld [vmem:[%s11059_s13 + $0x430] sm:$0xff]  }
 0x1f4   : > { %9064 = vmatpush3.bf16.msra.mxu1 %v9501_v32  ;;  %9043 = vmatprep.subr.bf16.mxu0 %v9502_v33  ;;  %v9569_v32 = vld [vmem:[%s11059_s13 + $0x4b0] sm:$0xff]   ;;  %v9570_v33 = vld [vmem:[%s11059_s13 + $0x468] sm:$0xff]  }
 0x1f5   : > { %9065 = vmatprep.subr.bf16.mxu1 %v9504_v35  ;;  %v9572_v35 = vld [vmem:[%s11059_s13 + $0x4e8] sm:$0xff]  }
 0x1f7   : > { %9044 = vmatpush3.bf16.msra.mxu0 %v9503_v34  ;;  %v9571_v34 = vld [vmem:[%s11059_s13 + $0x428] sm:$0xff]  }
 0x1f8   : > { %9066 = vmatpush3.bf16.msra.mxu1 %v9505_v36  ;;  %9045 = vmatprep.subr.bf16.mxu0 %v9506_v37  ;;  %v9573_v36 = vld [vmem:[%s11059_s13 + $0x4a8] sm:$0xff]   ;;  %v9574_v37 = vld [vmem:[%s11059_s13 + $0x460] sm:$0xff]  }
 0x1f9   : > { %9067 = vmatprep.subr.bf16.mxu1 %v9508_v39  ;;  %v9576_v39 = vld [vmem:[%s11059_s13 + $0x4e0] sm:$0xff]  }
 0x1fb   : > { %9046 = vmatpush3.bf16.msra.mxu0 %v9507_v38  ;;  %v9575_v38 = vld [vmem:[%s11059_s13 + $0x420] sm:$0xff]  }
 0x1fc   : > { %9068 = vmatpush3.bf16.msra.mxu1 %v9509_v40  ;;  %9047 = vmatprep.subr.bf16.mxu0 %v9510_v41  ;;  %v9577_v40 = vld [vmem:[%s11059_s13 + $0x4a0] sm:$0xff]   ;;  %v9578_v41 = vld [vmem:[%s11059_s13 + $0x458] sm:$0xff]  }
 0x1fd   : > { %9069 = vmatprep.subr.bf16.mxu1 %v9512_v43  ;;  %v9580_v43 = vld [vmem:[%s11059_s13 + $0x4d8] sm:$0xff]  }
 0x1ff   : > { %9048 = vmatpush3.bf16.msra.mxu0 %v9511_v42  ;;  %v9579_v42 = vld [vmem:[%s11059_s13 + $0x418] sm:$0xff]  }
 0x200   : > { %9070 = vmatpush3.bf16.msra.mxu1 %v9513_v44  ;;  %9049 = vmatprep.subr.bf16.mxu0 %v9514_v45  ;;  %v9581_v44 = vld [vmem:[%s11059_s13 + $0x498] sm:$0xff]   ;;  %v9582_v45 = vld [vmem:[%s11059_s13 + $0x450] sm:$0xff]  }
 0x201   : > { %9071 = vmatprep.subr.bf16.mxu1 %v9516_v47  ;;  %v9584_v47 = vld [vmem:[%s11059_s13 + $0x4d0] sm:$0xff]  }
 0x203   : > { %9050 = vmatpush3.bf16.msra.mxu0 %v9515_v46  ;;  %v9583_v46 = vld [vmem:[%s11059_s13 + $0x410] sm:$0xff]  }
 0x204   : > { %9072 = vmatpush3.bf16.msra.mxu1 %v9520_v50  ;;  %9079 = vmatprep.subr.bf16.mxu0 %v9521_v51  ;;  %v9587_v50 = vld [vmem:[%s11059_s13 + $0x408] sm:$0xff]  }
 0x205   : > { %9101 = vmatprep.subr.bf16.mxu1 %v9526_v55  ;;  %v9588_v51 = vld [vmem:[%s11059_s13 + $0x4c8] sm:$0xff]   ;;  %v9592_v55 = vld [vmem:[%s11059_s13 + $0x4c0] sm:$0xff]  }
 0x206   : > { %7794 = vmatmul.mubr.bf16.vlgmr.msra.gmra.mxu0 %v9517_v48  ;;  %v9585_v48 = vld [vmem:[%s11059_s13 + $0x490] sm:$0xff]  }
 0x207   : > { %9080 = vmatpush3.bf16.msra.mxu0 %v9525_v54  ;;  %7835 = vmatmul.mubr.bf16.vlgmr.msra.gmra.mxu1 %v9522_v52  ;;  %v9589_v52 = vld [vmem:[%s11059_s13 + $0x488] sm:$0xff]   ;;  %v9591_v54 = vld [vmem:[%s11059_s13 + $0x400] sm:$0xff]  }
 0x208   : > { %9102 = vmatpush3.bf16.msra.mxu1 %v9527_v56  ;;  %9081 = vmatprep.subr.bf16.mxu0 %v9528_v57  ;;  %v9593_v56 = vld [vmem:[%s11494_s0 + $0x40] ss:$148 sps:$4 sm:$0xff]   ;;  %v9595_v57 = vld [vmem:[%s11494_s0 + $0x44] ss:$148 sps:$4 sm:$0xff]  }
 0x209   : > { %9103 = vmatprep.subr.bf16.mxu1 %v9530_v59  ;;  %7875 = vmatprep.mubr.bf16.mxu0 %v9557_v21  ;;  %v9597_v59 = vld [vmem:[%s11059_s13 + $0x578] sm:$0xff]   ;;  %v9624_v21 = vld [vmem:[%s11059_s13 + $0x548] sm:$0xff]  }
 0x20a   : > { %7916 = vmatprep.mubr.bf16.mxu1 %v9562_v25  ;;  %v9628_v25 = vld [vmem:[%s11059_s13 + $0x540] sm:$0xff]  }
 0x20b   : > { %9082 = vmatpush3.bf16.msra.mxu0 %v9529_v58  ;;  %v9596_v58 = vld [vmem:[%s11059_s13 + $0x480] sm:$0xff]  }
 0x20c   : > { %9104 = vmatpush3.bf16.msra.mxu1 %v9531_v60  ;;  %9083 = vmatprep.subr.bf16.mxu0 %v9532_v61  ;;  %v9598_v60 = vld [vmem:[%s11494_s0 + $0x48] ss:$148 sps:$4 sm:$0xff]   ;;  %v9600_v61 = vld [vmem:[%s11494_s0 + $0x4c] ss:$148 sps:$4 sm:$0xff]  }
 0x20d   : > { %9105 = vmatprep.subr.bf16.mxu1 %v9534_v63  ;;  %v9602_v63 = vld [vmem:[%s11059_s13 + $0x5f8] sm:$0xff]  }
 0x20f   : > { %9084 = vmatpush3.bf16.msra.mxu0 %v9533_v62  ;;  %v9601_v62 = vld [vmem:[%s11059_s13 + $0x538] sm:$0xff]  }
 0x210   : > { %9106 = vmatpush3.bf16.msra.mxu1 %v9535_v0  ;;  %9085 = vmatprep.subr.bf16.mxu0 %v9536_v1  ;;  %v9603_v0 = vld [vmem:[%s11059_s13 + $0x5b8] sm:$0xff]   ;;  %v9604_v1 = vld [vmem:[%s11059_s13 + $0x570] sm:$0xff]  }
 0x211   : > { %9107 = vmatprep.subr.bf16.mxu1 %v9538_v3  ;;  %v9606_v3 = vld [vmem:[%s11059_s13 + $0x5f0] sm:$0xff]  }
 0x213   : > { %9086 = vmatpush3.bf16.msra.mxu0 %v9537_v2  ;;  %v9605_v2 = vld [vmem:[%s11059_s13 + $0x530] sm:$0xff]  }
 0x214   : > { %9108 = vmatpush3.bf16.msra.mxu1 %v9539_v4  ;;  %9087 = vmatprep.subr.bf16.mxu0 %v9540_v5  ;;  %v9607_v4 = vld [vmem:[%s11059_s13 + $0x5b0] sm:$0xff]   ;;  %v9608_v5 = vld [vmem:[%s11059_s13 + $0x568] sm:$0xff]  }
 0x215   : > { %9109 = vmatprep.subr.bf16.mxu1 %v9542_v7  ;;  %v9610_v7 = vld [vmem:[%s11059_s13 + $0x5e8] sm:$0xff]  }
 0x217   : > { %9088 = vmatpush3.bf16.msra.mxu0 %v9541_v6  ;;  %v9609_v6 = vld [vmem:[%s11059_s13 + $0x528] sm:$0xff]  }
 0x218   : > { %9110 = vmatpush3.bf16.msra.mxu1 %v9543_v8  ;;  %9089 = vmatprep.subr.bf16.mxu0 %v9544_v9  ;;  %v9611_v8 = vld [vmem:[%s11059_s13 + $0x5a8] sm:$0xff]   ;;  %v9612_v9 = vld [vmem:[%s11059_s13 + $0x560] sm:$0xff]  }
 0x219   : > { %9111 = vmatprep.subr.bf16.mxu1 %v9546_v11  ;;  %v9614_v11 = vld [vmem:[%s11059_s13 + $0x5e0] sm:$0xff]  }
 0x21b   : > { %9090 = vmatpush3.bf16.msra.mxu0 %v9545_v10  ;;  %v9613_v10 = vld [vmem:[%s11059_s13 + $0x520] sm:$0xff]  }
 0x21c   : > { %9112 = vmatpush3.bf16.msra.mxu1 %v9547_v12  ;;  %9091 = vmatprep.subr.bf16.mxu0 %v9548_v13  ;;  %v9615_v12 = vld [vmem:[%s11059_s13 + $0x5a0] sm:$0xff]   ;;  %v9616_v13 = vld [vmem:[%s11059_s13 + $0x558] sm:$0xff]  }
 0x21d   : > { %9113 = vmatprep.subr.bf16.mxu1 %v9550_v15  ;;  %v9618_v15 = vld [vmem:[%s11059_s13 + $0x5d8] sm:$0xff]  }
 0x21f   : > { %9092 = vmatpush3.bf16.msra.mxu0 %v9549_v14  ;;  %v9617_v14 = vld [vmem:[%s11059_s13 + $0x518] sm:$0xff]  }
 0x220   : > { %9114 = vmatpush3.bf16.msra.mxu1 %v9551_v16  ;;  %9093 = vmatprep.subr.bf16.mxu0 %v9552_v17  ;;  %v9619_v16 = vld [vmem:[%s11059_s13 + $0x598] sm:$0xff]   ;;  %v9620_v17 = vld [vmem:[%s11059_s13 + $0x550] sm:$0xff]  }
 0x221   : > { %9115 = vmatprep.subr.bf16.mxu1 %v9554_v19  ;;  %v9622_v19 = vld [vmem:[%s11059_s13 + $0x5d0] sm:$0xff]  }
 0x223   : > { %9094 = vmatpush3.bf16.msra.mxu0 %v9553_v18  ;;  %v9621_v18 = vld [vmem:[%s11059_s13 + $0x510] sm:$0xff]  }
 0x224   : > { %9116 = vmatpush3.bf16.msra.mxu1 %v9558_v22  ;;  %9123 = vmatprep.subr.bf16.mxu0 %v9559_v23  ;;  %v9625_v22 = vld [vmem:[%s11059_s13 + $0x508] sm:$0xff]  }
 0x225   : > { %9145 = vmatprep.subr.bf16.mxu1 %v9564_v27  ;;  %v9626_v23 = vld [vmem:[%s11059_s13 + $0x5c8] sm:$0xff]   ;;  %v9630_v27 = vld [vmem:[%s11059_s13 + $0x5c0] sm:$0xff]  }
 0x226   : > { %7876 = vmatmul.mubr.bf16.vlgmr.msra.gmra.mxu0 %v9555_v20  ;;  %v9623_v20 = vld [vmem:[%s11059_s13 + $0x590] sm:$0xff]  }
 0x227   : > { %9124 = vmatpush3.bf16.msra.mxu0 %v9563_v26  ;;  %7917 = vmatmul.mubr.bf16.vlgmr.msra.gmra.mxu1 %v9560_v24  ;;  %v9627_v24 = vld [vmem:[%s11059_s13 + $0x588] sm:$0xff]   ;;  %v9629_v26 = vld [vmem:[%s11059_s13 + $0x500] sm:$0xff]  }
 0x228   : > { %9146 = vmatpush3.bf16.msra.mxu1 %v9565_v28  ;;  %9125 = vmatprep.subr.bf16.mxu0 %v9566_v29  ;;  %v9631_v28 = vld [vmem:[%s11494_s0 + $0x50] ss:$148 sps:$4 sm:$0xff]   ;;  %v9633_v29 = vld [vmem:[%s11494_s0 + $0x54] ss:$148 sps:$4 sm:$0xff]  }
 0x229   : > { %9147 = vmatprep.subr.bf16.mxu1 %v9568_v31  ;;  %7957 = vmatprep.mubr.bf16.mxu0 %v9595_v57  ;;  %v9635_v31 = vld [vmem:[%s11059_s13 + $0x678] sm:$0xff]   ;;  %v9662_v57 = vld [vmem:[%s11059_s13 + $0x648] sm:$0xff]  }
 0x22a   : > { %7998 = vmatprep.mubr.bf16.mxu1 %v9600_v61  ;;  %v9666_v61 = vld [vmem:[%s11059_s13 + $0x640] sm:$0xff]  }
 0x22b   : > { %9126 = vmatpush3.bf16.msra.mxu0 %v9567_v30  ;;  %v9634_v30 = vld [vmem:[%s11059_s13 + $0x580] sm:$0xff]  }
 0x22c   : > { %9148 = vmatpush3.bf16.msra.mxu1 %v9569_v32  ;;  %9127 = vmatprep.subr.bf16.mxu0 %v9570_v33  ;;  %v9636_v32 = vld [vmem:[%s11494_s0 + $0x58] ss:$148 sps:$4 sm:$0xff]   ;;  %v9638_v33 = vld [vmem:[%s11494_s0 + $0x5c] ss:$148 sps:$4 sm:$0xff]  }
 0x22d   : > { %9149 = vmatprep.subr.bf16.mxu1 %v9572_v35  ;;  %v9640_v35 = vld [vmem:[%s11059_s13 + $0x6f8] sm:$0xff]  }
 0x22f   : > { %9128 = vmatpush3.bf16.msra.mxu0 %v9571_v34  ;;  %v9639_v34 = vld [vmem:[%s11059_s13 + $0x638] sm:$0xff]  }
 0x230   : > { %9150 = vmatpush3.bf16.msra.mxu1 %v9573_v36  ;;  %9129 = vmatprep.subr.bf16.mxu0 %v9574_v37  ;;  %v9641_v36 = vld [vmem:[%s11059_s13 + $0x6b8] sm:$0xff]   ;;  %v9642_v37 = vld [vmem:[%s11059_s13 + $0x670] sm:$0xff]  }
 0x231   : > { %9151 = vmatprep.subr.bf16.mxu1 %v9576_v39  ;;  %v9644_v39 = vld [vmem:[%s11059_s13 + $0x6f0] sm:$0xff]  }
 0x233   : > { %9130 = vmatpush3.bf16.msra.mxu0 %v9575_v38  ;;  %v9643_v38 = vld [vmem:[%s11059_s13 + $0x630] sm:$0xff]  }
 0x234   : > { %9152 = vmatpush3.bf16.msra.mxu1 %v9577_v40  ;;  %9131 = vmatprep.subr.bf16.mxu0 %v9578_v41  ;;  %v9645_v40 = vld [vmem:[%s11059_s13 + $0x6b0] sm:$0xff]   ;;  %v9646_v41 = vld [vmem:[%s11059_s13 + $0x668] sm:$0xff]  }
 0x235   : > { %9153 = vmatprep.subr.bf16.mxu1 %v9580_v43  ;;  %v9648_v43 = vld [vmem:[%s11059_s13 + $0x6e8] sm:$0xff]  }
 0x237   : > { %9132 = vmatpush3.bf16.msra.mxu0 %v9579_v42  ;;  %v9647_v42 = vld [vmem:[%s11059_s13 + $0x628] sm:$0xff]  }
 0x238   : > { %9154 = vmatpush3.bf16.msra.mxu1 %v9581_v44  ;;  %9133 = vmatprep.subr.bf16.mxu0 %v9582_v45  ;;  %v9649_v44 = vld [vmem:[%s11059_s13 + $0x6a8] sm:$0xff]   ;;  %v9650_v45 = vld [vmem:[%s11059_s13 + $0x660] sm:$0xff]  }
 0x239   : > { %9155 = vmatprep.subr.bf16.mxu1 %v9584_v47  ;;  %v9652_v47 = vld [vmem:[%s11059_s13 + $0x6e0] sm:$0xff]  }
 0x23b   : > { %9134 = vmatpush3.bf16.msra.mxu0 %v9583_v46  ;;  %v9651_v46 = vld [vmem:[%s11059_s13 + $0x620] sm:$0xff]  }
 0x23c   : > { %9156 = vmatpush3.bf16.msra.mxu1 %v9585_v48  ;;  %9135 = vmatprep.subr.bf16.mxu0 %v9586_v49  ;;  %v9653_v48 = vld [vmem:[%s11059_s13 + $0x6a0] sm:$0xff]   ;;  %v9654_v49 = vld [vmem:[%s11059_s13 + $0x658] sm:$0xff]  }
 0x23d   : > { %9157 = vmatprep.subr.bf16.mxu1 %v9588_v51  ;;  %v9656_v51 = vld [vmem:[%s11059_s13 + $0x6d8] sm:$0xff]  }
 0x23f   : > { %9136 = vmatpush3.bf16.msra.mxu0 %v9587_v50  ;;  %v9655_v50 = vld [vmem:[%s11059_s13 + $0x618] sm:$0xff]  }
 0x240   : > { %9158 = vmatpush3.bf16.msra.mxu1 %v9589_v52  ;;  %9137 = vmatprep.subr.bf16.mxu0 %v9590_v53  ;;  %v9657_v52 = vld [vmem:[%s11059_s13 + $0x698] sm:$0xff]   ;;  %v9658_v53 = vld [vmem:[%s11059_s13 + $0x650] sm:$0xff]  }
 0x241   : > { %9159 = vmatprep.subr.bf16.mxu1 %v9592_v55  ;;  %v9660_v55 = vld [vmem:[%s11059_s13 + $0x6d0] sm:$0xff]  }
 0x243   : > { %9138 = vmatpush3.bf16.msra.mxu0 %v9591_v54  ;;  %v9659_v54 = vld [vmem:[%s11059_s13 + $0x610] sm:$0xff]  }
 0x244   : > { %9160 = vmatpush3.bf16.msra.mxu1 %v9596_v58  ;;  %9167 = vmatprep.subr.bf16.mxu0 %v9597_v59  ;;  %v9663_v58 = vld [vmem:[%s11059_s13 + $0x608] sm:$0xff]  }
 0x245   : > { %9189 = vmatprep.subr.bf16.mxu1 %v9602_v63  ;;  %v9664_v59 = vld [vmem:[%s11059_s13 + $0x6c8] sm:$0xff]   ;;  %v9668_v63 = vld [vmem:[%s11059_s13 + $0x6c0] sm:$0xff]  }
 0x246   : > { %7958 = vmatmul.mubr.bf16.vlgmr.msra.gmra.mxu0 %v9593_v56  ;;  %v9661_v56 = vld [vmem:[%s11059_s13 + $0x690] sm:$0xff]  }
 0x247   : > { %9168 = vmatpush3.bf16.msra.mxu0 %v9601_v62  ;;  %7999 = vmatmul.mubr.bf16.vlgmr.msra.gmra.mxu1 %v9598_v60  ;;  %v9665_v60 = vld [vmem:[%s11059_s13 + $0x688] sm:$0xff]   ;;  %v9667_v62 = vld [vmem:[%s11059_s13 + $0x600] sm:$0xff]  }
 0x248   : > { %9190 = vmatpush3.bf16.msra.mxu1 %v9603_v0  ;;  %9169 = vmatprep.subr.bf16.mxu0 %v9604_v1  ;;  %v9669_v0 = vld [vmem:[%s11494_s0 + $0x60] ss:$148 sps:$4 sm:$0xff]   ;;  %v9671_v1 = vld [vmem:[%s11494_s0 + $0x64] ss:$148 sps:$4 sm:$0xff]  }
 0x249   : > { %9191 = vmatprep.subr.bf16.mxu1 %v9606_v3  ;;  %8039 = vmatprep.mubr.bf16.mxu0 %v9633_v29  ;;  %v9673_v3 = vld [vmem:[%s11059_s13 + $0x778] sm:$0xff]   ;;  %v9699_v29 = vld [vmem:[%s11059_s13 + $0x790] sm:$0xff]  }
 0x24a   : > { %8080 = vmatprep.mubr.bf16.mxu1 %v9638_v33  ;;  %v9703_v33 = vld [vmem:[%s11059_s13 + $0x788] sm:$0xff]  }
 0x24b   : > { %9170 = vmatpush3.bf16.msra.mxu0 %v9605_v2  ;;  %v9672_v2 = vld [vmem:[%s11059_s13 + $0x680] sm:$0xff]  }
 0x24c   : > { %9192 = vmatpush3.bf16.msra.mxu1 %v9607_v4  ;;  %9171 = vmatprep.subr.bf16.mxu0 %v9608_v5  ;;  %v9674_v4 = vld [vmem:[%s11494_s0 + $0x68] ss:$148 sps:$4 sm:$0xff]   ;;  %v9676_v5 = vld [vmem:[%s11494_s0 + $0x6c] ss:$148 sps:$4 sm:$0xff]  }
 0x24d   : > { %9193 = vmatprep.subr.bf16.mxu1 %v9610_v7  ;;  %v9678_v7 = vld [vmem:[%s11059_s13 + $0x7f8] sm:$0xff]  }
 0x24f   : > { %9172 = vmatpush3.bf16.msra.mxu0 %v9609_v6  ;;  %v9677_v6 = vld [vmem:[%s11059_s13 + $0x738] sm:$0xff]  }
 0x250   : > { %9194 = vmatpush3.bf16.msra.mxu1 %v9611_v8  ;;  %9173 = vmatprep.subr.bf16.mxu0 %v9612_v9  ;;  %v9679_v8 = vld [vmem:[%s11059_s13 + $0x7b8] sm:$0xff]   ;;  %v9680_v9 = vld [vmem:[%s11059_s13 + $0x770] sm:$0xff]  }
 0x251   : > { %9195 = vmatprep.subr.bf16.mxu1 %v9614_v11  ;;  %v9682_v11 = vld [vmem:[%s11059_s13 + $0x7f0] sm:$0xff]  }
 0x253   : > { %9174 = vmatpush3.bf16.msra.mxu0 %v9613_v10  ;;  %v9681_v10 = vld [vmem:[%s11059_s13 + $0x730] sm:$0xff]  }
 0x254   : > { %9196 = vmatpush3.bf16.msra.mxu1 %v9615_v12  ;;  %9175 = vmatprep.subr.bf16.mxu0 %v9616_v13  ;;  %v9683_v12 = vld [vmem:[%s11059_s13 + $0x7b0] sm:$0xff]   ;;  %v9684_v13 = vld [vmem:[%s11059_s13 + $0x768] sm:$0xff]  }
 0x255   : > { %9197 = vmatprep.subr.bf16.mxu1 %v9618_v15  ;;  %v9685_v15 = vld [vmem:[%s11059_s13 + $0x728] sm:$0xff]  }
 0x257   : > { %9176 = vmatpush3.bf16.msra.mxu0 %v9617_v14  ;;  %v9798_v14 = vmov 0  }
 0x258   : > { %9198 = vmatpush3.bf16.msra.mxu1 %v9619_v16  ;;  %9177 = vmatprep.subr.bf16.mxu0 %v9620_v17  ;;  %v9686_v16 = vld [vmem:[%s11059_s13 + $0x7e8] sm:$0xff]  }
 0x259   : > { %9199 = vmatprep.subr.bf16.mxu1 %v9622_v19  ;;  %9408 = vset.pattern.permute.xlu0 %v9798_v14  ;;  %v9687_v17 = vld [vmem:[%s11059_s13 + $0x7a8] sm:$0xff]   ;;  %v9689_v19 = vld [vmem:[%s11059_s13 + $0x720] sm:$0xff]  }
 0x25a   : > { %9409 = vset.pattern.permute.xlu1 %v9798_v14  ;;  %v9751_v14 = vld [vmem:[%s11494_s0 + $0x8c] ss:$148 sps:$4 sm:$0xff]  }
 0x25b   : > { %9178 = vmatpush3.bf16.msra.mxu0 %v9621_v18  ;;  %v9688_v18 = vld [vmem:[%s11059_s13 + $0x760] sm:$0xff]  }
 0x25c   : > { %9200 = vmatpush3.bf16.msra.mxu1 %v9623_v20  ;;  %9179 = vmatprep.subr.bf16.mxu0 %v9624_v21  ;;  %v9690_v20 = vld [vmem:[%s11059_s13 + $0x7e0] sm:$0xff]  }
 0x25d   : > { %9201 = vmatprep.subr.bf16.mxu1 %v9626_v23  ;;  %v9691_v21 = vld [vmem:[%s11059_s13 + $0x7a0] sm:$0xff]   ;;  %v9693_v23 = vld [vmem:[%s11059_s13 + $0x718] sm:$0xff]  }
 0x25f   : > { %9180 = vmatpush3.bf16.msra.mxu0 %v9625_v22  ;;  %v9692_v22 = vld [vmem:[%s11059_s13 + $0x758] sm:$0xff]  }
 0x260   : > { %9202 = vmatpush3.bf16.msra.mxu1 %v9627_v24  ;;  %9181 = vmatprep.subr.bf16.mxu0 %v9628_v25  ;;  %v9694_v24 = vld [vmem:[%s11059_s13 + $0x7d8] sm:$0xff]  }
 0x261   : > { %9203 = vmatprep.subr.bf16.mxu1 %v9630_v27  ;;  %v9695_v25 = vld [vmem:[%s11059_s13 + $0x798] sm:$0xff]   ;;  %v9697_v27 = vld [vmem:[%s11059_s13 + $0x710] sm:$0xff]  }
 0x263   : > { %9182 = vmatpush3.bf16.msra.mxu0 %v9629_v26  ;;  %v9696_v26 = vld [vmem:[%s11059_s13 + $0x750] sm:$0xff]  }
 0x264   : > { %9204 = vmatpush3.bf16.msra.mxu1 %v9634_v30  ;;  %9211 = vmatprep.subr.bf16.mxu0 %v9635_v31  ;;  %v9700_v30 = vld [vmem:[%s11059_s13 + $0x748] sm:$0xff]  }
 0x265   : > { %9233 = vmatprep.subr.bf16.mxu1 %v9640_v35  ;;  %v9701_v31 = vld [vmem:[%s11059_s13 + $0x708] sm:$0xff]   ;;  %v9705_v35 = vld [vmem:[%s11059_s13 + $0x700] sm:$0xff]  }
 0x266   : > { %8040 = vmatmul.mubr.bf16.vlgmr.msra.gmra.mxu0 %v9631_v28  ;;  %v9698_v28 = vld [vmem:[%s11059_s13 + $0x7d0] sm:$0xff]  }
 0x267   : > { %9212 = vmatpush3.bf16.msra.mxu0 %v9639_v34  ;;  %8081 = vmatmul.mubr.bf16.vlgmr.msra.gmra.mxu1 %v9636_v32  ;;  %v9702_v32 = vld [vmem:[%s11059_s13 + $0x7c8] sm:$0xff]   ;;  %v9704_v34 = vld [vmem:[%s11059_s13 + $0x740] sm:$0xff]  }
 0x268   : > { %9234 = vmatpush3.bf16.msra.mxu1 %v9641_v36  ;;  %9213 = vmatprep.subr.bf16.mxu0 %v9642_v37  ;;  %v9706_v36 = vld [vmem:[%s11059_s13 + $0x7c0] sm:$0xff]  }
 0x269   : > { %9235 = vmatprep.subr.bf16.mxu1 %v9644_v39  ;;  %8121 = vmatprep.mubr.bf16.mxu0 %v9671_v1  ;;  %v9707_v37 = vld [vmem:[%s11494_s0 + $0x70] ss:$148 sps:$4 sm:$0xff]  }
 0x26a   : > { %8162 = vmatprep.mubr.bf16.mxu1 %v9676_v5  ;;  %v9710_v39 = vld [vmem:[%s11059_s13 + $0x780] sm:$0xff]   ;;  %v9737_v1 = vld [vmem:[%s11059_s13 + $0x890] sm:$0xff]   ;;  %v9741_v5 = vld [vmem:[%s11059_s13 + $0x888] sm:$0xff]  }
 0x26b   : > { %9214 = vmatpush3.bf16.msra.mxu0 %v9643_v38  ;;  %v9709_v38 = vld [vmem:[%s11494_s0 + $0x74] ss:$148 sps:$4 sm:$0xff]  }
 0x26c   : > { %9236 = vmatpush3.bf16.msra.mxu1 %v9645_v40  ;;  %9215 = vmatprep.subr.bf16.mxu0 %v9646_v41  ;;  %v9711_v40 = vld [vmem:[%s11059_s13 + $0x878] sm:$0xff]  }
 0x26d   : > { %9237 = vmatprep.subr.bf16.mxu1 %v9648_v43  ;;  %v9712_v41 = vld [vmem:[%s11494_s0 + $0x78] ss:$148 sps:$4 sm:$0xff]  }
 0x26e   : > { %v9715_v43 = vld [vmem:[%s11059_s13 + $0x838] sm:$0xff]  }
 0x26f   : > { %9216 = vmatpush3.bf16.msra.mxu0 %v9647_v42  ;;  %v9714_v42 = vld [vmem:[%s11494_s0 + $0x7c] ss:$148 sps:$4 sm:$0xff]  }
 0x270   : > { %9238 = vmatpush3.bf16.msra.mxu1 %v9649_v44  ;;  %9217 = vmatprep.subr.bf16.mxu0 %v9650_v45  ;;  %v9716_v44 = vld [vmem:[%s11059_s13 + $0x8f8] sm:$0xff]  }
 0x271   : > { %9239 = vmatprep.subr.bf16.mxu1 %v9652_v47  ;;  %v9717_v45 = vld [vmem:[%s11059_s13 + $0x8b8] sm:$0xff]   ;;  %v9719_v47 = vld [vmem:[%s11059_s13 + $0x830] sm:$0xff]  }
 0x273   : > { %9218 = vmatpush3.bf16.msra.mxu0 %v9651_v46  ;;  %v9718_v46 = vld [vmem:[%s11059_s13 + $0x870] sm:$0xff]  }
 0x274   : > { %9240 = vmatpush3.bf16.msra.mxu1 %v9653_v48  ;;  %9219 = vmatprep.subr.bf16.mxu0 %v9654_v49  ;;  %v9720_v48 = vld [vmem:[%s11059_s13 + $0x8f0] sm:$0xff]  }
 0x275   : > { %9241 = vmatprep.subr.bf16.mxu1 %v9656_v51  ;;  %v9721_v49 = vld [vmem:[%s11059_s13 + $0x8b0] sm:$0xff]   ;;  %v9723_v51 = vld [vmem:[%s11059_s13 + $0x828] sm:$0xff]  }
 0x277   : > { %9220 = vmatpush3.bf16.msra.mxu0 %v9655_v50  ;;  %v9722_v50 = vld [vmem:[%s11059_s13 + $0x868] sm:$0xff]  }
 0x278   : > { %9242 = vmatpush3.bf16.msra.mxu1 %v9657_v52  ;;  %9221 = vmatprep.subr.bf16.mxu0 %v9658_v53  ;;  %v9724_v52 = vld [vmem:[%s11059_s13 + $0x8e8] sm:$0xff]  }
 0x279   : > { %9243 = vmatprep.subr.bf16.mxu1 %v9660_v55  ;;  %v9725_v53 = vld [vmem:[%s11059_s13 + $0x8a8] sm:$0xff]   ;;  %v9727_v55 = vld [vmem:[%s11059_s13 + $0x820] sm:$0xff]  }
 0x27b   : > { %9222 = vmatpush3.bf16.msra.mxu0 %v9659_v54  ;;  %v9726_v54 = vld [vmem:[%s11059_s13 + $0x860] sm:$0xff]  }
 0x27c   : > { %9244 = vmatpush3.bf16.msra.mxu1 %v9661_v56  ;;  %9223 = vmatprep.subr.bf16.mxu0 %v9662_v57  ;;  %v9728_v56 = vld [vmem:[%s11059_s13 + $0x8e0] sm:$0xff]  }
 0x27d   : > { %9245 = vmatprep.subr.bf16.mxu1 %v9664_v59  ;;  %v9729_v57 = vld [vmem:[%s11059_s13 + $0x8a0] sm:$0xff]   ;;  %v9731_v59 = vld [vmem:[%s11059_s13 + $0x818] sm:$0xff]  }
 0x27f   : > { %9224 = vmatpush3.bf16.msra.mxu0 %v9663_v58  ;;  %v9730_v58 = vld [vmem:[%s11059_s13 + $0x858] sm:$0xff]  }
 0x280   : > { %9246 = vmatpush3.bf16.msra.mxu1 %v9665_v60  ;;  %9225 = vmatprep.subr.bf16.mxu0 %v9666_v61  ;;  %v9732_v60 = vld [vmem:[%s11059_s13 + $0x8d8] sm:$0xff]  }
 0x281   : > { %9247 = vmatprep.subr.bf16.mxu1 %v9668_v63  ;;  %v9733_v61 = vld [vmem:[%s11059_s13 + $0x898] sm:$0xff]   ;;  %v9735_v63 = vld [vmem:[%s11059_s13 + $0x810] sm:$0xff]  }
 0x283   : > { %9226 = vmatpush3.bf16.msra.mxu0 %v9667_v62  ;;  %v9734_v62 = vld [vmem:[%s11059_s13 + $0x850] sm:$0xff]  }
 0x284   : > { %9248 = vmatpush3.bf16.msra.mxu1 %v9672_v2  ;;  %9255 = vmatprep.subr.bf16.mxu0 %v9673_v3  ;;  %v9738_v2 = vld [vmem:[%s11059_s13 + $0x848] sm:$0xff]  }
 0x285   : > { %9277 = vmatprep.subr.bf16.mxu1 %v9678_v7  ;;  %v9739_v3 = vld [vmem:[%s11059_s13 + $0x808] sm:$0xff]   ;;  %v9743_v7 = vld [vmem:[%s11059_s13 + $0x800] sm:$0xff]  }
 0x286   : > { %8122 = vmatmul.mubr.bf16.vlgmr.msra.gmra.mxu0 %v9669_v0  ;;  %v9736_v0 = vld [vmem:[%s11059_s13 + $0x8d0] sm:$0xff]  }
 0x287   : > { %9256 = vmatpush3.bf16.msra.mxu0 %v9677_v6  ;;  %8163 = vmatmul.mubr.bf16.vlgmr.msra.gmra.mxu1 %v9674_v4  ;;  %v9740_v4 = vld [vmem:[%s11059_s13 + $0x8c8] sm:$0xff]   ;;  %v9742_v6 = vld [vmem:[%s11059_s13 + $0x840] sm:$0xff]  }
 0x288   : > { %9278 = vmatpush3.bf16.msra.mxu1 %v9679_v8  ;;  %9257 = vmatprep.subr.bf16.mxu0 %v9680_v9  ;;  %v9744_v8 = vld [vmem:[%s11059_s13 + $0x8c0] sm:$0xff]  }
 0x289   : > { %9279 = vmatprep.subr.bf16.mxu1 %v9682_v11  ;;  %8203 = vmatprep.mubr.bf16.mxu0 %v9709_v38  ;;  %v9745_v9 = vld [vmem:[%s11494_s0 + $0x80] ss:$148 sps:$4 sm:$0xff]  }
 0x28a   : > { %8244 = vmatprep.mubr.bf16.mxu1 %v9714_v42  ;;  %v9748_v11 = vld [vmem:[%s11059_s13 + $0x880] sm:$0xff]  }
 0x28b   : > { %9258 = vmatpush3.bf16.msra.mxu0 %v9681_v10  ;;  %v9747_v10 = vld [vmem:[%s11494_s0 + $0x84] ss:$148 sps:$4 sm:$0xff]  }
 0x28c   : > { %9280 = vmatpush3.bf16.msra.mxu1 %v9683_v12  ;;  %9259 = vmatprep.subr.bf16.mxu0 %v9684_v13  ;;  %v9799_v12 = vmov 0.0   ;;  %v9749_v13 = vld [vmem:[%s11494_s0 + $0x88] ss:$148 sps:$4 sm:$0xff]  }
 0x28d   : > { %9281 = vmatprep.subr.bf16.mxu1 %v9686_v16 }
 0x28f   : > { %9260 = vmatpush3.bf16.msra.mxu0 %v9685_v15  ;;  %v9752_v15 = vld [vmem:[%s11059_s13 + $0x920] ss:$0 sps:$4 sm:$0xff]  }
 0x290   : > { %9282 = vmatpush3.bf16.msra.mxu1 %v9687_v17  ;;  %9261 = vmatprep.subr.bf16.mxu0 %v9688_v18  ;;  %v7595_v16 = vsel %vm7593_vm0, %v9752_v15, 0  ;;  %v9753_v17 = vld [vmem:[%s11059_s13 + $0x918] sm:$0xff]  }
 0x291   : > { %9283 = vmatprep.subr.bf16.mxu1 %v9690_v20  ;;  %v8376_v18 = vld [vmem:[%s11496_s2] sm:$0xff]  ;;  %v9754_v20 = vld [vmem:[%s11059_s13 + $0x910] sm:$0xff]  }
 0x292   : > { %8380 = vperm.xlu0 %9408, %v8376_v18  }
 0x293   : > { %9262 = vmatpush3.bf16.msra.mxu0 %v9689_v19  ;;  %v8390_v19 = vld [vmem:[%s11497_s3] sm:$0xff] }
 0x294   : > { %9284 = vmatpush3.bf16.msra.mxu1 %v9691_v21  ;;  %9263 = vmatprep.subr.bf16.mxu0 %v9692_v22  ;;  %v8377_v21 = vld [vmem:[%s11496_s2 + $0x8] sm:$0xff] }
 0x295   : > { %9285 = vmatprep.subr.bf16.mxu1 %v9694_v24  ;;  %8394 = vperm.xlu1 %9409, %v8390_v19   ;;  %v8391_v22 = vld [vmem:[%s11497_s3 + $0x8] sm:$0xff] }
 0x296   : > { %8385 = vperm.xlu0 %9408, %v8377_v21   ;;  %v9756_v24 = vld [vmem:[%s11059_s13 + $0x900] sm:$0xff]  }
 0x297   : > { %9264 = vmatpush3.bf16.msra.mxu0 %v9693_v23  ;;  %v9755_v23 = vld [vmem:[%s11059_s13 + $0x908] sm:$0xff]   ;;  %s8602_s13 = sshll.u32 %s4965_s7, 3 }
 0x298   : > { %9286 = vmatpush3.bf16.msra.mxu1 %v9695_v25  ;;  %9265 = vmatprep.subr.bf16.mxu0 %v9696_v26  ;;  %v9757_v25 = vld [vmem:[%s11494_s0 + $0x90] ss:$148 sps:$4 sm:$0xff]   ;;  %v8963_v26 = vpop.f32.mrf.mxu0  ;;  %s5004_s11 = scalar_lea.vmem [#allocation3], %s8602_s13 }
 0x299   : > { %9287 = vmatprep.subr.bf16.mxu1 %v9698_v28  ;;  %8399 = vperm.xlu1 %9409, %v8391_v22  }
 0x29a   : > { %v8964_v28 = vpop.f32.mrf.mxu0 }
 0x29b   : > { %9266 = vmatpush3.bf16.msra.mxu0 %v9697_v27  ;;  %v8985_v27 = vpop.f32.mrf.mxu1 }
 0x29c   : > { %9288 = vmatpush3.bf16.msra.mxu1 %v9699_v29  ;;  %9267 = vmatprep.subr.bf16.mxu0 %v9700_v30  ;;  %v8966_v30 = vpop.f32.mrf.mxu0 }
 0x29d   : > { %9289 = vmatprep.subr.bf16.mxu1 %v9702_v32  ;;  %v8986_v29 = vpop.f32.mrf.mxu1 }
 0x29e   : > { %v8967_v32 = vpop.f32.mrf.mxu0 }
 0x29f   : > { %9268 = vmatpush3.bf16.msra.mxu0 %v9701_v31  ;;  %v8988_v31 = vpop.f32.mrf.mxu1 }
 0x2a0   : > { %9290 = vmatpush3.bf16.msra.mxu1 %v9703_v33  ;;  %9269 = vmatprep.subr.bf16.mxu0 %v9704_v34 }
 0x2a1   : > { %9291 = vmatprep.subr.bf16.mxu1 %v9706_v36  ;;  %v8989_v34 = vpop.f32.mrf.mxu1 }
 0x2a3   : > { %9270 = vmatpush3.bf16.msra.mxu0 %v9705_v35 }
 0x2a4   : > { %9292 = vmatpush3.bf16.msra.mxu1 %v9710_v39  ;;  %9299 = vmatprep.subr.bf16.mxu0 %v9711_v40 }
 0x2a5   : > { %9321 = vmatprep.subr.bf16.mxu1 %v9716_v44 }
 0x2a6   : > { %8204 = vmatmul.mubr.bf16.vlgmr.msra.gmra.mxu0 %v9707_v37  ;;  %v9007_v33 = vpop.f32.mrf.mxu0 }
 0x2a7   : > { %9300 = vmatpush3.bf16.msra.mxu0 %v9715_v43  ;;  %8245 = vmatmul.mubr.bf16.vlgmr.msra.gmra.mxu1 %v9712_v41  ;;  %v9029_v36 = vpop.f32.mrf.mxu1 }
 0x2a8   : > { %9322 = vmatpush3.bf16.msra.mxu1 %v9717_v45  ;;  %9301 = vmatprep.subr.bf16.mxu0 %v9718_v46  ;;  %v9008_v35 = vpop.f32.mrf.mxu0 }
 0x2a9   : > { %9323 = vmatprep.subr.bf16.mxu1 %v9720_v48  ;;  %8285 = vmatprep.mubr.bf16.mxu0 %v9747_v10  ;;  %v9030_v38 = vpop.f32.mrf.mxu1 }
 0x2aa   : > { %8326 = vmatprep.mubr.bf16.mxu1 %v9751_v14  ;;  %v9010_v37 = vpop.f32.mrf.mxu0  ;;  %v8990_v14 = vadd.f32 %v8989_v34, %v8988_v31 }
 0x2ab   : > { %9302 = vmatpush3.bf16.msra.mxu0 %v9719_v47  ;;  %v9032_v40 = vpop.f32.mrf.mxu1 }
 0x2ac   : > { %9324 = vmatpush3.bf16.msra.mxu1 %v9721_v49  ;;  %9303 = vmatprep.subr.bf16.mxu0 %v9722_v50  ;;  %v9011_v39 = vpop.f32.mrf.mxu0 }
 0x2ad   : > { %9325 = vmatprep.subr.bf16.mxu1 %v9724_v52  ;;  %v9033_v42 = vpop.f32.mrf.mxu1  ;;  %v9012_v18 = vadd.f32 %v9011_v39, %v9010_v37 }
 0x2af   : > { %9304 = vmatpush3.bf16.msra.mxu0 %v9723_v51 }
 0x2b0   : > { %9326 = vmatpush3.bf16.msra.mxu1 %v9725_v53  ;;  %9305 = vmatprep.subr.bf16.mxu0 %v9726_v54 }
 0x2b1   : > { %9327 = vmatprep.subr.bf16.mxu1 %v9728_v56 }
 0x2b3   : > { %9306 = vmatpush3.bf16.msra.mxu0 %v9727_v55 }
 0x2b4   : > { %9328 = vmatpush3.bf16.msra.mxu1 %v9729_v57  ;;  %9307 = vmatprep.subr.bf16.mxu0 %v9730_v58 }
 0x2b5   : > { %9329 = vmatprep.subr.bf16.mxu1 %v9732_v60 }
 0x2b7   : > { %9308 = vmatpush3.bf16.msra.mxu0 %v9731_v59 }
 0x2b8   : > { %9330 = vmatpush3.bf16.msra.mxu1 %v9733_v61  ;;  %9309 = vmatprep.subr.bf16.mxu0 %v9734_v62 }
 0x2b9   : > { %9331 = vmatprep.subr.bf16.mxu1 %v9736_v0 }
 0x2bb   : > { %9310 = vmatpush3.bf16.msra.mxu0 %v9735_v63 }
 0x2bc   : > { %9332 = vmatpush3.bf16.msra.mxu1 %v9737_v1  ;;  %9311 = vmatprep.subr.bf16.mxu0 %v9738_v2 }
 0x2bd   : > { %9333 = vmatprep.subr.bf16.mxu1 %v9740_v4 }
 0x2bf   : > { %9312 = vmatpush3.bf16.msra.mxu0 %v9739_v3 }
 0x2c0   : > { %9334 = vmatpush3.bf16.msra.mxu1 %v9741_v5  ;;  %9313 = vmatprep.subr.bf16.mxu0 %v9742_v6 }
 0x2c1   : > { %9335 = vmatprep.subr.bf16.mxu1 %v9744_v8  ;;  %v8987_v8 = vadd.f32 %v8986_v29, %v8985_v27 }
 0x2c3   : > { %9314 = vmatpush3.bf16.msra.mxu0 %v9743_v7  ;;  %v8965_v7 = vadd.f32 %v8964_v28, %v8963_v26  ;;  %v9034_v26 = vadd.f32 %v9033_v42, %v9032_v40 }
 0x2c4   : > { %9349 = vmatprep.subr.bf16.mxu0 %v9799_v12  ;;  %9336 = vmatpush3.bf16.msra.mxu1 %v9748_v11 }
 0x2c6   : > { %8286 = vmatmul.mubr.bf16.vlgmr.msra.gmra.mxu0 %v9745_v9  ;;  %v9051_v41 = vpop.f32.mrf.mxu0  ;;  %v9009_v9 = vadd.f32 %v9008_v35, %v9007_v33 }
 0x2c7   : > { %9359 = vmatprep.mubr.msk.bf16.mxu0 %vm9800_vm1, %v9799_v12  ;;  %9350 = vmatpush3.bf16.msra.mxu0 %v7595_v16  ;;  %v9073_v44 = vpop.f32.mrf.mxu1 }
 0x2c8   : > { %8327 = vmatmul.mubr.bf16.vlgmr.msra.gmra.mxu1 %v9749_v13  ;;  %9351 = vmatprep.subr.bf16.mxu0 %v9799_v12  ;;  %v9052_v43 = vpop.f32.mrf.mxu0  ;;  %v8968_v13 = vadd.f32 %v8967_v32, %v8966_v30 }
 0x2c9   : > { %v9074_v46 = vpop.f32.mrf.mxu1  ;;  %v9053_v21 = vadd.f32 %v9052_v43, %v9051_v41 }
 0x2ca   : > { %v9054_v45 = vpop.f32.mrf.mxu0  ;;  %v9075_v27 = vadd.f32 %v9074_v46, %v9073_v44 }
 0x2cb   : > { %9352 = vmatpush3.bf16.msra.mxu0 %v9753_v17  ;;  %v9076_v48 = vpop.f32.mrf.mxu1  ;;  %v9031_v17 = vadd.f32 %v9030_v38, %v9029_v36 }
 0x2cc   : > { %9353 = vmatprep.subr.bf16.mxu0 %v9799_v12  ;;  %v9055_v47 = vpop.f32.mrf.mxu0 }
 0x2cd   : > { %v9077_v50 = vpop.f32.mrf.mxu1  ;;  %v9056_v29 = vadd.f32 %v9055_v47, %v9054_v45 }
 0x2ce   : > { %v9078_v34 = vadd.f32 %v9077_v50, %v9076_v48 }
 0x2cf   : > { %9354 = vmatpush3.bf16.msra.mxu0 %v9754_v20  ;;  %v7676_v20 = vadd.f32 %v8990_v14, %v8968_v13 }
 0x2d0   : > { %9355 = vmatprep.subr.bf16.mxu0 %v9799_v12 }
 0x2d3   : > { %9356 = vmatpush3.bf16.msra.mxu0 %v9755_v23 }
 0x2d4   : > { %9357 = vmatprep.subr.bf16.mxu0 %v9799_v12  ;;  %v7673_v12 = vadd.f32 %v8987_v8, %v8965_v7 }
 0x2d6   : > { %v7714_v16 = vadd.f32 %v9009_v9, %v7673_v12 }
 0x2d7   : > { %9358 = vmatpush3.bf16.msra.mxu0 %v9756_v24 }
 0x2d8   : > { %v7755_v24 = vadd.f32 %v9031_v17, %v7714_v16 }
 0x2da   : > { %9360 = vmatmul.mubr.msk.bf16.vlgmr.msra.gmra.mxu0 %vm7589_vm2, %v9757_v25  ;;  %v7717_v25 = vadd.f32 %v9012_v18, %v7676_v20  ;;  %v7796_v28 = vadd.f32 %v9053_v21, %v7755_v24 }
 0x2dc   : > { %v7758_v7 = vadd.f32 %v9034_v26, %v7717_v25  ;;  %v7837_v31 = vadd.f32 %v9075_v27, %v7796_v28 }
 0x2de   : > { %v7799_v32 = vadd.f32 %v9056_v29, %v7758_v7 }
 0x2e0   : > { %v7840_v8 = vadd.f32 %v9078_v34, %v7799_v32 }
 0x2e6   : > { %v9095_v49 = vpop.f32.mrf.mxu0 }
 0x2e7   : > { %v9117_v52 = vpop.f32.mrf.mxu1 }
 0x2e8   : > { %v9096_v51 = vpop.f32.mrf.mxu0 }
 0x2e9   : > { %v9118_v54 = vpop.f32.mrf.mxu1  ;;  %v9097_v30 = vadd.f32 %v9096_v51, %v9095_v49 }
 0x2ea   : > { %v9098_v53 = vpop.f32.mrf.mxu0  ;;  %v9119_v39 = vadd.f32 %v9118_v54, %v9117_v52 }
 0x2eb   : > { %v9120_v56 = vpop.f32.mrf.mxu1  ;;  %v7878_v38 = vadd.f32 %v9097_v30, %v7837_v31 }
 0x2ec   : > { %v9099_v55 = vpop.f32.mrf.mxu0 }
 0x2ed   : > { %v9121_v58 = vpop.f32.mrf.mxu1  ;;  %v9100_v41 = vadd.f32 %v9099_v55, %v9098_v53  ;;  %v7919_v40 = vadd.f32 %v9119_v39, %v7878_v38 }
 0x2ee   : > { %v9122_v44 = vadd.f32 %v9121_v58, %v9120_v56 }
 0x2ef   : > { %v7881_v42 = vadd.f32 %v9100_v41, %v7840_v8 }
 0x2f1   : > { %v7922_v51 = vadd.f32 %v9122_v44, %v7881_v42 }
 0x306   : > { %v9139_v57 = vpop.f32.mrf.mxu0 }
 0x307   : > { %v9161_v60 = vpop.f32.mrf.mxu1 }
 0x308   : > { %v9140_v59 = vpop.f32.mrf.mxu0 }
 0x309   : > { %v9162_v62 = vpop.f32.mrf.mxu1  ;;  %v9141_v9 = vadd.f32 %v9140_v59, %v9139_v57 }
 0x30a   : > { %v9142_v61 = vpop.f32.mrf.mxu0  ;;  %v9163_v13 = vadd.f32 %v9162_v62, %v9161_v60 }
 0x30b   : > { %v9164_v0 = vpop.f32.mrf.mxu1  ;;  %v7960_v47 = vadd.f32 %v9141_v9, %v7919_v40 }
 0x30c   : > { %v9143_v63 = vpop.f32.mrf.mxu0 }
 0x30d   : > { %v9165_v2 = vpop.f32.mrf.mxu1  ;;  %v9144_v49 = vadd.f32 %v9143_v63, %v9142_v61  ;;  %v8001_v16 = vadd.f32 %v9163_v13, %v7960_v47  ;;  %v8381_v38 = vpop.permute.xlu0 %8380 }
 0x30e   : > { %v9166_v52 = vadd.f32 %v9165_v2, %v9164_v0 }
 0x30f   : > { %v7963_v17 = vadd.f32 %v9144_v49, %v7922_v51 }
 0x311   : > { %v8004_v18 = vadd.f32 %v9166_v52, %v7963_v17  ;;  %v8386_v44 = vpop.permute.xlu0 %8385 }
 0x326   : > { %v9183_v1 = vpop.f32.mrf.mxu0 }
 0x327   : > { %v9205_v4 = vpop.f32.mrf.mxu1 }
 0x328   : > { %v9184_v3 = vpop.f32.mrf.mxu0 }
 0x329   : > { %v9206_v6 = vpop.f32.mrf.mxu1  ;;  %v9185_v14 = vadd.f32 %v9184_v3, %v9183_v1 }
 0x32a   : > { %v9186_v5 = vpop.f32.mrf.mxu0  ;;  %v9207_v54 = vadd.f32 %v9206_v6, %v9205_v4 }
 0x32b   : > { %v9208_v11 = vpop.f32.mrf.mxu1  ;;  %v8042_v53 = vadd.f32 %v9185_v14, %v8001_v16 }
 0x32c   : > { %v9187_v10 = vpop.f32.mrf.mxu0 }
 0x32d   : > { %v9209_v19 = vpop.f32.mrf.mxu1  ;;  %v9188_v55 = vadd.f32 %v9187_v10, %v9186_v5  ;;  %v8083_v58 = vadd.f32 %v9207_v54, %v8042_v53 }
 0x32e   : > { %v9210_v24 = vadd.f32 %v9209_v19, %v9208_v11 }
 0x32f   : > { %v8045_v21 = vadd.f32 %v9188_v55, %v8004_v18 }
 0x331   : > { %v8086_v25 = vadd.f32 %v9210_v24, %v8045_v21 }
 0x346   : > { %v9227_v15 = vpop.f32.mrf.mxu0 }
 0x347   : > { %v9249_v23 = vpop.f32.mrf.mxu1 }
 0x348   : > { %v9228_v22 = vpop.f32.mrf.mxu0 }
 0x349   : > { %v9250_v35 = vpop.f32.mrf.mxu1  ;;  %v9229_v20 = vadd.f32 %v9228_v22, %v9227_v15 }
 0x34a   : > { %v9230_v33 = vpop.f32.mrf.mxu0  ;;  %v9251_v62 = vadd.f32 %v9250_v35, %v9249_v23 }
 0x34b   : > { %v9252_v37 = vpop.f32.mrf.mxu1  ;;  %v8124_v61 = vadd.f32 %v9229_v20, %v8083_v58 }
 0x34c   : > { %v9231_v36 = vpop.f32.mrf.mxu0 }
 0x34d   : > { %v9253_v12 = vpop.f32.mrf.mxu1  ;;  %v9232_v63 = vadd.f32 %v9231_v36, %v9230_v33  ;;  %v8165_v0 = vadd.f32 %v9251_v62, %v8124_v61 }
 0x34e   : > { %v9254_v4 = vadd.f32 %v9253_v12, %v9252_v37 }
 0x34f   : > { %v8127_v2 = vadd.f32 %v9232_v63, %v8086_v25 }
 0x351   : > { %v8168_v22 = vadd.f32 %v9254_v4, %v8127_v2 }
 0x366   : > { %v9271_v43 = vpop.f32.mrf.mxu0 }
 0x367   : > { %v9293_v46 = vpop.f32.mrf.mxu1 }
 0x368   : > { %v9272_v45 = vpop.f32.mrf.mxu0 }
 0x369   : > { %v9294_v50 = vpop.f32.mrf.mxu1  ;;  %v9273_v26 = vadd.f32 %v9272_v45, %v9271_v43  ;;  %v8395_v43 = vpop.permute.xlu1 %8394 }
 0x36a   : > { %v9274_v48 = vpop.f32.mrf.mxu0  ;;  %v9295_v28 = vadd.f32 %v9294_v50, %v9293_v46 }
 0x36b   : > { %v9296_v59 = vpop.f32.mrf.mxu1  ;;  %v8206_v10 = vadd.f32 %v9273_v26, %v8165_v0 }
 0x36c   : > { %v9275_v57 = vpop.f32.mrf.mxu0 }
 0x36d   : > { %v9297_v60 = vpop.f32.mrf.mxu1  ;;  %v9276_v15 = vadd.f32 %v9275_v57, %v9274_v48  ;;  %v8247_v19 = vadd.f32 %v9295_v28, %v8206_v10  ;;  %v8400_v13 = vpop.permute.xlu1 %8399 }
 0x36e   : > { %v9298_v23 = vadd.f32 %v9297_v60, %v9296_v59 }
 0x36f   : > { %v8209_v7 = vadd.f32 %v9276_v15, %v8168_v22 }
 0x371   : > { %v8250_v32 = vadd.f32 %v9298_v23, %v8209_v7 }
 0x386   : > { %v9315_v56 = vpop.f32.mrf.mxu0 }
 0x388   : > { %v9316_v1 = vpop.f32.mrf.mxu0  ;;  %v9337_v3 = vpop.f32.mrf.mxu1 }
 0x389   : > { %v9317_v27 = vadd.f32 %v9316_v1, %v9315_v56 }
 0x38a   : > { %v9318_v5 = vpop.f32.mrf.mxu0  ;;  %v9338_v6 = vpop.f32.mrf.mxu1 }
 0x38b   : > { %v8288_v33 = vadd.f32 %v9317_v27, %v8247_v19  ;;  %v9339_v35 = vadd.f32 %v9338_v6, %v9337_v3 }
 0x38c   : > { %v9319_v29 = vpop.f32.mrf.mxu0  ;;  %v9340_v11 = vpop.f32.mrf.mxu1 }
 0x38d   : > { %v9320_v30 = vadd.f32 %v9319_v29, %v9318_v5  ;;  %v8329_v37 = vadd.f32 %v9339_v35, %v8288_v33 }
 0x38e   : > { %v9341_v31 = vpop.f32.mrf.mxu1 }
 0x38f   : > { %v8291_v34 = vadd.f32 %v9320_v30, %v8250_v32  ;;  %v9342_v36 = vadd.f32 %v9341_v31, %v9340_v11 }
 0x391   : > { %v8332_v12 = vadd.f32 %v9342_v36, %v8291_v34 }
 0x39a   : > { %v8369_v39 = vpop.f32.mrf.mxu0 }
 0x39b   : > { %v8370_v41 = vadd.f32 %v8369_v39, %v8329_v37 }
 0x39c   : > { %v9361_v8 = vpop.f32.mrf.mxu0 }
 0x39d   : > { %v8388_v9 = vmul.f32 %v8381_v38, %v8370_v41 }
 0x39e   : > { %v8372_v40 = vpop.f32.mrf.mxu0 }
 0x39f   : > { %v8373_v42 = vadd.f32 %v8372_v40, %v8332_v12  ;;  %v8402_v46 = vadd.f32 %v8395_v43, %v8388_v9 }
 0x3a0   : > { %v9362_v45 = vpop.f32.mrf.mxu0 }
 0x3a1   : > { %v8389_v47 = vmul.f32 %v8386_v44, %v8373_v42  ;;  %v8404_v51 = vmax.f32 %v8402_v46, 0.0 }
 0x3a3   : > { %v8403_v49 = vadd.f32 %v8400_v13, %v8389_v47 }
 0x3a5   : > { %v8405_v14 = vmax.f32 %v8403_v49, 0.0  ;;  %8422 = sbr.rel (!%p9861_p6) target bundleno = 946 (0x3b2), region = 92 }
 0x3a7   : > { %v8945_v48 = vpack.c.bf16 %v8405_v14, %v8404_v51 }
 0x3a9   : > { %8946 = vst [vmem:[%s5004_s11] sm:$0xff] %v8945_v48  }
 0x3b0   : > { %v8444_v50 = vld [vmem:[%s5004_s11] sm:$0xf]  ;;  %v8446_v16 = vld [vmem:[%s5004_s11 + $0x4] sm:$0xf] }
 0x3b1   : > { %8445 = vst [vmem:[%s8427_s22] sm:$0xf] %v8444_v50  ;;  %8447 = vst [vmem:[%s8427_s22 + $0x10] sm:$0xf] %v8446_v16 }
 0x3b2 PF: > { %s14_s19 = sadd.s32 1, %s9796_s19   ;;  %s11500_s15 = smov %s9784_s16 }
 0x3b3   : > { %p11_p11 = scmp.ge.s32.totalorder %s14_s19, 6   ;;  %s11501_s16 = smov %s9866_s25 }
 0x3b4   : > { %s11502_s17 = smov %s9792_s18  ;;  %s11503_s18 = smov %s11505_s20 }
 0x3b5   :  { %13 = sbr.rel (!%p11_p11) target bundleno = 3 (0x3), region = 177 }

// kernel: _lambda_.11
= control target key start
LH: loop header
LB: loop body
LE: loop exit
PB: predicated region body
PF: predicated region fallthrough
CT: control target
= control target key end

     0   :  { %s883_s15 = smov 0   ;;  %s885_s16 = smov 0   ;;  %s1017_s0 = inlined_call_operand.vmem [shape: bf16[16,144], index: 0, kind: input, shape index: {}]   ;;  %s1018_s1 = inlined_call_operand.vmem [shape: bf16[144,512], index: 1, kind: input, shape index: {}]   ;;  %s1019_s2 = inlined_call_operand.vmem [shape: f32[16,1], index: 2, kind: input, shape index: {}]   ;;  %s1020_s3 = inlined_call_operand.vmem [shape: f32[16,1], index: 3, kind: input, shape index: {}]   ;;  %s1021_s4 = inlined_call_operand.vmem [shape: bf16[16,512], index: 4, kind: output, shape index: {}]  }
   0x1   :  { %s887_s17 = smov 0   ;;  %s889_s18 = smov 0  }
   0x2   :  { %s891_s19 = smov 0  }
   0x3 LB: > { %s23_s20 = sadd.s32 1, %s851_s18  ;;  %s725_s21 = sadd.s32 4294967295, %s855_s19   ;;  %s855_s19 = sphi %s891_s19, %s14_s19   ;;  %s851_s18 = sphi %s889_s18, %s1026_s18   ;;  %s847_s17 = sphi %s887_s17, %s1025_s17   ;;  %s843_s16 = sphi %s885_s16, %s1024_s16   ;;  %s839_s15 = sphi %s883_s15, %s1023_s15  }
   0x4   : > { %p24_p0 = scmp.ge.s32.totalorder %s23_s20, 4  ;;  %p66_p1 = scmp.ne.s32.totalorder %s843_s16, %s839_s15 }
   0x5   : > { %p67_p2 = scmp.eq.s32.totalorder %s855_s19, 0  ;;  %p150_p4 = scmp.eq.s32.totalorder %s725_s21, 3 }
   0x6   : > { %s1028_s20 = smov (%p24_p0, %s23_s20), 0  ;;  %s59_s23 = sadd.s32 1, %s843_s16 }
   0x7   : > { %p68_p3 = por %p67_p2, %p66_p1  ;;  %s56_s22 = ssub.s32 %s851_s18, %s1028_s20 }
   0x8   : > { %p57_p5 = scmp.eq.s32.totalorder %s56_s22, 0  ;;  %p918_p6 = por %p150_p4, %p66_p1 }
   0x9   : > { %p731_p7 = scmp.ge.s32.totalorder %s855_s19, 4 }
   0xa   : > { %s923_s25 = scalar_select %p57_p5, %s843_s16, %s59_s23  }
   0xb   : > { %200 = sbr.rel (%p731_p7) target bundleno = 32 (0x20), region = 28 }
  0x10   : > { %203 = sbr.rel (!%p68_p3) target bundleno = 32 (0x20), region = 32  ;;  %s205_s26 = sand.u32 (%p68_p3), 1, %s843_s16  }
  0x11   : > { %s732_s27 = sshll.u32 (%p68_p3), %s851_s18, 2  ;;  %s760_s28 = smul.u32 (%p68_p3), 72, %s205_s26 }
  0x12   : > { %s931_s5 = scalar_lea.vmem (%p68_p3), %s1018_s1, %s732_s27 }
  0x13   : > { %v226_v0 = vld [vmem:[%s931_s5] sm:$0xf] (%p68_p3)  ;;  %v228_v1 = vld [vmem:[%s931_s5 + $0x10] sm:$0xf] (%p68_p3)  ;;  %s938_s6 = scalar_lea.vmem (%p68_p3), [#allocation2], %s760_s28 }
  0x14   : > { %v230_v2 = vld [vmem:[%s931_s5 + $0x20] sm:$0xf] (%p68_p3)  ;;  %v232_v3 = vld [vmem:[%s931_s5 + $0x30] sm:$0xf] (%p68_p3)  ;;  %227 = vst [vmem:[%s938_s6] sm:$0xf] (%p68_p3), %v226_v0 }
  0x15   : > { %v234_v4 = vld [vmem:[%s931_s5 + $0x40] sm:$0xf]  ;;  %229 = vst [vmem:[%s938_s6 + $0x4] sm:$0xf] %v228_v1  ;;  %231 = vst [vmem:[%s938_s6 + $0x8] sm:$0xf] %v230_v2 }
  0x16   : > { %233 = vst [vmem:[%s938_s6 + $0xc] sm:$0xf] %v232_v3  ;;  %235 = vst [vmem:[%s938_s6 + $0x10] sm:$0xf] %v234_v4  ;;  %v236_v5 = vld [vmem:[%s931_s5 + $0x50] sm:$0xf] }
  0x17   : > { %v238_v6 = vld [vmem:[%s931_s5 + $0x60] sm:$0xf]  ;;  %v240_v7 = vld [vmem:[%s931_s5 + $0x70] sm:$0xf]  ;;  %237 = vst [vmem:[%s938_s6 + $0x14] sm:$0xf] %v236_v5 }
  0x18   : > { %239 = vst [vmem:[%s938_s6 + $0x18] sm:$0xf] %v238_v6  ;;  %241 = vst [vmem:[%s938_s6 + $0x1c] sm:$0xf] %v240_v7  ;;  %v242_v8 = vld [vmem:[%s931_s5 + $0x80] sm:$0xf] }
  0x19   : > { %v244_v9 = vld [vmem:[%s931_s5 + $0x90] sm:$0xf]  ;;  %v246_v10 = vld [vmem:[%s931_s5 + $0xa0] sm:$0xf]  ;;  %243 = vst [vmem:[%s938_s6 + $0x20] sm:$0xf] %v242_v8 }
  0x1a   : > { %245 = vst [vmem:[%s938_s6 + $0x24] sm:$0xf] %v244_v9  ;;  %247 = vst [vmem:[%s938_s6 + $0x28] sm:$0xf] %v246_v10  ;;  %v248_v11 = vld [vmem:[%s931_s5 + $0xb0] sm:$0xf] }
  0x1b   : > { %v250_v12 = vld [vmem:[%s931_s5 + $0xc0] sm:$0xf]  ;;  %v252_v13 = vld [vmem:[%s931_s5 + $0xd0] sm:$0xf]  ;;  %249 = vst [vmem:[%s938_s6 + $0x2c] sm:$0xf] %v248_v11 }
  0x1c   : > { %251 = vst [vmem:[%s938_s6 + $0x30] sm:$0xf] %v250_v12  ;;  %253 = vst [vmem:[%s938_s6 + $0x34] sm:$0xf] %v252_v13  ;;  %v254_v14 = vld [vmem:[%s931_s5 + $0xe0] sm:$0xf] }
  0x1d   : > { %v256_v15 = vld [vmem:[%s931_s5 + $0xf0] sm:$0xf]  ;;  %v258_v16 = vld [vmem:[%s931_s5 + $0x100] sm:$0xf]  ;;  %255 = vst [vmem:[%s938_s6 + $0x38] sm:$0xf] %v254_v14 }
  0x1e   : > { %257 = vst [vmem:[%s938_s6 + $0x3c] sm:$0xf] %v256_v15  ;;  %259 = vst [vmem:[%s938_s6 + $0x40] sm:$0xf] %v258_v16  ;;  %v260_v17 = vld [vmem:[%s931_s5 + $0x110] sm:$0xf] }
  0x1f   : > { %261 = vst [vmem:[%s938_s6 + $0x44] sm:$0xf] %v260_v17 }
  0x20 PF: > { %p733_p8 = scmp.ge.s32.totalorder %s855_s19, 1  ;;  %p320_p9 = scmp.lt.s32.totalorder %s855_s19, 5 }
  0x22   : > { %p321_p10 = pnand %p733_p8, %p320_p9 }
  0x23   : > { %s327_s7 = sand.u32 (!%p321_p10), 1, %s839_s15  }
  0x24   : > { %324 = sbr.rel (%p321_p10) target bundleno = 294 (0x126), region = 73  ;;  %s734_s30 = sshll.u32 (!%p321_p10), %s327_s7, 3 }
  0x25   : > { %s761_s8 = smul.u32 (!%p321_p10), 72, %s327_s7  ;;  %s366_s5 = scalar_lea.vmem (!%p321_p10), [#allocation3], %s734_s30 }
  0x27   : > { %s329_s27 = scalar_lea.vmem (!%p321_p10), [#allocation2], %s761_s8 }
  0x29   : > { %v857_v18 = vmov 0   ;;  %v816_v19 = vld [vmem:[%s1017_s0 + $0x4] ss:$8 sps:$4 sm:$0xff]   ;;  %vm471_vm0 = vcmask 130048   ;;  %v806_v25 = vld [vmem:[%s329_s27 + $0x30] sm:$0xff]   ;;  %s750_s6 = sshll.u32 (%p918_p6), %s847_s17, 2 }
  0x2a   : > { %475 = vmatprep.subr.bf16.mxu0 %v857_v18  ;;  %803 = vset.pattern.permute.xlu0 %v857_v18  ;;  %v516_v20 = vld [vmem:[%s1019_s2] sm:$0xff]  ;;  %v517_v22 = vld [vmem:[%s1019_s2 + $0x8] sm:$0xff]  ;;  %v810_v29 = vld [vmem:[%s329_s27 + $0x10] sm:$0xff]   ;;  %s567_s10 = scalar_lea.vmem (%p918_p6), %s1021_s4, %s750_s6 }
  0x2b   : > { %v530_v21 = vld [vmem:[%s1020_s3] sm:$0xff]  ;;  %520 = vperm.xlu0 %803, %v516_v20   ;;  %804 = vset.pattern.permute.xlu1 %v857_v18  ;;  %v531_v23 = vld [vmem:[%s1020_s3 + $0x8] sm:$0xff] }
  0x2c   : > { %746 = vmatprep.mubr.msk.bf16.mxu0 %vm471_vm0, %v816_v19  ;;  %534 = vperm.xlu1 %804, %v530_v21   ;;  %v805_v24 = vld [vmem:[%s329_s27 + $0x38] sm:$0xff]   ;;  %v807_v26 = vld [vmem:[%s329_s27 + $0x28] sm:$0xff]   ;;  %v808_v27 = vld [vmem:[%s329_s27 + $0x20] sm:$0xff]  }
  0x2d   : > { %476 = vmatpush1.bf16.msra.mxu0 %v805_v24  ;;  %v809_v28 = vld [vmem:[%s329_s27 + $0x18] sm:$0xff]   ;;  %v811_v30 = vld [vmem:[%s329_s27 + $0x8] sm:$0xff]   ;;  %v812_v31 = vld [vmem:[%s329_s27] sm:$0xff]  }
  0x2e   : > { %477 = vmatprep.subr.bf16.mxu0 %v857_v18  ;;  %v813_v32 = vld [vmem:[%s329_s27 + $0x40] sm:$0xff]  }
  0x2f   : > { %525 = vperm.xlu0 %803, %v517_v22   ;;  %v814_v33 = vld [vmem:[%s1017_s0] ss:$8 sps:$4 sm:$0xff]  }
  0x30   : > { %539 = vperm.xlu1 %804, %v531_v23  }
  0x31   : > { %478 = vmatpush1.bf16.msra.mxu0 %v806_v25 }
  0x32   : > { %479 = vmatprep.subr.bf16.mxu0 %v857_v18 }
  0x35   : > { %480 = vmatpush1.bf16.msra.mxu0 %v807_v26 }
  0x36   : > { %481 = vmatprep.subr.bf16.mxu0 %v857_v18 }
  0x39   : > { %482 = vmatpush1.bf16.msra.mxu0 %v808_v27 }
  0x3a   : > { %483 = vmatprep.subr.bf16.mxu0 %v857_v18 }
  0x3d   : > { %484 = vmatpush1.bf16.msra.mxu0 %v809_v28 }
  0x3e   : > { %485 = vmatprep.subr.bf16.mxu0 %v857_v18 }
  0x41   : > { %486 = vmatpush1.bf16.msra.mxu0 %v810_v29 }
  0x42   : > { %487 = vmatprep.subr.bf16.mxu0 %v857_v18 }
  0x45   : > { %488 = vmatpush1.bf16.msra.mxu0 %v811_v30 }
  0x46   : > { %489 = vmatprep.subr.bf16.mxu0 %v857_v18 }
  0x49   : > { %490 = vmatpush1.bf16.msra.mxu0 %v812_v31 }
  0x4a   : > { %505 = vmatprep.subr.bf16.mxu0 %v857_v18 }
  0x4d   : > { %506 = vmatpush2.bf16.msra.mxu0 %v813_v32 }
  0x50   : > { %508 = vmatmul.mubr.bf16.vlgmr.msra.gmra.mxu0 %v814_v33 }
  0xa6   : > { %v521_v34 = vpop.permute.xlu0 %520 }
  0xa7   : > { %v535_v35 = vpop.permute.xlu1 %534 }
  0xaa   : > { %v526_v39 = vpop.permute.xlu0 %525 }
  0xab   : > { %v540_v43 = vpop.permute.xlu1 %539 }
 0x110   : > { %v509_v36 = vpop.f32.mrf.mxu0 }
 0x111   : > { %v528_v37 = vmul.f32 %v521_v34, %v509_v36 }
 0x112   : > { %v511_v38 = vpop.f32.mrf.mxu0 }
 0x113   : > { %v542_v41 = vadd.f32 %v535_v35, %v528_v37 }
 0x114   : > { %v512_v40 = vpop.f32.mrf.mxu0 }
 0x115   : > { %v529_v42 = vmul.f32 %v526_v39, %v512_v40  ;;  %v544_v46 = vmax.f32 %v542_v41, 0.0 }
 0x116   : > { %v514_v44 = vpop.f32.mrf.mxu0 }
 0x117   : > { %v543_v45 = vadd.f32 %v540_v43, %v529_v42 }
 0x119   : > { %v545_v47 = vmax.f32 %v543_v45, 0.0  ;;  %562 = sbr.rel (!%p918_p6) target bundleno = 294 (0x126), region = 81 }
 0x11b   : > { %v758_v48 = vpack.c.bf16 %v545_v47, %v544_v46 }
 0x11d   : > { %759 = vst [vmem:[%s366_s5] sm:$0xff] %v758_v48  }
 0x124   : > { %v584_v49 = vld [vmem:[%s366_s5] sm:$0xf]  ;;  %v586_v50 = vld [vmem:[%s366_s5 + $0x4] sm:$0xf] }
 0x125   : > { %585 = vst [vmem:[%s567_s10] sm:$0xf] %v584_v49  ;;  %587 = vst [vmem:[%s567_s10 + $0x10] sm:$0xf] %v586_v50 }
 0x126 PF: > { %s14_s19 = sadd.s32 1, %s855_s19   ;;  %s1023_s15 = smov %s843_s16 }
 0x127   : > { %p11_p11 = scmp.ge.s32.totalorder %s14_s19, 6   ;;  %s1024_s16 = smov %s923_s25 }
 0x128   : > { %s1025_s17 = smov %s851_s18  ;;  %s1026_s18 = smov %s1028_s20 }
 0x129   :  { %13 = sbr.rel (!%p11_p11) target bundleno = 3 (0x3), region = 162 }

// kernel: _lambda_.12
= control target key start
LH: loop header
LB: loop body
LE: loop exit
PB: predicated region body
PF: predicated region fallthrough
CT: control target
= control target key end

     0   :  { %s1352_s15 = smov 0   ;;  %s1354_s16 = smov 0   ;;  %s1614_s0 = inlined_call_operand.vmem [shape: bf16[16,216], index: 0, kind: input, shape index: {}]   ;;  %s1615_s1 = inlined_call_operand.vmem [shape: bf16[216,2048], index: 1, kind: input, shape index: {}]   ;;  %s1616_s2 = inlined_call_operand.vmem [shape: f32[16,1], index: 2, kind: input, shape index: {}]   ;;  %s1617_s3 = inlined_call_operand.vmem [shape: f32[16,1], index: 3, kind: input, shape index: {}]   ;;  %s1618_s4 = inlined_call_operand.vmem [shape: bf16[16,2048], index: 4, kind: output, shape index: {}]  }
   0x1   :  { %s1356_s17 = smov 0   ;;  %s1358_s18 = smov 0  }
   0x2   :  { %s1360_s19 = smov 0  }
   0x3 LB: > { %s23_s20 = sadd.s32 1, %s1320_s18  ;;  %s1068_s21 = sadd.s32 4294967295, %s1324_s19   ;;  %s1324_s19 = sphi %s1360_s19, %s14_s19   ;;  %s1320_s18 = sphi %s1358_s18, %s1623_s18   ;;  %s1316_s17 = sphi %s1356_s17, %s1622_s17   ;;  %s1312_s16 = sphi %s1354_s16, %s1621_s16   ;;  %s1308_s15 = sphi %s1352_s15, %s1620_s15  }
   0x4   : > { %p24_p0 = scmp.ge.s32.totalorder %s23_s20, 4  ;;  %p66_p1 = scmp.ne.s32.totalorder %s1312_s16, %s1308_s15 }
   0x5   : > { %p67_p2 = scmp.eq.s32.totalorder %s1324_s19, 0  ;;  %p150_p4 = scmp.eq.s32.totalorder %s1068_s21, 3 }
   0x6   : > { %s1625_s20 = smov (%p24_p0, %s23_s20), 0  ;;  %s59_s23 = sadd.s32 1, %s1312_s16 }
   0x7   : > { %p68_p3 = por %p67_p2, %p66_p1  ;;  %s56_s22 = ssub.s32 %s1320_s18, %s1625_s20 }
   0x8   : > { %p57_p5 = scmp.eq.s32.totalorder %s56_s22, 0  ;;  %p1387_p6 = por %p150_p4, %p66_p1 }
   0x9   : > { %p1074_p7 = scmp.ge.s32.totalorder %s1324_s19, 4 }
   0xa   : > { %s1392_s25 = scalar_select %p57_p5, %s1312_s16, %s59_s23  }
   0xb   : > { %200 = sbr.rel (%p1074_p7) target bundleno = 47 (0x2f), region = 28 }
  0x10   : > { %203 = sbr.rel (!%p68_p3) target bundleno = 47 (0x2f), region = 32  ;;  %s205_s26 = sand.u32 (%p68_p3), 1, %s1312_s16  }
  0x11   : > { %s1150_s27 = sshll.u32 (%p68_p3), %s1320_s18, 4  ;;  %s1156_s28 = smul.u32 (%p68_p3), 432, %s205_s26 }
  0x12   : > { %s1400_s5 = scalar_lea.vmem (%p68_p3), %s1615_s1, %s1150_s27 }
  0x13   : > { %v223_v0 = vld [vmem:[%s1400_s5] sm:$0xff] (%p68_p3)  ;;  %v225_v1 = vld [vmem:[%s1400_s5 + $0x8] sm:$0xff] (%p68_p3)  ;;  %s1408_s6 = scalar_lea.vmem (%p68_p3), [#allocation2], %s1156_s28 }
  0x14   : > { %v227_v2 = vld [vmem:[%s1400_s5 + $0x40] sm:$0xff] (%p68_p3)  ;;  %v229_v3 = vld [vmem:[%s1400_s5 + $0x48] sm:$0xff] (%p68_p3)  ;;  %224 = vst [vmem:[%s1408_s6] sm:$0xff] (%p68_p3), %v223_v0  ;;  %226 = vst [vmem:[%s1408_s6 + $0x8] sm:$0xff] (%p68_p3), %v225_v1 }
  0x15   : > { %v231_v4 = vld [vmem:[%s1400_s5 + $0x80] sm:$0xff]  ;;  %v233_v5 = vld [vmem:[%s1400_s5 + $0x88] sm:$0xff]  ;;  %228 = vst [vmem:[%s1408_s6 + $0x10] sm:$0xff] %v227_v2  ;;  %230 = vst [vmem:[%s1408_s6 + $0x18] sm:$0xff] %v229_v3 }
  0x16   : > { %232 = vst [vmem:[%s1408_s6 + $0x20] sm:$0xff] %v231_v4  ;;  %234 = vst [vmem:[%s1408_s6 + $0x28] sm:$0xff] %v233_v5  ;;  %v235_v6 = vld [vmem:[%s1400_s5 + $0xc0] sm:$0xff]  ;;  %v237_v7 = vld [vmem:[%s1400_s5 + $0xc8] sm:$0xff] }
  0x17   : > { %v239_v8 = vld [vmem:[%s1400_s5 + $0x100] sm:$0xff]  ;;  %236 = vst [vmem:[%s1408_s6 + $0x30] sm:$0xff] %v235_v6  ;;  %238 = vst [vmem:[%s1408_s6 + $0x38] sm:$0xff] %v237_v7  ;;  %v241_v9 = vld [vmem:[%s1400_s5 + $0x108] sm:$0xff] }
  0x18   : > { %240 = vst [vmem:[%s1408_s6 + $0x40] sm:$0xff] %v239_v8  ;;  %v243_v10 = vld [vmem:[%s1400_s5 + $0x140] sm:$0xff]  ;;  %v245_v11 = vld [vmem:[%s1400_s5 + $0x148] sm:$0xff]  ;;  %242 = vst [vmem:[%s1408_s6 + $0x48] sm:$0xff] %v241_v9 }
  0x19   : > { %244 = vst [vmem:[%s1408_s6 + $0x50] sm:$0xff] %v243_v10  ;;  %246 = vst [vmem:[%s1408_s6 + $0x58] sm:$0xff] %v245_v11  ;;  %v247_v12 = vld [vmem:[%s1400_s5 + $0x180] sm:$0xff]  ;;  %v249_v13 = vld [vmem:[%s1400_s5 + $0x188] sm:$0xff] }
  0x1a   : > { %v251_v14 = vld [vmem:[%s1400_s5 + $0x1c0] sm:$0xff]  ;;  %248 = vst [vmem:[%s1408_s6 + $0x60] sm:$0xff] %v247_v12  ;;  %250 = vst [vmem:[%s1408_s6 + $0x68] sm:$0xff] %v249_v13  ;;  %v253_v15 = vld [vmem:[%s1400_s5 + $0x1c8] sm:$0xff] }
  0x1b   : > { %252 = vst [vmem:[%s1408_s6 + $0x70] sm:$0xff] %v251_v14  ;;  %v255_v16 = vld [vmem:[%s1400_s5 + $0x200] sm:$0xff]  ;;  %v257_v17 = vld [vmem:[%s1400_s5 + $0x208] sm:$0xff]  ;;  %254 = vst [vmem:[%s1408_s6 + $0x78] sm:$0xff] %v253_v15 }
  0x1c   : > { %256 = vst [vmem:[%s1408_s6 + $0x80] sm:$0xff] %v255_v16  ;;  %258 = vst [vmem:[%s1408_s6 + $0x88] sm:$0xff] %v257_v17  ;;  %v259_v18 = vld [vmem:[%s1400_s5 + $0x240] sm:$0xff]  ;;  %v261_v19 = vld [vmem:[%s1400_s5 + $0x248] sm:$0xff] }
  0x1d   : > { %v263_v20 = vld [vmem:[%s1400_s5 + $0x280] sm:$0xff]  ;;  %260 = vst [vmem:[%s1408_s6 + $0x90] sm:$0xff] %v259_v18  ;;  %262 = vst [vmem:[%s1408_s6 + $0x98] sm:$0xff] %v261_v19  ;;  %v265_v21 = vld [vmem:[%s1400_s5 + $0x288] sm:$0xff] }
  0x1e   : > { %264 = vst [vmem:[%s1408_s6 + $0xa0] sm:$0xff] %v263_v20  ;;  %v267_v22 = vld [vmem:[%s1400_s5 + $0x2c0] sm:$0xff]  ;;  %v269_v23 = vld [vmem:[%s1400_s5 + $0x2c8] sm:$0xff]  ;;  %266 = vst [vmem:[%s1408_s6 + $0xa8] sm:$0xff] %v265_v21 }
  0x1f   : > { %268 = vst [vmem:[%s1408_s6 + $0xb0] sm:$0xff] %v267_v22  ;;  %270 = vst [vmem:[%s1408_s6 + $0xb8] sm:$0xff] %v269_v23  ;;  %v271_v24 = vld [vmem:[%s1400_s5 + $0x300] sm:$0xff]  ;;  %v273_v25 = vld [vmem:[%s1400_s5 + $0x308] sm:$0xff] }
  0x20   : > { %v275_v26 = vld [vmem:[%s1400_s5 + $0x340] sm:$0xff]  ;;  %272 = vst [vmem:[%s1408_s6 + $0xc0] sm:$0xff] %v271_v24  ;;  %274 = vst [vmem:[%s1408_s6 + $0xc8] sm:$0xff] %v273_v25  ;;  %v277_v27 = vld [vmem:[%s1400_s5 + $0x348] sm:$0xff] }
  0x21   : > { %276 = vst [vmem:[%s1408_s6 + $0xd0] sm:$0xff] %v275_v26  ;;  %v279_v28 = vld [vmem:[%s1400_s5 + $0x380] sm:$0xff]  ;;  %v281_v29 = vld [vmem:[%s1400_s5 + $0x388] sm:$0xff]  ;;  %278 = vst [vmem:[%s1408_s6 + $0xd8] sm:$0xff] %v277_v27 }
  0x22   : > { %280 = vst [vmem:[%s1408_s6 + $0xe0] sm:$0xff] %v279_v28  ;;  %282 = vst [vmem:[%s1408_s6 + $0xe8] sm:$0xff] %v281_v29  ;;  %v283_v30 = vld [vmem:[%s1400_s5 + $0x3c0] sm:$0xff]  ;;  %v285_v31 = vld [vmem:[%s1400_s5 + $0x3c8] sm:$0xff] }
  0x23   : > { %v287_v32 = vld [vmem:[%s1400_s5 + $0x400] sm:$0xff]  ;;  %284 = vst [vmem:[%s1408_s6 + $0xf0] sm:$0xff] %v283_v30  ;;  %286 = vst [vmem:[%s1408_s6 + $0xf8] sm:$0xff] %v285_v31  ;;  %v289_v33 = vld [vmem:[%s1400_s5 + $0x408] sm:$0xff] }
  0x24   : > { %288 = vst [vmem:[%s1408_s6 + $0x100] sm:$0xff] %v287_v32  ;;  %v291_v34 = vld [vmem:[%s1400_s5 + $0x440] sm:$0xff]  ;;  %v293_v35 = vld [vmem:[%s1400_s5 + $0x448] sm:$0xff]  ;;  %290 = vst [vmem:[%s1408_s6 + $0x108] sm:$0xff] %v289_v33 }
  0x25   : > { %292 = vst [vmem:[%s1408_s6 + $0x110] sm:$0xff] %v291_v34  ;;  %294 = vst [vmem:[%s1408_s6 + $0x118] sm:$0xff] %v293_v35  ;;  %v295_v36 = vld [vmem:[%s1400_s5 + $0x480] sm:$0xff]  ;;  %v297_v37 = vld [vmem:[%s1400_s5 + $0x488] sm:$0xff] }
  0x26   : > { %v299_v38 = vld [vmem:[%s1400_s5 + $0x4c0] sm:$0xff]  ;;  %296 = vst [vmem:[%s1408_s6 + $0x120] sm:$0xff] %v295_v36  ;;  %298 = vst [vmem:[%s1408_s6 + $0x128] sm:$0xff] %v297_v37  ;;  %v301_v39 = vld [vmem:[%s1400_s5 + $0x4c8] sm:$0xff] }
  0x27   : > { %300 = vst [vmem:[%s1408_s6 + $0x130] sm:$0xff] %v299_v38  ;;  %v303_v40 = vld [vmem:[%s1400_s5 + $0x500] sm:$0xff]  ;;  %v305_v41 = vld [vmem:[%s1400_s5 + $0x508] sm:$0xff]  ;;  %302 = vst [vmem:[%s1408_s6 + $0x138] sm:$0xff] %v301_v39 }
  0x28   : > { %304 = vst [vmem:[%s1408_s6 + $0x140] sm:$0xff] %v303_v40  ;;  %306 = vst [vmem:[%s1408_s6 + $0x148] sm:$0xff] %v305_v41  ;;  %v307_v42 = vld [vmem:[%s1400_s5 + $0x540] sm:$0xff]  ;;  %v309_v43 = vld [vmem:[%s1400_s5 + $0x548] sm:$0xff] }
  0x29   : > { %v311_v44 = vld [vmem:[%s1400_s5 + $0x580] sm:$0xff]  ;;  %308 = vst [vmem:[%s1408_s6 + $0x150] sm:$0xff] %v307_v42  ;;  %310 = vst [vmem:[%s1408_s6 + $0x158] sm:$0xff] %v309_v43  ;;  %v313_v45 = vld [vmem:[%s1400_s5 + $0x588] sm:$0xff] }
  0x2a   : > { %312 = vst [vmem:[%s1408_s6 + $0x160] sm:$0xff] %v311_v44  ;;  %v315_v46 = vld [vmem:[%s1400_s5 + $0x5c0] sm:$0xff]  ;;  %v317_v47 = vld [vmem:[%s1400_s5 + $0x5c8] sm:$0xff]  ;;  %314 = vst [vmem:[%s1408_s6 + $0x168] sm:$0xff] %v313_v45 }
  0x2b   : > { %316 = vst [vmem:[%s1408_s6 + $0x170] sm:$0xff] %v315_v46  ;;  %318 = vst [vmem:[%s1408_s6 + $0x178] sm:$0xff] %v317_v47  ;;  %v319_v48 = vld [vmem:[%s1400_s5 + $0x600] sm:$0xff]  ;;  %v321_v49 = vld [vmem:[%s1400_s5 + $0x608] sm:$0xff] }
  0x2c   : > { %v323_v50 = vld [vmem:[%s1400_s5 + $0x640] sm:$0xff]  ;;  %320 = vst [vmem:[%s1408_s6 + $0x180] sm:$0xff] %v319_v48  ;;  %322 = vst [vmem:[%s1408_s6 + $0x188] sm:$0xff] %v321_v49  ;;  %v325_v51 = vld [vmem:[%s1400_s5 + $0x648] sm:$0xff] }
  0x2d   : > { %324 = vst [vmem:[%s1408_s6 + $0x190] sm:$0xff] %v323_v50  ;;  %v327_v52 = vld [vmem:[%s1400_s5 + $0x680] sm:$0xff]  ;;  %v329_v53 = vld [vmem:[%s1400_s5 + $0x688] sm:$0xff]  ;;  %326 = vst [vmem:[%s1408_s6 + $0x198] sm:$0xff] %v325_v51 }
  0x2e   : > { %328 = vst [vmem:[%s1408_s6 + $0x1a0] sm:$0xff] %v327_v52  ;;  %330 = vst [vmem:[%s1408_s6 + $0x1a8] sm:$0xff] %v329_v53 }
  0x2f PF: > { %p1077_p8 = scmp.ge.s32.totalorder %s1324_s19, 1  ;;  %p335_p9 = scmp.lt.s32.totalorder %s1324_s19, 5 }
  0x31   : > { %p336_p10 = pnand %p1077_p8, %p335_p9 }
  0x32   : > { %s342_s7 = sand.u32 (!%p336_p10), 1, %s1308_s15  }
  0x33   : > { %339 = sbr.rel (%p336_p10) target bundleno = 332 (0x14c), region = 55  ;;  %s1078_s30 = sshll.u32 (!%p336_p10), %s342_s7, 5 }
  0x34   : > { %s1157_s8 = smul.u32 (!%p336_p10), 432, %s342_s7  ;;  %s381_s15 = scalar_lea.vmem (!%p336_p10), [#allocation3], %s1078_s30 }
  0x36   : > { %s1526_s21 = scalar_lea.vmem (!%p336_p10), [#allocation2], %s1157_s8 }
  0x38   : > { %v1285_v54 = vld [vmem:[%s1614_s0 + $0x4] ss:$8 sps:$4 sm:$0xff]   ;;  %vm740_vm0 = vcmask 719872   ;;  %v1326_v56 = vmov 0   ;;  %v1205_v62 = vld [vmem:[%s1526_s21 + $0xe0] ss:$16 sps:$4 sm:$0xff]  }
  0x39   : > { %v843_v55 = vld [vmem:[%s1616_s2] sm:$0xff]  ;;  %1199 = vset.pattern.permute.xlu0 %v1326_v56  ;;  %1200 = vset.pattern.permute.xlu1 %v1326_v56  ;;  %v844_v59 = vld [vmem:[%s1616_s2 + $0x8] sm:$0xff]  ;;  %vm744_vm1 = vcmask 1043456   ;;  %s1155_s5 = sshll.u32 (%p1387_p6), %s1316_s17, 4 }
  0x3a   : > { %v863_v57 = vld [vmem:[%s1617_s3] sm:$0xff]  ;;  %1138 = vmatprep.mubr.msk.bf16.mxu0 %vm740_vm0, %v1285_v54  ;;  %1140 = vmatprep.mubr.msk.bf16.mxu1 %vm740_vm0, %v1285_v54  ;;  %v1203_v60 = vld [vmem:[%s1526_s21 + $0xec] ss:$16 sps:$4 sm:$0xff]   ;;  %v1206_v63 = vld [vmem:[%s1526_s21 + $0xe8] ss:$16 sps:$4 sm:$0xff]   ;;  %s931_s8 = scalar_lea.vmem (%p1387_p6), %s1618_s4, %s1155_s5 }
  0x3b   : > { %v1201_v58 = vld [vmem:[%s1526_s21 + $0xe4] ss:$16 sps:$4 sm:$0xff]   ;;  %847 = vperm.xlu0 %1199, %v843_v55   ;;  %867 = vperm.xlu1 %1200, %v863_v57   ;;  %v864_v61 = vld [vmem:[%s1617_s3 + $0x8] sm:$0xff]  ;;  %v1211_v2 = vld [vmem:[%s1526_s21 + $0xc0] ss:$16 sps:$4 sm:$0xff]  }
  0x3c   : > { %757 = vmatprep.subr.bf16.mxu0 %v1201_v58  ;;  %800 = vmatprep.subr.bf16.mxu1 %v1203_v60  ;;  %v1207_v0 = vld [vmem:[%s1526_s21 + $0xc4] ss:$16 sps:$4 sm:$0xff]   ;;  %v1209_v1 = vld [vmem:[%s1526_s21 + $0xcc] ss:$16 sps:$4 sm:$0xff]   ;;  %v1212_v3 = vld [vmem:[%s1526_s21 + $0xc8] ss:$16 sps:$4 sm:$0xff]  }
  0x3d   : > { %758 = vmatpush1.bf16.msra.mxu0 %v1205_v62  ;;  %801 = vmatpush1.bf16.msra.mxu1 %v1206_v63  ;;  %v1213_v4 = vld [vmem:[%s1526_s21 + $0xa4] ss:$16 sps:$4 sm:$0xff]   ;;  %v1215_v5 = vld [vmem:[%s1526_s21 + $0xac] ss:$16 sps:$4 sm:$0xff]   ;;  %v1217_v6 = vld [vmem:[%s1526_s21 + $0xa0] ss:$16 sps:$4 sm:$0xff]  }
  0x3e   : > { %759 = vmatprep.subr.bf16.mxu0 %v1207_v0  ;;  %802 = vmatprep.subr.bf16.mxu1 %v1209_v1  ;;  %v1218_v7 = vld [vmem:[%s1526_s21 + $0xa8] ss:$16 sps:$4 sm:$0xff]   ;;  %v1219_v8 = vld [vmem:[%s1526_s21 + $0x84] ss:$16 sps:$4 sm:$0xff]   ;;  %v1221_v9 = vld [vmem:[%s1526_s21 + $0x8c] ss:$16 sps:$4 sm:$0xff]  }
  0x3f   : > { %852 = vperm.xlu0 %1199, %v844_v59   ;;  %872 = vperm.xlu1 %1200, %v864_v61   ;;  %v1223_v10 = vld [vmem:[%s1526_s21 + $0x80] ss:$16 sps:$4 sm:$0xff]   ;;  %v1224_v11 = vld [vmem:[%s1526_s21 + $0x88] ss:$16 sps:$4 sm:$0xff]   ;;  %v1225_v12 = vld [vmem:[%s1526_s21 + $0x64] ss:$16 sps:$4 sm:$0xff]  }
  0x40   : > { %v1227_v13 = vld [vmem:[%s1526_s21 + $0x6c] ss:$16 sps:$4 sm:$0xff]   ;;  %v1229_v14 = vld [vmem:[%s1526_s21 + $0x60] ss:$16 sps:$4 sm:$0xff]   ;;  %v1230_v15 = vld [vmem:[%s1526_s21 + $0x68] ss:$16 sps:$4 sm:$0xff]  }
  0x41   : > { %760 = vmatpush1.bf16.msra.mxu0 %v1211_v2  ;;  %803 = vmatpush1.bf16.msra.mxu1 %v1212_v3  ;;  %v1231_v16 = vld [vmem:[%s1526_s21 + $0x44] ss:$16 sps:$4 sm:$0xff]   ;;  %v1233_v17 = vld [vmem:[%s1526_s21 + $0x4c] ss:$16 sps:$4 sm:$0xff]   ;;  %v1235_v18 = vld [vmem:[%s1526_s21 + $0x40] ss:$16 sps:$4 sm:$0xff]  }
  0x42   : > { %761 = vmatprep.subr.bf16.mxu0 %v1213_v4  ;;  %804 = vmatprep.subr.bf16.mxu1 %v1215_v5  ;;  %v1236_v19 = vld [vmem:[%s1526_s21 + $0x48] ss:$16 sps:$4 sm:$0xff]   ;;  %v1237_v20 = vld [vmem:[%s1526_s21 + $0x24] ss:$16 sps:$4 sm:$0xff]   ;;  %v1239_v21 = vld [vmem:[%s1526_s21 + $0x2c] ss:$16 sps:$4 sm:$0xff]  }
  0x43   : > { %v1241_v22 = vld [vmem:[%s1526_s21 + $0x20] ss:$16 sps:$4 sm:$0xff]   ;;  %v1242_v23 = vld [vmem:[%s1526_s21 + $0x28] ss:$16 sps:$4 sm:$0xff]   ;;  %v1243_v24 = vld [vmem:[%s1526_s21 + $0x4] ss:$16 sps:$4 sm:$0xff]  }
  0x44   : > { %v1245_v25 = vld [vmem:[%s1526_s21 + $0xc] ss:$16 sps:$4 sm:$0xff]   ;;  %v459_v26 = vld [vmem:[%s1526_s21 + $0x1a0] sm:$0xff]  ;;  %v1248_v29 = vld [vmem:[%s1526_s21 + $0x8] ss:$16 sps:$4 sm:$0xff]  }
  0x45   : > { %762 = vmatpush1.bf16.msra.mxu0 %v1217_v6  ;;  %805 = vmatpush1.bf16.msra.mxu1 %v1218_v7  ;;  %v460_v27 = vld [vmem:[%s1526_s21 + $0x1a8] sm:$0xff]  ;;  %v1247_v28 = vld [vmem:[%s1526_s21] ss:$16 sps:$4 sm:$0xff]   ;;  %v1134_v30 = vcombine.high %v459_v26, %v459_v26  ;;  %v1133_v32 = vcombine.low %v459_v26, %v459_v26  ;;  %v1253_v34 = vld [vmem:[%s1526_s21 + $0x184] ss:$16 sps:$4 sm:$0xff]  }
  0x46   : > { %763 = vmatprep.subr.bf16.mxu0 %v1219_v8  ;;  %806 = vmatprep.subr.bf16.mxu1 %v1221_v9  ;;  %v1136_v31 = vcombine.high %v460_v27, %v460_v27  ;;  %v1135_v33 = vcombine.low %v460_v27, %v460_v27  ;;  %v1255_v37 = vld [vmem:[%s1526_s21 + $0x18c] ss:$16 sps:$4 sm:$0xff]   ;;  %v1257_v38 = vld [vmem:[%s1526_s21 + $0x180] ss:$16 sps:$4 sm:$0xff]   ;;  %v1258_v39 = vld [vmem:[%s1526_s21 + $0x188] ss:$16 sps:$4 sm:$0xff]  }
  0x47   : > { %v746_v35 = vsel %vm744_vm1, %v1133_v32, 0  ;;  %v1259_v40 = vld [vmem:[%s1526_s21 + $0x164] ss:$16 sps:$4 sm:$0xff]   ;;  %v1261_v41 = vld [vmem:[%s1526_s21 + $0x16c] ss:$16 sps:$4 sm:$0xff]  }
  0x48   : > { %v752_v36 = vsel %vm744_vm1, %v1135_v33, 0  ;;  %v1263_v42 = vld [vmem:[%s1526_s21 + $0x160] ss:$16 sps:$4 sm:$0xff]   ;;  %v1264_v43 = vld [vmem:[%s1526_s21 + $0x168] ss:$16 sps:$4 sm:$0xff]  }
  0x49   : > { %764 = vmatpush1.bf16.msra.mxu0 %v1223_v10  ;;  %807 = vmatpush1.bf16.msra.mxu1 %v1224_v11  ;;  %v1265_v44 = vld [vmem:[%s1526_s21 + $0x144] ss:$16 sps:$4 sm:$0xff]   ;;  %v1267_v45 = vld [vmem:[%s1526_s21 + $0x14c] ss:$16 sps:$4 sm:$0xff]   ;;  %v1269_v46 = vld [vmem:[%s1526_s21 + $0x140] ss:$16 sps:$4 sm:$0xff]  }
  0x4a   : > { %765 = vmatprep.subr.bf16.mxu0 %v1225_v12  ;;  %808 = vmatprep.subr.bf16.mxu1 %v1227_v13  ;;  %v1270_v47 = vld [vmem:[%s1526_s21 + $0x148] ss:$16 sps:$4 sm:$0xff]   ;;  %v1271_v48 = vld [vmem:[%s1526_s21 + $0x124] ss:$16 sps:$4 sm:$0xff]   ;;  %v1273_v49 = vld [vmem:[%s1526_s21 + $0x12c] ss:$16 sps:$4 sm:$0xff]  }
  0x4b   : > { %v1275_v50 = vld [vmem:[%s1526_s21 + $0x120] ss:$16 sps:$4 sm:$0xff]   ;;  %v1276_v51 = vld [vmem:[%s1526_s21 + $0x128] ss:$16 sps:$4 sm:$0xff]   ;;  %v1277_v52 = vld [vmem:[%s1526_s21 + $0x104] ss:$16 sps:$4 sm:$0xff]  }
  0x4c   : > { %v1279_v53 = vld [vmem:[%s1526_s21 + $0x10c] ss:$16 sps:$4 sm:$0xff]   ;;  %v1281_v54 = vld [vmem:[%s1526_s21 + $0x100] ss:$16 sps:$4 sm:$0xff]   ;;  %v1282_v55 = vld [vmem:[%s1526_s21 + $0x108] ss:$16 sps:$4 sm:$0xff]  }
  0x4d   : > { %766 = vmatpush1.bf16.msra.mxu0 %v1229_v14  ;;  %809 = vmatpush1.bf16.msra.mxu1 %v1230_v15  ;;  %v1283_v56 = vld [vmem:[%s1614_s0] ss:$8 sps:$4 sm:$0xff]  }
  0x4e   : > { %767 = vmatprep.subr.bf16.mxu0 %v1231_v16  ;;  %810 = vmatprep.subr.bf16.mxu1 %v1233_v17 }
  0x51   : > { %768 = vmatpush1.bf16.msra.mxu0 %v1235_v18  ;;  %811 = vmatpush1.bf16.msra.mxu1 %v1236_v19 }
  0x52   : > { %769 = vmatprep.subr.bf16.mxu0 %v1237_v20  ;;  %812 = vmatprep.subr.bf16.mxu1 %v1239_v21 }
  0x55   : > { %770 = vmatpush1.bf16.msra.mxu0 %v1241_v22  ;;  %813 = vmatpush1.bf16.msra.mxu1 %v1242_v23 }
  0x56   : > { %771 = vmatprep.subr.bf16.mxu0 %v1243_v24  ;;  %814 = vmatprep.subr.bf16.mxu1 %v1245_v25 }
  0x59   : > { %772 = vmatpush1.bf16.msra.mxu0 %v1247_v28  ;;  %815 = vmatpush1.bf16.msra.mxu1 %v1248_v29 }
  0x5a   : > { %1137 = vmatprep.subr.msk.bf16.mxu0 %vm744_vm1, %v1134_v30  ;;  %1139 = vmatprep.subr.msk.bf16.mxu1 %vm744_vm1, %v1136_v31 }
  0x5d   : > { %778 = vmatpush2.bf16.msra.mxu0 %v746_v35  ;;  %821 = vmatpush2.bf16.msra.mxu1 %v752_v36 }
  0x5e   : > { %779 = vmatprep.subr.bf16.mxu0 %v1253_v34  ;;  %822 = vmatprep.subr.bf16.mxu1 %v1255_v37 }
  0x61   : > { %780 = vmatpush2.bf16.msra.mxu0 %v1257_v38  ;;  %823 = vmatpush2.bf16.msra.mxu1 %v1258_v39 }
  0x62   : > { %781 = vmatprep.subr.bf16.mxu0 %v1259_v40  ;;  %824 = vmatprep.subr.bf16.mxu1 %v1261_v41 }
  0x65   : > { %782 = vmatpush2.bf16.msra.mxu0 %v1263_v42  ;;  %825 = vmatpush2.bf16.msra.mxu1 %v1264_v43 }
  0x66   : > { %783 = vmatprep.subr.bf16.mxu0 %v1265_v44  ;;  %826 = vmatprep.subr.bf16.mxu1 %v1267_v45 }
  0x69   : > { %784 = vmatpush2.bf16.msra.mxu0 %v1269_v46  ;;  %827 = vmatpush2.bf16.msra.mxu1 %v1270_v47 }
  0x6a   : > { %785 = vmatprep.subr.bf16.mxu0 %v1271_v48  ;;  %828 = vmatprep.subr.bf16.mxu1 %v1273_v49 }
  0x6d   : > { %786 = vmatpush2.bf16.msra.mxu0 %v1275_v50  ;;  %829 = vmatpush2.bf16.msra.mxu1 %v1276_v51 }
  0x6e   : > { %787 = vmatprep.subr.bf16.mxu0 %v1277_v52  ;;  %830 = vmatprep.subr.bf16.mxu1 %v1279_v53 }
  0x71   : > { %788 = vmatpush2.bf16.msra.mxu0 %v1281_v54  ;;  %831 = vmatpush2.bf16.msra.mxu1 %v1282_v55 }
  0x74   : > { %790 = vmatmul.mubr.bf16.vlgmr.msra.gmra.mxu0 %v1283_v56  ;;  %833 = vmatmul.mubr.bf16.vlgmr.msra.gmra.mxu1 %v1283_v56 }
  0xb6   : > { %v848_v57 = vpop.permute.xlu0 %847  ;;  %v868_v60 = vpop.permute.xlu1 %867 }
  0xba   : > { %v853_v7 = vpop.permute.xlu0 %852  ;;  %v873_v18 = vpop.permute.xlu1 %872 }
 0x134   : > { %v791_v58 = vpop.f32.mrf.mxu0  ;;  %v834_v59 = vpop.f32.mrf.mxu1 }
 0x135   : > { %v855_v61 = vmul.f32 %v848_v57, %v791_v58  ;;  %v857_v62 = vmul.f32 %v848_v57, %v834_v59 }
 0x136   : > { %v793_v63 = vpop.f32.mrf.mxu0  ;;  %v836_v0 = vpop.f32.mrf.mxu1 }
 0x137   : > { %v875_v1 = vadd.f32 %v868_v60, %v855_v61  ;;  %v877_v2 = vadd.f32 %v868_v60, %v857_v62  ;;  %v856_v3 = vmul.f32 %v848_v57, %v793_v63  ;;  %v858_v4 = vmul.f32 %v848_v57, %v836_v0 }
 0x138   : > { %v795_v5 = vpop.f32.mrf.mxu0  ;;  %v838_v6 = vpop.f32.mrf.mxu1 }
 0x139   : > { %v876_v8 = vadd.f32 %v868_v60, %v856_v3  ;;  %v878_v9 = vadd.f32 %v868_v60, %v858_v4  ;;  %v883_v10 = vmax.f32 %v875_v1, 0.0  ;;  %v885_v11 = vmax.f32 %v877_v2, 0.0 }
 0x13a   : > { %v859_v12 = vmul.f32 %v853_v7, %v795_v5  ;;  %v861_v13 = vmul.f32 %v853_v7, %v838_v6  ;;  %v797_v14 = vpop.f32.mrf.mxu0  ;;  %v840_v15 = vpop.f32.mrf.mxu1 }
 0x13b   : > { %v884_v16 = vmax.f32 %v876_v8, 0.0  ;;  %v886_v17 = vmax.f32 %v878_v9, 0.0  ;;  %v860_v19 = vmul.f32 %v853_v7, %v797_v14  ;;  %v862_v20 = vmul.f32 %v853_v7, %v840_v15 }
 0x13c   : > { %v879_v21 = vadd.f32 %v873_v18, %v859_v12  ;;  %v881_v22 = vadd.f32 %v873_v18, %v861_v13 }
 0x13d   : > { %v1151_v23 = vpack.c.bf16 %v884_v16, %v883_v10  ;;  %v1152_v24 = vpack.c.bf16 %v886_v17, %v885_v11  ;;  %v880_v25 = vadd.f32 %v873_v18, %v860_v19  ;;  %v882_v26 = vadd.f32 %v873_v18, %v862_v20 }
 0x13e   : > { %v887_v27 = vmax.f32 %v879_v21, 0.0  ;;  %v889_v28 = vmax.f32 %v881_v22, 0.0 }
 0x13f   : > { %915 = vst [vmem:[%s381_s15] sm:$0xff] %v1151_v23  ;;  %916 = vst [vmem:[%s381_s15 + $0x8] sm:$0xff] %v1152_v24  ;;  %v888_v29 = vmax.f32 %v880_v25, 0.0  ;;  %v890_v30 = vmax.f32 %v882_v26, 0.0  ;;  %925 = sbr.rel (!%p1387_p6) target bundleno = 332 (0x14c), region = 63 }
 0x141   : > { %v1153_v31 = vpack.c.bf16 %v888_v29, %v887_v27  ;;  %v1154_v32 = vpack.c.bf16 %v890_v30, %v889_v28 }
 0x143   : > { %917 = vst [vmem:[%s381_s15 + $0x10] sm:$0xff] %v1153_v31  ;;  %918 = vst [vmem:[%s381_s15 + $0x18] sm:$0xff] %v1154_v32 }
 0x146   : > { %v944_v33 = vld [vmem:[%s381_s15] sm:$0xff]  ;;  %v946_v34 = vld [vmem:[%s381_s15 + $0x8] sm:$0xff] }
 0x147   : > { %945 = vst [vmem:[%s931_s8] sm:$0xff] %v944_v33  ;;  %947 = vst [vmem:[%s931_s8 + $0x8] sm:$0xff] %v946_v34 }
 0x14a   : > { %v948_v35 = vld [vmem:[%s381_s15 + $0x10] sm:$0xff]  ;;  %v950_v36 = vld [vmem:[%s381_s15 + $0x18] sm:$0xff] }
 0x14b   : > { %949 = vst [vmem:[%s931_s8 + $0x40] sm:$0xff] %v948_v35  ;;  %951 = vst [vmem:[%s931_s8 + $0x48] sm:$0xff] %v950_v36 }
 0x14c PF: > { %s14_s19 = sadd.s32 1, %s1324_s19   ;;  %s1620_s15 = smov %s1312_s16 }
 0x14d   : > { %p11_p11 = scmp.ge.s32.totalorder %s14_s19, 6   ;;  %s1621_s16 = smov %s1392_s25 }
 0x14e   : > { %s1622_s17 = smov %s1320_s18  ;;  %s1623_s18 = smov %s1625_s20 }
 0x14f   :  { %13 = sbr.rel (!%p11_p11) target bundleno = 3 (0x3), region = 126 }

// kernel: _lambda_.13
= control target key start
LH: loop header
LB: loop body
LE: loop exit
PB: predicated region body
PF: predicated region fallthrough
CT: control target
= control target key end

     0   :  { %s1145_s15 = smov 0   ;;  %s1147_s16 = smov 0   ;;  %s1353_s0 = inlined_call_operand.vmem [shape: bf16[16,144], index: 0, kind: input, shape index: {}]   ;;  %s1354_s1 = inlined_call_operand.vmem [shape: bf16[144,2048], index: 1, kind: input, shape index: {}]   ;;  %s1355_s2 = inlined_call_operand.vmem [shape: f32[16,1], index: 2, kind: input, shape index: {}]   ;;  %s1356_s3 = inlined_call_operand.vmem [shape: f32[16,1], index: 3, kind: input, shape index: {}]   ;;  %s1357_s4 = inlined_call_operand.vmem [shape: bf16[16,2048], index: 4, kind: output, shape index: {}]  }
   0x1   :  { %s1149_s17 = smov 0   ;;  %s1151_s18 = smov 0  }
   0x2   :  { %s1153_s19 = smov 0  }
   0x3 LB: > { %s23_s20 = sadd.s32 1, %s1113_s18  ;;  %s911_s21 = sadd.s32 4294967295, %s1117_s19   ;;  %s1117_s19 = sphi %s1153_s19, %s14_s19   ;;  %s1113_s18 = sphi %s1151_s18, %s1362_s18   ;;  %s1109_s17 = sphi %s1149_s17, %s1361_s17   ;;  %s1105_s16 = sphi %s1147_s16, %s1360_s16   ;;  %s1101_s15 = sphi %s1145_s15, %s1359_s15  }
   0x4   : > { %p24_p0 = scmp.ge.s32.totalorder %s23_s20, 4  ;;  %p66_p1 = scmp.ne.s32.totalorder %s1105_s16, %s1101_s15 }
   0x5   : > { %p67_p2 = scmp.eq.s32.totalorder %s1117_s19, 0  ;;  %p150_p4 = scmp.eq.s32.totalorder %s911_s21, 3 }
   0x6   : > { %s1364_s20 = smov (%p24_p0, %s23_s20), 0  ;;  %s59_s23 = sadd.s32 1, %s1105_s16 }
   0x7   : > { %p68_p3 = por %p67_p2, %p66_p1  ;;  %s56_s22 = ssub.s32 %s1113_s18, %s1364_s20 }
   0x8   : > { %p57_p5 = scmp.eq.s32.totalorder %s56_s22, 0  ;;  %p1180_p6 = por %p150_p4, %p66_p1 }
   0x9   : > { %p917_p7 = scmp.ge.s32.totalorder %s1117_s19, 4 }
   0xa   : > { %s1185_s25 = scalar_select %p57_p5, %s1105_s16, %s59_s23  }
   0xb   : > { %200 = sbr.rel (%p917_p7) target bundleno = 38 (0x26), region = 28 }
  0x10   : > { %203 = sbr.rel (!%p68_p3) target bundleno = 38 (0x26), region = 32  ;;  %s205_s26 = sand.u32 (%p68_p3), 1, %s1105_s16  }
  0x11   : > { %s971_s27 = sshll.u32 (%p68_p3), %s1113_s18, 4  ;;  %s977_s28 = smul.u32 (%p68_p3), 288, %s205_s26 }
  0x12   : > { %s1193_s5 = scalar_lea.vmem (%p68_p3), %s1354_s1, %s971_s27 }
  0x13   : > { %v223_v0 = vld [vmem:[%s1193_s5] sm:$0xff] (%p68_p3)  ;;  %v225_v1 = vld [vmem:[%s1193_s5 + $0x8] sm:$0xff] (%p68_p3)  ;;  %s1201_s6 = scalar_lea.vmem (%p68_p3), [#allocation2], %s977_s28 }
  0x14   : > { %v227_v2 = vld [vmem:[%s1193_s5 + $0x40] sm:$0xff] (%p68_p3)  ;;  %v229_v3 = vld [vmem:[%s1193_s5 + $0x48] sm:$0xff] (%p68_p3)  ;;  %224 = vst [vmem:[%s1201_s6] sm:$0xff] (%p68_p3), %v223_v0  ;;  %226 = vst [vmem:[%s1201_s6 + $0x8] sm:$0xff] (%p68_p3), %v225_v1 }
  0x15   : > { %v231_v4 = vld [vmem:[%s1193_s5 + $0x80] sm:$0xff]  ;;  %v233_v5 = vld [vmem:[%s1193_s5 + $0x88] sm:$0xff]  ;;  %228 = vst [vmem:[%s1201_s6 + $0x10] sm:$0xff] %v227_v2  ;;  %230 = vst [vmem:[%s1201_s6 + $0x18] sm:$0xff] %v229_v3 }
  0x16   : > { %232 = vst [vmem:[%s1201_s6 + $0x20] sm:$0xff] %v231_v4  ;;  %234 = vst [vmem:[%s1201_s6 + $0x28] sm:$0xff] %v233_v5  ;;  %v235_v6 = vld [vmem:[%s1193_s5 + $0xc0] sm:$0xff]  ;;  %v237_v7 = vld [vmem:[%s1193_s5 + $0xc8] sm:$0xff] }
  0x17   : > { %v239_v8 = vld [vmem:[%s1193_s5 + $0x100] sm:$0xff]  ;;  %236 = vst [vmem:[%s1201_s6 + $0x30] sm:$0xff] %v235_v6  ;;  %238 = vst [vmem:[%s1201_s6 + $0x38] sm:$0xff] %v237_v7  ;;  %v241_v9 = vld [vmem:[%s1193_s5 + $0x108] sm:$0xff] }
  0x18   : > { %240 = vst [vmem:[%s1201_s6 + $0x40] sm:$0xff] %v239_v8  ;;  %v243_v10 = vld [vmem:[%s1193_s5 + $0x140] sm:$0xff]  ;;  %v245_v11 = vld [vmem:[%s1193_s5 + $0x148] sm:$0xff]  ;;  %242 = vst [vmem:[%s1201_s6 + $0x48] sm:$0xff] %v241_v9 }
  0x19   : > { %244 = vst [vmem:[%s1201_s6 + $0x50] sm:$0xff] %v243_v10  ;;  %246 = vst [vmem:[%s1201_s6 + $0x58] sm:$0xff] %v245_v11  ;;  %v247_v12 = vld [vmem:[%s1193_s5 + $0x180] sm:$0xff]  ;;  %v249_v13 = vld [vmem:[%s1193_s5 + $0x188] sm:$0xff] }
  0x1a   : > { %v251_v14 = vld [vmem:[%s1193_s5 + $0x1c0] sm:$0xff]  ;;  %248 = vst [vmem:[%s1201_s6 + $0x60] sm:$0xff] %v247_v12  ;;  %250 = vst [vmem:[%s1201_s6 + $0x68] sm:$0xff] %v249_v13  ;;  %v253_v15 = vld [vmem:[%s1193_s5 + $0x1c8] sm:$0xff] }
  0x1b   : > { %252 = vst [vmem:[%s1201_s6 + $0x70] sm:$0xff] %v251_v14  ;;  %v255_v16 = vld [vmem:[%s1193_s5 + $0x200] sm:$0xff]  ;;  %v257_v17 = vld [vmem:[%s1193_s5 + $0x208] sm:$0xff]  ;;  %254 = vst [vmem:[%s1201_s6 + $0x78] sm:$0xff] %v253_v15 }
  0x1c   : > { %256 = vst [vmem:[%s1201_s6 + $0x80] sm:$0xff] %v255_v16  ;;  %258 = vst [vmem:[%s1201_s6 + $0x88] sm:$0xff] %v257_v17  ;;  %v259_v18 = vld [vmem:[%s1193_s5 + $0x240] sm:$0xff]  ;;  %v261_v19 = vld [vmem:[%s1193_s5 + $0x248] sm:$0xff] }
  0x1d   : > { %v263_v20 = vld [vmem:[%s1193_s5 + $0x280] sm:$0xff]  ;;  %260 = vst [vmem:[%s1201_s6 + $0x90] sm:$0xff] %v259_v18  ;;  %262 = vst [vmem:[%s1201_s6 + $0x98] sm:$0xff] %v261_v19  ;;  %v265_v21 = vld [vmem:[%s1193_s5 + $0x288] sm:$0xff] }
  0x1e   : > { %264 = vst [vmem:[%s1201_s6 + $0xa0] sm:$0xff] %v263_v20  ;;  %v267_v22 = vld [vmem:[%s1193_s5 + $0x2c0] sm:$0xff]  ;;  %v269_v23 = vld [vmem:[%s1193_s5 + $0x2c8] sm:$0xff]  ;;  %266 = vst [vmem:[%s1201_s6 + $0xa8] sm:$0xff] %v265_v21 }
  0x1f   : > { %268 = vst [vmem:[%s1201_s6 + $0xb0] sm:$0xff] %v267_v22  ;;  %270 = vst [vmem:[%s1201_s6 + $0xb8] sm:$0xff] %v269_v23  ;;  %v271_v24 = vld [vmem:[%s1193_s5 + $0x300] sm:$0xff]  ;;  %v273_v25 = vld [vmem:[%s1193_s5 + $0x308] sm:$0xff] }
  0x20   : > { %v275_v26 = vld [vmem:[%s1193_s5 + $0x340] sm:$0xff]  ;;  %272 = vst [vmem:[%s1201_s6 + $0xc0] sm:$0xff] %v271_v24  ;;  %274 = vst [vmem:[%s1201_s6 + $0xc8] sm:$0xff] %v273_v25  ;;  %v277_v27 = vld [vmem:[%s1193_s5 + $0x348] sm:$0xff] }
  0x21   : > { %276 = vst [vmem:[%s1201_s6 + $0xd0] sm:$0xff] %v275_v26  ;;  %v279_v28 = vld [vmem:[%s1193_s5 + $0x380] sm:$0xff]  ;;  %v281_v29 = vld [vmem:[%s1193_s5 + $0x388] sm:$0xff]  ;;  %278 = vst [vmem:[%s1201_s6 + $0xd8] sm:$0xff] %v277_v27 }
  0x22   : > { %280 = vst [vmem:[%s1201_s6 + $0xe0] sm:$0xff] %v279_v28  ;;  %282 = vst [vmem:[%s1201_s6 + $0xe8] sm:$0xff] %v281_v29  ;;  %v283_v30 = vld [vmem:[%s1193_s5 + $0x3c0] sm:$0xff]  ;;  %v285_v31 = vld [vmem:[%s1193_s5 + $0x3c8] sm:$0xff] }
  0x23   : > { %v287_v32 = vld [vmem:[%s1193_s5 + $0x400] sm:$0xff]  ;;  %284 = vst [vmem:[%s1201_s6 + $0xf0] sm:$0xff] %v283_v30  ;;  %286 = vst [vmem:[%s1201_s6 + $0xf8] sm:$0xff] %v285_v31  ;;  %v289_v33 = vld [vmem:[%s1193_s5 + $0x408] sm:$0xff] }
  0x24   : > { %288 = vst [vmem:[%s1201_s6 + $0x100] sm:$0xff] %v287_v32  ;;  %v291_v34 = vld [vmem:[%s1193_s5 + $0x440] sm:$0xff]  ;;  %v293_v35 = vld [vmem:[%s1193_s5 + $0x448] sm:$0xff]  ;;  %290 = vst [vmem:[%s1201_s6 + $0x108] sm:$0xff] %v289_v33 }
  0x25   : > { %292 = vst [vmem:[%s1201_s6 + $0x110] sm:$0xff] %v291_v34  ;;  %294 = vst [vmem:[%s1201_s6 + $0x118] sm:$0xff] %v293_v35 }
  0x26 PF: > { %p920_p8 = scmp.ge.s32.totalorder %s1117_s19, 1  ;;  %p299_p9 = scmp.lt.s32.totalorder %s1117_s19, 5 }
  0x28   : > { %p300_p10 = pnand %p920_p8, %p299_p9 }
  0x29   : > { %s306_s7 = sand.u32 (!%p300_p10), 1, %s1101_s15  }
  0x2a   : > { %303 = sbr.rel (%p300_p10) target bundleno = 303 (0x12f), region = 55  ;;  %s921_s30 = sshll.u32 (!%p300_p10), %s306_s7, 5 }
  0x2b   : > { %s978_s8 = smul.u32 (!%p300_p10), 288, %s306_s7  ;;  %s345_s15 = scalar_lea.vmem (!%p300_p10), [#allocation3], %s921_s30 }
  0x2d   : > { %s1283_s21 = scalar_lea.vmem (!%p300_p10), [#allocation2], %s978_s8 }
  0x2f   : > { %vm596_vm0 = vcmask 130048   ;;  %v1078_v36 = vld [vmem:[%s1353_s0 + $0x4] ss:$8 sps:$4 sm:$0xff]   ;;  %v1119_v39 = vmov 0   ;;  %v1026_v44 = vld [vmem:[%s1283_s21 + $0xe0] ss:$16 sps:$4 sm:$0xff]  }
  0x30   : > { %v686_v37 = vld [vmem:[%s1355_s2] sm:$0xff]  ;;  %1020 = vset.pattern.permute.xlu0 %v1119_v39  ;;  %1021 = vset.pattern.permute.xlu1 %v1119_v39  ;;  %v687_v41 = vld [vmem:[%s1355_s2 + $0x8] sm:$0xff]  ;;  %s976_s5 = sshll.u32 (%p1180_p6), %s1109_s17, 4 }
  0x31   : > { %v706_v38 = vld [vmem:[%s1356_s3] sm:$0xff]  ;;  %960 = vmatprep.mubr.msk.bf16.mxu0 %vm596_vm0, %v1078_v36  ;;  %961 = vmatprep.mubr.msk.bf16.mxu1 %vm596_vm0, %v1078_v36  ;;  %v1024_v42 = vld [vmem:[%s1283_s21 + $0xec] ss:$16 sps:$4 sm:$0xff]   ;;  %v1027_v45 = vld [vmem:[%s1283_s21 + $0xe8] ss:$16 sps:$4 sm:$0xff]   ;;  %s774_s8 = scalar_lea.vmem (%p1180_p6), %s1357_s4, %s976_s5 }
  0x32   : > { %v1022_v40 = vld [vmem:[%s1283_s21 + $0xe4] ss:$16 sps:$4 sm:$0xff]   ;;  %690 = vperm.xlu0 %1020, %v686_v37   ;;  %710 = vperm.xlu1 %1021, %v706_v38   ;;  %v707_v43 = vld [vmem:[%s1356_s3 + $0x8] sm:$0xff]  ;;  %v1032_v48 = vld [vmem:[%s1283_s21 + $0xc0] ss:$16 sps:$4 sm:$0xff]  }
  0x33   : > { %600 = vmatprep.subr.bf16.mxu0 %v1022_v40  ;;  %643 = vmatprep.subr.bf16.mxu1 %v1024_v42  ;;  %v1028_v46 = vld [vmem:[%s1283_s21 + $0xc4] ss:$16 sps:$4 sm:$0xff]   ;;  %v1030_v47 = vld [vmem:[%s1283_s21 + $0xcc] ss:$16 sps:$4 sm:$0xff]   ;;  %v1033_v49 = vld [vmem:[%s1283_s21 + $0xc8] ss:$16 sps:$4 sm:$0xff]  }
  0x34   : > { %601 = vmatpush1.bf16.msra.mxu0 %v1026_v44  ;;  %644 = vmatpush1.bf16.msra.mxu1 %v1027_v45  ;;  %v1034_v50 = vld [vmem:[%s1283_s21 + $0xa4] ss:$16 sps:$4 sm:$0xff]   ;;  %v1036_v51 = vld [vmem:[%s1283_s21 + $0xac] ss:$16 sps:$4 sm:$0xff]   ;;  %v1038_v52 = vld [vmem:[%s1283_s21 + $0xa0] ss:$16 sps:$4 sm:$0xff]  }
  0x35   : > { %602 = vmatprep.subr.bf16.mxu0 %v1028_v46  ;;  %645 = vmatprep.subr.bf16.mxu1 %v1030_v47  ;;  %v1039_v53 = vld [vmem:[%s1283_s21 + $0xa8] ss:$16 sps:$4 sm:$0xff]   ;;  %v1040_v54 = vld [vmem:[%s1283_s21 + $0x84] ss:$16 sps:$4 sm:$0xff]   ;;  %v1042_v55 = vld [vmem:[%s1283_s21 + $0x8c] ss:$16 sps:$4 sm:$0xff]  }
  0x36   : > { %695 = vperm.xlu0 %1020, %v687_v41   ;;  %715 = vperm.xlu1 %1021, %v707_v43   ;;  %v1044_v56 = vld [vmem:[%s1283_s21 + $0x80] ss:$16 sps:$4 sm:$0xff]   ;;  %v1045_v57 = vld [vmem:[%s1283_s21 + $0x88] ss:$16 sps:$4 sm:$0xff]   ;;  %v1046_v58 = vld [vmem:[%s1283_s21 + $0x64] ss:$16 sps:$4 sm:$0xff]  }
  0x37   : > { %v1048_v59 = vld [vmem:[%s1283_s21 + $0x6c] ss:$16 sps:$4 sm:$0xff]   ;;  %v1050_v60 = vld [vmem:[%s1283_s21 + $0x60] ss:$16 sps:$4 sm:$0xff]   ;;  %v1051_v61 = vld [vmem:[%s1283_s21 + $0x68] ss:$16 sps:$4 sm:$0xff]  }
  0x38   : > { %603 = vmatpush1.bf16.msra.mxu0 %v1032_v48  ;;  %646 = vmatpush1.bf16.msra.mxu1 %v1033_v49  ;;  %v1052_v62 = vld [vmem:[%s1283_s21 + $0x44] ss:$16 sps:$4 sm:$0xff]   ;;  %v1054_v63 = vld [vmem:[%s1283_s21 + $0x4c] ss:$16 sps:$4 sm:$0xff]   ;;  %v1056_v0 = vld [vmem:[%s1283_s21 + $0x40] ss:$16 sps:$4 sm:$0xff]  }
  0x39   : > { %604 = vmatprep.subr.bf16.mxu0 %v1034_v50  ;;  %647 = vmatprep.subr.bf16.mxu1 %v1036_v51  ;;  %v1057_v1 = vld [vmem:[%s1283_s21 + $0x48] ss:$16 sps:$4 sm:$0xff]   ;;  %v1058_v2 = vld [vmem:[%s1283_s21 + $0x24] ss:$16 sps:$4 sm:$0xff]   ;;  %v1060_v3 = vld [vmem:[%s1283_s21 + $0x2c] ss:$16 sps:$4 sm:$0xff]  }
  0x3a   : > { %v1062_v4 = vld [vmem:[%s1283_s21 + $0x20] ss:$16 sps:$4 sm:$0xff]   ;;  %v1063_v5 = vld [vmem:[%s1283_s21 + $0x28] ss:$16 sps:$4 sm:$0xff]   ;;  %v1064_v6 = vld [vmem:[%s1283_s21 + $0x4] ss:$16 sps:$4 sm:$0xff]  }
  0x3b   : > { %v1066_v7 = vld [vmem:[%s1283_s21 + $0xc] ss:$16 sps:$4 sm:$0xff]   ;;  %v1068_v8 = vld [vmem:[%s1283_s21] ss:$16 sps:$4 sm:$0xff]   ;;  %v1069_v9 = vld [vmem:[%s1283_s21 + $0x8] ss:$16 sps:$4 sm:$0xff]  }
  0x3c   : > { %605 = vmatpush1.bf16.msra.mxu0 %v1038_v52  ;;  %648 = vmatpush1.bf16.msra.mxu1 %v1039_v53  ;;  %v1070_v10 = vld [vmem:[%s1283_s21 + $0x104] ss:$16 sps:$4 sm:$0xff]   ;;  %v1072_v11 = vld [vmem:[%s1283_s21 + $0x10c] ss:$16 sps:$4 sm:$0xff]   ;;  %v1074_v12 = vld [vmem:[%s1283_s21 + $0x100] ss:$16 sps:$4 sm:$0xff]  }
  0x3d   : > { %606 = vmatprep.subr.bf16.mxu0 %v1040_v54  ;;  %649 = vmatprep.subr.bf16.mxu1 %v1042_v55  ;;  %v1075_v13 = vld [vmem:[%s1283_s21 + $0x108] ss:$16 sps:$4 sm:$0xff]  }
  0x3e   : > { %v1076_v14 = vld [vmem:[%s1353_s0] ss:$8 sps:$4 sm:$0xff]  }
  0x40   : > { %607 = vmatpush1.bf16.msra.mxu0 %v1044_v56  ;;  %650 = vmatpush1.bf16.msra.mxu1 %v1045_v57 }
  0x41   : > { %608 = vmatprep.subr.bf16.mxu0 %v1046_v58  ;;  %651 = vmatprep.subr.bf16.mxu1 %v1048_v59 }
  0x44   : > { %609 = vmatpush1.bf16.msra.mxu0 %v1050_v60  ;;  %652 = vmatpush1.bf16.msra.mxu1 %v1051_v61 }
  0x45   : > { %610 = vmatprep.subr.bf16.mxu0 %v1052_v62  ;;  %653 = vmatprep.subr.bf16.mxu1 %v1054_v63 }
  0x48   : > { %611 = vmatpush1.bf16.msra.mxu0 %v1056_v0  ;;  %654 = vmatpush1.bf16.msra.mxu1 %v1057_v1 }
  0x49   : > { %612 = vmatprep.subr.bf16.mxu0 %v1058_v2  ;;  %655 = vmatprep.subr.bf16.mxu1 %v1060_v3 }
  0x4c   : > { %613 = vmatpush1.bf16.msra.mxu0 %v1062_v4  ;;  %656 = vmatpush1.bf16.msra.mxu1 %v1063_v5 }
  0x4d   : > { %614 = vmatprep.subr.bf16.mxu0 %v1064_v6  ;;  %657 = vmatprep.subr.bf16.mxu1 %v1066_v7 }
  0x50   : > { %615 = vmatpush1.bf16.msra.mxu0 %v1068_v8  ;;  %658 = vmatpush1.bf16.msra.mxu1 %v1069_v9 }
  0x51   : > { %630 = vmatprep.subr.bf16.mxu0 %v1070_v10  ;;  %673 = vmatprep.subr.bf16.mxu1 %v1072_v11 }
  0x54   : > { %631 = vmatpush2.bf16.msra.mxu0 %v1074_v12  ;;  %674 = vmatpush2.bf16.msra.mxu1 %v1075_v13 }
  0x57   : > { %633 = vmatmul.mubr.bf16.vlgmr.msra.gmra.mxu0 %v1076_v14  ;;  %676 = vmatmul.mubr.bf16.vlgmr.msra.gmra.mxu1 %v1076_v14 }
  0xad   : > { %v691_v15 = vpop.permute.xlu0 %690  ;;  %v711_v18 = vpop.permute.xlu1 %710 }
  0xb1   : > { %v696_v29 = vpop.permute.xlu0 %695  ;;  %v716_v40 = vpop.permute.xlu1 %715 }
 0x117   : > { %v634_v16 = vpop.f32.mrf.mxu0  ;;  %v677_v17 = vpop.f32.mrf.mxu1 }
 0x118   : > { %v698_v19 = vmul.f32 %v691_v15, %v634_v16  ;;  %v700_v20 = vmul.f32 %v691_v15, %v677_v17 }
 0x119   : > { %v636_v21 = vpop.f32.mrf.mxu0  ;;  %v679_v22 = vpop.f32.mrf.mxu1 }
 0x11a   : > { %v718_v23 = vadd.f32 %v711_v18, %v698_v19  ;;  %v720_v24 = vadd.f32 %v711_v18, %v700_v20  ;;  %v699_v25 = vmul.f32 %v691_v15, %v636_v21  ;;  %v701_v26 = vmul.f32 %v691_v15, %v679_v22 }
 0x11b   : > { %v638_v27 = vpop.f32.mrf.mxu0  ;;  %v681_v28 = vpop.f32.mrf.mxu1 }
 0x11c   : > { %v719_v30 = vadd.f32 %v711_v18, %v699_v25  ;;  %v721_v31 = vadd.f32 %v711_v18, %v701_v26  ;;  %v726_v32 = vmax.f32 %v718_v23, 0.0  ;;  %v728_v33 = vmax.f32 %v720_v24, 0.0 }
 0x11d   : > { %v702_v34 = vmul.f32 %v696_v29, %v638_v27  ;;  %v704_v35 = vmul.f32 %v696_v29, %v681_v28  ;;  %v640_v36 = vpop.f32.mrf.mxu0  ;;  %v683_v37 = vpop.f32.mrf.mxu1 }
 0x11e   : > { %v727_v38 = vmax.f32 %v719_v30, 0.0  ;;  %v729_v39 = vmax.f32 %v721_v31, 0.0  ;;  %v703_v41 = vmul.f32 %v696_v29, %v640_v36  ;;  %v705_v42 = vmul.f32 %v696_v29, %v683_v37 }
 0x11f   : > { %v722_v43 = vadd.f32 %v716_v40, %v702_v34  ;;  %v724_v44 = vadd.f32 %v716_v40, %v704_v35 }
 0x120   : > { %v972_v45 = vpack.c.bf16 %v727_v38, %v726_v32  ;;  %v973_v46 = vpack.c.bf16 %v729_v39, %v728_v33  ;;  %v723_v47 = vadd.f32 %v716_v40, %v703_v41  ;;  %v725_v48 = vadd.f32 %v716_v40, %v705_v42 }
 0x121   : > { %v730_v49 = vmax.f32 %v722_v43, 0.0  ;;  %v732_v50 = vmax.f32 %v724_v44, 0.0 }
 0x122   : > { %758 = vst [vmem:[%s345_s15] sm:$0xff] %v972_v45  ;;  %759 = vst [vmem:[%s345_s15 + $0x8] sm:$0xff] %v973_v46  ;;  %v731_v51 = vmax.f32 %v723_v47, 0.0  ;;  %v733_v52 = vmax.f32 %v725_v48, 0.0  ;;  %768 = sbr.rel (!%p1180_p6) target bundleno = 303 (0x12f), region = 63 }
 0x124   : > { %v974_v53 = vpack.c.bf16 %v731_v51, %v730_v49  ;;  %v975_v54 = vpack.c.bf16 %v733_v52, %v732_v50 }
 0x126   : > { %760 = vst [vmem:[%s345_s15 + $0x10] sm:$0xff] %v974_v53  ;;  %761 = vst [vmem:[%s345_s15 + $0x18] sm:$0xff] %v975_v54 }
 0x129   : > { %v787_v55 = vld [vmem:[%s345_s15] sm:$0xff]  ;;  %v789_v56 = vld [vmem:[%s345_s15 + $0x8] sm:$0xff] }
 0x12a   : > { %788 = vst [vmem:[%s774_s8] sm:$0xff] %v787_v55  ;;  %790 = vst [vmem:[%s774_s8 + $0x8] sm:$0xff] %v789_v56 }
 0x12d   : > { %v791_v57 = vld [vmem:[%s345_s15 + $0x10] sm:$0xff]  ;;  %v793_v58 = vld [vmem:[%s345_s15 + $0x18] sm:$0xff] }
 0x12e   : > { %792 = vst [vmem:[%s774_s8 + $0x40] sm:$0xff] %v791_v57  ;;  %794 = vst [vmem:[%s774_s8 + $0x48] sm:$0xff] %v793_v58 }
 0x12f PF: > { %s14_s19 = sadd.s32 1, %s1117_s19   ;;  %s1359_s15 = smov %s1105_s16 }
 0x130   : > { %p11_p11 = scmp.ge.s32.totalorder %s14_s19, 6   ;;  %s1360_s16 = smov %s1185_s25 }
 0x131   : > { %s1361_s17 = smov %s1113_s18  ;;  %s1362_s18 = smov %s1364_s20 }
 0x132   :  { %13 = sbr.rel (!%p11_p11) target bundleno = 3 (0x3), region = 126 }

// kernel: _lambda_.14
= control target key start
LH: loop header
LB: loop body
LE: loop exit
PB: predicated region body
PF: predicated region fallthrough
CT: control target
= control target key end

     0   :  { %s2788_s15 = smov 0   ;;  %s2790_s16 = smov 0   ;;  %s3516_s0 = inlined_call_operand.vmem [shape: bf16[8,180], index: 0, kind: input, shape index: {}]   ;;  %s3517_s1 = inlined_call_operand.vmem [shape: bf16[180,8192], index: 1, kind: input, shape index: {}]   ;;  %s3518_s2 = inlined_call_operand.vmem [shape: f32[8,1], index: 2, kind: input, shape index: {}]   ;;  %s3519_s3 = inlined_call_operand.vmem [shape: f32[8,1], index: 3, kind: input, shape index: {}]   ;;  %s3520_s4 = inlined_call_operand.vmem [shape: bf16[8,8192], index: 4, kind: output, shape index: {}]  }
   0x1   :  { %s2792_s17 = smov 0   ;;  %s2794_s18 = smov 0  }
   0x2   :  { %s2796_s19 = smov 0  }
   0x3 LB: > { %s23_s20 = sadd.s32 1, %s2756_s18  ;;  %p66_p1 = scmp.ne.s32.totalorder %s2748_s16, %s2744_s15  ;;  %s2760_s19 = sphi %s2796_s19, %s14_s19   ;;  %s2756_s18 = sphi %s2794_s18, %s3524_s18   ;;  %s2752_s17 = sphi %s2792_s17, %s3523_s17   ;;  %s2748_s16 = sphi %s2790_s16, %s3522_s16   ;;  %s2744_s15 = sphi %s2788_s15, %s3521_s15  }
   0x4   : > { %p24_p0 = scmp.ge.s32.totalorder %s23_s20, 4  ;;  %p67_p2 = scmp.eq.s32.totalorder %s2760_s19, 0 }
   0x5   : > { %s59_s22 = sadd.s32 1, %s2748_s16  ;;  %p2425_p5 = scmp.ge.s32.totalorder %s2760_s19, 4 }
   0x6   : > { %s3526_s20 = smov (%p24_p0, %s23_s20), 0  ;;  %p68_p3 = por %p67_p2, %p66_p1 }
   0x7   : > { %s56_s21 = ssub.s32 %s2756_s18, %s3526_s20  ;;  %194 = sbr.rel (%p2425_p5) target bundleno = 109 (0x6d), region = 28 }
   0x8   : > { %p57_p4 = scmp.eq.s32.totalorder %s56_s21, 0 }
   0xa   : > { %s2823_s23 = scalar_select %p57_p4, %s2748_s16, %s59_s22  }
   0xc   : > { %197 = sbr.rel (!%p68_p3) target bundleno = 109 (0x6d), region = 32  ;;  %s199_s24 = sand.u32 (%p68_p3), 1, %s2748_s16  }
   0xd   : > { %s2651_s25 = sshll.u32 (%p68_p3), %s2756_s18, 6  ;;  %s2660_s26 = smul.u32 (%p68_p3), 1472, %s199_s24 }
   0xe   : > { %s2831_s29 = scalar_lea.vmem (%p68_p3), %s3517_s1, %s2651_s25 }
   0xf   : > { %v217_v0 = vld [vmem:[%s2831_s29] sm:$0xff] (%p68_p3)  ;;  %v219_v1 = vld [vmem:[%s2831_s29 + $0x8] sm:$0xff] (%p68_p3)  ;;  %v221_v2 = vld [vmem:[%s2831_s29 + $0x10] sm:$0xff] (%p68_p3)  ;;  %s2839_s30 = scalar_lea.vmem (%p68_p3), [#allocation2], %s2660_s26 }
  0x10   : > { %v223_v3 = vld [vmem:[%s2831_s29 + $0x18] sm:$0xff] (%p68_p3)  ;;  %v225_v4 = vld [vmem:[%s2831_s29 + $0x20] sm:$0xff] (%p68_p3)  ;;  %v227_v5 = vld [vmem:[%s2831_s29 + $0x28] sm:$0xff] (%p68_p3)  ;;  %218 = vst [vmem:[%s2839_s30] sm:$0xff] (%p68_p3), %v217_v0 }
  0x11   : > { %220 = vst [vmem:[%s2839_s30 + $0x8] sm:$0xff] %v219_v1  ;;  %222 = vst [vmem:[%s2839_s30 + $0x10] sm:$0xff] %v221_v2  ;;  %v229_v6 = vld [vmem:[%s2831_s29 + $0x30] sm:$0xff]  ;;  %v231_v7 = vld [vmem:[%s2831_s29 + $0x38] sm:$0xff] }
  0x12   : > { %224 = vst [vmem:[%s2839_s30 + $0x18] sm:$0xff] %v223_v3  ;;  %226 = vst [vmem:[%s2839_s30 + $0x20] sm:$0xff] %v225_v4  ;;  %v233_v8 = vld [vmem:[%s2831_s29 + $0x100] sm:$0xff]  ;;  %v235_v9 = vld [vmem:[%s2831_s29 + $0x108] sm:$0xff] }
  0x13   : > { %228 = vst [vmem:[%s2839_s30 + $0x28] sm:$0xff] %v227_v5  ;;  %230 = vst [vmem:[%s2839_s30 + $0x30] sm:$0xff] %v229_v6  ;;  %v237_v10 = vld [vmem:[%s2831_s29 + $0x110] sm:$0xff]  ;;  %v239_v11 = vld [vmem:[%s2831_s29 + $0x118] sm:$0xff] }
  0x14   : > { %232 = vst [vmem:[%s2839_s30 + $0x38] sm:$0xff] %v231_v7  ;;  %234 = vst [vmem:[%s2839_s30 + $0x40] sm:$0xff] %v233_v8  ;;  %v241_v12 = vld [vmem:[%s2831_s29 + $0x120] sm:$0xff]  ;;  %v243_v13 = vld [vmem:[%s2831_s29 + $0x128] sm:$0xff] }
  0x15   : > { %236 = vst [vmem:[%s2839_s30 + $0x48] sm:$0xff] %v235_v9  ;;  %238 = vst [vmem:[%s2839_s30 + $0x50] sm:$0xff] %v237_v10  ;;  %v245_v14 = vld [vmem:[%s2831_s29 + $0x130] sm:$0xff]  ;;  %v247_v15 = vld [vmem:[%s2831_s29 + $0x138] sm:$0xff] }
  0x16   : > { %240 = vst [vmem:[%s2839_s30 + $0x58] sm:$0xff] %v239_v11  ;;  %242 = vst [vmem:[%s2839_s30 + $0x60] sm:$0xff] %v241_v12  ;;  %v249_v16 = vld [vmem:[%s2831_s29 + $0x200] sm:$0xff]  ;;  %v251_v17 = vld [vmem:[%s2831_s29 + $0x208] sm:$0xff] }
  0x17   : > { %244 = vst [vmem:[%s2839_s30 + $0x68] sm:$0xff] %v243_v13  ;;  %246 = vst [vmem:[%s2839_s30 + $0x70] sm:$0xff] %v245_v14  ;;  %v253_v18 = vld [vmem:[%s2831_s29 + $0x210] sm:$0xff]  ;;  %v255_v19 = vld [vmem:[%s2831_s29 + $0x218] sm:$0xff] }
  0x18   : > { %248 = vst [vmem:[%s2839_s30 + $0x78] sm:$0xff] %v247_v15  ;;  %250 = vst [vmem:[%s2839_s30 + $0x80] sm:$0xff] %v249_v16  ;;  %v257_v20 = vld [vmem:[%s2831_s29 + $0x220] sm:$0xff]  ;;  %v259_v21 = vld [vmem:[%s2831_s29 + $0x228] sm:$0xff] }
  0x19   : > { %252 = vst [vmem:[%s2839_s30 + $0x88] sm:$0xff] %v251_v17  ;;  %254 = vst [vmem:[%s2839_s30 + $0x90] sm:$0xff] %v253_v18  ;;  %v261_v22 = vld [vmem:[%s2831_s29 + $0x230] sm:$0xff]  ;;  %v263_v23 = vld [vmem:[%s2831_s29 + $0x238] sm:$0xff] }
  0x1a   : > { %256 = vst [vmem:[%s2839_s30 + $0x98] sm:$0xff] %v255_v19  ;;  %258 = vst [vmem:[%s2839_s30 + $0xa0] sm:$0xff] %v257_v20  ;;  %v265_v24 = vld [vmem:[%s2831_s29 + $0x300] sm:$0xff]  ;;  %v267_v25 = vld [vmem:[%s2831_s29 + $0x308] sm:$0xff] }
  0x1b   : > { %260 = vst [vmem:[%s2839_s30 + $0xa8] sm:$0xff] %v259_v21  ;;  %262 = vst [vmem:[%s2839_s30 + $0xb0] sm:$0xff] %v261_v22  ;;  %v269_v26 = vld [vmem:[%s2831_s29 + $0x310] sm:$0xff]  ;;  %v271_v27 = vld [vmem:[%s2831_s29 + $0x318] sm:$0xff] }
  0x1c   : > { %264 = vst [vmem:[%s2839_s30 + $0xb8] sm:$0xff] %v263_v23  ;;  %266 = vst [vmem:[%s2839_s30 + $0xc0] sm:$0xff] %v265_v24  ;;  %v273_v28 = vld [vmem:[%s2831_s29 + $0x320] sm:$0xff]  ;;  %v275_v29 = vld [vmem:[%s2831_s29 + $0x328] sm:$0xff] }
  0x1d   : > { %268 = vst [vmem:[%s2839_s30 + $0xc8] sm:$0xff] %v267_v25  ;;  %270 = vst [vmem:[%s2839_s30 + $0xd0] sm:$0xff] %v269_v26  ;;  %v277_v30 = vld [vmem:[%s2831_s29 + $0x330] sm:$0xff]  ;;  %v279_v31 = vld [vmem:[%s2831_s29 + $0x338] sm:$0xff] }
  0x1e   : > { %272 = vst [vmem:[%s2839_s30 + $0xd8] sm:$0xff] %v271_v27  ;;  %274 = vst [vmem:[%s2839_s30 + $0xe0] sm:$0xff] %v273_v28  ;;  %v281_v32 = vld [vmem:[%s2831_s29 + $0x400] sm:$0xff]  ;;  %v283_v33 = vld [vmem:[%s2831_s29 + $0x408] sm:$0xff] }
  0x1f   : > { %276 = vst [vmem:[%s2839_s30 + $0xe8] sm:$0xff] %v275_v29  ;;  %278 = vst [vmem:[%s2839_s30 + $0xf0] sm:$0xff] %v277_v30  ;;  %v285_v34 = vld [vmem:[%s2831_s29 + $0x410] sm:$0xff]  ;;  %v287_v35 = vld [vmem:[%s2831_s29 + $0x418] sm:$0xff] }
  0x20   : > { %280 = vst [vmem:[%s2839_s30 + $0xf8] sm:$0xff] %v279_v31  ;;  %282 = vst [vmem:[%s2839_s30 + $0x100] sm:$0xff] %v281_v32  ;;  %v289_v36 = vld [vmem:[%s2831_s29 + $0x420] sm:$0xff]  ;;  %v291_v37 = vld [vmem:[%s2831_s29 + $0x428] sm:$0xff] }
  0x21   : > { %284 = vst [vmem:[%s2839_s30 + $0x108] sm:$0xff] %v283_v33  ;;  %286 = vst [vmem:[%s2839_s30 + $0x110] sm:$0xff] %v285_v34  ;;  %v293_v38 = vld [vmem:[%s2831_s29 + $0x430] sm:$0xff]  ;;  %v295_v39 = vld [vmem:[%s2831_s29 + $0x438] sm:$0xff] }
  0x22   : > { %288 = vst [vmem:[%s2839_s30 + $0x118] sm:$0xff] %v287_v35  ;;  %290 = vst [vmem:[%s2839_s30 + $0x120] sm:$0xff] %v289_v36  ;;  %v297_v40 = vld [vmem:[%s2831_s29 + $0x500] sm:$0xff]  ;;  %v299_v41 = vld [vmem:[%s2831_s29 + $0x508] sm:$0xff] }
  0x23   : > { %292 = vst [vmem:[%s2839_s30 + $0x128] sm:$0xff] %v291_v37  ;;  %294 = vst [vmem:[%s2839_s30 + $0x130] sm:$0xff] %v293_v38  ;;  %v301_v42 = vld [vmem:[%s2831_s29 + $0x510] sm:$0xff]  ;;  %v303_v43 = vld [vmem:[%s2831_s29 + $0x518] sm:$0xff] }
  0x24   : > { %296 = vst [vmem:[%s2839_s30 + $0x138] sm:$0xff] %v295_v39  ;;  %298 = vst [vmem:[%s2839_s30 + $0x140] sm:$0xff] %v297_v40  ;;  %v305_v44 = vld [vmem:[%s2831_s29 + $0x520] sm:$0xff]  ;;  %v307_v45 = vld [vmem:[%s2831_s29 + $0x528] sm:$0xff] }
  0x25   : > { %300 = vst [vmem:[%s2839_s30 + $0x148] sm:$0xff] %v299_v41  ;;  %302 = vst [vmem:[%s2839_s30 + $0x150] sm:$0xff] %v301_v42  ;;  %v309_v46 = vld [vmem:[%s2831_s29 + $0x530] sm:$0xff]  ;;  %v311_v47 = vld [vmem:[%s2831_s29 + $0x538] sm:$0xff] }
  0x26   : > { %304 = vst [vmem:[%s2839_s30 + $0x158] sm:$0xff] %v303_v43  ;;  %306 = vst [vmem:[%s2839_s30 + $0x160] sm:$0xff] %v305_v44  ;;  %v313_v48 = vld [vmem:[%s2831_s29 + $0x600] sm:$0xff]  ;;  %v315_v49 = vld [vmem:[%s2831_s29 + $0x608] sm:$0xff] }
  0x27   : > { %308 = vst [vmem:[%s2839_s30 + $0x168] sm:$0xff] %v307_v45  ;;  %310 = vst [vmem:[%s2839_s30 + $0x170] sm:$0xff] %v309_v46  ;;  %v317_v50 = vld [vmem:[%s2831_s29 + $0x610] sm:$0xff]  ;;  %v319_v51 = vld [vmem:[%s2831_s29 + $0x618] sm:$0xff] }
  0x28   : > { %312 = vst [vmem:[%s2839_s30 + $0x178] sm:$0xff] %v311_v47  ;;  %314 = vst [vmem:[%s2839_s30 + $0x180] sm:$0xff] %v313_v48  ;;  %v321_v52 = vld [vmem:[%s2831_s29 + $0x620] sm:$0xff]  ;;  %v323_v53 = vld [vmem:[%s2831_s29 + $0x628] sm:$0xff] }
  0x29   : > { %316 = vst [vmem:[%s2839_s30 + $0x188] sm:$0xff] %v315_v49  ;;  %318 = vst [vmem:[%s2839_s30 + $0x190] sm:$0xff] %v317_v50  ;;  %v325_v54 = vld [vmem:[%s2831_s29 + $0x630] sm:$0xff]  ;;  %v327_v55 = vld [vmem:[%s2831_s29 + $0x638] sm:$0xff] }
  0x2a   : > { %320 = vst [vmem:[%s2839_s30 + $0x198] sm:$0xff] %v319_v51  ;;  %322 = vst [vmem:[%s2839_s30 + $0x1a0] sm:$0xff] %v321_v52  ;;  %v329_v56 = vld [vmem:[%s2831_s29 + $0x700] sm:$0xff]  ;;  %v331_v57 = vld [vmem:[%s2831_s29 + $0x708] sm:$0xff] }
  0x2b   : > { %324 = vst [vmem:[%s2839_s30 + $0x1a8] sm:$0xff] %v323_v53  ;;  %326 = vst [vmem:[%s2839_s30 + $0x1b0] sm:$0xff] %v325_v54  ;;  %v333_v58 = vld [vmem:[%s2831_s29 + $0x710] sm:$0xff]  ;;  %v335_v59 = vld [vmem:[%s2831_s29 + $0x718] sm:$0xff] }
  0x2c   : > { %328 = vst [vmem:[%s2839_s30 + $0x1b8] sm:$0xff] %v327_v55  ;;  %330 = vst [vmem:[%s2839_s30 + $0x1c0] sm:$0xff] %v329_v56  ;;  %v337_v60 = vld [vmem:[%s2831_s29 + $0x720] sm:$0xff]  ;;  %v339_v61 = vld [vmem:[%s2831_s29 + $0x728] sm:$0xff] }
  0x2d   : > { %332 = vst [vmem:[%s2839_s30 + $0x1c8] sm:$0xff] %v331_v57  ;;  %334 = vst [vmem:[%s2839_s30 + $0x1d0] sm:$0xff] %v333_v58  ;;  %v341_v62 = vld [vmem:[%s2831_s29 + $0x730] sm:$0xff]  ;;  %v343_v63 = vld [vmem:[%s2831_s29 + $0x738] sm:$0xff] }
  0x2e   : > { %336 = vst [vmem:[%s2839_s30 + $0x1d8] sm:$0xff] %v335_v59  ;;  %338 = vst [vmem:[%s2839_s30 + $0x1e0] sm:$0xff] %v337_v60  ;;  %v345_v0 = vld [vmem:[%s2831_s29 + $0x800] sm:$0xff]  ;;  %v347_v1 = vld [vmem:[%s2831_s29 + $0x808] sm:$0xff] }
  0x2f   : > { %340 = vst [vmem:[%s2839_s30 + $0x1e8] sm:$0xff] %v339_v61  ;;  %342 = vst [vmem:[%s2839_s30 + $0x1f0] sm:$0xff] %v341_v62  ;;  %v349_v2 = vld [vmem:[%s2831_s29 + $0x810] sm:$0xff]  ;;  %v351_v3 = vld [vmem:[%s2831_s29 + $0x818] sm:$0xff] }
  0x30   : > { %344 = vst [vmem:[%s2839_s30 + $0x1f8] sm:$0xff] %v343_v63  ;;  %346 = vst [vmem:[%s2839_s30 + $0x200] sm:$0xff] %v345_v0  ;;  %v353_v4 = vld [vmem:[%s2831_s29 + $0x820] sm:$0xff]  ;;  %v355_v5 = vld [vmem:[%s2831_s29 + $0x828] sm:$0xff] }
  0x31   : > { %348 = vst [vmem:[%s2839_s30 + $0x208] sm:$0xff] %v347_v1  ;;  %350 = vst [vmem:[%s2839_s30 + $0x210] sm:$0xff] %v349_v2  ;;  %v357_v6 = vld [vmem:[%s2831_s29 + $0x830] sm:$0xff]  ;;  %v359_v7 = vld [vmem:[%s2831_s29 + $0x838] sm:$0xff] }
  0x32   : > { %352 = vst [vmem:[%s2839_s30 + $0x218] sm:$0xff] %v351_v3  ;;  %354 = vst [vmem:[%s2839_s30 + $0x220] sm:$0xff] %v353_v4  ;;  %v361_v8 = vld [vmem:[%s2831_s29 + $0x900] sm:$0xff]  ;;  %v363_v9 = vld [vmem:[%s2831_s29 + $0x908] sm:$0xff] }
  0x33   : > { %356 = vst [vmem:[%s2839_s30 + $0x228] sm:$0xff] %v355_v5  ;;  %358 = vst [vmem:[%s2839_s30 + $0x230] sm:$0xff] %v357_v6  ;;  %v365_v10 = vld [vmem:[%s2831_s29 + $0x910] sm:$0xff]  ;;  %v367_v11 = vld [vmem:[%s2831_s29 + $0x918] sm:$0xff] }
  0x34   : > { %360 = vst [vmem:[%s2839_s30 + $0x238] sm:$0xff] %v359_v7  ;;  %362 = vst [vmem:[%s2839_s30 + $0x240] sm:$0xff] %v361_v8  ;;  %v369_v12 = vld [vmem:[%s2831_s29 + $0x920] sm:$0xff]  ;;  %v371_v13 = vld [vmem:[%s2831_s29 + $0x928] sm:$0xff] }
  0x35   : > { %364 = vst [vmem:[%s2839_s30 + $0x248] sm:$0xff] %v363_v9  ;;  %366 = vst [vmem:[%s2839_s30 + $0x250] sm:$0xff] %v365_v10  ;;  %v373_v14 = vld [vmem:[%s2831_s29 + $0x930] sm:$0xff]  ;;  %v375_v15 = vld [vmem:[%s2831_s29 + $0x938] sm:$0xff] }
  0x36   : > { %368 = vst [vmem:[%s2839_s30 + $0x258] sm:$0xff] %v367_v11  ;;  %370 = vst [vmem:[%s2839_s30 + $0x260] sm:$0xff] %v369_v12  ;;  %v377_v16 = vld [vmem:[%s2831_s29 + $0xa00] sm:$0xff]  ;;  %v379_v17 = vld [vmem:[%s2831_s29 + $0xa08] sm:$0xff] }
  0x37   : > { %372 = vst [vmem:[%s2839_s30 + $0x268] sm:$0xff] %v371_v13  ;;  %374 = vst [vmem:[%s2839_s30 + $0x270] sm:$0xff] %v373_v14  ;;  %v381_v18 = vld [vmem:[%s2831_s29 + $0xa10] sm:$0xff]  ;;  %v383_v19 = vld [vmem:[%s2831_s29 + $0xa18] sm:$0xff] }
  0x38   : > { %376 = vst [vmem:[%s2839_s30 + $0x278] sm:$0xff] %v375_v15  ;;  %378 = vst [vmem:[%s2839_s30 + $0x280] sm:$0xff] %v377_v16  ;;  %v385_v20 = vld [vmem:[%s2831_s29 + $0xa20] sm:$0xff]  ;;  %v387_v21 = vld [vmem:[%s2831_s29 + $0xa28] sm:$0xff] }
  0x39   : > { %380 = vst [vmem:[%s2839_s30 + $0x288] sm:$0xff] %v379_v17  ;;  %382 = vst [vmem:[%s2839_s30 + $0x290] sm:$0xff] %v381_v18  ;;  %v389_v22 = vld [vmem:[%s2831_s29 + $0xa30] sm:$0xff]  ;;  %v391_v23 = vld [vmem:[%s2831_s29 + $0xa38] sm:$0xff] }
  0x3a   : > { %384 = vst [vmem:[%s2839_s30 + $0x298] sm:$0xff] %v383_v19  ;;  %386 = vst [vmem:[%s2839_s30 + $0x2a0] sm:$0xff] %v385_v20  ;;  %v393_v24 = vld [vmem:[%s2831_s29 + $0xb00] sm:$0xff]  ;;  %v395_v25 = vld [vmem:[%s2831_s29 + $0xb08] sm:$0xff] }
  0x3b   : > { %388 = vst [vmem:[%s2839_s30 + $0x2a8] sm:$0xff] %v387_v21  ;;  %390 = vst [vmem:[%s2839_s30 + $0x2b0] sm:$0xff] %v389_v22  ;;  %v397_v26 = vld [vmem:[%s2831_s29 + $0xb10] sm:$0xff]  ;;  %v399_v27 = vld [vmem:[%s2831_s29 + $0xb18] sm:$0xff] }
  0x3c   : > { %392 = vst [vmem:[%s2839_s30 + $0x2b8] sm:$0xff] %v391_v23  ;;  %394 = vst [vmem:[%s2839_s30 + $0x2c0] sm:$0xff] %v393_v24  ;;  %v401_v28 = vld [vmem:[%s2831_s29 + $0xb20] sm:$0xff]  ;;  %v403_v29 = vld [vmem:[%s2831_s29 + $0xb28] sm:$0xff] }
  0x3d   : > { %396 = vst [vmem:[%s2839_s30 + $0x2c8] sm:$0xff] %v395_v25  ;;  %398 = vst [vmem:[%s2839_s30 + $0x2d0] sm:$0xff] %v397_v26  ;;  %v405_v30 = vld [vmem:[%s2831_s29 + $0xb30] sm:$0xff]  ;;  %v407_v31 = vld [vmem:[%s2831_s29 + $0xb38] sm:$0xff] }
  0x3e   : > { %400 = vst [vmem:[%s2839_s30 + $0x2d8] sm:$0xff] %v399_v27  ;;  %402 = vst [vmem:[%s2839_s30 + $0x2e0] sm:$0xff] %v401_v28  ;;  %v409_v32 = vld [vmem:[%s2831_s29 + $0xc00] sm:$0xff]  ;;  %v411_v33 = vld [vmem:[%s2831_s29 + $0xc08] sm:$0xff] }
  0x3f   : > { %404 = vst [vmem:[%s2839_s30 + $0x2e8] sm:$0xff] %v403_v29  ;;  %406 = vst [vmem:[%s2839_s30 + $0x2f0] sm:$0xff] %v405_v30  ;;  %v413_v34 = vld [vmem:[%s2831_s29 + $0xc10] sm:$0xff]  ;;  %v415_v35 = vld [vmem:[%s2831_s29 + $0xc18] sm:$0xff] }
  0x40   : > { %408 = vst [vmem:[%s2839_s30 + $0x2f8] sm:$0xff] %v407_v31  ;;  %410 = vst [vmem:[%s2839_s30 + $0x300] sm:$0xff] %v409_v32  ;;  %v417_v36 = vld [vmem:[%s2831_s29 + $0xc20] sm:$0xff]  ;;  %v419_v37 = vld [vmem:[%s2831_s29 + $0xc28] sm:$0xff] }
  0x41   : > { %412 = vst [vmem:[%s2839_s30 + $0x308] sm:$0xff] %v411_v33  ;;  %414 = vst [vmem:[%s2839_s30 + $0x310] sm:$0xff] %v413_v34  ;;  %v421_v38 = vld [vmem:[%s2831_s29 + $0xc30] sm:$0xff]  ;;  %v423_v39 = vld [vmem:[%s2831_s29 + $0xc38] sm:$0xff] }
  0x42   : > { %416 = vst [vmem:[%s2839_s30 + $0x318] sm:$0xff] %v415_v35  ;;  %418 = vst [vmem:[%s2839_s30 + $0x320] sm:$0xff] %v417_v36  ;;  %v425_v40 = vld [vmem:[%s2831_s29 + $0xd00] sm:$0xff]  ;;  %v427_v41 = vld [vmem:[%s2831_s29 + $0xd08] sm:$0xff] }
  0x43   : > { %420 = vst [vmem:[%s2839_s30 + $0x328] sm:$0xff] %v419_v37  ;;  %422 = vst [vmem:[%s2839_s30 + $0x330] sm:$0xff] %v421_v38  ;;  %v429_v42 = vld [vmem:[%s2831_s29 + $0xd10] sm:$0xff]  ;;  %v431_v43 = vld [vmem:[%s2831_s29 + $0xd18] sm:$0xff] }
  0x44   : > { %424 = vst [vmem:[%s2839_s30 + $0x338] sm:$0xff] %v423_v39  ;;  %426 = vst [vmem:[%s2839_s30 + $0x340] sm:$0xff] %v425_v40  ;;  %v433_v44 = vld [vmem:[%s2831_s29 + $0xd20] sm:$0xff]  ;;  %v435_v45 = vld [vmem:[%s2831_s29 + $0xd28] sm:$0xff] }
  0x45   : > { %428 = vst [vmem:[%s2839_s30 + $0x348] sm:$0xff] %v427_v41  ;;  %430 = vst [vmem:[%s2839_s30 + $0x350] sm:$0xff] %v429_v42  ;;  %v437_v46 = vld [vmem:[%s2831_s29 + $0xd30] sm:$0xff]  ;;  %v439_v47 = vld [vmem:[%s2831_s29 + $0xd38] sm:$0xff] }
  0x46   : > { %432 = vst [vmem:[%s2839_s30 + $0x358] sm:$0xff] %v431_v43  ;;  %434 = vst [vmem:[%s2839_s30 + $0x360] sm:$0xff] %v433_v44  ;;  %v441_v48 = vld [vmem:[%s2831_s29 + $0xe00] sm:$0xff]  ;;  %v443_v49 = vld [vmem:[%s2831_s29 + $0xe08] sm:$0xff] }
  0x47   : > { %436 = vst [vmem:[%s2839_s30 + $0x368] sm:$0xff] %v435_v45  ;;  %438 = vst [vmem:[%s2839_s30 + $0x370] sm:$0xff] %v437_v46  ;;  %v445_v50 = vld [vmem:[%s2831_s29 + $0xe10] sm:$0xff]  ;;  %v447_v51 = vld [vmem:[%s2831_s29 + $0xe18] sm:$0xff] }
  0x48   : > { %440 = vst [vmem:[%s2839_s30 + $0x378] sm:$0xff] %v439_v47  ;;  %442 = vst [vmem:[%s2839_s30 + $0x380] sm:$0xff] %v441_v48  ;;  %v449_v52 = vld [vmem:[%s2831_s29 + $0xe20] sm:$0xff]  ;;  %v451_v53 = vld [vmem:[%s2831_s29 + $0xe28] sm:$0xff] }
  0x49   : > { %444 = vst [vmem:[%s2839_s30 + $0x388] sm:$0xff] %v443_v49  ;;  %446 = vst [vmem:[%s2839_s30 + $0x390] sm:$0xff] %v445_v50  ;;  %v453_v54 = vld [vmem:[%s2831_s29 + $0xe30] sm:$0xff]  ;;  %v455_v55 = vld [vmem:[%s2831_s29 + $0xe38] sm:$0xff] }
  0x4a   : > { %448 = vst [vmem:[%s2839_s30 + $0x398] sm:$0xff] %v447_v51  ;;  %450 = vst [vmem:[%s2839_s30 + $0x3a0] sm:$0xff] %v449_v52  ;;  %v457_v56 = vld [vmem:[%s2831_s29 + $0xf00] sm:$0xff]  ;;  %v459_v57 = vld [vmem:[%s2831_s29 + $0xf08] sm:$0xff] }
  0x4b   : > { %452 = vst [vmem:[%s2839_s30 + $0x3a8] sm:$0xff] %v451_v53  ;;  %454 = vst [vmem:[%s2839_s30 + $0x3b0] sm:$0xff] %v453_v54  ;;  %v461_v58 = vld [vmem:[%s2831_s29 + $0xf10] sm:$0xff]  ;;  %v463_v59 = vld [vmem:[%s2831_s29 + $0xf18] sm:$0xff] }
  0x4c   : > { %456 = vst [vmem:[%s2839_s30 + $0x3b8] sm:$0xff] %v455_v55  ;;  %458 = vst [vmem:[%s2839_s30 + $0x3c0] sm:$0xff] %v457_v56  ;;  %v465_v60 = vld [vmem:[%s2831_s29 + $0xf20] sm:$0xff]  ;;  %v467_v61 = vld [vmem:[%s2831_s29 + $0xf28] sm:$0xff] }
  0x4d   : > { %460 = vst [vmem:[%s2839_s30 + $0x3c8] sm:$0xff] %v459_v57  ;;  %462 = vst [vmem:[%s2839_s30 + $0x3d0] sm:$0xff] %v461_v58  ;;  %v469_v62 = vld [vmem:[%s2831_s29 + $0xf30] sm:$0xff]  ;;  %v471_v63 = vld [vmem:[%s2831_s29 + $0xf38] sm:$0xff] }
  0x4e   : > { %464 = vst [vmem:[%s2839_s30 + $0x3d8] sm:$0xff] %v463_v59  ;;  %466 = vst [vmem:[%s2839_s30 + $0x3e0] sm:$0xff] %v465_v60  ;;  %v473_v0 = vld [vmem:[%s2831_s29 + $0x1000] sm:$0xff]  ;;  %v475_v1 = vld [vmem:[%s2831_s29 + $0x1008] sm:$0xff] }
  0x4f   : > { %468 = vst [vmem:[%s2839_s30 + $0x3e8] sm:$0xff] %v467_v61  ;;  %470 = vst [vmem:[%s2839_s30 + $0x3f0] sm:$0xff] %v469_v62  ;;  %v477_v2 = vld [vmem:[%s2831_s29 + $0x1010] sm:$0xff]  ;;  %v479_v3 = vld [vmem:[%s2831_s29 + $0x1018] sm:$0xff] }
  0x50   : > { %472 = vst [vmem:[%s2839_s30 + $0x3f8] sm:$0xff] %v471_v63  ;;  %474 = vst [vmem:[%s2839_s30 + $0x400] sm:$0xff] %v473_v0  ;;  %v481_v4 = vld [vmem:[%s2831_s29 + $0x1020] sm:$0xff]  ;;  %v483_v5 = vld [vmem:[%s2831_s29 + $0x1028] sm:$0xff] }
  0x51   : > { %476 = vst [vmem:[%s2839_s30 + $0x408] sm:$0xff] %v475_v1  ;;  %478 = vst [vmem:[%s2839_s30 + $0x410] sm:$0xff] %v477_v2  ;;  %v485_v6 = vld [vmem:[%s2831_s29 + $0x1030] sm:$0xff]  ;;  %v487_v7 = vld [vmem:[%s2831_s29 + $0x1038] sm:$0xff] }
  0x52   : > { %480 = vst [vmem:[%s2839_s30 + $0x418] sm:$0xff] %v479_v3  ;;  %482 = vst [vmem:[%s2839_s30 + $0x420] sm:$0xff] %v481_v4  ;;  %v489_v8 = vld [vmem:[%s2831_s29 + $0x1100] sm:$0xff]  ;;  %v491_v9 = vld [vmem:[%s2831_s29 + $0x1108] sm:$0xff] }
  0x53   : > { %484 = vst [vmem:[%s2839_s30 + $0x428] sm:$0xff] %v483_v5  ;;  %486 = vst [vmem:[%s2839_s30 + $0x430] sm:$0xff] %v485_v6  ;;  %v493_v10 = vld [vmem:[%s2831_s29 + $0x1110] sm:$0xff]  ;;  %v495_v11 = vld [vmem:[%s2831_s29 + $0x1118] sm:$0xff] }
  0x54   : > { %488 = vst [vmem:[%s2839_s30 + $0x438] sm:$0xff] %v487_v7  ;;  %490 = vst [vmem:[%s2839_s30 + $0x440] sm:$0xff] %v489_v8  ;;  %v497_v12 = vld [vmem:[%s2831_s29 + $0x1120] sm:$0xff]  ;;  %v499_v13 = vld [vmem:[%s2831_s29 + $0x1128] sm:$0xff] }
  0x55   : > { %492 = vst [vmem:[%s2839_s30 + $0x448] sm:$0xff] %v491_v9  ;;  %494 = vst [vmem:[%s2839_s30 + $0x450] sm:$0xff] %v493_v10  ;;  %v501_v14 = vld [vmem:[%s2831_s29 + $0x1130] sm:$0xff]  ;;  %v503_v15 = vld [vmem:[%s2831_s29 + $0x1138] sm:$0xff] }
  0x56   : > { %496 = vst [vmem:[%s2839_s30 + $0x458] sm:$0xff] %v495_v11  ;;  %498 = vst [vmem:[%s2839_s30 + $0x460] sm:$0xff] %v497_v12  ;;  %v505_v16 = vld [vmem:[%s2831_s29 + $0x1200] sm:$0xff]  ;;  %v507_v17 = vld [vmem:[%s2831_s29 + $0x1208] sm:$0xff] }
  0x57   : > { %500 = vst [vmem:[%s2839_s30 + $0x468] sm:$0xff] %v499_v13  ;;  %502 = vst [vmem:[%s2839_s30 + $0x470] sm:$0xff] %v501_v14  ;;  %v509_v18 = vld [vmem:[%s2831_s29 + $0x1210] sm:$0xff]  ;;  %v511_v19 = vld [vmem:[%s2831_s29 + $0x1218] sm:$0xff] }
  0x58   : > { %504 = vst [vmem:[%s2839_s30 + $0x478] sm:$0xff] %v503_v15  ;;  %506 = vst [vmem:[%s2839_s30 + $0x480] sm:$0xff] %v505_v16  ;;  %v513_v20 = vld [vmem:[%s2831_s29 + $0x1220] sm:$0xff]  ;;  %v515_v21 = vld [vmem:[%s2831_s29 + $0x1228] sm:$0xff] }
  0x59   : > { %508 = vst [vmem:[%s2839_s30 + $0x488] sm:$0xff] %v507_v17  ;;  %510 = vst [vmem:[%s2839_s30 + $0x490] sm:$0xff] %v509_v18  ;;  %v517_v22 = vld [vmem:[%s2831_s29 + $0x1230] sm:$0xff]  ;;  %v519_v23 = vld [vmem:[%s2831_s29 + $0x1238] sm:$0xff] }
  0x5a   : > { %512 = vst [vmem:[%s2839_s30 + $0x498] sm:$0xff] %v511_v19  ;;  %514 = vst [vmem:[%s2839_s30 + $0x4a0] sm:$0xff] %v513_v20  ;;  %v521_v24 = vld [vmem:[%s2831_s29 + $0x1300] sm:$0xff]  ;;  %v523_v25 = vld [vmem:[%s2831_s29 + $0x1308] sm:$0xff] }
  0x5b   : > { %516 = vst [vmem:[%s2839_s30 + $0x4a8] sm:$0xff] %v515_v21  ;;  %518 = vst [vmem:[%s2839_s30 + $0x4b0] sm:$0xff] %v517_v22  ;;  %v525_v26 = vld [vmem:[%s2831_s29 + $0x1310] sm:$0xff]  ;;  %v527_v27 = vld [vmem:[%s2831_s29 + $0x1318] sm:$0xff] }
  0x5c   : > { %520 = vst [vmem:[%s2839_s30 + $0x4b8] sm:$0xff] %v519_v23  ;;  %522 = vst [vmem:[%s2839_s30 + $0x4c0] sm:$0xff] %v521_v24  ;;  %v529_v28 = vld [vmem:[%s2831_s29 + $0x1320] sm:$0xff]  ;;  %v531_v29 = vld [vmem:[%s2831_s29 + $0x1328] sm:$0xff] }
  0x5d   : > { %524 = vst [vmem:[%s2839_s30 + $0x4c8] sm:$0xff] %v523_v25  ;;  %526 = vst [vmem:[%s2839_s30 + $0x4d0] sm:$0xff] %v525_v26  ;;  %v533_v30 = vld [vmem:[%s2831_s29 + $0x1330] sm:$0xff]  ;;  %v535_v31 = vld [vmem:[%s2831_s29 + $0x1338] sm:$0xff] }
  0x5e   : > { %528 = vst [vmem:[%s2839_s30 + $0x4d8] sm:$0xff] %v527_v27  ;;  %530 = vst [vmem:[%s2839_s30 + $0x4e0] sm:$0xff] %v529_v28  ;;  %v537_v32 = vld [vmem:[%s2831_s29 + $0x1400] sm:$0xff]  ;;  %v539_v33 = vld [vmem:[%s2831_s29 + $0x1408] sm:$0xff] }
  0x5f   : > { %532 = vst [vmem:[%s2839_s30 + $0x4e8] sm:$0xff] %v531_v29  ;;  %534 = vst [vmem:[%s2839_s30 + $0x4f0] sm:$0xff] %v533_v30  ;;  %v541_v34 = vld [vmem:[%s2831_s29 + $0x1410] sm:$0xff]  ;;  %v543_v35 = vld [vmem:[%s2831_s29 + $0x1418] sm:$0xff] }
  0x60   : > { %536 = vst [vmem:[%s2839_s30 + $0x4f8] sm:$0xff] %v535_v31  ;;  %538 = vst [vmem:[%s2839_s30 + $0x500] sm:$0xff] %v537_v32  ;;  %v545_v36 = vld [vmem:[%s2831_s29 + $0x1420] sm:$0xff]  ;;  %v547_v37 = vld [vmem:[%s2831_s29 + $0x1428] sm:$0xff] }
  0x61   : > { %540 = vst [vmem:[%s2839_s30 + $0x508] sm:$0xff] %v539_v33  ;;  %542 = vst [vmem:[%s2839_s30 + $0x510] sm:$0xff] %v541_v34  ;;  %v549_v38 = vld [vmem:[%s2831_s29 + $0x1430] sm:$0xff]  ;;  %v551_v39 = vld [vmem:[%s2831_s29 + $0x1438] sm:$0xff] }
  0x62   : > { %544 = vst [vmem:[%s2839_s30 + $0x518] sm:$0xff] %v543_v35  ;;  %546 = vst [vmem:[%s2839_s30 + $0x520] sm:$0xff] %v545_v36  ;;  %v553_v40 = vld [vmem:[%s2831_s29 + $0x1500] sm:$0xff]  ;;  %v555_v41 = vld [vmem:[%s2831_s29 + $0x1508] sm:$0xff] }
  0x63   : > { %548 = vst [vmem:[%s2839_s30 + $0x528] sm:$0xff] %v547_v37  ;;  %550 = vst [vmem:[%s2839_s30 + $0x530] sm:$0xff] %v549_v38  ;;  %v557_v42 = vld [vmem:[%s2831_s29 + $0x1510] sm:$0xff]  ;;  %v559_v43 = vld [vmem:[%s2831_s29 + $0x1518] sm:$0xff] }
  0x64   : > { %552 = vst [vmem:[%s2839_s30 + $0x538] sm:$0xff] %v551_v39  ;;  %554 = vst [vmem:[%s2839_s30 + $0x540] sm:$0xff] %v553_v40  ;;  %v561_v44 = vld [vmem:[%s2831_s29 + $0x1520] sm:$0xff]  ;;  %v563_v45 = vld [vmem:[%s2831_s29 + $0x1528] sm:$0xff] }
  0x65   : > { %556 = vst [vmem:[%s2839_s30 + $0x548] sm:$0xff] %v555_v41  ;;  %558 = vst [vmem:[%s2839_s30 + $0x550] sm:$0xff] %v557_v42  ;;  %v565_v46 = vld [vmem:[%s2831_s29 + $0x1530] sm:$0xff]  ;;  %v567_v47 = vld [vmem:[%s2831_s29 + $0x1538] sm:$0xff] }
  0x66   : > { %560 = vst [vmem:[%s2839_s30 + $0x558] sm:$0xff] %v559_v43  ;;  %562 = vst [vmem:[%s2839_s30 + $0x560] sm:$0xff] %v561_v44  ;;  %v569_v48 = vld [vmem:[%s2831_s29 + $0x1600] sm:$0xff]  ;;  %v571_v49 = vld [vmem:[%s2831_s29 + $0x1608] sm:$0xff] }
  0x67   : > { %564 = vst [vmem:[%s2839_s30 + $0x568] sm:$0xff] %v563_v45  ;;  %566 = vst [vmem:[%s2839_s30 + $0x570] sm:$0xff] %v565_v46  ;;  %v573_v50 = vld [vmem:[%s2831_s29 + $0x1610] sm:$0xff]  ;;  %v575_v51 = vld [vmem:[%s2831_s29 + $0x1618] sm:$0xff] }
  0x68   : > { %568 = vst [vmem:[%s2839_s30 + $0x578] sm:$0xff] %v567_v47  ;;  %570 = vst [vmem:[%s2839_s30 + $0x580] sm:$0xff] %v569_v48  ;;  %v577_v52 = vld [vmem:[%s2831_s29 + $0x1620] sm:$0xff]  ;;  %v579_v53 = vld [vmem:[%s2831_s29 + $0x1628] sm:$0xff] }
  0x69   : > { %572 = vst [vmem:[%s2839_s30 + $0x588] sm:$0xff] %v571_v49  ;;  %574 = vst [vmem:[%s2839_s30 + $0x590] sm:$0xff] %v573_v50  ;;  %v581_v54 = vld [vmem:[%s2831_s29 + $0x1630] sm:$0xff]  ;;  %v583_v55 = vld [vmem:[%s2831_s29 + $0x1638] sm:$0xff] }
  0x6a   : > { %576 = vst [vmem:[%s2839_s30 + $0x598] sm:$0xff] %v575_v51  ;;  %578 = vst [vmem:[%s2839_s30 + $0x5a0] sm:$0xff] %v577_v52 }
  0x6b   : > { %580 = vst [vmem:[%s2839_s30 + $0x5a8] sm:$0xff] %v579_v53  ;;  %582 = vst [vmem:[%s2839_s30 + $0x5b0] sm:$0xff] %v581_v54 }
  0x6c   : > { %584 = vst [vmem:[%s2839_s30 + $0x5b8] sm:$0xff] %v583_v55 }
  0x6d PF: > { %p2428_p6 = scmp.ge.s32.totalorder %s2760_s19, 1  ;;  %p589_p7 = scmp.lt.s32.totalorder %s2760_s19, 5 }
  0x6f   : > { %p590_p8 = pnand %p2428_p6, %p589_p7 }
  0x70   : > { %s596_s5 = sand.u32 (!%p590_p8), 1, %s2744_s15   ;;  %s2429_s14 = sshll.u32 (!%p590_p8), %s2752_s17, 4 }
  0x71   : > { %593 = sbr.rel (%p590_p8) target bundleno = 521 (0x209), region = 55  ;;  %p655_p9 = scmp.lt.s32.totalorder (!%p590_p8), %s2429_s14, 63 }
  0x72   : > { %s2661_s10 = smul.u32 (!%p590_p8), 1472, %s596_s5 }
  0x74   : > { %s3225_s13 = scalar_lea.vmem (!%p590_p8), [#allocation2], %s2661_s10 }
  0x76   : > { %v3209_v56 = vld [vmem:[%s3516_s0] sm:$0xff]  ;;  %vm1774_vm0 = vcmask 424960   ;;  %v2762_v59 = vmov 0   ;;  %v777_v63 = vld [vmem:[%s3225_s13 + $0x388] sm:$0xff]  ;;  %vm1778_vm1 = vcmask 1041408   ;;  %s3528_s14 = smov (!%p655_p9, %s2429_s14), 63 }
  0x77   : > { %v2155_v57 = vld [vmem:[%s3518_s2] sm:$0xff]  ;;  %v3216_v58 = vcombine.high %v3209_v56, %v3209_v56  ;;  %2703 = vset.pattern.permute.xlu0 %v2762_v59  ;;  %v785_v1 = vld [vmem:[%s3225_s13 + $0x3c8] sm:$0xff]  ;;  %s2430_s15 = sshll.u32 %s3528_s14, 2 }
  0x78   : > { %2158 = vperm.xlu0 %2703, %v2155_v57   ;;  %v2177_v60 = vld [vmem:[%s3519_s3] sm:$0xff]  ;;  %v2548_v5 = vcombine.high %v777_v63, %v785_v1  ;;  %v2547_v6 = vcombine.low %v777_v63, %v785_v1  ;;  %v761_v8 = vld [vmem:[%s3225_s13 + $0x308] sm:$0xff]  ;;  %s3467_s22 = scalar_lea.vmem %s3520_s4, %s2430_s15 }
  0x79   : > { %2626 = vmatprep.mubr.msk.bf16.mxu0 %vm1774_vm0, %v3216_v58  ;;  %2628 = vmatprep.mubr.msk.bf16.mxu1 %vm1774_vm0, %v3216_v58  ;;  %v776_v61 = vld [vmem:[%s3225_s13 + $0x380] sm:$0xff]  ;;  %v769_v9 = vld [vmem:[%s3225_s13 + $0x348] sm:$0xff] }
  0x7a   : > { %v784_v62 = vld [vmem:[%s3225_s13 + $0x3c0] sm:$0xff]  ;;  %v2532_v11 = vcombine.high %v761_v8, %v769_v9  ;;  %v745_v13 = vld [vmem:[%s3225_s13 + $0x288] sm:$0xff]  ;;  %1868 = vmatprep.subr.bf16.mxu1 %v2548_v5  ;;  %v2531_v16 = vcombine.low %v761_v8, %v769_v9 }
  0x7b   : > { %v2546_v0 = vcombine.high %v776_v61, %v784_v62  ;;  %v2545_v2 = vcombine.low %v776_v61, %v784_v62  ;;  %v760_v3 = vld [vmem:[%s3225_s13 + $0x300] sm:$0xff]  ;;  %v753_v14 = vld [vmem:[%s3225_s13 + $0x2c8] sm:$0xff]  ;;  %1869 = vmatpush1.bf16.msra.mxu1 %v2547_v6 }
  0x7c   : > { %v768_v4 = vld [vmem:[%s3225_s13 + $0x340] sm:$0xff]  ;;  %2180 = vperm.xlu0 %2703, %v2177_v60   ;;  %1870 = vmatprep.subr.bf16.mxu1 %v2532_v11  ;;  %v2516_v18 = vcombine.high %v745_v13, %v753_v14  ;;  %v729_v21 = vld [vmem:[%s3225_s13 + $0x208] sm:$0xff]  ;;  %v2515_v24 = vcombine.low %v745_v13, %v753_v14 }
  0x7d   : > { %v2530_v7 = vcombine.high %v760_v3, %v768_v4  ;;  %v744_v10 = vld [vmem:[%s3225_s13 + $0x280] sm:$0xff]  ;;  %1827 = vmatprep.subr.bf16.mxu0 %v2546_v0  ;;  %v2529_v15 = vcombine.low %v760_v3, %v768_v4  ;;  %v737_v22 = vld [vmem:[%s3225_s13 + $0x248] sm:$0xff] }
  0x7e   : > { %v752_v12 = vld [vmem:[%s3225_s13 + $0x2c0] sm:$0xff]  ;;  %1828 = vmatpush1.bf16.msra.mxu0 %v2545_v2  ;;  %v2500_v26 = vcombine.high %v729_v21, %v737_v22  ;;  %v713_v29 = vld [vmem:[%s3225_s13 + $0x188] sm:$0xff]  ;;  %v2499_v32 = vcombine.low %v729_v21, %v737_v22 }
  0x7f   : > { %1829 = vmatprep.subr.bf16.mxu0 %v2530_v7  ;;  %v2514_v17 = vcombine.high %v744_v10, %v752_v12  ;;  %v728_v19 = vld [vmem:[%s3225_s13 + $0x200] sm:$0xff]  ;;  %v2513_v23 = vcombine.low %v744_v10, %v752_v12  ;;  %1871 = vmatpush1.bf16.msra.mxu1 %v2531_v16  ;;  %v721_v30 = vld [vmem:[%s3225_s13 + $0x1c8] sm:$0xff] }
  0x80   : > { %v736_v20 = vld [vmem:[%s3225_s13 + $0x240] sm:$0xff]  ;;  %1872 = vmatprep.subr.bf16.mxu1 %v2516_v18  ;;  %v2484_v34 = vcombine.high %v713_v29, %v721_v30  ;;  %v697_v37 = vld [vmem:[%s3225_s13 + $0x108] sm:$0xff]  ;;  %v2483_v40 = vcombine.low %v713_v29, %v721_v30  ;;  %v778_v29 = vld [vmem:[%s3225_s13 + $0x390] sm:$0xff] }
  0x81   : > { %v2498_v25 = vcombine.high %v728_v19, %v736_v20  ;;  %v712_v27 = vld [vmem:[%s3225_s13 + $0x180] sm:$0xff]  ;;  %v2497_v31 = vcombine.low %v728_v19, %v736_v20  ;;  %v705_v38 = vld [vmem:[%s3225_s13 + $0x148] sm:$0xff]  ;;  %v786_v30 = vld [vmem:[%s3225_s13 + $0x3d0] sm:$0xff] }
  0x82   : > { %1830 = vmatpush1.bf16.msra.mxu0 %v2529_v15  ;;  %v720_v28 = vld [vmem:[%s3225_s13 + $0x1c0] sm:$0xff]  ;;  %v2468_v42 = vcombine.high %v697_v37, %v705_v38  ;;  %v681_v45 = vld [vmem:[%s3225_s13 + $0x88] sm:$0xff]  ;;  %v2467_v48 = vcombine.low %v697_v37, %v705_v38  ;;  %v762_v37 = vld [vmem:[%s3225_s13 + $0x310] sm:$0xff] }
  0x83   : > { %1831 = vmatprep.subr.bf16.mxu0 %v2514_v17  ;;  %1873 = vmatpush1.bf16.msra.mxu1 %v2515_v24  ;;  %v2482_v33 = vcombine.high %v712_v27, %v720_v28  ;;  %v696_v35 = vld [vmem:[%s3225_s13 + $0x100] sm:$0xff]  ;;  %v2481_v39 = vcombine.low %v712_v27, %v720_v28  ;;  %v689_v46 = vld [vmem:[%s3225_s13 + $0xc8] sm:$0xff]  ;;  %v770_v38 = vld [vmem:[%s3225_s13 + $0x350] sm:$0xff] }
  0x84   : > { %1874 = vmatprep.subr.bf16.mxu1 %v2500_v26  ;;  %v704_v36 = vld [vmem:[%s3225_s13 + $0x140] sm:$0xff]  ;;  %v2452_v50 = vcombine.high %v681_v45, %v689_v46  ;;  %v665_v53 = vld [vmem:[%s3225_s13 + $0x8] sm:$0xff]  ;;  %v2451_v57 = vcombine.low %v681_v45, %v689_v46  ;;  %v746_v46 = vld [vmem:[%s3225_s13 + $0x290] sm:$0xff] }
  0x85   : > { %v2466_v41 = vcombine.high %v696_v35, %v704_v36  ;;  %v680_v43 = vld [vmem:[%s3225_s13 + $0x80] sm:$0xff]  ;;  %v2465_v47 = vcombine.low %v696_v35, %v704_v36  ;;  %v673_v54 = vld [vmem:[%s3225_s13 + $0x48] sm:$0xff]  ;;  %v2550_v35 = vcombine.high %v778_v29, %v786_v30 }
  0x86   : > { %1832 = vmatpush1.bf16.msra.mxu0 %v2513_v23  ;;  %v688_v44 = vld [vmem:[%s3225_s13 + $0xc0] sm:$0xff]  ;;  %v2436_v60 = vcombine.high %v665_v53, %v673_v54  ;;  %v841_v62 = vld [vmem:[%s3225_s13 + $0x588] sm:$0x33]  ;;  %v2435_v0 = vcombine.low %v665_v53, %v673_v54  ;;  %v730_v53 = vld [vmem:[%s3225_s13 + $0x210] sm:$0xff] }
  0x87   : > { %1833 = vmatprep.subr.bf16.mxu0 %v2498_v25  ;;  %1875 = vmatpush1.bf16.msra.mxu1 %v2499_v32  ;;  %v2450_v49 = vcombine.high %v680_v43, %v688_v44  ;;  %v664_v51 = vld [vmem:[%s3225_s13] sm:$0xff]  ;;  %v2449_v55 = vcombine.low %v680_v43, %v688_v44  ;;  %v2612_v3 = vcombine.high %v841_v62, %v841_v62  ;;  %v825_v7 = vld [vmem:[%s3225_s13 + $0x508] sm:$0xff]  ;;  %v787_v32 = vld [vmem:[%s3225_s13 + $0x3d8] sm:$0xff] }
  0x88   : > { %1876 = vmatprep.subr.bf16.mxu1 %v2484_v34  ;;  %v672_v52 = vld [vmem:[%s3225_s13 + $0x40] sm:$0xff]  ;;  %v2611_v4 = vcombine.low %v841_v62, %v841_v62  ;;  %v833_v8 = vld [vmem:[%s3225_s13 + $0x548] sm:$0xff]  ;;  %v2534_v44 = vcombine.high %v762_v37, %v770_v38  ;;  %v738_v54 = vld [vmem:[%s3225_s13 + $0x250] sm:$0xff] }
  0x89   : > { %v2434_v59 = vcombine.high %v664_v51, %v672_v52  ;;  %v840_v61 = vld [vmem:[%s3225_s13 + $0x580] sm:$0x33]  ;;  %v2433_v63 = vcombine.low %v664_v51, %v672_v52  ;;  %v2596_v12 = vcombine.high %v825_v7, %v833_v8  ;;  %v809_v15 = vld [vmem:[%s3225_s13 + $0x488] sm:$0xff]  ;;  %v2595_v18 = vcombine.low %v825_v7, %v833_v8  ;;  %v698_v7 = vld [vmem:[%s3225_s13 + $0x110] sm:$0xff] }
  0x8a   : > { %1834 = vmatpush1.bf16.msra.mxu0 %v2497_v31  ;;  %v2610_v1 = vcombine.high %v840_v61, %v840_v61  ;;  %v2609_v2 = vcombine.low %v840_v61, %v840_v61  ;;  %v824_v5 = vld [vmem:[%s3225_s13 + $0x500] sm:$0xff]  ;;  %v1786_v11 = vsel %vm1778_vm1, %v2611_v4, 0  ;;  %v817_v16 = vld [vmem:[%s3225_s13 + $0x4c8] sm:$0xff]  ;;  %v779_v31 = vld [vmem:[%s3225_s13 + $0x398] sm:$0xff]  ;;  %v2502_v61 = vcombine.high %v730_v53, %v738_v54 }
  0x8b   : > { %1835 = vmatprep.subr.bf16.mxu0 %v2482_v33  ;;  %1877 = vmatpush1.bf16.msra.mxu1 %v2483_v40  ;;  %v832_v6 = vld [vmem:[%s3225_s13 + $0x540] sm:$0xff]  ;;  %v2580_v20 = vcombine.high %v809_v15, %v817_v16  ;;  %v793_v23 = vld [vmem:[%s3225_s13 + $0x408] sm:$0xff]  ;;  %v2579_v26 = vcombine.low %v809_v15, %v817_v16  ;;  %v2552_v36 = vcombine.high %v779_v31, %v787_v32  ;;  %v763_v40 = vld [vmem:[%s3225_s13 + $0x318] sm:$0xff] }
  0x8c   : > { %1878 = vmatprep.subr.bf16.mxu1 %v2468_v42  ;;  %v1780_v9 = vsel %vm1778_vm1, %v2609_v2, 0  ;;  %v2594_v10 = vcombine.high %v824_v5, %v832_v6  ;;  %v808_v13 = vld [vmem:[%s3225_s13 + $0x480] sm:$0xff]  ;;  %v2593_v17 = vcombine.low %v824_v5, %v832_v6  ;;  %v801_v24 = vld [vmem:[%s3225_s13 + $0x448] sm:$0xff]  ;;  %v2549_v42 = vcombine.low %v778_v29, %v786_v30  ;;  %v723_v2 = vld [vmem:[%s3225_s13 + $0x1d8] sm:$0xff] }
  0x8d   : > { %v816_v14 = vld [vmem:[%s3225_s13 + $0x4c0] sm:$0xff]  ;;  %v2564_v28 = vcombine.high %v793_v23, %v801_v24  ;;  %v2563_v34 = vcombine.low %v793_v23, %v801_v24  ;;  %v2551_v43 = vcombine.low %v779_v31, %v787_v32  ;;  %v706_v8 = vld [vmem:[%s3225_s13 + $0x150] sm:$0xff]  ;;  %v843_v32 = vld [vmem:[%s3225_s13 + $0x598] sm:$0x33] }
  0x8e   : > { %1836 = vmatpush1.bf16.msra.mxu0 %v2481_v39  ;;  %v2578_v19 = vcombine.high %v808_v13, %v816_v14  ;;  %v792_v21 = vld [vmem:[%s3225_s13 + $0x400] sm:$0xff]  ;;  %v2577_v25 = vcombine.low %v808_v13, %v816_v14  ;;  %v3285_v39 = vcombine.low %v3209_v56, %v3209_v56  ;;  %v747_v56 = vld [vmem:[%s3225_s13 + $0x298] sm:$0xff]  ;;  %v2470_v13 = vcombine.high %v698_v7, %v706_v8  ;;  %v682_v15 = vld [vmem:[%s3225_s13 + $0x90] sm:$0xff] }
  0x8f   : > { %1837 = vmatprep.subr.bf16.mxu0 %v2466_v41  ;;  %1879 = vmatpush1.bf16.msra.mxu1 %v2467_v48  ;;  %v800_v22 = vld [vmem:[%s3225_s13 + $0x440] sm:$0xff]  ;;  %v771_v41 = vld [vmem:[%s3225_s13 + $0x358] sm:$0xff]  ;;  %v690_v16 = vld [vmem:[%s3225_s13 + $0xd0] sm:$0xff] }
  0x90   : > { %1880 = vmatprep.subr.bf16.mxu1 %v2452_v50  ;;  %v2562_v27 = vcombine.high %v792_v21, %v800_v22  ;;  %v2561_v33 = vcombine.low %v792_v21, %v800_v22  ;;  %v2536_v45 = vcombine.high %v763_v40, %v771_v41  ;;  %v755_v48 = vld [vmem:[%s3225_s13 + $0x2d8] sm:$0xff]  ;;  %v2535_v50 = vcombine.low %v763_v40, %v771_v41  ;;  %v666_v23 = vld [vmem:[%s3225_s13 + $0x10] sm:$0xff] }
  0x91   : > { %v2520_v52 = vcombine.high %v747_v56, %v755_v48  ;;  %v2454_v21 = vcombine.high %v682_v15, %v690_v16  ;;  %v674_v24 = vld [vmem:[%s3225_s13 + $0x50] sm:$0xff] }
  0x92   : > { %1838 = vmatpush1.bf16.msra.mxu0 %v2465_v47  ;;  %v754_v47 = vld [vmem:[%s3225_s13 + $0x2d0] sm:$0xff]  ;;  %v2438_v29 = vcombine.high %v666_v23, %v674_v24 }
  0x93   : > { %1839 = vmatprep.subr.bf16.mxu0 %v2450_v49  ;;  %1881 = vmatpush1.bf16.msra.mxu1 %v2451_v57  ;;  %v2533_v49 = vcombine.low %v762_v37, %v770_v38  ;;  %v2518_v51 = vcombine.high %v746_v46, %v754_v47  ;;  %v739_v57 = vld [vmem:[%s3225_s13 + $0x258] sm:$0xff]  ;;  %v842_v31 = vld [vmem:[%s3225_s13 + $0x590] sm:$0x33]  ;;  %v2616_v37 = vcombine.high %v843_v32, %v843_v32 }
  0x94   : > { %1882 = vmatprep.subr.bf16.mxu1 %v2436_v60  ;;  %v2519_v60 = vcombine.low %v747_v56, %v755_v48  ;;  %v2615_v38 = vcombine.low %v843_v32, %v843_v32  ;;  %v826_v40 = vld [vmem:[%s3225_s13 + $0x510] sm:$0xff] }
  0x95   : > { %v834_v41 = vld [vmem:[%s3225_s13 + $0x550] sm:$0xff] }
  0x96   : > { %1840 = vmatpush1.bf16.msra.mxu0 %v2449_v55  ;;  %v731_v55 = vld [vmem:[%s3225_s13 + $0x218] sm:$0xff]  ;;  %v810_v56 = vld [vmem:[%s3225_s13 + $0x490] sm:$0xff] }
  0x97   : > { %1841 = vmatprep.subr.bf16.mxu0 %v2434_v59  ;;  %1883 = vmatpush1.bf16.msra.mxu1 %v2435_v0  ;;  %v2517_v59 = vcombine.low %v746_v46, %v754_v47  ;;  %v2504_v62 = vcombine.high %v731_v55, %v739_v57  ;;  %v722_v0 = vld [vmem:[%s3225_s13 + $0x1d0] sm:$0xff]  ;;  %v2503_v4 = vcombine.low %v731_v55, %v739_v57  ;;  %v1798_v46 = vsel %vm1778_vm1, %v2615_v38, 0 }
  0x98   : > { %2627 = vmatprep.subr.msk.bf16.mxu1 %vm1778_vm1, %v2612_v3  ;;  %v2501_v3 = vcombine.low %v730_v53, %v738_v54  ;;  %v818_v48 = vld [vmem:[%s3225_s13 + $0x4d0] sm:$0xff] }
  0x99   : > { %v2582_v53 = vcombine.high %v810_v56, %v818_v48  ;;  %v794_v55 = vld [vmem:[%s3225_s13 + $0x410] sm:$0xff] }
  0x9a   : > { %1842 = vmatpush1.bf16.msra.mxu0 %v2433_v63  ;;  %v714_v63 = vld [vmem:[%s3225_s13 + $0x190] sm:$0xff] }
  0x9b   : > { %2625 = vmatprep.subr.msk.bf16.mxu0 %vm1778_vm1, %v2610_v1  ;;  %1893 = vmatpush2.bf16.msra.mxu1 %v1786_v11  ;;  %v715_v1 = vld [vmem:[%s3225_s13 + $0x198] sm:$0xff]  ;;  %v2486_v5 = vcombine.high %v714_v63, %v722_v0  ;;  %v2485_v11 = vcombine.low %v714_v63, %v722_v0  ;;  %v802_v57 = vld [vmem:[%s3225_s13 + $0x450] sm:$0xff] }
  0x9c   : > { %1894 = vmatprep.subr.bf16.mxu1 %v2596_v12  ;;  %v2488_v6 = vcombine.high %v715_v1, %v723_v2  ;;  %v2487_v12 = vcombine.low %v715_v1, %v723_v2  ;;  %v2566_v63 = vcombine.high %v794_v55, %v802_v57  ;;  %v780_v1 = vld [vmem:[%s3225_s13 + $0x3a0] sm:$0xff] }
  0x9d   : > { %v788_v2 = vld [vmem:[%s3225_s13 + $0x3e0] sm:$0xff] }
  0x9e   : > { %1852 = vmatpush2.bf16.msra.mxu0 %v1780_v9  ;;  %v699_v9 = vld [vmem:[%s3225_s13 + $0x118] sm:$0xff] }
  0x9f   : > { %1853 = vmatprep.subr.bf16.mxu0 %v2594_v10  ;;  %1895 = vmatpush2.bf16.msra.mxu1 %v2595_v18  ;;  %v707_v10 = vld [vmem:[%s3225_s13 + $0x158] sm:$0xff] }
  0xa0   : > { %1896 = vmatprep.subr.bf16.mxu1 %v2580_v20  ;;  %v2472_v14 = vcombine.high %v699_v9, %v707_v10  ;;  %v691_v18 = vld [vmem:[%s3225_s13 + $0xd8] sm:$0xff]  ;;  %v2471_v20 = vcombine.low %v699_v9, %v707_v10  ;;  %v764_v9 = vld [vmem:[%s3225_s13 + $0x320] sm:$0xff] }
  0xa1   : > { %v772_v10 = vld [vmem:[%s3225_s13 + $0x360] sm:$0xff] }
  0xa2   : > { %1854 = vmatpush2.bf16.msra.mxu0 %v2593_v17  ;;  %v683_v17 = vld [vmem:[%s3225_s13 + $0x98] sm:$0xff] }
  0xa3   : > { %1855 = vmatprep.subr.bf16.mxu0 %v2578_v19  ;;  %1897 = vmatpush2.bf16.msra.mxu1 %v2579_v26  ;;  %v2469_v19 = vcombine.low %v698_v7, %v706_v8  ;;  %v2456_v22 = vcombine.high %v683_v17, %v691_v18  ;;  %v675_v26 = vld [vmem:[%s3225_s13 + $0x58] sm:$0xff]  ;;  %v2554_v7 = vcombine.high %v780_v1, %v788_v2 }
  0xa4   : > { %1898 = vmatprep.subr.bf16.mxu1 %v2564_v28  ;;  %v2455_v28 = vcombine.low %v683_v17, %v691_v18  ;;  %v748_v17 = vld [vmem:[%s3225_s13 + $0x2a0] sm:$0xff] }
  0xa5   : > { %v756_v18 = vld [vmem:[%s3225_s13 + $0x2e0] sm:$0xff] }
  0xa6   : > { %1856 = vmatpush2.bf16.msra.mxu0 %v2577_v25  ;;  %v667_v25 = vld [vmem:[%s3225_s13 + $0x18] sm:$0xff] }
  0xa7   : > { %1857 = vmatprep.subr.bf16.mxu0 %v2562_v27  ;;  %1899 = vmatpush2.bf16.msra.mxu1 %v2563_v34  ;;  %v2453_v27 = vcombine.low %v682_v15, %v690_v16  ;;  %v2440_v30 = vcombine.high %v667_v25, %v675_v26  ;;  %v2439_v34 = vcombine.low %v667_v25, %v675_v26  ;;  %v732_v25 = vld [vmem:[%s3225_s13 + $0x220] sm:$0xff] }
  0xa8   : > { %1950 = vmatprep.subr.bf16.mxu1 %v2552_v36  ;;  %v2613_v36 = vcombine.low %v842_v31, %v842_v31  ;;  %v2538_v15 = vcombine.high %v764_v9, %v772_v10  ;;  %v740_v26 = vld [vmem:[%s3225_s13 + $0x260] sm:$0xff] }
  0xaa   : > { %1858 = vmatpush2.bf16.msra.mxu0 %v2561_v33  ;;  %1901 = vmatmul.mubr.bf16.vlgmr.msra.gmra.mxu1 %v3285_v39  ;;  %v2437_v33 = vcombine.low %v666_v23, %v674_v24  ;;  %v2522_v23 = vcombine.high %v748_v17, %v756_v18 }
  0xab   : > { %1909 = vmatprep.subr.bf16.mxu0 %v2550_v35  ;;  %1951 = vmatpush1.bf16.msra.mxu1 %v2551_v43  ;;  %v2614_v35 = vcombine.high %v842_v31, %v842_v31  ;;  %v835_v43 = vld [vmem:[%s3225_s13 + $0x558] sm:$0xff]  ;;  %v2506_v31 = vcombine.high %v732_v25, %v740_v26 }
  0xac   : > { %1952 = vmatprep.subr.bf16.mxu1 %v2536_v45  ;;  %2632 = vmatprep.mubr.msk.bf16.mxu1 %vm1774_vm0, %v3216_v58  ;;  %v2598_v45 = vcombine.high %v826_v40, %v834_v41 }
  0xad   : > { %1860 = vmatmul.mubr.bf16.vlgmr.msra.gmra.mxu0 %v3285_v39 }
  0xae   : > { %1910 = vmatpush1.bf16.msra.mxu0 %v2549_v42  ;;  %2630 = vmatprep.mubr.msk.bf16.mxu0 %vm1774_vm0, %v3216_v58  ;;  %v827_v42 = vld [vmem:[%s3225_s13 + $0x518] sm:$0xff] }
  0xaf   : > { %1911 = vmatprep.subr.bf16.mxu0 %v2534_v44  ;;  %1953 = vmatpush1.bf16.msra.mxu1 %v2535_v50  ;;  %v1792_v44 = vsel %vm1778_vm1, %v2613_v36, 0  ;;  %v2600_v47 = vcombine.high %v827_v42, %v835_v43  ;;  %v819_v50 = vld [vmem:[%s3225_s13 + $0x4d8] sm:$0xff]  ;;  %v725_v36 = vld [vmem:[%s3225_s13 + $0x1e8] sm:$0xff] }
  0xb0   : > { %1954 = vmatprep.subr.bf16.mxu1 %v2520_v52  ;;  %v2599_v52 = vcombine.low %v827_v42, %v835_v43  ;;  %v700_v42 = vld [vmem:[%s3225_s13 + $0x120] sm:$0xff] }
  0xb1   : > { %v708_v43 = vld [vmem:[%s3225_s13 + $0x160] sm:$0xff] }
  0xb2   : > { %1912 = vmatpush1.bf16.msra.mxu0 %v2533_v49  ;;  %v811_v49 = vld [vmem:[%s3225_s13 + $0x498] sm:$0xff] }
  0xb3   : > { %1913 = vmatprep.subr.bf16.mxu0 %v2518_v51  ;;  %1955 = vmatpush1.bf16.msra.mxu1 %v2519_v60  ;;  %v2597_v51 = vcombine.low %v826_v40, %v834_v41  ;;  %v2584_v54 = vcombine.high %v811_v49, %v819_v50  ;;  %v803_v60 = vld [vmem:[%s3225_s13 + $0x458] sm:$0xff] }
  0xb4   : > { %1956 = vmatprep.subr.bf16.mxu1 %v2504_v62  ;;  %v2583_v62 = vcombine.low %v811_v49, %v819_v50  ;;  %v684_v49 = vld [vmem:[%s3225_s13 + $0xa0] sm:$0xff] }
  0xb5   : > { %v692_v50 = vld [vmem:[%s3225_s13 + $0xe0] sm:$0xff] }
  0xb6   : > { %1914 = vmatpush1.bf16.msra.mxu0 %v2517_v59  ;;  %v795_v59 = vld [vmem:[%s3225_s13 + $0x418] sm:$0xff] }
  0xb7   : > { %1915 = vmatprep.subr.bf16.mxu0 %v2502_v61  ;;  %1957 = vmatpush1.bf16.msra.mxu1 %v2503_v4  ;;  %v2581_v61 = vcombine.low %v810_v56, %v818_v48  ;;  %v2568_v0 = vcombine.high %v795_v59, %v803_v60  ;;  %v789_v4 = vld [vmem:[%s3225_s13 + $0x3e8] sm:$0xff]  ;;  %v2474_v56 = vcombine.high %v700_v42, %v708_v43 }
  0xb8   : > { %1958 = vmatprep.subr.bf16.mxu1 %v2488_v6  ;;  %v2567_v6 = vcombine.low %v795_v59, %v803_v60  ;;  %v668_v59 = vld [vmem:[%s3225_s13 + $0x20] sm:$0xff] }
  0xb9   : > { %v676_v60 = vld [vmem:[%s3225_s13 + $0x60] sm:$0xff] }
  0xba   : > { %1916 = vmatpush1.bf16.msra.mxu0 %v2501_v3  ;;  %v781_v3 = vld [vmem:[%s3225_s13 + $0x3a8] sm:$0xff] }
  0xbb   : > { %1917 = vmatprep.subr.bf16.mxu0 %v2486_v5  ;;  %1959 = vmatpush1.bf16.msra.mxu1 %v2487_v12  ;;  %v2565_v5 = vcombine.low %v794_v55, %v802_v57  ;;  %v2556_v8 = vcombine.high %v781_v3, %v789_v4  ;;  %v773_v12 = vld [vmem:[%s3225_s13 + $0x368] sm:$0xff]  ;;  %v2458_v55 = vcombine.high %v684_v49, %v692_v50 }
  0xbc   : > { %1960 = vmatprep.subr.bf16.mxu1 %v2472_v14  ;;  %v2555_v14 = vcombine.low %v781_v3, %v789_v4  ;;  %v844_v3 = vld [vmem:[%s3225_s13 + $0x5a0] sm:$0x33]  ;;  %v845_v4 = vld [vmem:[%s3225_s13 + $0x5a8] sm:$0x33] }
  0xbe   : > { %1918 = vmatpush1.bf16.msra.mxu0 %v2485_v11  ;;  %v765_v11 = vld [vmem:[%s3225_s13 + $0x328] sm:$0xff] }
  0xbf   : > { %1919 = vmatprep.subr.bf16.mxu0 %v2470_v13  ;;  %1961 = vmatpush1.bf16.msra.mxu1 %v2471_v20  ;;  %v2553_v13 = vcombine.low %v780_v1, %v788_v2  ;;  %v2540_v16 = vcombine.high %v765_v11, %v773_v12  ;;  %v757_v20 = vld [vmem:[%s3225_s13 + $0x2e8] sm:$0xff]  ;;  %v2442_v1 = vcombine.high %v668_v59, %v676_v60 }
  0xc0   : > { %1962 = vmatprep.subr.bf16.mxu1 %v2456_v22  ;;  %v2539_v22 = vcombine.low %v765_v11, %v773_v12  ;;  %v828_v11 = vld [vmem:[%s3225_s13 + $0x520] sm:$0xff] }
  0xc1   : > { %v836_v12 = vld [vmem:[%s3225_s13 + $0x560] sm:$0xff] }
  0xc2   : > { %1920 = vmatpush1.bf16.msra.mxu0 %v2469_v19  ;;  %v749_v19 = vld [vmem:[%s3225_s13 + $0x2a8] sm:$0xff] }
  0xc3   : > { %1921 = vmatprep.subr.bf16.mxu0 %v2454_v21  ;;  %1963 = vmatpush1.bf16.msra.mxu1 %v2455_v28  ;;  %v2537_v21 = vcombine.low %v764_v9, %v772_v10  ;;  %v2524_v24 = vcombine.high %v749_v19, %v757_v20  ;;  %v741_v28 = vld [vmem:[%s3225_s13 + $0x268] sm:$0xff]  ;;  %v2620_v9 = vcombine.high %v845_v4, %v845_v4 }
  0xc4   : > { %1964 = vmatprep.subr.bf16.mxu1 %v2440_v30  ;;  %v2523_v30 = vcombine.low %v749_v19, %v757_v20  ;;  %v2619_v10 = vcombine.low %v845_v4, %v845_v4  ;;  %v812_v19 = vld [vmem:[%s3225_s13 + $0x4a0] sm:$0xff] }
  0xc5   : > { %v820_v20 = vld [vmem:[%s3225_s13 + $0x4e0] sm:$0xff] }
  0xc6   : > { %1922 = vmatpush1.bf16.msra.mxu0 %v2453_v27  ;;  %v733_v27 = vld [vmem:[%s3225_s13 + $0x228] sm:$0xff] }
  0xc7   : > { %1923 = vmatprep.subr.bf16.mxu0 %v2438_v29  ;;  %1965 = vmatpush1.bf16.msra.mxu1 %v2439_v34  ;;  %v2521_v29 = vcombine.low %v748_v17, %v756_v18  ;;  %v2508_v32 = vcombine.high %v733_v27, %v741_v28  ;;  %v724_v34 = vld [vmem:[%s3225_s13 + $0x1e0] sm:$0xff]  ;;  %v2507_v38 = vcombine.low %v733_v27, %v741_v28  ;;  %v1810_v17 = vsel %vm1778_vm1, %v2619_v10, 0 }
  0xc8   : > { %2631 = vmatprep.subr.msk.bf16.mxu1 %vm1778_vm1, %v2616_v37  ;;  %v2505_v37 = vcombine.low %v732_v25, %v740_v26  ;;  %v2586_v25 = vcombine.high %v812_v19, %v820_v20  ;;  %v796_v27 = vld [vmem:[%s3225_s13 + $0x420] sm:$0xff] }
  0xc9   : > { %v804_v28 = vld [vmem:[%s3225_s13 + $0x460] sm:$0xff] }
  0xca   : > { %1924 = vmatpush1.bf16.msra.mxu0 %v2437_v33  ;;  %v716_v33 = vld [vmem:[%s3225_s13 + $0x1a0] sm:$0xff] }
  0xcb   : > { %2629 = vmatprep.subr.msk.bf16.mxu0 %vm1778_vm1, %v2614_v35  ;;  %1975 = vmatpush2.bf16.msra.mxu1 %v1798_v46  ;;  %v717_v35 = vld [vmem:[%s3225_s13 + $0x1a8] sm:$0xff]  ;;  %v2490_v40 = vcombine.high %v716_v33, %v724_v34  ;;  %v2489_v46 = vcombine.low %v716_v33, %v724_v34  ;;  %v2570_v33 = vcombine.high %v796_v27, %v804_v28 }
  0xcc   : > { %1976 = vmatprep.subr.bf16.mxu1 %v2600_v47  ;;  %v2492_v41 = vcombine.high %v717_v35, %v725_v36  ;;  %v2491_v47 = vcombine.low %v717_v35, %v725_v36  ;;  %v782_v35 = vld [vmem:[%s3225_s13 + $0x3b0] sm:$0xff] }
  0xcd   : > { %v790_v36 = vld [vmem:[%s3225_s13 + $0x3f0] sm:$0xff] }
  0xce   : > { %1934 = vmatpush2.bf16.msra.mxu0 %v1792_v44  ;;  %v701_v44 = vld [vmem:[%s3225_s13 + $0x128] sm:$0xff] }
  0xcf   : > { %1935 = vmatprep.subr.bf16.mxu0 %v2598_v45  ;;  %1977 = vmatpush2.bf16.msra.mxu1 %v2599_v52  ;;  %v709_v45 = vld [vmem:[%s3225_s13 + $0x168] sm:$0xff] }
  0xd0   : > { %1978 = vmatprep.subr.bf16.mxu1 %v2584_v54  ;;  %v2476_v48 = vcombine.high %v701_v44, %v709_v45  ;;  %v693_v52 = vld [vmem:[%s3225_s13 + $0xe8] sm:$0xff]  ;;  %v2475_v54 = vcombine.low %v701_v44, %v709_v45  ;;  %v766_v44 = vld [vmem:[%s3225_s13 + $0x330] sm:$0xff] }
  0xd1   : > { %v774_v45 = vld [vmem:[%s3225_s13 + $0x370] sm:$0xff] }
  0xd2   : > { %1936 = vmatpush2.bf16.msra.mxu0 %v2597_v51  ;;  %v685_v51 = vld [vmem:[%s3225_s13 + $0xa8] sm:$0xff] }
  0xd3   : > { %1937 = vmatprep.subr.bf16.mxu0 %v2582_v53  ;;  %1979 = vmatpush2.bf16.msra.mxu1 %v2583_v62  ;;  %v2473_v53 = vcombine.low %v700_v42, %v708_v43  ;;  %v2460_v57 = vcombine.high %v685_v51, %v693_v52  ;;  %v677_v62 = vld [vmem:[%s3225_s13 + $0x68] sm:$0xff]  ;;  %v2558_v42 = vcombine.high %v782_v35, %v790_v36 }
  0xd4   : > { %1980 = vmatprep.subr.bf16.mxu1 %v2568_v0  ;;  %v2459_v0 = vcombine.low %v685_v51, %v693_v52  ;;  %v750_v51 = vld [vmem:[%s3225_s13 + $0x2b0] sm:$0xff] }
  0xd5   : > { %v758_v52 = vld [vmem:[%s3225_s13 + $0x2f0] sm:$0xff] }
  0xd6   : > { %1938 = vmatpush2.bf16.msra.mxu0 %v2581_v61  ;;  %v669_v61 = vld [vmem:[%s3225_s13 + $0x28] sm:$0xff] }
  0xd7   : > { %1939 = vmatprep.subr.bf16.mxu0 %v2566_v63  ;;  %1981 = vmatpush2.bf16.msra.mxu1 %v2567_v6  ;;  %v2457_v63 = vcombine.low %v684_v49, %v692_v50  ;;  %v2444_v2 = vcombine.high %v669_v61, %v677_v62  ;;  %v2443_v6 = vcombine.low %v669_v61, %v677_v62  ;;  %v734_v61 = vld [vmem:[%s3225_s13 + $0x230] sm:$0xff] }
  0xd8   : > { %2032 = vmatprep.subr.bf16.mxu1 %v2556_v8  ;;  %v2617_v8 = vcombine.low %v844_v3, %v844_v3  ;;  %v2542_v49 = vcombine.high %v766_v44, %v774_v45  ;;  %v742_v62 = vld [vmem:[%s3225_s13 + $0x270] sm:$0xff] }
  0xda   : > { %1940 = vmatpush2.bf16.msra.mxu0 %v2565_v5  ;;  %1983 = vmatmul.mubr.bf16.vlgmr.msra.gmra.mxu1 %v3285_v39  ;;  %v2441_v5 = vcombine.low %v668_v59, %v676_v60  ;;  %v2526_v59 = vcombine.high %v750_v51, %v758_v52 }
  0xdb   : > { %1991 = vmatprep.subr.bf16.mxu0 %v2554_v7  ;;  %2033 = vmatpush1.bf16.msra.mxu1 %v2555_v14  ;;  %v2618_v7 = vcombine.high %v844_v3, %v844_v3  ;;  %v837_v14 = vld [vmem:[%s3225_s13 + $0x568] sm:$0xff]  ;;  %v2510_v3 = vcombine.high %v734_v61, %v742_v62 }
  0xdc   : > { %2034 = vmatprep.subr.bf16.mxu1 %v2540_v16  ;;  %2636 = vmatprep.mubr.msk.bf16.mxu1 %vm1774_vm0, %v3216_v58  ;;  %v2602_v16 = vcombine.high %v828_v11, %v836_v12 }
  0xdd   : > { %1942 = vmatmul.mubr.bf16.vlgmr.msra.gmra.mxu0 %v3285_v39 }
  0xde   : > { %1992 = vmatpush1.bf16.msra.mxu0 %v2553_v13  ;;  %2634 = vmatprep.mubr.msk.bf16.mxu0 %vm1774_vm0, %v3216_v58  ;;  %v829_v13 = vld [vmem:[%s3225_s13 + $0x528] sm:$0xff] }
  0xdf   : > { %1993 = vmatprep.subr.bf16.mxu0 %v2538_v15  ;;  %2035 = vmatpush1.bf16.msra.mxu1 %v2539_v22  ;;  %v1804_v15 = vsel %vm1778_vm1, %v2617_v8, 0  ;;  %v2604_v18 = vcombine.high %v829_v13, %v837_v14  ;;  %v821_v22 = vld [vmem:[%s3225_s13 + $0x4e8] sm:$0xff]  ;;  %v727_v8 = vld [vmem:[%s3225_s13 + $0x1f8] sm:$0xff] }
  0xe0   : > { %2036 = vmatprep.subr.bf16.mxu1 %v2524_v24  ;;  %v2603_v24 = vcombine.low %v829_v13, %v837_v14  ;;  %v710_v13 = vld [vmem:[%s3225_s13 + $0x170] sm:$0xff]  ;;  %v703_v14 = vld [vmem:[%s3225_s13 + $0x138] sm:$0xff] }
  0xe2   : > { %1994 = vmatpush1.bf16.msra.mxu0 %v2537_v21  ;;  %v813_v21 = vld [vmem:[%s3225_s13 + $0x4a8] sm:$0xff] }
  0xe3   : > { %1995 = vmatprep.subr.bf16.mxu0 %v2522_v23  ;;  %2037 = vmatpush1.bf16.msra.mxu1 %v2523_v30  ;;  %v2601_v23 = vcombine.low %v828_v11, %v836_v12  ;;  %v2588_v26 = vcombine.high %v813_v21, %v821_v22  ;;  %v805_v30 = vld [vmem:[%s3225_s13 + $0x468] sm:$0xff]  ;;  %v702_v12 = vld [vmem:[%s3225_s13 + $0x130] sm:$0xff] }
  0xe4   : > { %2038 = vmatprep.subr.bf16.mxu1 %v2508_v32  ;;  %v2587_v32 = vcombine.low %v813_v21, %v821_v22  ;;  %v694_v21 = vld [vmem:[%s3225_s13 + $0xf0] sm:$0xff]  ;;  %v687_v22 = vld [vmem:[%s3225_s13 + $0xb8] sm:$0xff] }
  0xe6   : > { %1996 = vmatpush1.bf16.msra.mxu0 %v2521_v29  ;;  %v797_v29 = vld [vmem:[%s3225_s13 + $0x428] sm:$0xff] }
  0xe7   : > { %1997 = vmatprep.subr.bf16.mxu0 %v2506_v31  ;;  %2039 = vmatpush1.bf16.msra.mxu1 %v2507_v38  ;;  %v2585_v31 = vcombine.low %v812_v19, %v820_v20  ;;  %v2572_v34 = vcombine.high %v797_v29, %v805_v30  ;;  %v791_v38 = vld [vmem:[%s3225_s13 + $0x3f8] sm:$0xff]  ;;  %v686_v20 = vld [vmem:[%s3225_s13 + $0xb0] sm:$0xff] }
  0xe8   : > { %2040 = vmatprep.subr.bf16.mxu1 %v2492_v41  ;;  %v2571_v41 = vcombine.low %v797_v29, %v805_v30  ;;  %v678_v29 = vld [vmem:[%s3225_s13 + $0x70] sm:$0xff]  ;;  %v671_v30 = vld [vmem:[%s3225_s13 + $0x38] sm:$0xff] }
  0xea   : > { %1998 = vmatpush1.bf16.msra.mxu0 %v2505_v37  ;;  %v783_v37 = vld [vmem:[%s3225_s13 + $0x3b8] sm:$0xff] }
  0xeb   : > { %1999 = vmatprep.subr.bf16.mxu0 %v2490_v40  ;;  %2041 = vmatpush1.bf16.msra.mxu1 %v2491_v47  ;;  %v2569_v40 = vcombine.low %v796_v27, %v804_v28  ;;  %v2560_v43 = vcombine.high %v783_v37, %v791_v38  ;;  %v775_v47 = vld [vmem:[%s3225_s13 + $0x378] sm:$0xff]  ;;  %v670_v28 = vld [vmem:[%s3225_s13 + $0x30] sm:$0xff] }
  0xec   : > { %2042 = vmatprep.subr.bf16.mxu1 %v2476_v48  ;;  %v2559_v48 = vcombine.low %v783_v37, %v791_v38  ;;  %v847_v37 = vld [vmem:[%s3225_s13 + $0x5b8] sm:$0x33]  ;;  %v2445_v38 = vcombine.low %v670_v28, %v678_v29 }
  0xee   : > { %2000 = vmatpush1.bf16.msra.mxu0 %v2489_v46  ;;  %v767_v46 = vld [vmem:[%s3225_s13 + $0x338] sm:$0xff] }
  0xef   : > { %2001 = vmatprep.subr.bf16.mxu0 %v2474_v56  ;;  %2043 = vmatpush1.bf16.msra.mxu1 %v2475_v54  ;;  %v2557_v56 = vcombine.low %v782_v35, %v790_v36  ;;  %v2544_v50 = vcombine.high %v767_v46, %v775_v47  ;;  %v759_v54 = vld [vmem:[%s3225_s13 + $0x2f8] sm:$0xff]  ;;  %v846_v36 = vld [vmem:[%s3225_s13 + $0x5b0] sm:$0x33] }
  0xf0   : > { %2044 = vmatprep.subr.bf16.mxu1 %v2460_v57  ;;  %v2543_v57 = vcombine.low %v767_v46, %v775_v47  ;;  %v838_v46 = vld [vmem:[%s3225_s13 + $0x570] sm:$0xff]  ;;  %v831_v47 = vld [vmem:[%s3225_s13 + $0x538] sm:$0xff] }
  0xf2   : > { %2002 = vmatpush1.bf16.msra.mxu0 %v2473_v53  ;;  %v751_v53 = vld [vmem:[%s3225_s13 + $0x2b8] sm:$0xff] }
  0xf3   : > { %2003 = vmatprep.subr.bf16.mxu0 %v2458_v55  ;;  %2045 = vmatpush1.bf16.msra.mxu1 %v2459_v0  ;;  %v2541_v55 = vcombine.low %v766_v44, %v774_v45  ;;  %v2528_v60 = vcombine.high %v751_v53, %v759_v54  ;;  %v743_v0 = vld [vmem:[%s3225_s13 + $0x278] sm:$0xff]  ;;  %v2623_v44 = vcombine.low %v847_v37, %v847_v37  ;;  %v830_v45 = vld [vmem:[%s3225_s13 + $0x530] sm:$0xff] }
  0xf4   : > { %2046 = vmatprep.subr.bf16.mxu1 %v2444_v2  ;;  %v2527_v2 = vcombine.low %v751_v53, %v759_v54  ;;  %v822_v53 = vld [vmem:[%s3225_s13 + $0x4f0] sm:$0xff]  ;;  %v815_v54 = vld [vmem:[%s3225_s13 + $0x4b8] sm:$0xff] }
  0xf6   : > { %2004 = vmatpush1.bf16.msra.mxu0 %v2457_v63  ;;  %v735_v63 = vld [vmem:[%s3225_s13 + $0x238] sm:$0xff] }
  0xf7   : > { %2005 = vmatprep.subr.bf16.mxu0 %v2442_v1  ;;  %2047 = vmatpush1.bf16.msra.mxu1 %v2443_v6  ;;  %v2525_v1 = vcombine.low %v750_v51, %v758_v52  ;;  %v2512_v4 = vcombine.high %v735_v63, %v743_v0  ;;  %v726_v6 = vld [vmem:[%s3225_s13 + $0x1f0] sm:$0xff] }
  0xf8   : > { %2635 = vmatprep.subr.msk.bf16.mxu1 %vm1778_vm1, %v2620_v9  ;;  %v2509_v9 = vcombine.low %v734_v61, %v742_v62  ;;  %v814_v52 = vld [vmem:[%s3225_s13 + $0x4b0] sm:$0xff] }
  0xf9   : > { %v798_v62 = vld [vmem:[%s3225_s13 + $0x430] sm:$0xff] }
  0xfa   : > { %2006 = vmatpush1.bf16.msra.mxu0 %v2441_v5  ;;  %v718_v5 = vld [vmem:[%s3225_s13 + $0x1b0] sm:$0xff] }
  0xfb   : > { %2633 = vmatprep.subr.msk.bf16.mxu0 %vm1778_vm1, %v2618_v7  ;;  %2057 = vmatpush2.bf16.msra.mxu1 %v1810_v17  ;;  %v719_v7 = vld [vmem:[%s3225_s13 + $0x1b8] sm:$0xff]  ;;  %v2494_v10 = vcombine.high %v718_v5, %v726_v6 }
  0xfc   : > { %2058 = vmatprep.subr.bf16.mxu1 %v2604_v18  ;;  %v2496_v11 = vcombine.high %v719_v7, %v727_v8  ;;  %v2495_v17 = vcombine.low %v719_v7, %v727_v8  ;;  %v2478_v18 = vcombine.high %v702_v12, %v710_v13  ;;  %v3451_v8 = vpop.permute.xlu0 %2158 }
  0xfe   : > { %2016 = vmatpush2.bf16.msra.mxu0 %v1804_v15  ;;  %v711_v15 = vld [vmem:[%s3225_s13 + $0x178] sm:$0xff] }
  0xff   : > { %2017 = vmatprep.subr.bf16.mxu0 %v2602_v16  ;;  %2059 = vmatpush2.bf16.msra.mxu1 %v2603_v24  ;;  %v2493_v16 = vcombine.low %v718_v5, %v726_v6  ;;  %v2480_v19 = vcombine.high %v703_v14, %v711_v15  ;;  %v2477_v24 = vcombine.low %v702_v12, %v710_v13 }
 0x100   : > { %2060 = vmatprep.subr.bf16.mxu1 %v2588_v26  ;;  %v2462_v26 = vcombine.high %v686_v20, %v694_v21 }
 0x102   : > { %2018 = vmatpush2.bf16.msra.mxu0 %v2601_v23  ;;  %v695_v23 = vld [vmem:[%s3225_s13 + $0xf8] sm:$0xff] }
 0x103   : > { %2019 = vmatprep.subr.bf16.mxu0 %v2586_v25  ;;  %2061 = vmatpush2.bf16.msra.mxu1 %v2587_v32  ;;  %v2479_v25 = vcombine.low %v703_v14, %v711_v15  ;;  %v2464_v27 = vcombine.high %v687_v22, %v695_v23  ;;  %v2461_v32 = vcombine.low %v686_v20, %v694_v21 }
 0x104   : > { %2062 = vmatprep.subr.bf16.mxu1 %v2572_v34  ;;  %v2446_v34 = vcombine.high %v670_v28, %v678_v29 }
 0x106   : > { %2020 = vmatpush2.bf16.msra.mxu0 %v2585_v31  ;;  %v679_v31 = vld [vmem:[%s3225_s13 + $0x78] sm:$0xff] }
 0x107   : > { %2021 = vmatprep.subr.bf16.mxu0 %v2570_v33  ;;  %2063 = vmatpush2.bf16.msra.mxu1 %v2571_v41  ;;  %v2463_v33 = vcombine.low %v687_v22, %v695_v23  ;;  %v2448_v35 = vcombine.high %v671_v30, %v679_v31  ;;  %v2622_v41 = vcombine.high %v846_v36, %v846_v36 }
 0x108   : > { %2114 = vmatprep.subr.bf16.mxu1 %v2560_v43  ;;  %v2624_v43 = vcombine.high %v847_v37, %v847_v37 }
 0x10a   : > { %2022 = vmatpush2.bf16.msra.mxu0 %v2569_v40  ;;  %2065 = vmatmul.mubr.bf16.vlgmr.msra.gmra.mxu1 %v3285_v39  ;;  %v2447_v40 = vcombine.low %v671_v30, %v679_v31 }
 0x10b   : > { %2073 = vmatprep.subr.bf16.mxu0 %v2558_v42  ;;  %2115 = vmatpush1.bf16.msra.mxu1 %v2559_v48  ;;  %v2621_v42 = vcombine.low %v846_v36, %v846_v36 }
 0x10c   : > { %2116 = vmatprep.subr.bf16.mxu1 %v2544_v50  ;;  %2640 = vmatprep.mubr.msk.bf16.mxu1 %vm1774_vm0, %v3216_v58  ;;  %v1822_v50 = vsel %vm1778_vm1, %v2623_v44, 0 }
 0x10d   : > { %2024 = vmatmul.mubr.bf16.vlgmr.msra.gmra.mxu0 %v3285_v39  ;;  %v1816_v48 = vsel %vm1778_vm1, %v2621_v42, 0 }
 0x10e   : > { %2074 = vmatpush1.bf16.msra.mxu0 %v2557_v56  ;;  %2638 = vmatprep.mubr.msk.bf16.mxu0 %vm1774_vm0, %v3216_v58  ;;  %v2511_v58 = vcombine.low %v735_v63, %v743_v0  ;;  %v839_v56 = vld [vmem:[%s3225_s13 + $0x578] sm:$0xff]  ;;  %v806_v63 = vld [vmem:[%s3225_s13 + $0x470] sm:$0xff] }
 0x10f   : > { %2075 = vmatprep.subr.bf16.mxu0 %v2542_v49  ;;  %2117 = vmatpush1.bf16.msra.mxu1 %v2543_v57  ;;  %v2606_v49 = vcombine.high %v830_v45, %v838_v46  ;;  %v2608_v51 = vcombine.high %v831_v47, %v839_v56  ;;  %v2605_v57 = vcombine.low %v830_v45, %v838_v46  ;;  %v799_v0 = vld [vmem:[%s3225_s13 + $0x438] sm:$0xff] }
 0x110   : > { %2118 = vmatprep.subr.bf16.mxu1 %v2528_v60  ;;  %v2590_v60 = vcombine.high %v814_v52, %v822_v53  ;;  %v2573_v6 = vcombine.low %v798_v62, %v806_v63 }
 0x112   : > { %2076 = vmatpush1.bf16.msra.mxu0 %v2541_v55  ;;  %v823_v55 = vld [vmem:[%s3225_s13 + $0x4f8] sm:$0xff] }
 0x113   : > { %2077 = vmatprep.subr.bf16.mxu0 %v2526_v59  ;;  %2119 = vmatpush1.bf16.msra.mxu1 %v2527_v2  ;;  %v2607_v59 = vcombine.low %v831_v47, %v839_v56  ;;  %v2592_v61 = vcombine.high %v815_v54, %v823_v55  ;;  %v2589_v2 = vcombine.low %v814_v52, %v822_v53 }
 0x114   : > { %2120 = vmatprep.subr.bf16.mxu1 %v2512_v4  ;;  %v2574_v4 = vcombine.high %v798_v62, %v806_v63 }
 0x116   : > { %2078 = vmatpush1.bf16.msra.mxu0 %v2525_v1  ;;  %v807_v1 = vld [vmem:[%s3225_s13 + $0x478] sm:$0xff] }
 0x117   : > { %2079 = vmatprep.subr.bf16.mxu0 %v2510_v3  ;;  %2121 = vmatpush1.bf16.msra.mxu1 %v2511_v58  ;;  %v2591_v3 = vcombine.low %v815_v54, %v823_v55  ;;  %v2576_v5 = vcombine.high %v799_v0, %v807_v1  ;;  %v2575_v7 = vcombine.low %v799_v0, %v807_v1  ;;  %v3454_v58 = vpop.permute.xlu0 %2180 }
 0x118   : > { %2122 = vmatprep.subr.bf16.mxu1 %v2496_v11 }
 0x11a   : > { %2080 = vmatpush1.bf16.msra.mxu0 %v2509_v9 }
 0x11b   : > { %2081 = vmatprep.subr.bf16.mxu0 %v2494_v10  ;;  %2123 = vmatpush1.bf16.msra.mxu1 %v2495_v17 }
 0x11c   : > { %2124 = vmatprep.subr.bf16.mxu1 %v2480_v19 }
 0x11e   : > { %2082 = vmatpush1.bf16.msra.mxu0 %v2493_v16 }
 0x11f   : > { %2083 = vmatprep.subr.bf16.mxu0 %v2478_v18  ;;  %2125 = vmatpush1.bf16.msra.mxu1 %v2479_v25 }
 0x120   : > { %2126 = vmatprep.subr.bf16.mxu1 %v2464_v27 }
 0x122   : > { %2084 = vmatpush1.bf16.msra.mxu0 %v2477_v24 }
 0x123   : > { %2085 = vmatprep.subr.bf16.mxu0 %v2462_v26  ;;  %2127 = vmatpush1.bf16.msra.mxu1 %v2463_v33 }
 0x124   : > { %2128 = vmatprep.subr.bf16.mxu1 %v2448_v35 }
 0x126   : > { %2086 = vmatpush1.bf16.msra.mxu0 %v2461_v32 }
 0x127   : > { %2087 = vmatprep.subr.bf16.mxu0 %v2446_v34  ;;  %2129 = vmatpush1.bf16.msra.mxu1 %v2447_v40 }
 0x128   : > { %2639 = vmatprep.subr.msk.bf16.mxu1 %vm1778_vm1, %v2624_v43 }
 0x12a   : > { %2088 = vmatpush1.bf16.msra.mxu0 %v2445_v38 }
 0x12b   : > { %2637 = vmatprep.subr.msk.bf16.mxu0 %vm1778_vm1, %v2622_v41  ;;  %2139 = vmatpush2.bf16.msra.mxu1 %v1822_v50 }
 0x12c   : > { %2140 = vmatprep.subr.bf16.mxu1 %v2608_v51 }
 0x12e   : > { %2098 = vmatpush2.bf16.msra.mxu0 %v1816_v48 }
 0x12f   : > { %2099 = vmatprep.subr.bf16.mxu0 %v2606_v49  ;;  %2141 = vmatpush2.bf16.msra.mxu1 %v2607_v59 }
 0x130   : > { %2142 = vmatprep.subr.bf16.mxu1 %v2592_v61 }
 0x132   : > { %2100 = vmatpush2.bf16.msra.mxu0 %v2605_v57 }
 0x133   : > { %2101 = vmatprep.subr.bf16.mxu0 %v2590_v60  ;;  %2143 = vmatpush2.bf16.msra.mxu1 %v2591_v3 }
 0x134   : > { %2144 = vmatprep.subr.bf16.mxu1 %v2576_v5 }
 0x136   : > { %2102 = vmatpush2.bf16.msra.mxu0 %v2589_v2 }
 0x137   : > { %2103 = vmatprep.subr.bf16.mxu0 %v2574_v4  ;;  %2145 = vmatpush2.bf16.msra.mxu1 %v2575_v7 }
 0x13a   : > { %2104 = vmatpush2.bf16.msra.mxu0 %v2573_v6  ;;  %2147 = vmatmul.mubr.bf16.vlgmr.msra.gmra.mxu1 %v3285_v39 }
 0x13d   : > { %2106 = vmatmul.mubr.bf16.vlgmr.msra.gmra.mxu0 %v3285_v39 }
 0x16a   : > { %v1902_v11 = vpop.f32.mrf.mxu1 }
 0x16b   : > { %v2163_v12 = vmul.f32 %v3451_v8, %v1902_v11 }
 0x16c   : > { %v1904_v15 = vpop.f32.mrf.mxu1 }
 0x16d   : > { %v1861_v9 = vpop.f32.mrf.mxu0  ;;  %v2164_v39 = vmul.f32 %v3451_v8, %v1904_v15  ;;  %v2185_v18 = vadd.f32 %v3454_v58, %v2163_v12 }
 0x16e   : > { %v2161_v10 = vmul.f32 %v3451_v8, %v1861_v9  ;;  %v1906_v19 = vpop.f32.mrf.mxu1 }
 0x16f   : > { %v1863_v13 = vpop.f32.mrf.mxu0  ;;  %v2186_v23 = vadd.f32 %v3454_v58, %v2164_v39  ;;  %v2201_v24 = vmax.f32 %v2185_v18, 0.0 }
 0x170   : > { %v2162_v14 = vmul.f32 %v3451_v8, %v1863_v13  ;;  %v2183_v16 = vadd.f32 %v3454_v58, %v2161_v10  ;;  %v1907_v25 = vpop.f32.mrf.mxu1 }
 0x171   : > { %v1865_v17 = vpop.f32.mrf.mxu0  ;;  %v2202_v27 = vmax.f32 %v2186_v23, 0.0 }
 0x172   : > { %v2184_v20 = vadd.f32 %v3454_v58, %v2162_v14  ;;  %v2199_v21 = vmax.f32 %v2183_v16, 0.0 }
 0x173   : > { %v1866_v22 = vpop.f32.mrf.mxu0  ;;  %v2653_v29 = vpack.c.bf16 %v2202_v27, %v2201_v24 }
 0x174   : > { %v2200_v26 = vmax.f32 %v2184_v20, 0.0 }
 0x175   : > { %2280 = vst [vmem:[%s3467_s22 + $0x8] sm:$0xff] %v2653_v29 }
 0x176   : > { %v2652_v28 = vpack.c.bf16 %v2200_v26, %v2199_v21 }
 0x178   : > { %2279 = vst [vmem:[%s3467_s22] sm:$0xff] %v2652_v28 }
 0x19a   : > { %v1984_v32 = vpop.f32.mrf.mxu1 }
 0x19b   : > { %v2167_v33 = vmul.f32 %v3451_v8, %v1984_v32 }
 0x19c   : > { %v1986_v37 = vpop.f32.mrf.mxu1 }
 0x19d   : > { %v1943_v30 = vpop.f32.mrf.mxu0  ;;  %v2189_v38 = vadd.f32 %v3454_v58, %v2167_v33  ;;  %v2168_v40 = vmul.f32 %v3451_v8, %v1986_v37 }
 0x19e   : > { %v2165_v31 = vmul.f32 %v3451_v8, %v1943_v30  ;;  %v1988_v44 = vpop.f32.mrf.mxu1 }
 0x19f   : > { %v1945_v34 = vpop.f32.mrf.mxu0  ;;  %v2205_v45 = vmax.f32 %v2189_v38, 0.0  ;;  %v2190_v46 = vadd.f32 %v3454_v58, %v2168_v40 }
 0x1a0   : > { %v2187_v35 = vadd.f32 %v3454_v58, %v2165_v31  ;;  %v2166_v36 = vmul.f32 %v3451_v8, %v1945_v34  ;;  %v1989_v48 = vpop.f32.mrf.mxu1 }
 0x1a1   : > { %v1947_v41 = vpop.f32.mrf.mxu0  ;;  %v2206_v49 = vmax.f32 %v2190_v46, 0.0 }
 0x1a2   : > { %v2203_v42 = vmax.f32 %v2187_v35, 0.0  ;;  %v2188_v43 = vadd.f32 %v3454_v58, %v2166_v36 }
 0x1a3   : > { %v1948_v47 = vpop.f32.mrf.mxu0  ;;  %v2655_v51 = vpack.c.bf16 %v2206_v49, %v2205_v45 }
 0x1a4   : > { %v2204_v56 = vmax.f32 %v2188_v43, 0.0 }
 0x1a5   : > { %2282 = vst [vmem:[%s3467_s22 + $0x18] sm:$0xff] %v2655_v51 }
 0x1a6   : > { %v2654_v50 = vpack.c.bf16 %v2204_v56, %v2203_v42 }
 0x1a8   : > { %2281 = vst [vmem:[%s3467_s22 + $0x10] sm:$0xff] %v2654_v50 }
 0x1ca   : > { %v2066_v54 = vpop.f32.mrf.mxu1 }
 0x1cb   : > { %v2171_v55 = vmul.f32 %v3451_v8, %v2066_v54 }
 0x1cc   : > { %v2068_v61 = vpop.f32.mrf.mxu1 }
 0x1cd   : > { %v2025_v52 = vpop.f32.mrf.mxu0  ;;  %v2193_v62 = vadd.f32 %v3454_v58, %v2171_v55  ;;  %v2172_v63 = vmul.f32 %v3451_v8, %v2068_v61 }
 0x1ce   : > { %v2169_v53 = vmul.f32 %v3451_v8, %v2025_v52  ;;  %v2070_v3 = vpop.f32.mrf.mxu1 }
 0x1cf   : > { %v2027_v57 = vpop.f32.mrf.mxu0  ;;  %v2209_v4 = vmax.f32 %v2193_v62, 0.0  ;;  %v2194_v5 = vadd.f32 %v3454_v58, %v2172_v63 }
 0x1d0   : > { %v2191_v59 = vadd.f32 %v3454_v58, %v2169_v53  ;;  %v2170_v60 = vmul.f32 %v3451_v8, %v2027_v57  ;;  %v2071_v9 = vpop.f32.mrf.mxu1 }
 0x1d1   : > { %v2029_v0 = vpop.f32.mrf.mxu0  ;;  %v2210_v10 = vmax.f32 %v2194_v5, 0.0 }
 0x1d2   : > { %v2207_v1 = vmax.f32 %v2191_v59, 0.0  ;;  %v2192_v2 = vadd.f32 %v3454_v58, %v2170_v60 }
 0x1d3   : > { %v2030_v6 = vpop.f32.mrf.mxu0  ;;  %v2657_v12 = vpack.c.bf16 %v2210_v10, %v2209_v4 }
 0x1d4   : > { %v2208_v7 = vmax.f32 %v2192_v2, 0.0 }
 0x1d5   : > { %2284 = vst [vmem:[%s3467_s22 + $0x28] sm:$0xff] %v2657_v12 }
 0x1d6   : > { %v2656_v11 = vpack.c.bf16 %v2208_v7, %v2207_v1 }
 0x1d8   : > { %2283 = vst [vmem:[%s3467_s22 + $0x20] sm:$0xff] %v2656_v11 }
 0x1fa   : > { %v2148_v15 = vpop.f32.mrf.mxu1 }
 0x1fb   : > { %v2175_v16 = vmul.f32 %v3451_v8, %v2148_v15 }
 0x1fc   : > { %v2150_v19 = vpop.f32.mrf.mxu1 }
 0x1fd   : > { %v2107_v13 = vpop.f32.mrf.mxu0  ;;  %v2197_v20 = vadd.f32 %v3454_v58, %v2175_v16  ;;  %v2176_v21 = vmul.f32 %v3451_v8, %v2150_v19 }
 0x1fe   : > { %v2173_v14 = vmul.f32 %v3451_v8, %v2107_v13  ;;  %v2152_v24 = vpop.f32.mrf.mxu1 }
 0x1ff   : > { %v2109_v39 = vpop.f32.mrf.mxu0  ;;  %v2198_v25 = vadd.f32 %v3454_v58, %v2176_v21  ;;  %v2213_v30 = vmax.f32 %v2197_v20, 0.0 }
 0x200   : > { %v2195_v17 = vadd.f32 %v3454_v58, %v2173_v14  ;;  %v2174_v18 = vmul.f32 %v3451_v8, %v2109_v39  ;;  %v2153_v29 = vpop.f32.mrf.mxu1 }
 0x201   : > { %v2111_v22 = vpop.f32.mrf.mxu0  ;;  %v2214_v31 = vmax.f32 %v2198_v25, 0.0 }
 0x202   : > { %v2196_v23 = vadd.f32 %v3454_v58, %v2174_v18  ;;  %v2211_v27 = vmax.f32 %v2195_v17, 0.0 }
 0x203   : > { %v2112_v26 = vpop.f32.mrf.mxu0  ;;  %v2659_v33 = vpack.c.bf16 %v2214_v31, %v2213_v30 }
 0x204   : > { %v2212_v28 = vmax.f32 %v2196_v23, 0.0 }
 0x205   : > { %2286 = vst [vmem:[%s3467_s22 + $0x38] sm:$0xff] %v2659_v33 }
 0x206   : > { %v2658_v32 = vpack.c.bf16 %v2212_v28, %v2211_v27 }
 0x208   : > { %2285 = vst [vmem:[%s3467_s22 + $0x30] sm:$0xff] %v2658_v32 }
 0x209 PF: > { %s14_s19 = sadd.s32 1, %s2760_s19   ;;  %s3521_s15 = smov %s2748_s16 }
 0x20a   : > { %p11_p10 = scmp.ge.s32.totalorder %s14_s19, 6   ;;  %s3522_s16 = smov %s2823_s23 }
 0x20b   : > { %s3523_s17 = smov %s2756_s18  ;;  %s3524_s18 = smov %s3526_s20 }
 0x20c   :  { %13 = sbr.rel (!%p11_p10) target bundleno = 3 (0x3), region = 103 }

// kernel: _lambda_.15
= control target key start
LH: loop header
LB: loop body
LE: loop exit
PB: predicated region body
PF: predicated region fallthrough
CT: control target
= control target key end

     0   :  { %s1767_s15 = smov 0   ;;  %s1769_s16 = smov 0   ;;  %s2152_s0 = inlined_call_operand.vmem [shape: bf16[8,72], index: 0, kind: input, shape index: {}]   ;;  %s2153_s1 = inlined_call_operand.vmem [shape: bf16[72,8192], index: 1, kind: input, shape index: {}]   ;;  %s2154_s2 = inlined_call_operand.vmem [shape: f32[8,1], index: 2, kind: input, shape index: {}]   ;;  %s2155_s3 = inlined_call_operand.vmem [shape: f32[8,1], index: 3, kind: input, shape index: {}]   ;;  %s2156_s4 = inlined_call_operand.vmem [shape: bf16[8,8192], index: 4, kind: output, shape index: {}]  }
   0x1   :  { %s1771_s17 = smov 0   ;;  %s1773_s18 = smov 0  }
   0x2   :  { %s1775_s19 = smov 0  }
   0x3 LB: > { %s23_s20 = sadd.s32 1, %s1735_s18  ;;  %p66_p1 = scmp.ne.s32.totalorder %s1727_s16, %s1723_s15  ;;  %s1739_s19 = sphi %s1775_s19, %s14_s19   ;;  %s1735_s18 = sphi %s1773_s18, %s2160_s18   ;;  %s1731_s17 = sphi %s1771_s17, %s2159_s17   ;;  %s1727_s16 = sphi %s1769_s16, %s2158_s16   ;;  %s1723_s15 = sphi %s1767_s15, %s2157_s15  }
   0x4   : > { %p24_p0 = scmp.ge.s32.totalorder %s23_s20, 4  ;;  %p67_p2 = scmp.eq.s32.totalorder %s1739_s19, 0 }
   0x5   : > { %s59_s22 = sadd.s32 1, %s1727_s16  ;;  %p1520_p5 = scmp.ge.s32.totalorder %s1739_s19, 4 }
   0x6   : > { %s2162_s20 = smov (%p24_p0, %s23_s20), 0  ;;  %p68_p3 = por %p67_p2, %p66_p1 }
   0x7   : > { %s56_s21 = ssub.s32 %s1735_s18, %s2162_s20  ;;  %193 = sbr.rel (%p1520_p5) target bundleno = 53 (0x35), region = 28 }
   0x8   : > { %p57_p4 = scmp.eq.s32.totalorder %s56_s21, 0 }
   0xa   : > { %s1802_s23 = scalar_select %p57_p4, %s1727_s16, %s59_s22  }
   0xc   : > { %196 = sbr.rel (!%p68_p3) target bundleno = 53 (0x35), region = 32  ;;  %s198_s24 = sand.u32 (%p68_p3), 1, %s1727_s16  }
   0xd   : > { %s1632_s25 = sshll.u32 (%p68_p3), %s1735_s18, 6  ;;  %s1641_s26 = smul.u32 (%p68_p3), 576, %s198_s24 }
   0xe   : > { %s1810_s29 = scalar_lea.vmem (%p68_p3), %s2153_s1, %s1632_s25 }
   0xf   : > { %v216_v0 = vld [vmem:[%s1810_s29] sm:$0xff] (%p68_p3)  ;;  %v218_v1 = vld [vmem:[%s1810_s29 + $0x8] sm:$0xff] (%p68_p3)  ;;  %v220_v2 = vld [vmem:[%s1810_s29 + $0x10] sm:$0xff] (%p68_p3)  ;;  %s1818_s30 = scalar_lea.vmem (%p68_p3), [#allocation2], %s1641_s26 }
  0x10   : > { %v222_v3 = vld [vmem:[%s1810_s29 + $0x18] sm:$0xff] (%p68_p3)  ;;  %v224_v4 = vld [vmem:[%s1810_s29 + $0x20] sm:$0xff] (%p68_p3)  ;;  %v226_v5 = vld [vmem:[%s1810_s29 + $0x28] sm:$0xff] (%p68_p3)  ;;  %217 = vst [vmem:[%s1818_s30] sm:$0xff] (%p68_p3), %v216_v0 }
  0x11   : > { %219 = vst [vmem:[%s1818_s30 + $0x8] sm:$0xff] %v218_v1  ;;  %221 = vst [vmem:[%s1818_s30 + $0x10] sm:$0xff] %v220_v2  ;;  %v228_v6 = vld [vmem:[%s1810_s29 + $0x30] sm:$0xff]  ;;  %v230_v7 = vld [vmem:[%s1810_s29 + $0x38] sm:$0xff] }
  0x12   : > { %223 = vst [vmem:[%s1818_s30 + $0x18] sm:$0xff] %v222_v3  ;;  %225 = vst [vmem:[%s1818_s30 + $0x20] sm:$0xff] %v224_v4  ;;  %v232_v8 = vld [vmem:[%s1810_s29 + $0x100] sm:$0xff]  ;;  %v234_v9 = vld [vmem:[%s1810_s29 + $0x108] sm:$0xff] }
  0x13   : > { %227 = vst [vmem:[%s1818_s30 + $0x28] sm:$0xff] %v226_v5  ;;  %229 = vst [vmem:[%s1818_s30 + $0x30] sm:$0xff] %v228_v6  ;;  %v236_v10 = vld [vmem:[%s1810_s29 + $0x110] sm:$0xff]  ;;  %v238_v11 = vld [vmem:[%s1810_s29 + $0x118] sm:$0xff] }
  0x14   : > { %231 = vst [vmem:[%s1818_s30 + $0x38] sm:$0xff] %v230_v7  ;;  %233 = vst [vmem:[%s1818_s30 + $0x40] sm:$0xff] %v232_v8  ;;  %v240_v12 = vld [vmem:[%s1810_s29 + $0x120] sm:$0xff]  ;;  %v242_v13 = vld [vmem:[%s1810_s29 + $0x128] sm:$0xff] }
  0x15   : > { %235 = vst [vmem:[%s1818_s30 + $0x48] sm:$0xff] %v234_v9  ;;  %237 = vst [vmem:[%s1818_s30 + $0x50] sm:$0xff] %v236_v10  ;;  %v244_v14 = vld [vmem:[%s1810_s29 + $0x130] sm:$0xff]  ;;  %v246_v15 = vld [vmem:[%s1810_s29 + $0x138] sm:$0xff] }
  0x16   : > { %239 = vst [vmem:[%s1818_s30 + $0x58] sm:$0xff] %v238_v11  ;;  %241 = vst [vmem:[%s1818_s30 + $0x60] sm:$0xff] %v240_v12  ;;  %v248_v16 = vld [vmem:[%s1810_s29 + $0x200] sm:$0xff]  ;;  %v250_v17 = vld [vmem:[%s1810_s29 + $0x208] sm:$0xff] }
  0x17   : > { %243 = vst [vmem:[%s1818_s30 + $0x68] sm:$0xff] %v242_v13  ;;  %245 = vst [vmem:[%s1818_s30 + $0x70] sm:$0xff] %v244_v14  ;;  %v252_v18 = vld [vmem:[%s1810_s29 + $0x210] sm:$0xff]  ;;  %v254_v19 = vld [vmem:[%s1810_s29 + $0x218] sm:$0xff] }
  0x18   : > { %247 = vst [vmem:[%s1818_s30 + $0x78] sm:$0xff] %v246_v15  ;;  %249 = vst [vmem:[%s1818_s30 + $0x80] sm:$0xff] %v248_v16  ;;  %v256_v20 = vld [vmem:[%s1810_s29 + $0x220] sm:$0xff]  ;;  %v258_v21 = vld [vmem:[%s1810_s29 + $0x228] sm:$0xff] }
  0x19   : > { %251 = vst [vmem:[%s1818_s30 + $0x88] sm:$0xff] %v250_v17  ;;  %253 = vst [vmem:[%s1818_s30 + $0x90] sm:$0xff] %v252_v18  ;;  %v260_v22 = vld [vmem:[%s1810_s29 + $0x230] sm:$0xff]  ;;  %v262_v23 = vld [vmem:[%s1810_s29 + $0x238] sm:$0xff] }
  0x1a   : > { %255 = vst [vmem:[%s1818_s30 + $0x98] sm:$0xff] %v254_v19  ;;  %257 = vst [vmem:[%s1818_s30 + $0xa0] sm:$0xff] %v256_v20  ;;  %v264_v24 = vld [vmem:[%s1810_s29 + $0x300] sm:$0xff]  ;;  %v266_v25 = vld [vmem:[%s1810_s29 + $0x308] sm:$0xff] }
  0x1b   : > { %259 = vst [vmem:[%s1818_s30 + $0xa8] sm:$0xff] %v258_v21  ;;  %261 = vst [vmem:[%s1818_s30 + $0xb0] sm:$0xff] %v260_v22  ;;  %v268_v26 = vld [vmem:[%s1810_s29 + $0x310] sm:$0xff]  ;;  %v270_v27 = vld [vmem:[%s1810_s29 + $0x318] sm:$0xff] }
  0x1c   : > { %263 = vst [vmem:[%s1818_s30 + $0xb8] sm:$0xff] %v262_v23  ;;  %265 = vst [vmem:[%s1818_s30 + $0xc0] sm:$0xff] %v264_v24  ;;  %v272_v28 = vld [vmem:[%s1810_s29 + $0x320] sm:$0xff]  ;;  %v274_v29 = vld [vmem:[%s1810_s29 + $0x328] sm:$0xff] }
  0x1d   : > { %267 = vst [vmem:[%s1818_s30 + $0xc8] sm:$0xff] %v266_v25  ;;  %269 = vst [vmem:[%s1818_s30 + $0xd0] sm:$0xff] %v268_v26  ;;  %v276_v30 = vld [vmem:[%s1810_s29 + $0x330] sm:$0xff]  ;;  %v278_v31 = vld [vmem:[%s1810_s29 + $0x338] sm:$0xff] }
  0x1e   : > { %271 = vst [vmem:[%s1818_s30 + $0xd8] sm:$0xff] %v270_v27  ;;  %273 = vst [vmem:[%s1818_s30 + $0xe0] sm:$0xff] %v272_v28  ;;  %v280_v32 = vld [vmem:[%s1810_s29 + $0x400] sm:$0xff]  ;;  %v282_v33 = vld [vmem:[%s1810_s29 + $0x408] sm:$0xff] }
  0x1f   : > { %275 = vst [vmem:[%s1818_s30 + $0xe8] sm:$0xff] %v274_v29  ;;  %277 = vst [vmem:[%s1818_s30 + $0xf0] sm:$0xff] %v276_v30  ;;  %v284_v34 = vld [vmem:[%s1810_s29 + $0x410] sm:$0xff]  ;;  %v286_v35 = vld [vmem:[%s1810_s29 + $0x418] sm:$0xff] }
  0x20   : > { %279 = vst [vmem:[%s1818_s30 + $0xf8] sm:$0xff] %v278_v31  ;;  %281 = vst [vmem:[%s1818_s30 + $0x100] sm:$0xff] %v280_v32  ;;  %v288_v36 = vld [vmem:[%s1810_s29 + $0x420] sm:$0xff]  ;;  %v290_v37 = vld [vmem:[%s1810_s29 + $0x428] sm:$0xff] }
  0x21   : > { %283 = vst [vmem:[%s1818_s30 + $0x108] sm:$0xff] %v282_v33  ;;  %285 = vst [vmem:[%s1818_s30 + $0x110] sm:$0xff] %v284_v34  ;;  %v292_v38 = vld [vmem:[%s1810_s29 + $0x430] sm:$0xff]  ;;  %v294_v39 = vld [vmem:[%s1810_s29 + $0x438] sm:$0xff] }
  0x22   : > { %287 = vst [vmem:[%s1818_s30 + $0x118] sm:$0xff] %v286_v35  ;;  %289 = vst [vmem:[%s1818_s30 + $0x120] sm:$0xff] %v288_v36  ;;  %v296_v40 = vld [vmem:[%s1810_s29 + $0x500] sm:$0xff]  ;;  %v298_v41 = vld [vmem:[%s1810_s29 + $0x508] sm:$0xff] }
  0x23   : > { %291 = vst [vmem:[%s1818_s30 + $0x128] sm:$0xff] %v290_v37  ;;  %293 = vst [vmem:[%s1818_s30 + $0x130] sm:$0xff] %v292_v38  ;;  %v300_v42 = vld [vmem:[%s1810_s29 + $0x510] sm:$0xff]  ;;  %v302_v43 = vld [vmem:[%s1810_s29 + $0x518] sm:$0xff] }
  0x24   : > { %295 = vst [vmem:[%s1818_s30 + $0x138] sm:$0xff] %v294_v39  ;;  %297 = vst [vmem:[%s1818_s30 + $0x140] sm:$0xff] %v296_v40  ;;  %v304_v44 = vld [vmem:[%s1810_s29 + $0x520] sm:$0xff]  ;;  %v306_v45 = vld [vmem:[%s1810_s29 + $0x528] sm:$0xff] }
  0x25   : > { %299 = vst [vmem:[%s1818_s30 + $0x148] sm:$0xff] %v298_v41  ;;  %301 = vst [vmem:[%s1818_s30 + $0x150] sm:$0xff] %v300_v42  ;;  %v308_v46 = vld [vmem:[%s1810_s29 + $0x530] sm:$0xff]  ;;  %v310_v47 = vld [vmem:[%s1810_s29 + $0x538] sm:$0xff] }
  0x26   : > { %303 = vst [vmem:[%s1818_s30 + $0x158] sm:$0xff] %v302_v43  ;;  %305 = vst [vmem:[%s1818_s30 + $0x160] sm:$0xff] %v304_v44  ;;  %v312_v48 = vld [vmem:[%s1810_s29 + $0x600] sm:$0xff]  ;;  %v314_v49 = vld [vmem:[%s1810_s29 + $0x608] sm:$0xff] }
  0x27   : > { %307 = vst [vmem:[%s1818_s30 + $0x168] sm:$0xff] %v306_v45  ;;  %309 = vst [vmem:[%s1818_s30 + $0x170] sm:$0xff] %v308_v46  ;;  %v316_v50 = vld [vmem:[%s1810_s29 + $0x610] sm:$0xff]  ;;  %v318_v51 = vld [vmem:[%s1810_s29 + $0x618] sm:$0xff] }
  0x28   : > { %311 = vst [vmem:[%s1818_s30 + $0x178] sm:$0xff] %v310_v47  ;;  %313 = vst [vmem:[%s1818_s30 + $0x180] sm:$0xff] %v312_v48  ;;  %v320_v52 = vld [vmem:[%s1810_s29 + $0x620] sm:$0xff]  ;;  %v322_v53 = vld [vmem:[%s1810_s29 + $0x628] sm:$0xff] }
  0x29   : > { %315 = vst [vmem:[%s1818_s30 + $0x188] sm:$0xff] %v314_v49  ;;  %317 = vst [vmem:[%s1818_s30 + $0x190] sm:$0xff] %v316_v50  ;;  %v324_v54 = vld [vmem:[%s1810_s29 + $0x630] sm:$0xff]  ;;  %v326_v55 = vld [vmem:[%s1810_s29 + $0x638] sm:$0xff] }
  0x2a   : > { %319 = vst [vmem:[%s1818_s30 + $0x198] sm:$0xff] %v318_v51  ;;  %321 = vst [vmem:[%s1818_s30 + $0x1a0] sm:$0xff] %v320_v52  ;;  %v328_v56 = vld [vmem:[%s1810_s29 + $0x700] sm:$0xff]  ;;  %v330_v57 = vld [vmem:[%s1810_s29 + $0x708] sm:$0xff] }
  0x2b   : > { %323 = vst [vmem:[%s1818_s30 + $0x1a8] sm:$0xff] %v322_v53  ;;  %325 = vst [vmem:[%s1818_s30 + $0x1b0] sm:$0xff] %v324_v54  ;;  %v332_v58 = vld [vmem:[%s1810_s29 + $0x710] sm:$0xff]  ;;  %v334_v59 = vld [vmem:[%s1810_s29 + $0x718] sm:$0xff] }
  0x2c   : > { %327 = vst [vmem:[%s1818_s30 + $0x1b8] sm:$0xff] %v326_v55  ;;  %329 = vst [vmem:[%s1818_s30 + $0x1c0] sm:$0xff] %v328_v56  ;;  %v336_v60 = vld [vmem:[%s1810_s29 + $0x720] sm:$0xff]  ;;  %v338_v61 = vld [vmem:[%s1810_s29 + $0x728] sm:$0xff] }
  0x2d   : > { %331 = vst [vmem:[%s1818_s30 + $0x1c8] sm:$0xff] %v330_v57  ;;  %333 = vst [vmem:[%s1818_s30 + $0x1d0] sm:$0xff] %v332_v58  ;;  %v340_v62 = vld [vmem:[%s1810_s29 + $0x730] sm:$0xff]  ;;  %v342_v63 = vld [vmem:[%s1810_s29 + $0x738] sm:$0xff] }
  0x2e   : > { %335 = vst [vmem:[%s1818_s30 + $0x1d8] sm:$0xff] %v334_v59  ;;  %337 = vst [vmem:[%s1818_s30 + $0x1e0] sm:$0xff] %v336_v60  ;;  %v344_v0 = vld [vmem:[%s1810_s29 + $0x800] sm:$0xff]  ;;  %v346_v1 = vld [vmem:[%s1810_s29 + $0x808] sm:$0xff] }
  0x2f   : > { %339 = vst [vmem:[%s1818_s30 + $0x1e8] sm:$0xff] %v338_v61  ;;  %341 = vst [vmem:[%s1818_s30 + $0x1f0] sm:$0xff] %v340_v62  ;;  %v348_v2 = vld [vmem:[%s1810_s29 + $0x810] sm:$0xff]  ;;  %v350_v3 = vld [vmem:[%s1810_s29 + $0x818] sm:$0xff] }
  0x30   : > { %343 = vst [vmem:[%s1818_s30 + $0x1f8] sm:$0xff] %v342_v63  ;;  %345 = vst [vmem:[%s1818_s30 + $0x200] sm:$0xff] %v344_v0  ;;  %v352_v4 = vld [vmem:[%s1810_s29 + $0x820] sm:$0xff]  ;;  %v354_v5 = vld [vmem:[%s1810_s29 + $0x828] sm:$0xff] }
  0x31   : > { %347 = vst [vmem:[%s1818_s30 + $0x208] sm:$0xff] %v346_v1  ;;  %349 = vst [vmem:[%s1818_s30 + $0x210] sm:$0xff] %v348_v2  ;;  %v356_v6 = vld [vmem:[%s1810_s29 + $0x830] sm:$0xff]  ;;  %v358_v7 = vld [vmem:[%s1810_s29 + $0x838] sm:$0xff] }
  0x32   : > { %351 = vst [vmem:[%s1818_s30 + $0x218] sm:$0xff] %v350_v3  ;;  %353 = vst [vmem:[%s1818_s30 + $0x220] sm:$0xff] %v352_v4 }
  0x33   : > { %355 = vst [vmem:[%s1818_s30 + $0x228] sm:$0xff] %v354_v5  ;;  %357 = vst [vmem:[%s1818_s30 + $0x230] sm:$0xff] %v356_v6 }
  0x34   : > { %359 = vst [vmem:[%s1818_s30 + $0x238] sm:$0xff] %v358_v7 }
  0x35 PF: > { %p1523_p6 = scmp.ge.s32.totalorder %s1739_s19, 1  ;;  %p364_p7 = scmp.lt.s32.totalorder %s1739_s19, 5 }
  0x37   : > { %p365_p8 = pnand %p1523_p6, %p364_p7 }
  0x38   : > { %s371_s5 = sand.u32 (!%p365_p8), 1, %s1723_s15   ;;  %s1524_s14 = sshll.u32 (!%p365_p8), %s1731_s17, 4 }
  0x39   : > { %368 = sbr.rel (%p365_p8) target bundleno = 350 (0x15e), region = 55  ;;  %p428_p9 = scmp.lt.s32.totalorder (!%p365_p8), %s1524_s14, 63 }
  0x3a   : > { %s1642_s6 = smul.u32 (!%p365_p8), 576, %s371_s5 }
  0x3c   : > { %s1967_s9 = scalar_lea.vmem (!%p365_p8), [#allocation2], %s1642_s6 }
  0x3e   : > { %v1741_v8 = vmov 0   ;;  %v1250_v9 = vld [vmem:[%s2154_s2] sm:$0xff]  ;;  %vm873_vm0 = vcmask 1043456   ;;  %v502_v11 = vld [vmem:[%s1967_s9 + $0x208] sm:$0xff]  ;;  %v503_v49 = vld [vmem:[%s1967_s9 + $0x210] sm:$0xff]  ;;  %vm869_vm1 = vcmask 588800  }
  0x3f   : > { %954 = vmatprep.mubr.bf16.mxu0 %v1741_v8  ;;  %995 = vmatprep.mubr.bf16.mxu1 %v1741_v8  ;;  %v501_v10 = vld [vmem:[%s1967_s9 + $0x200] sm:$0xff]  ;;  %v1593_v14 = vcombine.high %v502_v11, %v502_v11  ;;  %v1592_v16 = vcombine.low %v502_v11, %v502_v11  ;;  %v486_v18 = vld [vmem:[%s1967_s9 + $0x188] sm:$0xff]  ;;  %v504_v50 = vld [vmem:[%s1967_s9 + $0x218] sm:$0xff]  ;;  %v1595_v53 = vcombine.high %v503_v49, %v503_v49  ;;  %s2164_s14 = smov (!%p428_p9, %s1524_s14), 63 }
  0x40   : > { %1684 = vset.pattern.permute.xlu0 %v1741_v8  ;;  %v485_v12 = vld [vmem:[%s1967_s9 + $0x180] sm:$0xff]  ;;  %v1591_v13 = vcombine.high %v501_v10, %v501_v10  ;;  %v1590_v15 = vcombine.low %v501_v10, %v501_v10  ;;  %v494_v19 = vld [vmem:[%s1967_s9 + $0x1c8] sm:$0xff]  ;;  %v1597_v54 = vcombine.high %v504_v50, %v504_v50  ;;  %v1594_v55 = vcombine.low %v503_v49, %v503_v49  ;;  %v487_v57 = vld [vmem:[%s1967_s9 + $0x190] sm:$0xff]  ;;  %s1525_s15 = sshll.u32 %s2164_s14, 2 }
  0x41   : > { %1253 = vperm.xlu0 %1684, %v1250_v9   ;;  %v493_v17 = vld [vmem:[%s1967_s9 + $0x1c0] sm:$0xff]  ;;  %v1577_v21 = vcombine.high %v486_v18, %v494_v19  ;;  %v470_v24 = vld [vmem:[%s1967_s9 + $0x108] sm:$0xff]  ;;  %1608 = vmatprep.subr.msk.bf16.mxu1 %vm873_vm0, %v1593_v14  ;;  %v881_v26 = vsel %vm873_vm0, %v1592_v16, 0  ;;  %v1576_v30 = vcombine.low %v486_v18, %v494_v19  ;;  %v1596_v56 = vcombine.low %v504_v50, %v504_v50  ;;  %v495_v58 = vld [vmem:[%s1967_s9 + $0x1d0] sm:$0xff]  ;;  %s2103_s22 = scalar_lea.vmem %s2156_s4, %s1525_s15 }
  0x42   : > { %v1575_v20 = vcombine.high %v485_v12, %v493_v17  ;;  %v469_v22 = vld [vmem:[%s1967_s9 + $0x100] sm:$0xff]  ;;  %1606 = vmatprep.subr.msk.bf16.mxu0 %vm873_vm0, %v1591_v13  ;;  %v875_v25 = vsel %vm873_vm0, %v1590_v15, 0  ;;  %v478_v27 = vld [vmem:[%s1967_s9 + $0x148] sm:$0xff]  ;;  %970 = vmatpush1.bf16.msra.mxu1 %v881_v26  ;;  %v1574_v29 = vcombine.low %v485_v12, %v493_v17  ;;  %v488_v59 = vld [vmem:[%s1967_s9 + $0x198] sm:$0xff]  ;;  %v887_v62 = vsel %vm873_vm0, %v1594_v55, 0 }
  0x43   : > { %v477_v23 = vld [vmem:[%s1967_s9 + $0x140] sm:$0xff]  ;;  %929 = vmatpush1.bf16.msra.mxu0 %v875_v25  ;;  %971 = vmatprep.subr.bf16.mxu1 %v1577_v21  ;;  %v1561_v32 = vcombine.high %v470_v24, %v478_v27  ;;  %v454_v35 = vld [vmem:[%s1967_s9 + $0x88] sm:$0xff]  ;;  %v1560_v38 = vcombine.low %v470_v24, %v478_v27  ;;  %v496_v60 = vld [vmem:[%s1967_s9 + $0x1d8] sm:$0xff]  ;;  %v893_v63 = vsel %vm873_vm0, %v1596_v56, 0  ;;  %v1579_v0 = vcombine.high %v487_v57, %v495_v58 }
  0x44   : > { %v1272_v28 = vld [vmem:[%s2155_s3] sm:$0xff]  ;;  %930 = vmatprep.subr.bf16.mxu0 %v1575_v20  ;;  %v1559_v31 = vcombine.high %v469_v22, %v477_v23  ;;  %v462_v36 = vld [vmem:[%s1967_s9 + $0xc8] sm:$0xff]  ;;  %v1558_v37 = vcombine.low %v469_v22, %v477_v23  ;;  %v1581_v1 = vcombine.high %v488_v59, %v496_v60  ;;  %v471_v2 = vld [vmem:[%s1967_s9 + $0x110] sm:$0xff]  ;;  %v1578_v6 = vcombine.low %v487_v57, %v495_v58 }
  0x45   : > { %v453_v33 = vld [vmem:[%s1967_s9 + $0x80] sm:$0xff]  ;;  %1275 = vperm.xlu0 %1684, %v1272_v28   ;;  %v1545_v40 = vcombine.high %v454_v35, %v462_v36  ;;  %v438_v43 = vld [vmem:[%s1967_s9 + $0x8] sm:$0xff]  ;;  %v1544_v46 = vcombine.low %v454_v35, %v462_v36  ;;  %v479_v3 = vld [vmem:[%s1967_s9 + $0x150] sm:$0xff]  ;;  %v1580_v7 = vcombine.low %v488_v59, %v496_v60 }
  0x46   : > { %v461_v34 = vld [vmem:[%s1967_s9 + $0xc0] sm:$0xff]  ;;  %972 = vmatpush1.bf16.msra.mxu1 %v1576_v30  ;;  %v446_v44 = vld [vmem:[%s1967_s9 + $0x48] sm:$0xff]  ;;  %v472_v4 = vld [vmem:[%s1967_s9 + $0x118] sm:$0xff]  ;;  %v1563_v9 = vcombine.high %v471_v2, %v479_v3  ;;  %v1562_v15 = vcombine.low %v471_v2, %v479_v3 }
  0x47   : > { %931 = vmatpush1.bf16.msra.mxu0 %v1574_v29  ;;  %973 = vmatprep.subr.bf16.mxu1 %v1561_v32  ;;  %v1543_v39 = vcombine.high %v453_v33, %v461_v34  ;;  %v437_v41 = vld [vmem:[%s1967_s9] sm:$0xff]  ;;  %v1542_v45 = vcombine.low %v453_v33, %v461_v34  ;;  %v1529_v48 = vcombine.high %v438_v43, %v446_v44  ;;  %v480_v5 = vld [vmem:[%s1967_s9 + $0x158] sm:$0xff]  ;;  %v455_v11 = vld [vmem:[%s1967_s9 + $0x90] sm:$0xff] }
  0x48   : > { %932 = vmatprep.subr.bf16.mxu0 %v1559_v31  ;;  %v445_v42 = vld [vmem:[%s1967_s9 + $0x40] sm:$0xff]  ;;  %v1528_v52 = vcombine.low %v438_v43, %v446_v44  ;;  %v1565_v10 = vcombine.high %v472_v4, %v480_v5  ;;  %v463_v12 = vld [vmem:[%s1967_s9 + $0xd0] sm:$0xff]  ;;  %v456_v13 = vld [vmem:[%s1967_s9 + $0x98] sm:$0xff]  ;;  %v1564_v16 = vcombine.low %v472_v4, %v480_v5 }
  0x49   : > { %v1527_v47 = vcombine.high %v437_v41, %v445_v42  ;;  %v1526_v51 = vcombine.low %v437_v41, %v445_v42  ;;  %v2003_v61 = vld [vmem:[%s2152_s0] sm:$0xf]  ;;  %v464_v14 = vld [vmem:[%s1967_s9 + $0xd8] sm:$0xff]  ;;  %v1547_v17 = vcombine.high %v455_v11, %v463_v12  ;;  %v439_v19 = vld [vmem:[%s1967_s9 + $0x10] sm:$0xff]  ;;  %v1546_v23 = vcombine.low %v455_v11, %v463_v12 }
  0x4a   : > { %974 = vmatpush1.bf16.msra.mxu1 %v1560_v38  ;;  %v1549_v18 = vcombine.high %v456_v13, %v464_v14  ;;  %v447_v20 = vld [vmem:[%s1967_s9 + $0x50] sm:$0xff]  ;;  %v440_v21 = vld [vmem:[%s1967_s9 + $0x18] sm:$0xff]  ;;  %v1548_v24 = vcombine.low %v456_v13, %v464_v14  ;;  %v505_v27 = vld [vmem:[%s1967_s9 + $0x220] sm:$0xff] }
  0x4b   : > { %933 = vmatpush1.bf16.msra.mxu0 %v1558_v37  ;;  %975 = vmatprep.subr.bf16.mxu1 %v1545_v40  ;;  %v448_v22 = vld [vmem:[%s1967_s9 + $0x58] sm:$0xff]  ;;  %v1531_v25 = vcombine.high %v439_v19, %v447_v20  ;;  %v506_v28 = vld [vmem:[%s1967_s9 + $0x228] sm:$0xff]  ;;  %v1530_v29 = vcombine.low %v439_v19, %v447_v20  ;;  %v1599_v31 = vcombine.high %v505_v27, %v505_v27  ;;  %v489_v35 = vld [vmem:[%s1967_s9 + $0x1a0] sm:$0xff] }
  0x4c   : > { %934 = vmatprep.subr.bf16.mxu0 %v1543_v39  ;;  %v1533_v26 = vcombine.high %v440_v21, %v448_v22  ;;  %v1532_v30 = vcombine.low %v440_v21, %v448_v22  ;;  %v1601_v32 = vcombine.high %v506_v28, %v506_v28  ;;  %v1598_v33 = vcombine.low %v505_v27, %v505_v27  ;;  %v497_v36 = vld [vmem:[%s1967_s9 + $0x1e0] sm:$0xff]  ;;  %v490_v37 = vld [vmem:[%s1967_s9 + $0x1a8] sm:$0xff]  ;;  %v507_v4 = vld [vmem:[%s1967_s9 + $0x230] sm:$0xff] }
  0x4d   : > { %v1600_v34 = vcombine.low %v506_v28, %v506_v28  ;;  %v498_v38 = vld [vmem:[%s1967_s9 + $0x1e8] sm:$0xff]  ;;  %v1583_v41 = vcombine.high %v489_v35, %v497_v36  ;;  %v473_v43 = vld [vmem:[%s1967_s9 + $0x120] sm:$0xff]  ;;  %v508_v5 = vld [vmem:[%s1967_s9 + $0x238] sm:$0xff]  ;;  %v1602_v11 = vcombine.low %v507_v4, %v507_v4 }
  0x4e   : > { %976 = vmatpush1.bf16.msra.mxu1 %v1544_v46  ;;  %v899_v39 = vsel %vm873_vm0, %v1598_v33, 0  ;;  %v1585_v42 = vcombine.high %v490_v37, %v498_v38  ;;  %v481_v44 = vld [vmem:[%s1967_s9 + $0x160] sm:$0xff]  ;;  %v482_v46 = vld [vmem:[%s1967_s9 + $0x168] sm:$0xff]  ;;  %v1604_v12 = vcombine.low %v508_v5, %v508_v5  ;;  %v491_v13 = vld [vmem:[%s1967_s9 + $0x1b0] sm:$0xff] }
  0x4f   : > { %935 = vmatpush1.bf16.msra.mxu0 %v1542_v45  ;;  %977 = vmatprep.subr.bf16.mxu1 %v1529_v48  ;;  %v905_v40 = vsel %vm873_vm0, %v1600_v34, 0  ;;  %v474_v45 = vld [vmem:[%s1967_s9 + $0x128] sm:$0xff]  ;;  %v1584_v48 = vcombine.low %v490_v37, %v498_v38  ;;  %v1567_v49 = vcombine.high %v473_v43, %v481_v44  ;;  %v1566_v55 = vcombine.low %v473_v43, %v481_v44  ;;  %v441_v59 = vld [vmem:[%s1967_s9 + $0x20] sm:$0xff]  ;;  %v499_v14 = vld [vmem:[%s1967_s9 + $0x1f0] sm:$0xff] }
  0x50   : > { %936 = vmatprep.subr.bf16.mxu0 %v1527_v47  ;;  %v1582_v47 = vcombine.low %v489_v35, %v497_v36  ;;  %v1569_v50 = vcombine.high %v474_v45, %v482_v46  ;;  %v1568_v56 = vcombine.low %v474_v45, %v482_v46  ;;  %v449_v60 = vld [vmem:[%s1967_s9 + $0x60] sm:$0xff]  ;;  %v1587_v19 = vcombine.high %v491_v13, %v499_v14  ;;  %v475_v21 = vld [vmem:[%s1967_s9 + $0x130] sm:$0xff] }
  0x51   : > { %v1535_v2 = vcombine.high %v441_v59, %v449_v60  ;;  %v483_v22 = vld [vmem:[%s1967_s9 + $0x170] sm:$0xff] }
  0x52   : > { %978 = vmatpush1.bf16.msra.mxu1 %v1528_v52  ;;  %v465_v52 = vld [vmem:[%s1967_s9 + $0xe0] sm:$0xff]  ;;  %v1571_v27 = vcombine.high %v475_v21, %v483_v22  ;;  %v1570_v33 = vcombine.low %v475_v21, %v483_v22  ;;  %v443_v37 = vld [vmem:[%s1967_s9 + $0x30] sm:$0xff] }
  0x53   : > { %937 = vmatpush1.bf16.msra.mxu0 %v1526_v51  ;;  %1612 = vmatprep.subr.msk.bf16.mxu1 %vm873_vm0, %v1597_v54  ;;  %v457_v51 = vld [vmem:[%s1967_s9 + $0xa0] sm:$0xff]  ;;  %v466_v54 = vld [vmem:[%s1967_s9 + $0xe8] sm:$0xff]  ;;  %v451_v38 = vld [vmem:[%s1967_s9 + $0x70] sm:$0xff] }
  0x54   : > { %1610 = vmatprep.subr.msk.bf16.mxu0 %vm873_vm0, %v1595_v53  ;;  %v458_v53 = vld [vmem:[%s1967_s9 + $0xa8] sm:$0xff]  ;;  %v1551_v57 = vcombine.high %v457_v51, %v465_v52  ;;  %v1538_v44 = vcombine.low %v443_v37, %v451_v38 }
  0x55   : > { %1609 = vmatmul.mubr.msk.bf16.vlgmr.msra.gmra.mxu1 %vm869_vm1, %v2003_v61  ;;  %v1553_v58 = vcombine.high %v458_v53, %v466_v54 }
  0x56   : > { %1607 = vmatmul.mubr.msk.bf16.vlgmr.msra.gmra.mxu0 %vm869_vm1, %v2003_v61  ;;  %1052 = vmatpush1.bf16.msra.mxu1 %v893_v63  ;;  %v450_v63 = vld [vmem:[%s1967_s9 + $0x68] sm:$0xff] }
  0x57   : > { %1011 = vmatpush1.bf16.msra.mxu0 %v887_v62  ;;  %1053 = vmatprep.subr.bf16.mxu1 %v1581_v1  ;;  %v442_v62 = vld [vmem:[%s1967_s9 + $0x28] sm:$0xff]  ;;  %v1552_v1 = vcombine.low %v458_v53, %v466_v54 }
  0x58   : > { %1012 = vmatprep.subr.bf16.mxu0 %v1579_v0  ;;  %1036 = vmatprep.mubr.bf16.mxu0 %v1741_v8  ;;  %v1550_v0 = vcombine.low %v457_v51, %v465_v52  ;;  %v1537_v3 = vcombine.high %v442_v62, %v450_v63 }
  0x59   : > { %1077 = vmatprep.mubr.bf16.mxu1 %v1741_v8 }
  0x5a   : > { %1054 = vmatpush1.bf16.msra.mxu1 %v1580_v7  ;;  %v1536_v7 = vcombine.low %v442_v62, %v450_v63 }
  0x5b   : > { %1013 = vmatpush1.bf16.msra.mxu0 %v1578_v6  ;;  %1055 = vmatprep.subr.bf16.mxu1 %v1565_v10  ;;  %v1534_v6 = vcombine.low %v441_v59, %v449_v60  ;;  %v1605_v10 = vcombine.high %v508_v5, %v508_v5 }
  0x5c   : > { %1014 = vmatprep.subr.bf16.mxu0 %v1563_v9  ;;  %v1603_v9 = vcombine.high %v507_v4, %v507_v4 }
  0x5e   : > { %1056 = vmatpush1.bf16.msra.mxu1 %v1564_v16  ;;  %v500_v16 = vld [vmem:[%s1967_s9 + $0x1f8] sm:$0xff] }
  0x5f   : > { %1015 = vmatpush1.bf16.msra.mxu0 %v1562_v15  ;;  %1057 = vmatprep.subr.bf16.mxu1 %v1549_v18  ;;  %v492_v15 = vld [vmem:[%s1967_s9 + $0x1b8] sm:$0xff]  ;;  %v917_v18 = vsel %vm873_vm0, %v1604_v12, 0 }
  0x60   : > { %1016 = vmatprep.subr.bf16.mxu0 %v1547_v17  ;;  %v911_v17 = vsel %vm873_vm0, %v1602_v11, 0  ;;  %v1589_v20 = vcombine.high %v492_v15, %v500_v16 }
  0x62   : > { %1058 = vmatpush1.bf16.msra.mxu1 %v1548_v24  ;;  %v484_v24 = vld [vmem:[%s1967_s9 + $0x178] sm:$0xff] }
  0x63   : > { %1017 = vmatpush1.bf16.msra.mxu0 %v1546_v23  ;;  %1059 = vmatprep.subr.bf16.mxu1 %v1533_v26  ;;  %v476_v23 = vld [vmem:[%s1967_s9 + $0x138] sm:$0xff]  ;;  %v1588_v26 = vcombine.low %v492_v15, %v500_v16 }
  0x64   : > { %1018 = vmatprep.subr.bf16.mxu0 %v1531_v25  ;;  %v1586_v25 = vcombine.low %v491_v13, %v499_v14  ;;  %v1573_v28 = vcombine.high %v476_v23, %v484_v24  ;;  %v1572_v34 = vcombine.low %v476_v23, %v484_v24 }
  0x66   : > { %1060 = vmatpush1.bf16.msra.mxu1 %v1532_v30  ;;  %v467_v30 = vld [vmem:[%s1967_s9 + $0xf0] sm:$0xff] }
  0x67   : > { %1019 = vmatpush1.bf16.msra.mxu0 %v1530_v29  ;;  %1616 = vmatprep.subr.msk.bf16.mxu1 %vm873_vm0, %v1601_v32  ;;  %v459_v29 = vld [vmem:[%s1967_s9 + $0xb0] sm:$0xff]  ;;  %v468_v32 = vld [vmem:[%s1967_s9 + $0xf8] sm:$0xff] }
  0x68   : > { %1614 = vmatprep.subr.msk.bf16.mxu0 %vm873_vm0, %v1599_v31  ;;  %v460_v31 = vld [vmem:[%s1967_s9 + $0xb8] sm:$0xff]  ;;  %v1555_v35 = vcombine.high %v459_v29, %v467_v30 }
  0x69   : > { %1613 = vmatmul.mubr.msk.bf16.vlgmr.msra.gmra.mxu1 %vm869_vm1, %v2003_v61  ;;  %v1557_v36 = vcombine.high %v460_v31, %v468_v32 }
  0x6a   : > { %1611 = vmatmul.mubr.msk.bf16.vlgmr.msra.gmra.mxu0 %vm869_vm1, %v2003_v61  ;;  %1134 = vmatpush1.bf16.msra.mxu1 %v905_v40  ;;  %v452_v40 = vld [vmem:[%s1967_s9 + $0x78] sm:$0xff] }
  0x6b   : > { %1093 = vmatpush1.bf16.msra.mxu0 %v899_v39  ;;  %1135 = vmatprep.subr.bf16.mxu1 %v1585_v42  ;;  %v444_v39 = vld [vmem:[%s1967_s9 + $0x38] sm:$0xff]  ;;  %v1556_v42 = vcombine.low %v460_v31, %v468_v32 }
  0x6c   : > { %1094 = vmatprep.subr.bf16.mxu0 %v1583_v41  ;;  %1118 = vmatprep.mubr.bf16.mxu0 %v1741_v8  ;;  %v1554_v41 = vcombine.low %v459_v29, %v467_v30  ;;  %v1541_v43 = vcombine.high %v444_v39, %v452_v40  ;;  %v1540_v45 = vcombine.low %v444_v39, %v452_v40 }
  0x6d   : > { %1159 = vmatprep.mubr.bf16.mxu1 %v1741_v8 }
  0x6e   : > { %1136 = vmatpush1.bf16.msra.mxu1 %v1584_v48 }
  0x6f   : > { %1095 = vmatpush1.bf16.msra.mxu0 %v1582_v47  ;;  %1137 = vmatprep.subr.bf16.mxu1 %v1569_v50 }
  0x70   : > { %1096 = vmatprep.subr.bf16.mxu0 %v1567_v49 }
  0x72   : > { %1138 = vmatpush1.bf16.msra.mxu1 %v1568_v56 }
  0x73   : > { %1097 = vmatpush1.bf16.msra.mxu0 %v1566_v55  ;;  %1139 = vmatprep.subr.bf16.mxu1 %v1553_v58 }
  0x74   : > { %1098 = vmatprep.subr.bf16.mxu0 %v1551_v57 }
  0x76   : > { %1140 = vmatpush1.bf16.msra.mxu1 %v1552_v1 }
  0x77   : > { %1099 = vmatpush1.bf16.msra.mxu0 %v1550_v0  ;;  %1141 = vmatprep.subr.bf16.mxu1 %v1537_v3 }
  0x78   : > { %1100 = vmatprep.subr.bf16.mxu0 %v1535_v2 }
  0x7a   : > { %1142 = vmatpush1.bf16.msra.mxu1 %v1536_v7 }
  0x7b   : > { %1101 = vmatpush1.bf16.msra.mxu0 %v1534_v6  ;;  %1620 = vmatprep.subr.msk.bf16.mxu1 %vm873_vm0, %v1605_v10 }
  0x7c   : > { %1618 = vmatprep.subr.msk.bf16.mxu0 %vm873_vm0, %v1603_v9 }
  0x7d   : > { %1617 = vmatmul.mubr.msk.bf16.vlgmr.msra.gmra.mxu1 %vm869_vm1, %v2003_v61 }
  0x7e   : > { %1615 = vmatmul.mubr.msk.bf16.vlgmr.msra.gmra.mxu0 %vm869_vm1, %v2003_v61  ;;  %1216 = vmatpush1.bf16.msra.mxu1 %v917_v18 }
  0x7f   : > { %1175 = vmatpush1.bf16.msra.mxu0 %v911_v17  ;;  %1217 = vmatprep.subr.bf16.mxu1 %v1589_v20 }
  0x80   : > { %1176 = vmatprep.subr.bf16.mxu0 %v1587_v19  ;;  %1200 = vmatprep.mubr.bf16.mxu0 %v1741_v8 }
  0x81   : > { %1241 = vmatprep.mubr.bf16.mxu1 %v1741_v8  ;;  %v1539_v8 = vcombine.high %v443_v37, %v451_v38 }
  0x82   : > { %1218 = vmatpush1.bf16.msra.mxu1 %v1588_v26 }
  0x83   : > { %1177 = vmatpush1.bf16.msra.mxu0 %v1586_v25  ;;  %1219 = vmatprep.subr.bf16.mxu1 %v1573_v28 }
  0x84   : > { %1178 = vmatprep.subr.bf16.mxu0 %v1571_v27 }
  0x86   : > { %1220 = vmatpush1.bf16.msra.mxu1 %v1572_v34 }
  0x87   : > { %1179 = vmatpush1.bf16.msra.mxu0 %v1570_v33  ;;  %1221 = vmatprep.subr.bf16.mxu1 %v1557_v36 }
  0x88   : > { %1180 = vmatprep.subr.bf16.mxu0 %v1555_v35 }
  0x8a   : > { %1222 = vmatpush1.bf16.msra.mxu1 %v1556_v42 }
  0x8b   : > { %1181 = vmatpush1.bf16.msra.mxu0 %v1554_v41  ;;  %1223 = vmatprep.subr.bf16.mxu1 %v1541_v43 }
  0x8c   : > { %1182 = vmatprep.subr.bf16.mxu0 %v1539_v8 }
  0x8e   : > { %1224 = vmatpush1.bf16.msra.mxu1 %v1540_v45 }
  0x8f   : > { %1183 = vmatpush1.bf16.msra.mxu0 %v1538_v44 }
  0x91   : > { %1621 = vmatmul.mubr.msk.bf16.vlgmr.msra.gmra.mxu1 %vm869_vm1, %v2003_v61 }
  0x92   : > { %1619 = vmatmul.mubr.msk.bf16.vlgmr.msra.gmra.mxu0 %vm869_vm1, %v2003_v61 }
  0xbc   : > { %v2087_v46 = vpop.permute.xlu0 %1253 }
  0xc0   : > { %v2090_v47 = vpop.permute.xlu0 %1275 }
 0x115   : > { %v997_v49 = vpop.f32.mrf.mxu1 }
 0x116   : > { %v956_v48 = vpop.f32.mrf.mxu0  ;;  %v1258_v51 = vmul.f32 %v2087_v46, %v997_v49 }
 0x117   : > { %v1256_v50 = vmul.f32 %v2087_v46, %v956_v48  ;;  %v999_v53 = vpop.f32.mrf.mxu1 }
 0x118   : > { %v958_v52 = vpop.f32.mrf.mxu0  ;;  %v1259_v55 = vmul.f32 %v2087_v46, %v999_v53  ;;  %v1280_v56 = vadd.f32 %v2090_v47, %v1258_v51 }
 0x119   : > { %v1257_v54 = vmul.f32 %v2087_v46, %v958_v52  ;;  %v1278_v61 = vadd.f32 %v2090_v47, %v1256_v50  ;;  %v1001_v58 = vpop.f32.mrf.mxu1 }
 0x11a   : > { %v960_v57 = vpop.f32.mrf.mxu0  ;;  %v1281_v60 = vadd.f32 %v2090_v47, %v1259_v55  ;;  %v1296_v63 = vmax.f32 %v1280_v56, 0.0 }
 0x11b   : > { %v1279_v59 = vadd.f32 %v2090_v47, %v1257_v54  ;;  %v1294_v62 = vmax.f32 %v1278_v61, 0.0  ;;  %v1002_v1 = vpop.f32.mrf.mxu1 }
 0x11c   : > { %v961_v0 = vpop.f32.mrf.mxu0  ;;  %v1297_v3 = vmax.f32 %v1281_v60, 0.0 }
 0x11d   : > { %v1295_v2 = vmax.f32 %v1279_v59, 0.0 }
 0x11e   : > { %v1634_v5 = vpack.c.bf16 %v1297_v3, %v1296_v63 }
 0x11f   : > { %v1633_v4 = vpack.c.bf16 %v1295_v2, %v1294_v62 }
 0x120   : > { %1375 = vst [vmem:[%s2103_s22 + $0x8] sm:$0xff] %v1634_v5 }
 0x121   : > { %1374 = vst [vmem:[%s2103_s22] sm:$0xff] %v1633_v4 }
 0x129   : > { %v1079_v7 = vpop.f32.mrf.mxu1 }
 0x12a   : > { %v1038_v6 = vpop.f32.mrf.mxu0  ;;  %v1262_v10 = vmul.f32 %v2087_v46, %v1079_v7 }
 0x12b   : > { %v1260_v9 = vmul.f32 %v2087_v46, %v1038_v6  ;;  %v1081_v12 = vpop.f32.mrf.mxu1 }
 0x12c   : > { %v1040_v11 = vpop.f32.mrf.mxu0  ;;  %v1284_v14 = vadd.f32 %v2090_v47, %v1262_v10  ;;  %v1263_v16 = vmul.f32 %v2087_v46, %v1081_v12 }
 0x12d   : > { %v1282_v13 = vadd.f32 %v2090_v47, %v1260_v9  ;;  %v1261_v15 = vmul.f32 %v2087_v46, %v1040_v11  ;;  %v1083_v18 = vpop.f32.mrf.mxu1 }
 0x12e   : > { %v1042_v17 = vpop.f32.mrf.mxu0  ;;  %v1300_v20 = vmax.f32 %v1284_v14, 0.0  ;;  %v1285_v22 = vadd.f32 %v2090_v47, %v1263_v16 }
 0x12f   : > { %v1298_v19 = vmax.f32 %v1282_v13, 0.0  ;;  %v1283_v21 = vadd.f32 %v2090_v47, %v1261_v15  ;;  %v1084_v24 = vpop.f32.mrf.mxu1 }
 0x130   : > { %v1043_v23 = vpop.f32.mrf.mxu0  ;;  %v1301_v26 = vmax.f32 %v1285_v22, 0.0 }
 0x131   : > { %v1299_v25 = vmax.f32 %v1283_v21, 0.0 }
 0x132   : > { %v1636_v28 = vpack.c.bf16 %v1301_v26, %v1300_v20 }
 0x133   : > { %v1635_v27 = vpack.c.bf16 %v1299_v25, %v1298_v19 }
 0x134   : > { %1377 = vst [vmem:[%s2103_s22 + $0x18] sm:$0xff] %v1636_v28 }
 0x135   : > { %1376 = vst [vmem:[%s2103_s22 + $0x10] sm:$0xff] %v1635_v27 }
 0x13d   : > { %v1161_v30 = vpop.f32.mrf.mxu1 }
 0x13e   : > { %v1120_v29 = vpop.f32.mrf.mxu0  ;;  %v1266_v32 = vmul.f32 %v2087_v46, %v1161_v30 }
 0x13f   : > { %v1264_v31 = vmul.f32 %v2087_v46, %v1120_v29  ;;  %v1163_v34 = vpop.f32.mrf.mxu1 }
 0x140   : > { %v1122_v33 = vpop.f32.mrf.mxu0  ;;  %v1288_v36 = vadd.f32 %v2090_v47, %v1266_v32  ;;  %v1267_v38 = vmul.f32 %v2087_v46, %v1163_v34 }
 0x141   : > { %v1286_v35 = vadd.f32 %v2090_v47, %v1264_v31  ;;  %v1265_v37 = vmul.f32 %v2087_v46, %v1122_v33  ;;  %v1165_v40 = vpop.f32.mrf.mxu1 }
 0x142   : > { %v1124_v39 = vpop.f32.mrf.mxu0  ;;  %v1304_v42 = vmax.f32 %v1288_v36, 0.0  ;;  %v1289_v43 = vadd.f32 %v2090_v47, %v1267_v38 }
 0x143   : > { %v1302_v41 = vmax.f32 %v1286_v35, 0.0  ;;  %v1287_v8 = vadd.f32 %v2090_v47, %v1265_v37  ;;  %v1166_v45 = vpop.f32.mrf.mxu1 }
 0x144   : > { %v1125_v44 = vpop.f32.mrf.mxu0  ;;  %v1305_v49 = vmax.f32 %v1289_v43, 0.0 }
 0x145   : > { %v1303_v48 = vmax.f32 %v1287_v8, 0.0 }
 0x146   : > { %v1638_v51 = vpack.c.bf16 %v1305_v49, %v1304_v42 }
 0x147   : > { %v1637_v50 = vpack.c.bf16 %v1303_v48, %v1302_v41 }
 0x148   : > { %1379 = vst [vmem:[%s2103_s22 + $0x28] sm:$0xff] %v1638_v51 }
 0x149   : > { %1378 = vst [vmem:[%s2103_s22 + $0x20] sm:$0xff] %v1637_v50 }
 0x151   : > { %v1243_v53 = vpop.f32.mrf.mxu1 }
 0x152   : > { %v1202_v52 = vpop.f32.mrf.mxu0  ;;  %v1270_v55 = vmul.f32 %v2087_v46, %v1243_v53 }
 0x153   : > { %v1268_v54 = vmul.f32 %v2087_v46, %v1202_v52  ;;  %v1245_v56 = vpop.f32.mrf.mxu1 }
 0x154   : > { %v1204_v61 = vpop.f32.mrf.mxu0  ;;  %v1292_v58 = vadd.f32 %v2090_v47, %v1270_v55  ;;  %v1271_v60 = vmul.f32 %v2087_v46, %v1245_v56 }
 0x155   : > { %v1290_v57 = vadd.f32 %v2090_v47, %v1268_v54  ;;  %v1269_v59 = vmul.f32 %v2087_v46, %v1204_v61  ;;  %v1247_v63 = vpop.f32.mrf.mxu1 }
 0x156   : > { %v1206_v62 = vpop.f32.mrf.mxu0  ;;  %v1293_v1 = vadd.f32 %v2090_v47, %v1271_v60  ;;  %v1308_v5 = vmax.f32 %v1292_v58, 0.0 }
 0x157   : > { %v1291_v0 = vadd.f32 %v2090_v47, %v1269_v59  ;;  %v1248_v3 = vpop.f32.mrf.mxu1  ;;  %v1306_v4 = vmax.f32 %v1290_v57, 0.0 }
 0x158   : > { %v1207_v2 = vpop.f32.mrf.mxu0  ;;  %v1309_v7 = vmax.f32 %v1293_v1, 0.0 }
 0x159   : > { %v1307_v6 = vmax.f32 %v1291_v0, 0.0 }
 0x15a   : > { %v1640_v10 = vpack.c.bf16 %v1309_v7, %v1308_v5 }
 0x15b   : > { %v1639_v9 = vpack.c.bf16 %v1307_v6, %v1306_v4 }
 0x15c   : > { %1381 = vst [vmem:[%s2103_s22 + $0x38] sm:$0xff] %v1640_v10 }
 0x15d   : > { %1380 = vst [vmem:[%s2103_s22 + $0x30] sm:$0xff] %v1639_v9 }
 0x15e PF: > { %s14_s19 = sadd.s32 1, %s1739_s19   ;;  %s2157_s15 = smov %s1727_s16 }
 0x15f   : > { %p11_p10 = scmp.ge.s32.totalorder %s14_s19, 6   ;;  %s2158_s16 = smov %s1802_s23 }
 0x160   : > { %s2159_s17 = smov %s1735_s18  ;;  %s2160_s18 = smov %s2162_s20 }
 0x161   :  { %13 = sbr.rel (!%p11_p10) target bundleno = 3 (0x3), region = 103 }

// kernel: _lambda_.16
= control target key start
LH: loop header
LB: loop body
LE: loop exit
PB: predicated region body
PF: predicated region fallthrough
CT: control target
= control target key end

     0   :  { %s1767_s15 = smov 0   ;;  %s1769_s16 = smov 0   ;;  %s2152_s0 = inlined_call_operand.vmem [shape: bf16[8,72], index: 0, kind: input, shape index: {}]   ;;  %s2153_s1 = inlined_call_operand.vmem [shape: bf16[72,32768], index: 1, kind: input, shape index: {}]   ;;  %s2154_s2 = inlined_call_operand.vmem [shape: f32[8,1], index: 2, kind: input, shape index: {}]   ;;  %s2155_s3 = inlined_call_operand.vmem [shape: f32[8,1], index: 3, kind: input, shape index: {}]   ;;  %s2156_s4 = inlined_call_operand.vmem [shape: bf16[8,32768], index: 4, kind: output, shape index: {}]  }
   0x1   :  { %s1771_s17 = smov 0   ;;  %s1773_s18 = smov 0  }
   0x2   :  { %s1775_s19 = smov 0  }
   0x3 LB: > { %s23_s20 = sadd.s32 1, %s1735_s18  ;;  %p66_p1 = scmp.ne.s32.totalorder %s1727_s16, %s1723_s15  ;;  %s1739_s19 = sphi %s1775_s19, %s14_s19   ;;  %s1735_s18 = sphi %s1773_s18, %s2160_s18   ;;  %s1731_s17 = sphi %s1771_s17, %s2159_s17   ;;  %s1727_s16 = sphi %s1769_s16, %s2158_s16   ;;  %s1723_s15 = sphi %s1767_s15, %s2157_s15  }
   0x4   : > { %p24_p0 = scmp.ge.s32.totalorder %s23_s20, 16  ;;  %p67_p2 = scmp.eq.s32.totalorder %s1739_s19, 0 }
   0x5   : > { %s59_s22 = sadd.s32 1, %s1727_s16  ;;  %p1520_p5 = scmp.ge.s32.totalorder %s1739_s19, 16 }
   0x6   : > { %s2162_s20 = smov (%p24_p0, %s23_s20), 0  ;;  %p68_p3 = por %p67_p2, %p66_p1 }
   0x7   : > { %s56_s21 = ssub.s32 %s1735_s18, %s2162_s20  ;;  %193 = sbr.rel (%p1520_p5) target bundleno = 53 (0x35), region = 28 }
   0x8   : > { %p57_p4 = scmp.eq.s32.totalorder %s56_s21, 0 }
   0xa   : > { %s1802_s23 = scalar_select %p57_p4, %s1727_s16, %s59_s22  }
   0xc   : > { %196 = sbr.rel (!%p68_p3) target bundleno = 53 (0x35), region = 32  ;;  %s198_s24 = sand.u32 (%p68_p3), 1, %s1727_s16  }
   0xd   : > { %s1632_s25 = sshll.u32 (%p68_p3), %s1735_s18, 6  ;;  %s1641_s26 = smul.u32 (%p68_p3), 576, %s198_s24 }
   0xe   : > { %s1810_s29 = scalar_lea.vmem (%p68_p3), %s2153_s1, %s1632_s25 }
   0xf   : > { %v216_v0 = vld [vmem:[%s1810_s29] sm:$0xff] (%p68_p3)  ;;  %v218_v1 = vld [vmem:[%s1810_s29 + $0x8] sm:$0xff] (%p68_p3)  ;;  %v220_v2 = vld [vmem:[%s1810_s29 + $0x10] sm:$0xff] (%p68_p3)  ;;  %s1818_s30 = scalar_lea.vmem (%p68_p3), [#allocation2], %s1641_s26 }
  0x10   : > { %v222_v3 = vld [vmem:[%s1810_s29 + $0x18] sm:$0xff] (%p68_p3)  ;;  %v224_v4 = vld [vmem:[%s1810_s29 + $0x20] sm:$0xff] (%p68_p3)  ;;  %v226_v5 = vld [vmem:[%s1810_s29 + $0x28] sm:$0xff] (%p68_p3)  ;;  %217 = vst [vmem:[%s1818_s30] sm:$0xff] (%p68_p3), %v216_v0 }
  0x11   : > { %219 = vst [vmem:[%s1818_s30 + $0x8] sm:$0xff] %v218_v1  ;;  %221 = vst [vmem:[%s1818_s30 + $0x10] sm:$0xff] %v220_v2  ;;  %v228_v6 = vld [vmem:[%s1810_s29 + $0x30] sm:$0xff]  ;;  %v230_v7 = vld [vmem:[%s1810_s29 + $0x38] sm:$0xff] }
  0x12   : > { %223 = vst [vmem:[%s1818_s30 + $0x18] sm:$0xff] %v222_v3  ;;  %225 = vst [vmem:[%s1818_s30 + $0x20] sm:$0xff] %v224_v4  ;;  %v232_v8 = vld [vmem:[%s1810_s29 + $0x400] sm:$0xff]  ;;  %v234_v9 = vld [vmem:[%s1810_s29 + $0x408] sm:$0xff] }
  0x13   : > { %227 = vst [vmem:[%s1818_s30 + $0x28] sm:$0xff] %v226_v5  ;;  %229 = vst [vmem:[%s1818_s30 + $0x30] sm:$0xff] %v228_v6  ;;  %v236_v10 = vld [vmem:[%s1810_s29 + $0x410] sm:$0xff]  ;;  %v238_v11 = vld [vmem:[%s1810_s29 + $0x418] sm:$0xff] }
  0x14   : > { %231 = vst [vmem:[%s1818_s30 + $0x38] sm:$0xff] %v230_v7  ;;  %233 = vst [vmem:[%s1818_s30 + $0x40] sm:$0xff] %v232_v8  ;;  %v240_v12 = vld [vmem:[%s1810_s29 + $0x420] sm:$0xff]  ;;  %v242_v13 = vld [vmem:[%s1810_s29 + $0x428] sm:$0xff] }
  0x15   : > { %235 = vst [vmem:[%s1818_s30 + $0x48] sm:$0xff] %v234_v9  ;;  %237 = vst [vmem:[%s1818_s30 + $0x50] sm:$0xff] %v236_v10  ;;  %v244_v14 = vld [vmem:[%s1810_s29 + $0x430] sm:$0xff]  ;;  %v246_v15 = vld [vmem:[%s1810_s29 + $0x438] sm:$0xff] }
  0x16   : > { %239 = vst [vmem:[%s1818_s30 + $0x58] sm:$0xff] %v238_v11  ;;  %241 = vst [vmem:[%s1818_s30 + $0x60] sm:$0xff] %v240_v12  ;;  %v248_v16 = vld [vmem:[%s1810_s29 + $0x800] sm:$0xff]  ;;  %v250_v17 = vld [vmem:[%s1810_s29 + $0x808] sm:$0xff] }
  0x17   : > { %243 = vst [vmem:[%s1818_s30 + $0x68] sm:$0xff] %v242_v13  ;;  %245 = vst [vmem:[%s1818_s30 + $0x70] sm:$0xff] %v244_v14  ;;  %v252_v18 = vld [vmem:[%s1810_s29 + $0x810] sm:$0xff]  ;;  %v254_v19 = vld [vmem:[%s1810_s29 + $0x818] sm:$0xff] }
  0x18   : > { %247 = vst [vmem:[%s1818_s30 + $0x78] sm:$0xff] %v246_v15  ;;  %249 = vst [vmem:[%s1818_s30 + $0x80] sm:$0xff] %v248_v16  ;;  %v256_v20 = vld [vmem:[%s1810_s29 + $0x820] sm:$0xff]  ;;  %v258_v21 = vld [vmem:[%s1810_s29 + $0x828] sm:$0xff] }
  0x19   : > { %251 = vst [vmem:[%s1818_s30 + $0x88] sm:$0xff] %v250_v17  ;;  %253 = vst [vmem:[%s1818_s30 + $0x90] sm:$0xff] %v252_v18  ;;  %v260_v22 = vld [vmem:[%s1810_s29 + $0x830] sm:$0xff]  ;;  %v262_v23 = vld [vmem:[%s1810_s29 + $0x838] sm:$0xff] }
  0x1a   : > { %255 = vst [vmem:[%s1818_s30 + $0x98] sm:$0xff] %v254_v19  ;;  %257 = vst [vmem:[%s1818_s30 + $0xa0] sm:$0xff] %v256_v20  ;;  %v264_v24 = vld [vmem:[%s1810_s29 + $0xc00] sm:$0xff]  ;;  %v266_v25 = vld [vmem:[%s1810_s29 + $0xc08] sm:$0xff] }
  0x1b   : > { %259 = vst [vmem:[%s1818_s30 + $0xa8] sm:$0xff] %v258_v21  ;;  %261 = vst [vmem:[%s1818_s30 + $0xb0] sm:$0xff] %v260_v22  ;;  %v268_v26 = vld [vmem:[%s1810_s29 + $0xc10] sm:$0xff]  ;;  %v270_v27 = vld [vmem:[%s1810_s29 + $0xc18] sm:$0xff] }
  0x1c   : > { %263 = vst [vmem:[%s1818_s30 + $0xb8] sm:$0xff] %v262_v23  ;;  %265 = vst [vmem:[%s1818_s30 + $0xc0] sm:$0xff] %v264_v24  ;;  %v272_v28 = vld [vmem:[%s1810_s29 + $0xc20] sm:$0xff]  ;;  %v274_v29 = vld [vmem:[%s1810_s29 + $0xc28] sm:$0xff] }
  0x1d   : > { %267 = vst [vmem:[%s1818_s30 + $0xc8] sm:$0xff] %v266_v25  ;;  %269 = vst [vmem:[%s1818_s30 + $0xd0] sm:$0xff] %v268_v26  ;;  %v276_v30 = vld [vmem:[%s1810_s29 + $0xc30] sm:$0xff]  ;;  %v278_v31 = vld [vmem:[%s1810_s29 + $0xc38] sm:$0xff] }
  0x1e   : > { %271 = vst [vmem:[%s1818_s30 + $0xd8] sm:$0xff] %v270_v27  ;;  %273 = vst [vmem:[%s1818_s30 + $0xe0] sm:$0xff] %v272_v28  ;;  %v280_v32 = vld [vmem:[%s1810_s29 + $0x1000] sm:$0xff]  ;;  %v282_v33 = vld [vmem:[%s1810_s29 + $0x1008] sm:$0xff] }
  0x1f   : > { %275 = vst [vmem:[%s1818_s30 + $0xe8] sm:$0xff] %v274_v29  ;;  %277 = vst [vmem:[%s1818_s30 + $0xf0] sm:$0xff] %v276_v30  ;;  %v284_v34 = vld [vmem:[%s1810_s29 + $0x1010] sm:$0xff]  ;;  %v286_v35 = vld [vmem:[%s1810_s29 + $0x1018] sm:$0xff] }
  0x20   : > { %279 = vst [vmem:[%s1818_s30 + $0xf8] sm:$0xff] %v278_v31  ;;  %281 = vst [vmem:[%s1818_s30 + $0x100] sm:$0xff] %v280_v32  ;;  %v288_v36 = vld [vmem:[%s1810_s29 + $0x1020] sm:$0xff]  ;;  %v290_v37 = vld [vmem:[%s1810_s29 + $0x1028] sm:$0xff] }
  0x21   : > { %283 = vst [vmem:[%s1818_s30 + $0x108] sm:$0xff] %v282_v33  ;;  %285 = vst [vmem:[%s1818_s30 + $0x110] sm:$0xff] %v284_v34  ;;  %v292_v38 = vld [vmem:[%s1810_s29 + $0x1030] sm:$0xff]  ;;  %v294_v39 = vld [vmem:[%s1810_s29 + $0x1038] sm:$0xff] }
  0x22   : > { %287 = vst [vmem:[%s1818_s30 + $0x118] sm:$0xff] %v286_v35  ;;  %289 = vst [vmem:[%s1818_s30 + $0x120] sm:$0xff] %v288_v36  ;;  %v296_v40 = vld [vmem:[%s1810_s29 + $0x1400] sm:$0xff]  ;;  %v298_v41 = vld [vmem:[%s1810_s29 + $0x1408] sm:$0xff] }
  0x23   : > { %291 = vst [vmem:[%s1818_s30 + $0x128] sm:$0xff] %v290_v37  ;;  %293 = vst [vmem:[%s1818_s30 + $0x130] sm:$0xff] %v292_v38  ;;  %v300_v42 = vld [vmem:[%s1810_s29 + $0x1410] sm:$0xff]  ;;  %v302_v43 = vld [vmem:[%s1810_s29 + $0x1418] sm:$0xff] }
  0x24   : > { %295 = vst [vmem:[%s1818_s30 + $0x138] sm:$0xff] %v294_v39  ;;  %297 = vst [vmem:[%s1818_s30 + $0x140] sm:$0xff] %v296_v40  ;;  %v304_v44 = vld [vmem:[%s1810_s29 + $0x1420] sm:$0xff]  ;;  %v306_v45 = vld [vmem:[%s1810_s29 + $0x1428] sm:$0xff] }
  0x25   : > { %299 = vst [vmem:[%s1818_s30 + $0x148] sm:$0xff] %v298_v41  ;;  %301 = vst [vmem:[%s1818_s30 + $0x150] sm:$0xff] %v300_v42  ;;  %v308_v46 = vld [vmem:[%s1810_s29 + $0x1430] sm:$0xff]  ;;  %v310_v47 = vld [vmem:[%s1810_s29 + $0x1438] sm:$0xff] }
  0x26   : > { %303 = vst [vmem:[%s1818_s30 + $0x158] sm:$0xff] %v302_v43  ;;  %305 = vst [vmem:[%s1818_s30 + $0x160] sm:$0xff] %v304_v44  ;;  %v312_v48 = vld [vmem:[%s1810_s29 + $0x1800] sm:$0xff]  ;;  %v314_v49 = vld [vmem:[%s1810_s29 + $0x1808] sm:$0xff] }
  0x27   : > { %307 = vst [vmem:[%s1818_s30 + $0x168] sm:$0xff] %v306_v45  ;;  %309 = vst [vmem:[%s1818_s30 + $0x170] sm:$0xff] %v308_v46  ;;  %v316_v50 = vld [vmem:[%s1810_s29 + $0x1810] sm:$0xff]  ;;  %v318_v51 = vld [vmem:[%s1810_s29 + $0x1818] sm:$0xff] }
  0x28   : > { %311 = vst [vmem:[%s1818_s30 + $0x178] sm:$0xff] %v310_v47  ;;  %313 = vst [vmem:[%s1818_s30 + $0x180] sm:$0xff] %v312_v48  ;;  %v320_v52 = vld [vmem:[%s1810_s29 + $0x1820] sm:$0xff]  ;;  %v322_v53 = vld [vmem:[%s1810_s29 + $0x1828] sm:$0xff] }
  0x29   : > { %315 = vst [vmem:[%s1818_s30 + $0x188] sm:$0xff] %v314_v49  ;;  %317 = vst [vmem:[%s1818_s30 + $0x190] sm:$0xff] %v316_v50  ;;  %v324_v54 = vld [vmem:[%s1810_s29 + $0x1830] sm:$0xff]  ;;  %v326_v55 = vld [vmem:[%s1810_s29 + $0x1838] sm:$0xff] }
  0x2a   : > { %319 = vst [vmem:[%s1818_s30 + $0x198] sm:$0xff] %v318_v51  ;;  %321 = vst [vmem:[%s1818_s30 + $0x1a0] sm:$0xff] %v320_v52  ;;  %v328_v56 = vld [vmem:[%s1810_s29 + $0x1c00] sm:$0xff]  ;;  %v330_v57 = vld [vmem:[%s1810_s29 + $0x1c08] sm:$0xff] }
  0x2b   : > { %323 = vst [vmem:[%s1818_s30 + $0x1a8] sm:$0xff] %v322_v53  ;;  %325 = vst [vmem:[%s1818_s30 + $0x1b0] sm:$0xff] %v324_v54  ;;  %v332_v58 = vld [vmem:[%s1810_s29 + $0x1c10] sm:$0xff]  ;;  %v334_v59 = vld [vmem:[%s1810_s29 + $0x1c18] sm:$0xff] }
  0x2c   : > { %327 = vst [vmem:[%s1818_s30 + $0x1b8] sm:$0xff] %v326_v55  ;;  %329 = vst [vmem:[%s1818_s30 + $0x1c0] sm:$0xff] %v328_v56  ;;  %v336_v60 = vld [vmem:[%s1810_s29 + $0x1c20] sm:$0xff]  ;;  %v338_v61 = vld [vmem:[%s1810_s29 + $0x1c28] sm:$0xff] }
  0x2d   : > { %331 = vst [vmem:[%s1818_s30 + $0x1c8] sm:$0xff] %v330_v57  ;;  %333 = vst [vmem:[%s1818_s30 + $0x1d0] sm:$0xff] %v332_v58  ;;  %v340_v62 = vld [vmem:[%s1810_s29 + $0x1c30] sm:$0xff]  ;;  %v342_v63 = vld [vmem:[%s1810_s29 + $0x1c38] sm:$0xff] }
  0x2e   : > { %335 = vst [vmem:[%s1818_s30 + $0x1d8] sm:$0xff] %v334_v59  ;;  %337 = vst [vmem:[%s1818_s30 + $0x1e0] sm:$0xff] %v336_v60  ;;  %v344_v0 = vld [vmem:[%s1810_s29 + $0x2000] sm:$0xff]  ;;  %v346_v1 = vld [vmem:[%s1810_s29 + $0x2008] sm:$0xff] }
  0x2f   : > { %339 = vst [vmem:[%s1818_s30 + $0x1e8] sm:$0xff] %v338_v61  ;;  %341 = vst [vmem:[%s1818_s30 + $0x1f0] sm:$0xff] %v340_v62  ;;  %v348_v2 = vld [vmem:[%s1810_s29 + $0x2010] sm:$0xff]  ;;  %v350_v3 = vld [vmem:[%s1810_s29 + $0x2018] sm:$0xff] }
  0x30   : > { %343 = vst [vmem:[%s1818_s30 + $0x1f8] sm:$0xff] %v342_v63  ;;  %345 = vst [vmem:[%s1818_s30 + $0x200] sm:$0xff] %v344_v0  ;;  %v352_v4 = vld [vmem:[%s1810_s29 + $0x2020] sm:$0xff]  ;;  %v354_v5 = vld [vmem:[%s1810_s29 + $0x2028] sm:$0xff] }
  0x31   : > { %347 = vst [vmem:[%s1818_s30 + $0x208] sm:$0xff] %v346_v1  ;;  %349 = vst [vmem:[%s1818_s30 + $0x210] sm:$0xff] %v348_v2  ;;  %v356_v6 = vld [vmem:[%s1810_s29 + $0x2030] sm:$0xff]  ;;  %v358_v7 = vld [vmem:[%s1810_s29 + $0x2038] sm:$0xff] }
  0x32   : > { %351 = vst [vmem:[%s1818_s30 + $0x218] sm:$0xff] %v350_v3  ;;  %353 = vst [vmem:[%s1818_s30 + $0x220] sm:$0xff] %v352_v4 }
  0x33   : > { %355 = vst [vmem:[%s1818_s30 + $0x228] sm:$0xff] %v354_v5  ;;  %357 = vst [vmem:[%s1818_s30 + $0x230] sm:$0xff] %v356_v6 }
  0x34   : > { %359 = vst [vmem:[%s1818_s30 + $0x238] sm:$0xff] %v358_v7 }
  0x35 PF: > { %p1523_p6 = scmp.ge.s32.totalorder %s1739_s19, 1  ;;  %p364_p7 = scmp.lt.s32.totalorder %s1739_s19, 17 }
  0x37   : > { %p365_p8 = pnand %p1523_p6, %p364_p7 }
  0x38   : > { %s371_s5 = sand.u32 (!%p365_p8), 1, %s1723_s15   ;;  %s1524_s14 = sshll.u32 (!%p365_p8), %s1731_s17, 4 }
  0x39   : > { %368 = sbr.rel (%p365_p8) target bundleno = 350 (0x15e), region = 55  ;;  %p428_p9 = scmp.lt.s32.totalorder (!%p365_p8), %s1524_s14, 255 }
  0x3a   : > { %s1642_s6 = smul.u32 (!%p365_p8), 576, %s371_s5 }
  0x3c   : > { %s1967_s9 = scalar_lea.vmem (!%p365_p8), [#allocation2], %s1642_s6 }
  0x3e   : > { %v1741_v8 = vmov 0   ;;  %v1250_v9 = vld [vmem:[%s2154_s2] sm:$0xff]  ;;  %vm873_vm0 = vcmask 1043456   ;;  %v502_v11 = vld [vmem:[%s1967_s9 + $0x208] sm:$0xff]  ;;  %v503_v49 = vld [vmem:[%s1967_s9 + $0x210] sm:$0xff]  ;;  %vm869_vm1 = vcmask 588800  }
  0x3f   : > { %954 = vmatprep.mubr.bf16.mxu0 %v1741_v8  ;;  %995 = vmatprep.mubr.bf16.mxu1 %v1741_v8  ;;  %v501_v10 = vld [vmem:[%s1967_s9 + $0x200] sm:$0xff]  ;;  %v1593_v14 = vcombine.high %v502_v11, %v502_v11  ;;  %v1592_v16 = vcombine.low %v502_v11, %v502_v11  ;;  %v486_v18 = vld [vmem:[%s1967_s9 + $0x188] sm:$0xff]  ;;  %v504_v50 = vld [vmem:[%s1967_s9 + $0x218] sm:$0xff]  ;;  %v1595_v53 = vcombine.high %v503_v49, %v503_v49  ;;  %s2164_s14 = smov (!%p428_p9, %s1524_s14), 255 }
  0x40   : > { %1684 = vset.pattern.permute.xlu0 %v1741_v8  ;;  %v485_v12 = vld [vmem:[%s1967_s9 + $0x180] sm:$0xff]  ;;  %v1591_v13 = vcombine.high %v501_v10, %v501_v10  ;;  %v1590_v15 = vcombine.low %v501_v10, %v501_v10  ;;  %v494_v19 = vld [vmem:[%s1967_s9 + $0x1c8] sm:$0xff]  ;;  %v1597_v54 = vcombine.high %v504_v50, %v504_v50  ;;  %v1594_v55 = vcombine.low %v503_v49, %v503_v49  ;;  %v487_v57 = vld [vmem:[%s1967_s9 + $0x190] sm:$0xff]  ;;  %s1525_s15 = sshll.u32 %s2164_s14, 2 }
  0x41   : > { %1253 = vperm.xlu0 %1684, %v1250_v9   ;;  %v493_v17 = vld [vmem:[%s1967_s9 + $0x1c0] sm:$0xff]  ;;  %v1577_v21 = vcombine.high %v486_v18, %v494_v19  ;;  %v470_v24 = vld [vmem:[%s1967_s9 + $0x108] sm:$0xff]  ;;  %1608 = vmatprep.subr.msk.bf16.mxu1 %vm873_vm0, %v1593_v14  ;;  %v881_v26 = vsel %vm873_vm0, %v1592_v16, 0  ;;  %v1576_v30 = vcombine.low %v486_v18, %v494_v19  ;;  %v1596_v56 = vcombine.low %v504_v50, %v504_v50  ;;  %v495_v58 = vld [vmem:[%s1967_s9 + $0x1d0] sm:$0xff]  ;;  %s2103_s22 = scalar_lea.vmem %s2156_s4, %s1525_s15 }
  0x42   : > { %v1575_v20 = vcombine.high %v485_v12, %v493_v17  ;;  %v469_v22 = vld [vmem:[%s1967_s9 + $0x100] sm:$0xff]  ;;  %1606 = vmatprep.subr.msk.bf16.mxu0 %vm873_vm0, %v1591_v13  ;;  %v875_v25 = vsel %vm873_vm0, %v1590_v15, 0  ;;  %v478_v27 = vld [vmem:[%s1967_s9 + $0x148] sm:$0xff]  ;;  %970 = vmatpush1.bf16.msra.mxu1 %v881_v26  ;;  %v1574_v29 = vcombine.low %v485_v12, %v493_v17  ;;  %v488_v59 = vld [vmem:[%s1967_s9 + $0x198] sm:$0xff]  ;;  %v887_v62 = vsel %vm873_vm0, %v1594_v55, 0 }
  0x43   : > { %v477_v23 = vld [vmem:[%s1967_s9 + $0x140] sm:$0xff]  ;;  %929 = vmatpush1.bf16.msra.mxu0 %v875_v25  ;;  %971 = vmatprep.subr.bf16.mxu1 %v1577_v21  ;;  %v1561_v32 = vcombine.high %v470_v24, %v478_v27  ;;  %v454_v35 = vld [vmem:[%s1967_s9 + $0x88] sm:$0xff]  ;;  %v1560_v38 = vcombine.low %v470_v24, %v478_v27  ;;  %v496_v60 = vld [vmem:[%s1967_s9 + $0x1d8] sm:$0xff]  ;;  %v893_v63 = vsel %vm873_vm0, %v1596_v56, 0  ;;  %v1579_v0 = vcombine.high %v487_v57, %v495_v58 }
  0x44   : > { %v1272_v28 = vld [vmem:[%s2155_s3] sm:$0xff]  ;;  %930 = vmatprep.subr.bf16.mxu0 %v1575_v20  ;;  %v1559_v31 = vcombine.high %v469_v22, %v477_v23  ;;  %v462_v36 = vld [vmem:[%s1967_s9 + $0xc8] sm:$0xff]  ;;  %v1558_v37 = vcombine.low %v469_v22, %v477_v23  ;;  %v1581_v1 = vcombine.high %v488_v59, %v496_v60  ;;  %v471_v2 = vld [vmem:[%s1967_s9 + $0x110] sm:$0xff]  ;;  %v1578_v6 = vcombine.low %v487_v57, %v495_v58 }
  0x45   : > { %v453_v33 = vld [vmem:[%s1967_s9 + $0x80] sm:$0xff]  ;;  %1275 = vperm.xlu0 %1684, %v1272_v28   ;;  %v1545_v40 = vcombine.high %v454_v35, %v462_v36  ;;  %v438_v43 = vld [vmem:[%s1967_s9 + $0x8] sm:$0xff]  ;;  %v1544_v46 = vcombine.low %v454_v35, %v462_v36  ;;  %v479_v3 = vld [vmem:[%s1967_s9 + $0x150] sm:$0xff]  ;;  %v1580_v7 = vcombine.low %v488_v59, %v496_v60 }
  0x46   : > { %v461_v34 = vld [vmem:[%s1967_s9 + $0xc0] sm:$0xff]  ;;  %972 = vmatpush1.bf16.msra.mxu1 %v1576_v30  ;;  %v446_v44 = vld [vmem:[%s1967_s9 + $0x48] sm:$0xff]  ;;  %v472_v4 = vld [vmem:[%s1967_s9 + $0x118] sm:$0xff]  ;;  %v1563_v9 = vcombine.high %v471_v2, %v479_v3  ;;  %v1562_v15 = vcombine.low %v471_v2, %v479_v3 }
  0x47   : > { %931 = vmatpush1.bf16.msra.mxu0 %v1574_v29  ;;  %973 = vmatprep.subr.bf16.mxu1 %v1561_v32  ;;  %v1543_v39 = vcombine.high %v453_v33, %v461_v34  ;;  %v437_v41 = vld [vmem:[%s1967_s9] sm:$0xff]  ;;  %v1542_v45 = vcombine.low %v453_v33, %v461_v34  ;;  %v1529_v48 = vcombine.high %v438_v43, %v446_v44  ;;  %v480_v5 = vld [vmem:[%s1967_s9 + $0x158] sm:$0xff]  ;;  %v455_v11 = vld [vmem:[%s1967_s9 + $0x90] sm:$0xff] }
  0x48   : > { %932 = vmatprep.subr.bf16.mxu0 %v1559_v31  ;;  %v445_v42 = vld [vmem:[%s1967_s9 + $0x40] sm:$0xff]  ;;  %v1528_v52 = vcombine.low %v438_v43, %v446_v44  ;;  %v1565_v10 = vcombine.high %v472_v4, %v480_v5  ;;  %v463_v12 = vld [vmem:[%s1967_s9 + $0xd0] sm:$0xff]  ;;  %v456_v13 = vld [vmem:[%s1967_s9 + $0x98] sm:$0xff]  ;;  %v1564_v16 = vcombine.low %v472_v4, %v480_v5 }
  0x49   : > { %v1527_v47 = vcombine.high %v437_v41, %v445_v42  ;;  %v1526_v51 = vcombine.low %v437_v41, %v445_v42  ;;  %v2003_v61 = vld [vmem:[%s2152_s0] sm:$0xf]  ;;  %v464_v14 = vld [vmem:[%s1967_s9 + $0xd8] sm:$0xff]  ;;  %v1547_v17 = vcombine.high %v455_v11, %v463_v12  ;;  %v439_v19 = vld [vmem:[%s1967_s9 + $0x10] sm:$0xff]  ;;  %v1546_v23 = vcombine.low %v455_v11, %v463_v12 }
  0x4a   : > { %974 = vmatpush1.bf16.msra.mxu1 %v1560_v38  ;;  %v1549_v18 = vcombine.high %v456_v13, %v464_v14  ;;  %v447_v20 = vld [vmem:[%s1967_s9 + $0x50] sm:$0xff]  ;;  %v440_v21 = vld [vmem:[%s1967_s9 + $0x18] sm:$0xff]  ;;  %v1548_v24 = vcombine.low %v456_v13, %v464_v14  ;;  %v505_v27 = vld [vmem:[%s1967_s9 + $0x220] sm:$0xff] }
  0x4b   : > { %933 = vmatpush1.bf16.msra.mxu0 %v1558_v37  ;;  %975 = vmatprep.subr.bf16.mxu1 %v1545_v40  ;;  %v448_v22 = vld [vmem:[%s1967_s9 + $0x58] sm:$0xff]  ;;  %v1531_v25 = vcombine.high %v439_v19, %v447_v20  ;;  %v506_v28 = vld [vmem:[%s1967_s9 + $0x228] sm:$0xff]  ;;  %v1530_v29 = vcombine.low %v439_v19, %v447_v20  ;;  %v1599_v31 = vcombine.high %v505_v27, %v505_v27  ;;  %v489_v35 = vld [vmem:[%s1967_s9 + $0x1a0] sm:$0xff] }
  0x4c   : > { %934 = vmatprep.subr.bf16.mxu0 %v1543_v39  ;;  %v1533_v26 = vcombine.high %v440_v21, %v448_v22  ;;  %v1532_v30 = vcombine.low %v440_v21, %v448_v22  ;;  %v1601_v32 = vcombine.high %v506_v28, %v506_v28  ;;  %v1598_v33 = vcombine.low %v505_v27, %v505_v27  ;;  %v497_v36 = vld [vmem:[%s1967_s9 + $0x1e0] sm:$0xff]  ;;  %v490_v37 = vld [vmem:[%s1967_s9 + $0x1a8] sm:$0xff]  ;;  %v507_v4 = vld [vmem:[%s1967_s9 + $0x230] sm:$0xff] }
  0x4d   : > { %v1600_v34 = vcombine.low %v506_v28, %v506_v28  ;;  %v498_v38 = vld [vmem:[%s1967_s9 + $0x1e8] sm:$0xff]  ;;  %v1583_v41 = vcombine.high %v489_v35, %v497_v36  ;;  %v473_v43 = vld [vmem:[%s1967_s9 + $0x120] sm:$0xff]  ;;  %v508_v5 = vld [vmem:[%s1967_s9 + $0x238] sm:$0xff]  ;;  %v1602_v11 = vcombine.low %v507_v4, %v507_v4 }
  0x4e   : > { %976 = vmatpush1.bf16.msra.mxu1 %v1544_v46  ;;  %v899_v39 = vsel %vm873_vm0, %v1598_v33, 0  ;;  %v1585_v42 = vcombine.high %v490_v37, %v498_v38  ;;  %v481_v44 = vld [vmem:[%s1967_s9 + $0x160] sm:$0xff]  ;;  %v482_v46 = vld [vmem:[%s1967_s9 + $0x168] sm:$0xff]  ;;  %v1604_v12 = vcombine.low %v508_v5, %v508_v5  ;;  %v491_v13 = vld [vmem:[%s1967_s9 + $0x1b0] sm:$0xff] }
  0x4f   : > { %935 = vmatpush1.bf16.msra.mxu0 %v1542_v45  ;;  %977 = vmatprep.subr.bf16.mxu1 %v1529_v48  ;;  %v905_v40 = vsel %vm873_vm0, %v1600_v34, 0  ;;  %v474_v45 = vld [vmem:[%s1967_s9 + $0x128] sm:$0xff]  ;;  %v1584_v48 = vcombine.low %v490_v37, %v498_v38  ;;  %v1567_v49 = vcombine.high %v473_v43, %v481_v44  ;;  %v1566_v55 = vcombine.low %v473_v43, %v481_v44  ;;  %v441_v59 = vld [vmem:[%s1967_s9 + $0x20] sm:$0xff]  ;;  %v499_v14 = vld [vmem:[%s1967_s9 + $0x1f0] sm:$0xff] }
  0x50   : > { %936 = vmatprep.subr.bf16.mxu0 %v1527_v47  ;;  %v1582_v47 = vcombine.low %v489_v35, %v497_v36  ;;  %v1569_v50 = vcombine.high %v474_v45, %v482_v46  ;;  %v1568_v56 = vcombine.low %v474_v45, %v482_v46  ;;  %v449_v60 = vld [vmem:[%s1967_s9 + $0x60] sm:$0xff]  ;;  %v1587_v19 = vcombine.high %v491_v13, %v499_v14  ;;  %v475_v21 = vld [vmem:[%s1967_s9 + $0x130] sm:$0xff] }
  0x51   : > { %v1535_v2 = vcombine.high %v441_v59, %v449_v60  ;;  %v483_v22 = vld [vmem:[%s1967_s9 + $0x170] sm:$0xff] }
  0x52   : > { %978 = vmatpush1.bf16.msra.mxu1 %v1528_v52  ;;  %v465_v52 = vld [vmem:[%s1967_s9 + $0xe0] sm:$0xff]  ;;  %v1571_v27 = vcombine.high %v475_v21, %v483_v22  ;;  %v1570_v33 = vcombine.low %v475_v21, %v483_v22  ;;  %v443_v37 = vld [vmem:[%s1967_s9 + $0x30] sm:$0xff] }
  0x53   : > { %937 = vmatpush1.bf16.msra.mxu0 %v1526_v51  ;;  %1612 = vmatprep.subr.msk.bf16.mxu1 %vm873_vm0, %v1597_v54  ;;  %v457_v51 = vld [vmem:[%s1967_s9 + $0xa0] sm:$0xff]  ;;  %v466_v54 = vld [vmem:[%s1967_s9 + $0xe8] sm:$0xff]  ;;  %v451_v38 = vld [vmem:[%s1967_s9 + $0x70] sm:$0xff] }
  0x54   : > { %1610 = vmatprep.subr.msk.bf16.mxu0 %vm873_vm0, %v1595_v53  ;;  %v458_v53 = vld [vmem:[%s1967_s9 + $0xa8] sm:$0xff]  ;;  %v1551_v57 = vcombine.high %v457_v51, %v465_v52  ;;  %v1538_v44 = vcombine.low %v443_v37, %v451_v38 }
  0x55   : > { %1609 = vmatmul.mubr.msk.bf16.vlgmr.msra.gmra.mxu1 %vm869_vm1, %v2003_v61  ;;  %v1553_v58 = vcombine.high %v458_v53, %v466_v54 }
  0x56   : > { %1607 = vmatmul.mubr.msk.bf16.vlgmr.msra.gmra.mxu0 %vm869_vm1, %v2003_v61  ;;  %1052 = vmatpush1.bf16.msra.mxu1 %v893_v63  ;;  %v450_v63 = vld [vmem:[%s1967_s9 + $0x68] sm:$0xff] }
  0x57   : > { %1011 = vmatpush1.bf16.msra.mxu0 %v887_v62  ;;  %1053 = vmatprep.subr.bf16.mxu1 %v1581_v1  ;;  %v442_v62 = vld [vmem:[%s1967_s9 + $0x28] sm:$0xff]  ;;  %v1552_v1 = vcombine.low %v458_v53, %v466_v54 }
  0x58   : > { %1012 = vmatprep.subr.bf16.mxu0 %v1579_v0  ;;  %1036 = vmatprep.mubr.bf16.mxu0 %v1741_v8  ;;  %v1550_v0 = vcombine.low %v457_v51, %v465_v52  ;;  %v1537_v3 = vcombine.high %v442_v62, %v450_v63 }
  0x59   : > { %1077 = vmatprep.mubr.bf16.mxu1 %v1741_v8 }
  0x5a   : > { %1054 = vmatpush1.bf16.msra.mxu1 %v1580_v7  ;;  %v1536_v7 = vcombine.low %v442_v62, %v450_v63 }
  0x5b   : > { %1013 = vmatpush1.bf16.msra.mxu0 %v1578_v6  ;;  %1055 = vmatprep.subr.bf16.mxu1 %v1565_v10  ;;  %v1534_v6 = vcombine.low %v441_v59, %v449_v60  ;;  %v1605_v10 = vcombine.high %v508_v5, %v508_v5 }
  0x5c   : > { %1014 = vmatprep.subr.bf16.mxu0 %v1563_v9  ;;  %v1603_v9 = vcombine.high %v507_v4, %v507_v4 }
  0x5e   : > { %1056 = vmatpush1.bf16.msra.mxu1 %v1564_v16  ;;  %v500_v16 = vld [vmem:[%s1967_s9 + $0x1f8] sm:$0xff] }
  0x5f   : > { %1015 = vmatpush1.bf16.msra.mxu0 %v1562_v15  ;;  %1057 = vmatprep.subr.bf16.mxu1 %v1549_v18  ;;  %v492_v15 = vld [vmem:[%s1967_s9 + $0x1b8] sm:$0xff]  ;;  %v917_v18 = vsel %vm873_vm0, %v1604_v12, 0 }
  0x60   : > { %1016 = vmatprep.subr.bf16.mxu0 %v1547_v17  ;;  %v911_v17 = vsel %vm873_vm0, %v1602_v11, 0  ;;  %v1589_v20 = vcombine.high %v492_v15, %v500_v16 }
  0x62   : > { %1058 = vmatpush1.bf16.msra.mxu1 %v1548_v24  ;;  %v484_v24 = vld [vmem:[%s1967_s9 + $0x178] sm:$0xff] }
  0x63   : > { %1017 = vmatpush1.bf16.msra.mxu0 %v1546_v23  ;;  %1059 = vmatprep.subr.bf16.mxu1 %v1533_v26  ;;  %v476_v23 = vld [vmem:[%s1967_s9 + $0x138] sm:$0xff]  ;;  %v1588_v26 = vcombine.low %v492_v15, %v500_v16 }
  0x64   : > { %1018 = vmatprep.subr.bf16.mxu0 %v1531_v25  ;;  %v1586_v25 = vcombine.low %v491_v13, %v499_v14  ;;  %v1573_v28 = vcombine.high %v476_v23, %v484_v24  ;;  %v1572_v34 = vcombine.low %v476_v23, %v484_v24 }
  0x66   : > { %1060 = vmatpush1.bf16.msra.mxu1 %v1532_v30  ;;  %v467_v30 = vld [vmem:[%s1967_s9 + $0xf0] sm:$0xff] }
  0x67   : > { %1019 = vmatpush1.bf16.msra.mxu0 %v1530_v29  ;;  %1616 = vmatprep.subr.msk.bf16.mxu1 %vm873_vm0, %v1601_v32  ;;  %v459_v29 = vld [vmem:[%s1967_s9 + $0xb0] sm:$0xff]  ;;  %v468_v32 = vld [vmem:[%s1967_s9 + $0xf8] sm:$0xff] }
  0x68   : > { %1614 = vmatprep.subr.msk.bf16.mxu0 %vm873_vm0, %v1599_v31  ;;  %v460_v31 = vld [vmem:[%s1967_s9 + $0xb8] sm:$0xff]  ;;  %v1555_v35 = vcombine.high %v459_v29, %v467_v30 }
  0x69   : > { %1613 = vmatmul.mubr.msk.bf16.vlgmr.msra.gmra.mxu1 %vm869_vm1, %v2003_v61  ;;  %v1557_v36 = vcombine.high %v460_v31, %v468_v32 }
  0x6a   : > { %1611 = vmatmul.mubr.msk.bf16.vlgmr.msra.gmra.mxu0 %vm869_vm1, %v2003_v61  ;;  %1134 = vmatpush1.bf16.msra.mxu1 %v905_v40  ;;  %v452_v40 = vld [vmem:[%s1967_s9 + $0x78] sm:$0xff] }
  0x6b   : > { %1093 = vmatpush1.bf16.msra.mxu0 %v899_v39  ;;  %1135 = vmatprep.subr.bf16.mxu1 %v1585_v42  ;;  %v444_v39 = vld [vmem:[%s1967_s9 + $0x38] sm:$0xff]  ;;  %v1556_v42 = vcombine.low %v460_v31, %v468_v32 }
  0x6c   : > { %1094 = vmatprep.subr.bf16.mxu0 %v1583_v41  ;;  %1118 = vmatprep.mubr.bf16.mxu0 %v1741_v8  ;;  %v1554_v41 = vcombine.low %v459_v29, %v467_v30  ;;  %v1541_v43 = vcombine.high %v444_v39, %v452_v40  ;;  %v1540_v45 = vcombine.low %v444_v39, %v452_v40 }
  0x6d   : > { %1159 = vmatprep.mubr.bf16.mxu1 %v1741_v8 }
  0x6e   : > { %1136 = vmatpush1.bf16.msra.mxu1 %v1584_v48 }
  0x6f   : > { %1095 = vmatpush1.bf16.msra.mxu0 %v1582_v47  ;;  %1137 = vmatprep.subr.bf16.mxu1 %v1569_v50 }
  0x70   : > { %1096 = vmatprep.subr.bf16.mxu0 %v1567_v49 }
  0x72   : > { %1138 = vmatpush1.bf16.msra.mxu1 %v1568_v56 }
  0x73   : > { %1097 = vmatpush1.bf16.msra.mxu0 %v1566_v55  ;;  %1139 = vmatprep.subr.bf16.mxu1 %v1553_v58 }
  0x74   : > { %1098 = vmatprep.subr.bf16.mxu0 %v1551_v57 }
  0x76   : > { %1140 = vmatpush1.bf16.msra.mxu1 %v1552_v1 }
  0x77   : > { %1099 = vmatpush1.bf16.msra.mxu0 %v1550_v0  ;;  %1141 = vmatprep.subr.bf16.mxu1 %v1537_v3 }
  0x78   : > { %1100 = vmatprep.subr.bf16.mxu0 %v1535_v2 }
  0x7a   : > { %1142 = vmatpush1.bf16.msra.mxu1 %v1536_v7 }
  0x7b   : > { %1101 = vmatpush1.bf16.msra.mxu0 %v1534_v6  ;;  %1620 = vmatprep.subr.msk.bf16.mxu1 %vm873_vm0, %v1605_v10 }
  0x7c   : > { %1618 = vmatprep.subr.msk.bf16.mxu0 %vm873_vm0, %v1603_v9 }
  0x7d   : > { %1617 = vmatmul.mubr.msk.bf16.vlgmr.msra.gmra.mxu1 %vm869_vm1, %v2003_v61 }
  0x7e   : > { %1615 = vmatmul.mubr.msk.bf16.vlgmr.msra.gmra.mxu0 %vm869_vm1, %v2003_v61  ;;  %1216 = vmatpush1.bf16.msra.mxu1 %v917_v18 }
  0x7f   : > { %1175 = vmatpush1.bf16.msra.mxu0 %v911_v17  ;;  %1217 = vmatprep.subr.bf16.mxu1 %v1589_v20 }
  0x80   : > { %1176 = vmatprep.subr.bf16.mxu0 %v1587_v19  ;;  %1200 = vmatprep.mubr.bf16.mxu0 %v1741_v8 }
  0x81   : > { %1241 = vmatprep.mubr.bf16.mxu1 %v1741_v8  ;;  %v1539_v8 = vcombine.high %v443_v37, %v451_v38 }
  0x82   : > { %1218 = vmatpush1.bf16.msra.mxu1 %v1588_v26 }
  0x83   : > { %1177 = vmatpush1.bf16.msra.mxu0 %v1586_v25  ;;  %1219 = vmatprep.subr.bf16.mxu1 %v1573_v28 }
  0x84   : > { %1178 = vmatprep.subr.bf16.mxu0 %v1571_v27 }
  0x86   : > { %1220 = vmatpush1.bf16.msra.mxu1 %v1572_v34 }
  0x87   : > { %1179 = vmatpush1.bf16.msra.mxu0 %v1570_v33  ;;  %1221 = vmatprep.subr.bf16.mxu1 %v1557_v36 }
  0x88   : > { %1180 = vmatprep.subr.bf16.mxu0 %v1555_v35 }
  0x8a   : > { %1222 = vmatpush1.bf16.msra.mxu1 %v1556_v42 }
  0x8b   : > { %1181 = vmatpush1.bf16.msra.mxu0 %v1554_v41  ;;  %1223 = vmatprep.subr.bf16.mxu1 %v1541_v43 }
  0x8c   : > { %1182 = vmatprep.subr.bf16.mxu0 %v1539_v8 }
  0x8e   : > { %1224 = vmatpush1.bf16.msra.mxu1 %v1540_v45 }
  0x8f   : > { %1183 = vmatpush1.bf16.msra.mxu0 %v1538_v44 }
  0x91   : > { %1621 = vmatmul.mubr.msk.bf16.vlgmr.msra.gmra.mxu1 %vm869_vm1, %v2003_v61 }
  0x92   : > { %1619 = vmatmul.mubr.msk.bf16.vlgmr.msra.gmra.mxu0 %vm869_vm1, %v2003_v61 }
  0xbc   : > { %v2087_v46 = vpop.permute.xlu0 %1253 }
  0xc0   : > { %v2090_v47 = vpop.permute.xlu0 %1275 }
 0x115   : > { %v997_v49 = vpop.f32.mrf.mxu1 }
 0x116   : > { %v956_v48 = vpop.f32.mrf.mxu0  ;;  %v1258_v51 = vmul.f32 %v2087_v46, %v997_v49 }
 0x117   : > { %v1256_v50 = vmul.f32 %v2087_v46, %v956_v48  ;;  %v999_v53 = vpop.f32.mrf.mxu1 }
 0x118   : > { %v958_v52 = vpop.f32.mrf.mxu0  ;;  %v1259_v55 = vmul.f32 %v2087_v46, %v999_v53  ;;  %v1280_v56 = vadd.f32 %v2090_v47, %v1258_v51 }
 0x119   : > { %v1257_v54 = vmul.f32 %v2087_v46, %v958_v52  ;;  %v1278_v61 = vadd.f32 %v2090_v47, %v1256_v50  ;;  %v1001_v58 = vpop.f32.mrf.mxu1 }
 0x11a   : > { %v960_v57 = vpop.f32.mrf.mxu0  ;;  %v1281_v60 = vadd.f32 %v2090_v47, %v1259_v55  ;;  %v1296_v63 = vmax.f32 %v1280_v56, 0.0 }
 0x11b   : > { %v1279_v59 = vadd.f32 %v2090_v47, %v1257_v54  ;;  %v1294_v62 = vmax.f32 %v1278_v61, 0.0  ;;  %v1002_v1 = vpop.f32.mrf.mxu1 }
 0x11c   : > { %v961_v0 = vpop.f32.mrf.mxu0  ;;  %v1297_v3 = vmax.f32 %v1281_v60, 0.0 }
 0x11d   : > { %v1295_v2 = vmax.f32 %v1279_v59, 0.0 }
 0x11e   : > { %v1634_v5 = vpack.c.bf16 %v1297_v3, %v1296_v63 }
 0x11f   : > { %v1633_v4 = vpack.c.bf16 %v1295_v2, %v1294_v62 }
 0x120   : > { %1375 = vst [vmem:[%s2103_s22 + $0x8] sm:$0xff] %v1634_v5 }
 0x121   : > { %1374 = vst [vmem:[%s2103_s22] sm:$0xff] %v1633_v4 }
 0x129   : > { %v1079_v7 = vpop.f32.mrf.mxu1 }
 0x12a   : > { %v1038_v6 = vpop.f32.mrf.mxu0  ;;  %v1262_v10 = vmul.f32 %v2087_v46, %v1079_v7 }
 0x12b   : > { %v1260_v9 = vmul.f32 %v2087_v46, %v1038_v6  ;;  %v1081_v12 = vpop.f32.mrf.mxu1 }
 0x12c   : > { %v1040_v11 = vpop.f32.mrf.mxu0  ;;  %v1284_v14 = vadd.f32 %v2090_v47, %v1262_v10  ;;  %v1263_v16 = vmul.f32 %v2087_v46, %v1081_v12 }
 0x12d   : > { %v1282_v13 = vadd.f32 %v2090_v47, %v1260_v9  ;;  %v1261_v15 = vmul.f32 %v2087_v46, %v1040_v11  ;;  %v1083_v18 = vpop.f32.mrf.mxu1 }
 0x12e   : > { %v1042_v17 = vpop.f32.mrf.mxu0  ;;  %v1300_v20 = vmax.f32 %v1284_v14, 0.0  ;;  %v1285_v22 = vadd.f32 %v2090_v47, %v1263_v16 }
 0x12f   : > { %v1298_v19 = vmax.f32 %v1282_v13, 0.0  ;;  %v1283_v21 = vadd.f32 %v2090_v47, %v1261_v15  ;;  %v1084_v24 = vpop.f32.mrf.mxu1 }
 0x130   : > { %v1043_v23 = vpop.f32.mrf.mxu0  ;;  %v1301_v26 = vmax.f32 %v1285_v22, 0.0 }
 0x131   : > { %v1299_v25 = vmax.f32 %v1283_v21, 0.0 }
 0x132   : > { %v1636_v28 = vpack.c.bf16 %v1301_v26, %v1300_v20 }
 0x133   : > { %v1635_v27 = vpack.c.bf16 %v1299_v25, %v1298_v19 }
 0x134   : > { %1377 = vst [vmem:[%s2103_s22 + $0x18] sm:$0xff] %v1636_v28 }
 0x135   : > { %1376 = vst [vmem:[%s2103_s22 + $0x10] sm:$0xff] %v1635_v27 }
 0x13d   : > { %v1161_v30 = vpop.f32.mrf.mxu1 }
 0x13e   : > { %v1120_v29 = vpop.f32.mrf.mxu0  ;;  %v1266_v32 = vmul.f32 %v2087_v46, %v1161_v30 }
 0x13f   : > { %v1264_v31 = vmul.f32 %v2087_v46, %v1120_v29  ;;  %v1163_v34 = vpop.f32.mrf.mxu1 }
 0x140   : > { %v1122_v33 = vpop.f32.mrf.mxu0  ;;  %v1288_v36 = vadd.f32 %v2090_v47, %v1266_v32  ;;  %v1267_v38 = vmul.f32 %v2087_v46, %v1163_v34 }
 0x141   : > { %v1286_v35 = vadd.f32 %v2090_v47, %v1264_v31  ;;  %v1265_v37 = vmul.f32 %v2087_v46, %v1122_v33  ;;  %v1165_v40 = vpop.f32.mrf.mxu1 }
 0x142   : > { %v1124_v39 = vpop.f32.mrf.mxu0  ;;  %v1304_v42 = vmax.f32 %v1288_v36, 0.0  ;;  %v1289_v43 = vadd.f32 %v2090_v47, %v1267_v38 }
 0x143   : > { %v1302_v41 = vmax.f32 %v1286_v35, 0.0  ;;  %v1287_v8 = vadd.f32 %v2090_v47, %v1265_v37  ;;  %v1166_v45 = vpop.f32.mrf.mxu1 }
 0x144   : > { %v1125_v44 = vpop.f32.mrf.mxu0  ;;  %v1305_v49 = vmax.f32 %v1289_v43, 0.0 }
 0x145   : > { %v1303_v48 = vmax.f32 %v1287_v8, 0.0 }
 0x146   : > { %v1638_v51 = vpack.c.bf16 %v1305_v49, %v1304_v42 }
 0x147   : > { %v1637_v50 = vpack.c.bf16 %v1303_v48, %v1302_v41 }
 0x148   : > { %1379 = vst [vmem:[%s2103_s22 + $0x28] sm:$0xff] %v1638_v51 }
 0x149   : > { %1378 = vst [vmem:[%s2103_s22 + $0x20] sm:$0xff] %v1637_v50 }
 0x151   : > { %v1243_v53 = vpop.f32.mrf.mxu1 }
 0x152   : > { %v1202_v52 = vpop.f32.mrf.mxu0  ;;  %v1270_v55 = vmul.f32 %v2087_v46, %v1243_v53 }
 0x153   : > { %v1268_v54 = vmul.f32 %v2087_v46, %v1202_v52  ;;  %v1245_v56 = vpop.f32.mrf.mxu1 }
 0x154   : > { %v1204_v61 = vpop.f32.mrf.mxu0  ;;  %v1292_v58 = vadd.f32 %v2090_v47, %v1270_v55  ;;  %v1271_v60 = vmul.f32 %v2087_v46, %v1245_v56 }
 0x155   : > { %v1290_v57 = vadd.f32 %v2090_v47, %v1268_v54  ;;  %v1269_v59 = vmul.f32 %v2087_v46, %v1204_v61  ;;  %v1247_v63 = vpop.f32.mrf.mxu1 }
 0x156   : > { %v1206_v62 = vpop.f32.mrf.mxu0  ;;  %v1293_v1 = vadd.f32 %v2090_v47, %v1271_v60  ;;  %v1308_v5 = vmax.f32 %v1292_v58, 0.0 }
 0x157   : > { %v1291_v0 = vadd.f32 %v2090_v47, %v1269_v59  ;;  %v1248_v3 = vpop.f32.mrf.mxu1  ;;  %v1306_v4 = vmax.f32 %v1290_v57, 0.0 }
 0x158   : > { %v1207_v2 = vpop.f32.mrf.mxu0  ;;  %v1309_v7 = vmax.f32 %v1293_v1, 0.0 }
 0x159   : > { %v1307_v6 = vmax.f32 %v1291_v0, 0.0 }
 0x15a   : > { %v1640_v10 = vpack.c.bf16 %v1309_v7, %v1308_v5 }
 0x15b   : > { %v1639_v9 = vpack.c.bf16 %v1307_v6, %v1306_v4 }
 0x15c   : > { %1381 = vst [vmem:[%s2103_s22 + $0x38] sm:$0xff] %v1640_v10 }
 0x15d   : > { %1380 = vst [vmem:[%s2103_s22 + $0x30] sm:$0xff] %v1639_v9 }
 0x15e PF: > { %s14_s19 = sadd.s32 1, %s1739_s19   ;;  %s2157_s15 = smov %s1727_s16 }
 0x15f   : > { %p11_p10 = scmp.ge.s32.totalorder %s14_s19, 18   ;;  %s2158_s16 = smov %s1802_s23 }
 0x160   : > { %s2159_s17 = smov %s1735_s18  ;;  %s2160_s18 = smov %s2162_s20 }
 0x161   :  { %13 = sbr.rel (!%p11_p10) target bundleno = 3 (0x3), region = 103 }

</bundles_post_ra>
